<compile_context>
chip_gen: v7x
topology: tpu7x:2x2x1
jax: 0.10.0
libtpu: 0.0.40
codegen_flags: <defaults>
</compile_context>

<pallas_src>
import functools

import jax
import jax.numpy as jnp
from jax.experimental import pallas as pl
from jax.experimental.pallas import tpu as pltpu


def _round_up(x, m):
    return (x + m - 1) // m * m


# ------------------------- fused Pallas kernel -------------------------

def _fused_gemm_kernel(*refs, epilogue, phase_width):
    """out = epilogue(A @ B + bias), epilogue in {none, sigmoid, gdn, igdn}.

    For gdn/igdn the normalization is applied per `phase_width`-wide column
    block (block-diagonal gamma): decoder layers reuse one (C, C) gamma for all
    4 sub-pixel output phases instead of a materialized (4C, 4C) matrix.
    """
    if epilogue in ("gdn", "igdn"):
        a_ref, b_ref, bias_ref, gt_ref, beta_ref, o_ref = refs
    else:
        a_ref, b_ref, bias_ref, o_ref = refs

    a = a_ref[...].astype(jnp.bfloat16)                      # bf16 MXU operands
    y = jnp.dot(a, b_ref[...],                               # f32 accumulation
                preferred_element_type=jnp.float32) + bias_ref[...]

    if epilogue == "sigmoid":
        o_ref[...] = jax.nn.sigmoid(y).astype(o_ref.dtype)
    elif epilogue in ("gdn", "igdn"):
        gt = gt_ref[...]
        beta = beta_ref[...]
        n_total = y.shape[-1]
        for p in range(n_total // phase_width):               # static unroll (<=4)
            lo, hi = p * phase_width, (p + 1) * phase_width
            yp = y[:, lo:hi]
            norm2 = jnp.dot(yp * yp, gt,
                            preferred_element_type=jnp.float32) + beta
            if epilogue == "gdn":
                scale = jax.lax.rsqrt(norm2)                  # EUP slot
            else:
                scale = jnp.sqrt(norm2)
            o_ref[:, lo:hi] = (yp * scale).astype(o_ref.dtype)
    else:
        o_ref[...] = y.astype(o_ref.dtype)


def fused_gemm(cols, w_mat, bias_row, gammaT=None, beta_row=None,
               epilogue="none", n_out=None, out_dtype=jnp.bfloat16):
    """act(cols @ w_mat + bias) with optional fused (I)GDN.
    cols:(M,K) bf16, w_mat:(Kp,Np) bf16 lane-padded, bias:(1,Np) f32,
    gammaT:(C,C) f32 applied block-diagonally, beta:(1,C) f32."""
    M, K = cols.shape
    Kb, Np = w_mat.shape
    if K != Kb:                                   # ragged K (conv_1: 27 -> 128)
        cols = jnp.pad(cols, ((0, 0), (0, Kb - K)))
    if n_out is None:
        n_out = Np
    phase_width = gammaT.shape[0] if gammaT is not None else Np

    # Per-layer row tile: no 128-row padding of tiny layers; >= 2 parallel
    # blocks when there are enough rows so both v7x TensorCores get work.
    if M >= 256:
        tm = 128
    elif M >= 128:
        tm = 64
    else:
        tm = _round_up(M, 8)
    Mp = _round_up(M, tm)
    if Mp != M:
        cols = jnp.pad(cols, ((0, Mp - M), (0, 0)))

    in_specs = [
        pl.BlockSpec((tm, Kb), lambda i: (i, 0)),
        pl.BlockSpec((Kb, Np), lambda i: (0, 0)),
        pl.BlockSpec((1, Np), lambda i: (0, 0)),
    ]
    args = [cols, w_mat, bias_row]
    if epilogue in ("gdn", "igdn"):
        in_specs += [pl.BlockSpec((phase_width, phase_width), lambda i: (0, 0)),
                     pl.BlockSpec((1, phase_width), lambda i: (0, 0))]
        args += [gammaT, beta_row]

    out = pl.pallas_call(
        functools.partial(_fused_gemm_kernel, epilogue=epilogue,
                          phase_width=phase_width),
        out_shape=jax.ShapeDtypeStruct((Mp, Np), out_dtype),
        grid_spec=pltpu.PrefetchScalarGridSpec(
            num_scalar_prefetch=0,
            grid=(Mp // tm,),
            in_specs=in_specs,
            out_specs=pl.BlockSpec((tm, Np), lambda i: (i, 0)),
        ),
        compiler_params=pltpu.CompilerParams(
            dimension_semantics=("parallel",)),
    )(*args)
    if Mp == M and n_out == Np:
        return out
    return out[:M, :n_out]


# ------------------------- conv glue (im2col) -------------------------

def _im2col(x, k, stride, pad):
    """x: NHWC -> (cols (N*Ho*Wo, k*k*C), (N, Ho, Wo))."""
    x = jnp.pad(x, ((0, 0), (pad, pad), (pad, pad), (0, 0)))
    N, Hp, Wp, C = x.shape
    Ho = (Hp - k) // stride + 1
    Wo = (Wp - k) // stride + 1
    patches = []
    for i in range(k):
        for j in range(k):
            patches.append(
                x[:, i:i + stride * Ho:stride, j:j + stride * Wo:stride, :])
    cols = jnp.concatenate(patches, axis=-1)
    return cols.reshape(N * Ho * Wo, k * k * C), (N, Ho, Wo)


def conv2d_fused(x, w_mat, bias_row, gammaT=None, beta_row=None,
                 epilogue="none", c_out=128, out_dtype=jnp.bfloat16):
    """PyTorch Conv2d(k=3, s=2, p=1) + fused epilogue. x: NHWC (bf16)."""
    cols, (N, Ho, Wo) = _im2col(x, 3, 2, 1)
    y = fused_gemm(cols, w_mat, bias_row, gammaT, beta_row, epilogue,
                   n_out=c_out, out_dtype=out_dtype)
    return y.reshape(N, Ho, Wo, c_out)


def conv_transpose2d_fused(x, w_mat, bias_row, gammaT=None, beta_row=None,
                           epilogue="none", c_out=128, out_dtype=jnp.bfloat16):
    """PyTorch ConvTranspose2d(k=4, s=2, p=1) via sub-pixel decomposition:
    one GEMM over a 3x3/stride-1/pad-1 im2col of the input producing all 4
    output phases, then an interleave.  No zero insertion."""
    N, H, W, _ = x.shape
    cols, _ = _im2col(x, 3, 1, 1)
    y = fused_gemm(cols, w_mat, bias_row, gammaT, beta_row, epilogue,
                   n_out=4 * c_out, out_dtype=out_dtype)
    y = y.reshape(N, H, W, 2, 2, c_out)
    y = y.transpose(0, 1, 3, 2, 4, 5).reshape(N, 2 * H, 2 * W, c_out)
    return y


# ------------------------- parameters -------------------------

def _xavier_uniform(key, shape, fan_in, fan_out):
    bound = (6.0 / (fan_in + fan_out)) ** 0.5
    return jax.random.uniform(key, shape, jnp.float32, -bound, bound)


_CONV_DEFS = [("conv_1", 3, 128), ("conv_2", 128, 128), ("conv_3", 128, 128),
              ("conv_4", 128, 128), ("conv_5", 128, 128)]
_TCONV_DEFS = [("T_conv_5", 128, 128), ("T_conv_4", 128, 128),
               ("T_conv_3", 128, 128), ("T_conv_2", 128, 128),
               ("T_conv_1", 128, 3)]


def init_params(key):
    params = {}
    keys = jax.random.split(key, 32)
    ki = iter(range(32))
    for name, cin, cout in _CONV_DEFS:
        k = 3
        params[name + "_w"] = _xavier_uniform(
            keys[next(ki)], (cout, cin, k, k), cin * k * k, cout * k * k)
        lim = 1.0 / (cin * k * k) ** 0.5
        params[name + "_b"] = jax.random.uniform(
            keys[next(ki)], (cout,), jnp.float32, -lim, lim)
    for name, cin, cout in _TCONV_DEFS:
        k = 4
        # PyTorch ConvTranspose2d weight layout: (C_in, C_out, k, k)
        params[name + "_w"] = _xavier_uniform(
            keys[next(ki)], (cin, cout, k, k), cout * k * k, cin * k * k)
        lim = 1.0 / (cin * k * k) ** 0.5
        params[name + "_b"] = jax.random.uniform(
            keys[next(ki)], (cout,), jnp.float32, -lim, lim)
    # GDN / IGDN parameters at their standard (effective) init.
    params["gdn_beta"] = jnp.ones((128,), jnp.float32)
    params["gdn_gamma"] = 0.1 * jnp.eye(128, dtype=jnp.float32)
    params["igdn_beta"] = jnp.ones((128,), jnp.float32)
    params["igdn_gamma"] = 0.1 * jnp.eye(128, dtype=jnp.float32)
    return params


def _deconv_phase_weight(w):
    """w: (C_in, C_out, 4, 4) -> (9*C_in, 4*C_out) phase weight.
    Output column block p = 2*py + px holds output pixel (2m+py, 2n+px);
    row block t = a*3 + b corresponds to im2col tap in_padded[m+a, n+b]."""
    c_in, c_out = w.shape[0], w.shape[1]
    B = jnp.zeros((3, 3, c_in, 2, 2, c_out), jnp.float32)
    for py in range(2):
        for px in range(2):
            for a in range(3):
                ky = py + 3 - 2 * a
                if ky < 0 or ky > 3:
                    continue
                for b in range(3):
                    kx = px + 3 - 2 * b
                    if kx < 0 or kx > 3:
                        continue
                    B = B.at[a, b, :, py, px, :].set(w[:, :, ky, kx])
    return B.reshape(9 * c_in, 4 * c_out)


def prepare_params(p):
    """Precompute GEMM-ready (lane-padded, bf16) weights + GDN constants once."""
    prep = {}
    for name, cin, cout in _CONV_DEFS:
        k = 3
        B = jnp.transpose(p[name + "_w"], (2, 3, 1, 0)).reshape(k * k * cin, cout)
        Kp = _round_up(k * k * cin, 128)
        if Kp != k * k * cin:
            B = jnp.pad(B, ((0, Kp - k * k * cin), (0, 0)))
        prep[name + "_W"] = B.astype(jnp.bfloat16)
        prep[name + "_b"] = p[name + "_b"].reshape(1, cout).astype(jnp.float32)
    for name, cin, cout in _TCONV_DEFS:
        B = _deconv_phase_weight(p[name + "_w"])          # (9*cin, 4*cout)
        Np = _round_up(4 * cout, 128)
        bias = jnp.tile(p[name + "_b"], 4)
        if Np != 4 * cout:
            B = jnp.pad(B, ((0, 0), (0, Np - 4 * cout)))
            bias = jnp.pad(bias, (0, Np - 4 * cout))
        prep[name + "_W"] = B.astype(jnp.bfloat16)
        prep[name + "_b"] = bias.reshape(1, Np).astype(jnp.float32)
    # GDN constants: gamma^T (per-channel) used block-diagonally in the kernel
    # (1 phase for the encoder, 4 sub-pixel phases for the decoder).
    prep["gdn_gt"] = p["gdn_gamma"].T.astype(jnp.float32)             # (128,128)
    prep["gdn_beta"] = p["gdn_beta"].reshape(1, 128).astype(jnp.float32)
    prep["igdn_gt"] = p["igdn_gamma"].T.astype(jnp.float32)           # (128,128)
    prep["igdn_beta"] = p["igdn_beta"].reshape(1, 128).astype(jnp.float32)
    return prep


# ------------------------- full forward -------------------------

def gdn_net_forward(x_nchw, prep):
    # NCHW -> NHWC; inter-layer activations kept in bf16 (MXU operand dtype).
    x = jnp.transpose(x_nchw, (0, 2, 3, 1)).astype(jnp.bfloat16)
    # ---- encoder: conv(3x3, s2) with GDN fused into the matmul epilogue ----
    for i in range(1, 5):
        x = conv2d_fused(x, prep[f"conv_{i}_W"], prep[f"conv_{i}_b"],
                         prep["gdn_gt"], prep["gdn_beta"],
                         epilogue="gdn", c_out=128)
    x = conv2d_fused(x, prep["conv_5_W"], prep["conv_5_b"],
                     epilogue="sigmoid", c_out=128)
    # ---- decoder: deconv(4x4, s2) as sub-pixel convs with IGDN fused ----
    for name in ("T_conv_5", "T_conv_4", "T_conv_3", "T_conv_2"):
        x = conv_transpose2d_fused(x, prep[name + "_W"], prep[name + "_b"],
                                   prep["igdn_gt"], prep["igdn_beta"],
                                   epilogue="igdn", c_out=128)
    x = conv_transpose2d_fused(x, prep["T_conv_1_W"], prep["T_conv_1_b"],
                               epilogue="none", c_out=3, out_dtype=jnp.float32)
    return jnp.transpose(x, (0, 3, 1, 2))                         # NHWC -> NCHW


if __name__ == "__main__":
    key = jax.random.PRNGKey(0)
    kp, kx = jax.random.split(key)
    params = init_params(kp)
    prep = prepare_params(params)
    # Module expects 3-channel NCHW input.
    x = jax.random.normal(kx, (2, 3, 16, 16), jnp.float32)
    fwd = jax.jit(gdn_net_forward)
    y = fwd(x, prep)
    jax.block_until_ready(y)
    # 16x16 input: 5 stride-2 downsamples (16->8->4->2->1->1) then 5 stride-2
    # upsamples (1->2->4->8->16->32), matching the PyTorch module.
    assert y.shape == (2, 3, 32, 32), y.shape
    assert y.dtype == jnp.float32
    print("KERNEL_OK")
</pallas_src>

<mosaic_0001>
module attributes {stable_mosaic.version = 11 : i64} {
  func.func @_fused_gemm_kernel(%arg0: i32, %arg1: memref<64x128xbf16, #tpu.memory_space<vmem>>, %arg2: memref<128x128xbf16, #tpu.memory_space<vmem>>, %arg3: memref<1x128xf32, #tpu.memory_space<vmem>>, %arg4: memref<128x128xf32, #tpu.memory_space<vmem>>, %arg5: memref<1x128xf32, #tpu.memory_space<vmem>>, %arg6: memref<64x128xbf16, #tpu.memory_space<vmem>>) attributes {dimension_semantics = [#tpu.dimension_semantics<parallel>], iteration_bounds = array<i64: 2>, scalar_prefetch = 0 : i64, scratch_operands = 0 : i64, tpu.core_type = #tpu.core_type<tc>, window_params = [{transform_indices = @transform_0, window_bounds = array<i64: 64, 128>}, {pipeline_mode = #tpu.pipeline_mode<synchronous>, transform_indices = @transform_1, window_bounds = array<i64: 128, 128>}, {pipeline_mode = #tpu.pipeline_mode<synchronous>, transform_indices = @transform_2, window_bounds = array<i64: 1, 128>}, {pipeline_mode = #tpu.pipeline_mode<synchronous>, transform_indices = @transform_3, window_bounds = array<i64: 128, 128>}, {pipeline_mode = #tpu.pipeline_mode<synchronous>, transform_indices = @transform_4, window_bounds = array<i64: 1, 128>}, {transform_indices = @transform_5, window_bounds = array<i64: 64, 128>}]} {
    %c0 = arith.constant 0 : index
    %c0_0 = arith.constant 0 : index
    %0 = vector.load %arg1[%c0, %c0_0] : memref<64x128xbf16, #tpu.memory_space<vmem>>, vector<64x128xbf16>
    %c0_1 = arith.constant 0 : index
    %c0_2 = arith.constant 0 : index
    %1 = vector.load %arg2[%c0_1, %c0_2] : memref<128x128xbf16, #tpu.memory_space<vmem>>, vector<128x128xbf16>
    %cst = arith.constant dense<0.000000e+00> : vector<64x128xf32>
    %2 = tpu.matmul %0, %1, %cst {dimension_numbers = #tpu.dot_dimension_numbers<[1], [0], [0], [1], [0, 0, 1, 1], [], []>} : vector<64x128xbf16>, vector<128x128xbf16>, vector<64x128xf32> -> vector<64x128xf32>
    %c0_3 = arith.constant 0 : index
    %c0_4 = arith.constant 0 : index
    %3 = vector.load %arg3[%c0_3, %c0_4] : memref<1x128xf32, #tpu.memory_space<vmem>>, vector<1x128xf32>
    %4 = vector.broadcast %3 : vector<1x128xf32> to vector<64x128xf32>
    %5 = arith.addf %2, %4 : vector<64x128xf32>
    %c0_5 = arith.constant 0 : index
    %c0_6 = arith.constant 0 : index
    %6 = vector.load %arg4[%c0_5, %c0_6] : memref<128x128xf32, #tpu.memory_space<vmem>>, vector<128x128xf32>
    %c0_7 = arith.constant 0 : index
    %c0_8 = arith.constant 0 : index
    %7 = vector.load %arg5[%c0_7, %c0_8] : memref<1x128xf32, #tpu.memory_space<vmem>>, vector<1x128xf32>
    %8 = arith.mulf %5, %5 : vector<64x128xf32>
    %cst_9 = arith.constant dense<0.000000e+00> : vector<64x128xf32>
    %9 = tpu.matmul %8, %6, %cst_9 {dimension_numbers = #tpu.dot_dimension_numbers<[1], [0], [0], [1], [0, 0, 1, 1], [], []>} : vector<64x128xf32>, vector<128x128xf32>, vector<64x128xf32> -> vector<64x128xf32>
    %10 = vector.broadcast %7 : vector<1x128xf32> to vector<64x128xf32>
    %11 = arith.addf %9, %10 : vector<64x128xf32>
    %12 = math.rsqrt %11 : vector<64x128xf32>
    %13 = arith.mulf %5, %12 : vector<64x128xf32>
    %14 = arith.truncf %13 : vector<64x128xf32> to vector<64x128xbf16>
    %c0_10 = arith.constant 0 : index
    %c0_11 = arith.constant 0 : index
    %15 = vector.load %arg6[%c0_10, %c0_11] : memref<64x128xbf16, #tpu.memory_space<vmem>>, vector<64x128xbf16>
    tpu.vector_store %arg6[%c0_10, %c0_11], %14 {strides = array<i32>} : memref<64x128xbf16, #tpu.memory_space<vmem>>, vector<64x128xbf16>,
    return
  }
  func.func @transform_0(%arg0: i32) -> (i32, i32) {
    %c0_i32 = arith.constant 0 : i32
    %c0_i32_0 = arith.constant 0 : i32
    return %arg0, %c0_i32 : i32, i32
  }
  func.func @transform_1(%arg0: i32) -> (i32, i32) {
    %c0_i32 = arith.constant 0 : i32
    %c0_i32_0 = arith.constant 0 : i32
    %c0_i32_1 = arith.constant 0 : i32
    return %c0_i32, %c0_i32_0 : i32, i32
  }
  func.func @transform_2(%arg0: i32) -> (i32, i32) {
    %c0_i32 = arith.constant 0 : i32
    %c0_i32_0 = arith.constant 0 : i32
    %c0_i32_1 = arith.constant 0 : i32
    return %c0_i32, %c0_i32_0 : i32, i32
  }
  func.func @transform_3(%arg0: i32) -> (i32, i32) {
    %c0_i32 = arith.constant 0 : i32
    %c0_i32_0 = arith.constant 0 : i32
    %c0_i32_1 = arith.constant 0 : i32
    return %c0_i32, %c0_i32_0 : i32, i32
  }
  func.func @transform_4(%arg0: i32) -> (i32, i32) {
    %c0_i32 = arith.constant 0 : i32
    %c0_i32_0 = arith.constant 0 : i32
    %c0_i32_1 = arith.constant 0 : i32
    return %c0_i32, %c0_i32_0 : i32, i32
  }
  func.func @transform_5(%arg0: i32) -> (i32, i32) {
    %c0_i32 = arith.constant 0 : i32
    %c0_i32_0 = arith.constant 0 : i32
    return %arg0, %c0_i32 : i32, i32
  }
}

module attributes {stable_mosaic.version = 11 : i64} {
  func.func @_fused_gemm_kernel(%arg0: i32, %arg1: memref<32x1152xbf16, #tpu.memory_space<vmem>>, %arg2: memref<1152x128xbf16, #tpu.memory_space<vmem>>, %arg3: memref<1x128xf32, #tpu.memory_space<vmem>>, %arg4: memref<128x128xf32, #tpu.memory_space<vmem>>, %arg5: memref<1x128xf32, #tpu.memory_space<vmem>>, %arg6: memref<32x128xbf16, #tpu.memory_space<vmem>>) attributes {dimension_semantics = [#tpu.dimension_semantics<parallel>], iteration_bounds = array<i64: 1>, scalar_prefetch = 0 : i64, scratch_operands = 0 : i64, tpu.core_type = #tpu.core_type<tc>, window_params = [{transform_indices = @transform_0, window_bounds = array<i64: 32, 1152>}, {pipeline_mode = #tpu.pipeline_mode<synchronous>, transform_indices = @transform_1, window_bounds = array<i64: 1152, 128>}, {pipeline_mode = #tpu.pipeline_mode<synchronous>, transform_indices = @transform_2, window_bounds = array<i64: 1, 128>}, {pipeline_mode = #tpu.pipeline_mode<synchronous>, transform_indices = @transform_3, window_bounds = array<i64: 128, 128>}, {pipeline_mode = #tpu.pipeline_mode<synchronous>, transform_indices = @transform_4, window_bounds = array<i64: 1, 128>}, {transform_indices = @transform_5, window_bounds = array<i64: 32, 128>}]} {
    %c0 = arith.constant 0 : index
    %c0_0 = arith.constant 0 : index
    %0 = vector.load %arg1[%c0, %c0_0] : memref<32x1152xbf16, #tpu.memory_space<vmem>>, vector<32x1152xbf16>
    %c0_1 = arith.constant 0 : index
    %c0_2 = arith.constant 0 : index
    %1 = vector.load %arg2[%c0_1, %c0_2] : memref<1152x128xbf16, #tpu.memory_space<vmem>>, vector<1152x128xbf16>
    %cst = arith.constant dense<0.000000e+00> : vector<32x128xf32>
    %2 = tpu.matmul %0, %1, %cst {dimension_numbers = #tpu.dot_dimension_numbers<[1], [0], [0], [1], [0, 0, 1, 1], [], []>} : vector<32x1152xbf16>, vector<1152x128xbf16>, vector<32x128xf32> -> vector<32x128xf32>
    %c0_3 = arith.constant 0 : index
    %c0_4 = arith.constant 0 : index
    %3 = vector.load %arg3[%c0_3, %c0_4] : memref<1x128xf32, #tpu.memory_space<vmem>>, vector<1x128xf32>
    %4 = vector.broadcast %3 : vector<1x128xf32> to vector<32x128xf32>
    %5 = arith.addf %2, %4 : vector<32x128xf32>
    %c0_5 = arith.constant 0 : index
    %c0_6 = arith.constant 0 : index
    %6 = vector.load %arg4[%c0_5, %c0_6] : memref<128x128xf32, #tpu.memory_space<vmem>>, vector<128x128xf32>
    %c0_7 = arith.constant 0 : index
    %c0_8 = arith.constant 0 : index
    %7 = vector.load %arg5[%c0_7, %c0_8] : memref<1x128xf32, #tpu.memory_space<vmem>>, vector<1x128xf32>
    %8 = arith.mulf %5, %5 : vector<32x128xf32>
    %cst_9 = arith.constant dense<0.000000e+00> : vector<32x128xf32>
    %9 = tpu.matmul %8, %6, %cst_9 {dimension_numbers = #tpu.dot_dimension_numbers<[1], [0], [0], [1], [0, 0, 1, 1], [], []>} : vector<32x128xf32>, vector<128x128xf32>, vector<32x128xf32> -> vector<32x128xf32>
    %10 = vector.broadcast %7 : vector<1x128xf32> to vector<32x128xf32>
    %11 = arith.addf %9, %10 : vector<32x128xf32>
    %12 = math.rsqrt %11 : vector<32x128xf32>
    %13 = arith.mulf %5, %12 : vector<32x128xf32>
    %14 = arith.truncf %13 : vector<32x128xf32> to vector<32x128xbf16>
    %c0_10 = arith.constant 0 : index
    %c0_11 = arith.constant 0 : index
    %15 = vector.load %arg6[%c0_10, %c0_11] : memref<32x128xbf16, #tpu.memory_space<vmem>>, vector<32x128xbf16>
    tpu.vector_store %arg6[%c0_10, %c0_11], %14 {strides = array<i32>} : memref<32x128xbf16, #tpu.memory_space<vmem>>, vector<32x128xbf16>,
    return
  }
  func.func @transform_0(%arg0: i32) -> (i32, i32) {
    %c0_i32 = arith.constant 0 : i32
    %c0_i32_0 = arith.constant 0 : i32
    return %arg0, %c0_i32 : i32, i32
  }
  func.func @transform_1(%arg0: i32) -> (i32, i32) {
    %c0_i32 = arith.constant 0 : i32
    %c0_i32_0 = arith.constant 0 : i32
    %c0_i32_1 = arith.constant 0 : i32
    return %c0_i32, %c0_i32_0 : i32, i32
  }
  func.func @transform_2(%arg0: i32) -> (i32, i32) {
    %c0_i32 = arith.constant 0 : i32
    %c0_i32_0 = arith.constant 0 : i32
    %c0_i32_1 = arith.constant 0 : i32
    return %c0_i32, %c0_i32_0 : i32, i32
  }
  func.func @transform_3(%arg0: i32) -> (i32, i32) {
    %c0_i32 = arith.constant 0 : i32
    %c0_i32_0 = arith.constant 0 : i32
    %c0_i32_1 = arith.constant 0 : i32
    return %c0_i32, %c0_i32_0 : i32, i32
  }
  func.func @transform_4(%arg0: i32) -> (i32, i32) {
    %c0_i32 = arith.constant 0 : i32
    %c0_i32_0 = arith.constant 0 : i32
    %c0_i32_1 = arith.constant 0 : i32
    return %c0_i32, %c0_i32_0 : i32, i32
  }
  func.func @transform_5(%arg0: i32) -> (i32, i32) {
    %c0_i32 = arith.constant 0 : i32
    %c0_i32_0 = arith.constant 0 : i32
    return %arg0, %c0_i32 : i32, i32
  }
}

module attributes {stable_mosaic.version = 11 : i64} {
  func.func @_fused_gemm_kernel(%arg0: i32, %arg1: memref<8x1152xbf16, #tpu.memory_space<vmem>>, %arg2: memref<1152x128xbf16, #tpu.memory_space<vmem>>, %arg3: memref<1x128xf32, #tpu.memory_space<vmem>>, %arg4: memref<128x128xf32, #tpu.memory_space<vmem>>, %arg5: memref<1x128xf32, #tpu.memory_space<vmem>>, %arg6: memref<8x128xbf16, #tpu.memory_space<vmem>>) attributes {dimension_semantics = [#tpu.dimension_semantics<parallel>], iteration_bounds = array<i64: 1>, scalar_prefetch = 0 : i64, scratch_operands = 0 : i64, tpu.core_type = #tpu.core_type<tc>, window_params = [{transform_indices = @transform_0, window_bounds = array<i64: 8, 1152>}, {pipeline_mode = #tpu.pipeline_mode<synchronous>, transform_indices = @transform_1, window_bounds = array<i64: 1152, 128>}, {pipeline_mode = #tpu.pipeline_mode<synchronous>, transform_indices = @transform_2, window_bounds = array<i64: 1, 128>}, {pipeline_mode = #tpu.pipeline_mode<synchronous>, transform_indices = @transform_3, window_bounds = array<i64: 128, 128>}, {pipeline_mode = #tpu.pipeline_mode<synchronous>, transform_indices = @transform_4, window_bounds = array<i64: 1, 128>}, {transform_indices = @transform_5, window_bounds = array<i64: 8, 128>}]} {
    %c0 = arith.constant 0 : index
    %c0_0 = arith.constant 0 : index
    %0 = vector.load %arg1[%c0, %c0_0] : memref<8x1152xbf16, #tpu.memory_space<vmem>>, vector<8x1152xbf16>
    %c0_1 = arith.constant 0 : index
    %c0_2 = arith.constant 0 : index
    %1 = vector.load %arg2[%c0_1, %c0_2] : memref<1152x128xbf16, #tpu.memory_space<vmem>>, vector<1152x128xbf16>
    %cst = arith.constant dense<0.000000e+00> : vector<8x128xf32>
    %2 = tpu.matmul %0, %1, %cst {dimension_numbers = #tpu.dot_dimension_numbers<[1], [0], [0], [1], [0, 0, 1, 1], [], []>} : vector<8x1152xbf16>, vector<1152x128xbf16>, vector<8x128xf32> -> vector<8x128xf32>
    %c0_3 = arith.constant 0 : index
    %c0_4 = arith.constant 0 : index
    %3 = vector.load %arg3[%c0_3, %c0_4] : memref<1x128xf32, #tpu.memory_space<vmem>>, vector<1x128xf32>
    %4 = vector.broadcast %3 : vector<1x128xf32> to vector<8x128xf32>
    %5 = arith.addf %2, %4 : vector<8x128xf32>
    %c0_5 = arith.constant 0 : index
    %c0_6 = arith.constant 0 : index
    %6 = vector.load %arg4[%c0_5, %c0_6] : memref<128x128xf32, #tpu.memory_space<vmem>>, vector<128x128xf32>
    %c0_7 = arith.constant 0 : index
    %c0_8 = arith.constant 0 : index
    %7 = vector.load %arg5[%c0_7, %c0_8] : memref<1x128xf32, #tpu.memory_space<vmem>>, vector<1x128xf32>
    %8 = arith.mulf %5, %5 : vector<8x128xf32>
    %cst_9 = arith.constant dense<0.000000e+00> : vector<8x128xf32>
    %9 = tpu.matmul %8, %6, %cst_9 {dimension_numbers = #tpu.dot_dimension_numbers<[1], [0], [0], [1], [0, 0, 1, 1], [], []>} : vector<8x128xf32>, vector<128x128xf32>, vector<8x128xf32> -> vector<8x128xf32>
    %10 = vector.broadcast %7 : vector<1x128xf32> to vector<8x128xf32>
    %11 = arith.addf %9, %10 : vector<8x128xf32>
    %12 = math.rsqrt %11 : vector<8x128xf32>
    %13 = arith.mulf %5, %12 : vector<8x128xf32>
    %14 = arith.truncf %13 : vector<8x128xf32> to vector<8x128xbf16>
    %c0_10 = arith.constant 0 : index
    %c0_11 = arith.constant 0 : index
    %15 = vector.load %arg6[%c0_10, %c0_11] : memref<8x128xbf16, #tpu.memory_space<vmem>>, vector<8x128xbf16>
    tpu.vector_store %arg6[%c0_10, %c0_11], %14 {strides = array<i32>} : memref<8x128xbf16, #tpu.memory_space<vmem>>, vector<8x128xbf16>,
    return
  }
  func.func @transform_0(%arg0: i32) -> (i32, i32) {
    %c0_i32 = arith.constant 0 : i32
    %c0_i32_0 = arith.constant 0 : i32
    return %arg0, %c0_i32 : i32, i32
  }
  func.func @transform_1(%arg0: i32) -> (i32, i32) {
    %c0_i32 = arith.constant 0 : i32
    %c0_i32_0 = arith.constant 0 : i32
    %c0_i32_1 = arith.constant 0 : i32
    return %c0_i32, %c0_i32_0 : i32, i32
  }
  func.func @transform_2(%arg0: i32) -> (i32, i32) {
    %c0_i32 = arith.constant 0 : i32
    %c0_i32_0 = arith.constant 0 : i32
    %c0_i32_1 = arith.constant 0 : i32
    return %c0_i32, %c0_i32_0 : i32, i32
  }
  func.func @transform_3(%arg0: i32) -> (i32, i32) {
    %c0_i32 = arith.constant 0 : i32
    %c0_i32_0 = arith.constant 0 : i32
    %c0_i32_1 = arith.constant 0 : i32
    return %c0_i32, %c0_i32_0 : i32, i32
  }
  func.func @transform_4(%arg0: i32) -> (i32, i32) {
    %c0_i32 = arith.constant 0 : i32
    %c0_i32_0 = arith.constant 0 : i32
    %c0_i32_1 = arith.constant 0 : i32
    return %c0_i32, %c0_i32_0 : i32, i32
  }
  func.func @transform_5(%arg0: i32) -> (i32, i32) {
    %c0_i32 = arith.constant 0 : i32
    %c0_i32_0 = arith.constant 0 : i32
    return %arg0, %c0_i32 : i32, i32
  }
}

module attributes {stable_mosaic.version = 11 : i64} {
  func.func @_fused_gemm_kernel(%arg0: i32, %arg1: memref<8x1152xbf16, #tpu.memory_space<vmem>>, %arg2: memref<1152x512xbf16, #tpu.memory_space<vmem>>, %arg3: memref<1x512xf32, #tpu.memory_space<vmem>>, %arg4: memref<128x128xf32, #tpu.memory_space<vmem>>, %arg5: memref<1x128xf32, #tpu.memory_space<vmem>>, %arg6: memref<8x512xbf16, #tpu.memory_space<vmem>>) attributes {dimension_semantics = [#tpu.dimension_semantics<parallel>], iteration_bounds = array<i64: 1>, scalar_prefetch = 0 : i64, scratch_operands = 0 : i64, tpu.core_type = #tpu.core_type<tc>, window_params = [{transform_indices = @transform_0, window_bounds = array<i64: 8, 1152>}, {pipeline_mode = #tpu.pipeline_mode<synchronous>, transform_indices = @transform_1, window_bounds = array<i64: 1152, 512>}, {pipeline_mode = #tpu.pipeline_mode<synchronous>, transform_indices = @transform_2, window_bounds = array<i64: 1, 512>}, {pipeline_mode = #tpu.pipeline_mode<synchronous>, transform_indices = @transform_3, window_bounds = array<i64: 128, 128>}, {pipeline_mode = #tpu.pipeline_mode<synchronous>, transform_indices = @transform_4, window_bounds = array<i64: 1, 128>}, {transform_indices = @transform_5, window_bounds = array<i64: 8, 512>}]} {
    %c0 = arith.constant 0 : index
    %c0_0 = arith.constant 0 : index
    %0 = vector.load %arg1[%c0, %c0_0] : memref<8x1152xbf16, #tpu.memory_space<vmem>>, vector<8x1152xbf16>
    %c0_1 = arith.constant 0 : index
    %c0_2 = arith.constant 0 : index
    %1 = vector.load %arg2[%c0_1, %c0_2] : memref<1152x512xbf16, #tpu.memory_space<vmem>>, vector<1152x512xbf16>
    %cst = arith.constant dense<0.000000e+00> : vector<8x512xf32>
    %2 = tpu.matmul %0, %1, %cst {dimension_numbers = #tpu.dot_dimension_numbers<[1], [0], [0], [1], [0, 0, 1, 1], [], []>} : vector<8x1152xbf16>, vector<1152x512xbf16>, vector<8x512xf32> -> vector<8x512xf32>
    %c0_3 = arith.constant 0 : index
    %c0_4 = arith.constant 0 : index
    %3 = vector.load %arg3[%c0_3, %c0_4] : memref<1x512xf32, #tpu.memory_space<vmem>>, vector<1x512xf32>
    %4 = vector.broadcast %3 : vector<1x512xf32> to vector<8x512xf32>
    %5 = arith.addf %2, %4 : vector<8x512xf32>
    %c0_5 = arith.constant 0 : index
    %c0_6 = arith.constant 0 : index
    %6 = vector.load %arg4[%c0_5, %c0_6] : memref<128x128xf32, #tpu.memory_space<vmem>>, vector<128x128xf32>
    %c0_7 = arith.constant 0 : index
    %c0_8 = arith.constant 0 : index
    %7 = vector.load %arg5[%c0_7, %c0_8] : memref<1x128xf32, #tpu.memory_space<vmem>>, vector<1x128xf32>
    %8 = vector.extract_strided_slice %5 {offsets = [0, 0], sizes = [8, 128], strides = [1, 1]} : vector<8x512xf32> to vector<8x128xf32>
    %9 = arith.mulf %8, %8 : vector<8x128xf32>
    %cst_9 = arith.constant dense<0.000000e+00> : vector<8x128xf32>
    %10 = tpu.matmul %9, %6, %cst_9 {dimension_numbers = #tpu.dot_dimension_numbers<[1], [0], [0], [1], [0, 0, 1, 1], [], []>} : vector<8x128xf32>, vector<128x128xf32>, vector<8x128xf32> -> vector<8x128xf32>
    %11 = vector.broadcast %7 : vector<1x128xf32> to vector<8x128xf32>
    %12 = arith.addf %10, %11 : vector<8x128xf32>
    %13 = math.sqrt %12 : vector<8x128xf32>
    %14 = arith.mulf %8, %13 : vector<8x128xf32>
    %15 = arith.truncf %14 : vector<8x128xf32> to vector<8x128xbf16>
    %c0_10 = arith.constant 0 : index
    %c0_11 = arith.constant 0 : index
    %16 = vector.load %arg6[%c0_10, %c0_11] : memref<8x512xbf16, #tpu.memory_space<vmem>>, vector<8x128xbf16>
    tpu.vector_store %arg6[%c0_10, %c0_11], %15 {strides = array<i32>} : memref<8x512xbf16, #tpu.memory_space<vmem>>, vector<8x128xbf16>,
    %17 = vector.extract_strided_slice %5 {offsets = [0, 128], sizes = [8, 128], strides = [1, 1]} : vector<8x512xf32> to vector<8x128xf32>
    %18 = arith.mulf %17, %17 : vector<8x128xf32>
    %cst_12 = arith.constant dense<0.000000e+00> : vector<8x128xf32>
    %19 = tpu.matmul %18, %6, %cst_12 {dimension_numbers = #tpu.dot_dimension_numbers<[1], [0], [0], [1], [0, 0, 1, 1], [], []>} : vector<8x128xf32>, vector<128x128xf32>, vector<8x128xf32> -> vector<8x128xf32>
    %20 = vector.broadcast %7 : vector<1x128xf32> to vector<8x128xf32>
    %21 = arith.addf %19, %20 : vector<8x128xf32>
    %22 = math.sqrt %21 : vector<8x128xf32>
    %23 = arith.mulf %17, %22 : vector<8x128xf32>
    %24 = arith.truncf %23 : vector<8x128xf32> to vector<8x128xbf16>
    %c0_13 = arith.constant 0 : index
    %c128 = arith.constant 128 : index
    %25 = vector.load %arg6[%c0_13, %c128] : memref<8x512xbf16, #tpu.memory_space<vmem>>, vector<8x128xbf16>
    tpu.vector_store %arg6[%c0_13, %c128], %24 {strides = array<i32>} : memref<8x512xbf16, #tpu.memory_space<vmem>>, vector<8x128xbf16>,
    %26 = vector.extract_strided_slice %5 {offsets = [0, 256], sizes = [8, 128], strides = [1, 1]} : vector<8x512xf32> to vector<8x128xf32>
    %27 = arith.mulf %26, %26 : vector<8x128xf32>
    %cst_14 = arith.constant dense<0.000000e+00> : vector<8x128xf32>
    %28 = tpu.matmul %27, %6, %cst_14 {dimension_numbers = #tpu.dot_dimension_numbers<[1], [0], [0], [1], [0, 0, 1, 1], [], []>} : vector<8x128xf32>, vector<128x128xf32>, vector<8x128xf32> -> vector<8x128xf32>
    %29 = vector.broadcast %7 : vector<1x128xf32> to vector<8x128xf32>
    %30 = arith.addf %28, %29 : vector<8x128xf32>
    %31 = math.sqrt %30 : vector<8x128xf32>
    %32 = arith.mulf %26, %31 : vector<8x128xf32>
    %33 = arith.truncf %32 : vector<8x128xf32> to vector<8x128xbf16>
    %c0_15 = arith.constant 0 : index
    %c256 = arith.constant 256 : index
    %34 = vector.load %arg6[%c0_15, %c256] : memref<8x512xbf16, #tpu.memory_space<vmem>>, vector<8x128xbf16>
    tpu.vector_store %arg6[%c0_15, %c256], %33 {strides = array<i32>} : memref<8x512xbf16, #tpu.memory_space<vmem>>, vector<8x128xbf16>,
    %35 = vector.extract_strided_slice %5 {offsets = [0, 384], sizes = [8, 128], strides = [1, 1]} : vector<8x512xf32> to vector<8x128xf32>
    %36 = arith.mulf %35, %35 : vector<8x128xf32>
    %cst_16 = arith.constant dense<0.000000e+00> : vector<8x128xf32>
    %37 = tpu.matmul %36, %6, %cst_16 {dimension_numbers = #tpu.dot_dimension_numbers<[1], [0], [0], [1], [0, 0, 1, 1], [], []>} : vector<8x128xf32>, vector<128x128xf32>, vector<8x128xf32> -> vector<8x128xf32>
    %38 = vector.broadcast %7 : vector<1x128xf32> to vector<8x128xf32>
    %39 = arith.addf %37, %38 : vector<8x128xf32>
    %40 = math.sqrt %39 : vector<8x128xf32>
    %41 = arith.mulf %35, %40 : vector<8x128xf32>
    %42 = arith.truncf %41 : vector<8x128xf32> to vector<8x128xbf16>
    %c0_17 = arith.constant 0 : index
    %c384 = arith.constant 384 : index
    %43 = vector.load %arg6[%c0_17, %c384] : memref<8x512xbf16, #tpu.memory_space<vmem>>, vector<8x128xbf16>
    tpu.vector_store %arg6[%c0_17, %c384], %42 {strides = array<i32>} : memref<8x512xbf16, #tpu.memory_space<vmem>>, vector<8x128xbf16>,
    return
  }
  func.func @transform_0(%arg0: i32) -> (i32, i32) {
    %c0_i32 = arith.constant 0 : i32
    %c0_i32_0 = arith.constant 0 : i32
    return %arg0, %c0_i32 : i32, i32
  }
  func.func @transform_1(%arg0: i32) -> (i32, i32) {
    %c0_i32 = arith.constant 0 : i32
    %c0_i32_0 = arith.constant 0 : i32
    %c0_i32_1 = arith.constant 0 : i32
    return %c0_i32, %c0_i32_0 : i32, i32
  }
  func.func @transform_2(%arg0: i32) -> (i32, i32) {
    %c0_i32 = arith.constant 0 : i32
    %c0_i32_0 = arith.constant 0 : i32
    %c0_i32_1 = arith.constant 0 : i32
    return %c0_i32, %c0_i32_0 : i32, i32
  }
  func.func @transform_3(%arg0: i32) -> (i32, i32) {
    %c0_i32 = arith.constant 0 : i32
    %c0_i32_0 = arith.constant 0 : i32
    %c0_i32_1 = arith.constant 0 : i32
    return %c0_i32, %c0_i32_0 : i32, i32
  }
  func.func @transform_4(%arg0: i32) -> (i32, i32) {
    %c0_i32 = arith.constant 0 : i32
    %c0_i32_0 = arith.constant 0 : i32
    %c0_i32_1 = arith.constant 0 : i32
    return %c0_i32, %c0_i32_0 : i32, i32
  }
  func.func @transform_5(%arg0: i32) -> (i32, i32) {
    %c0_i32 = arith.constant 0 : i32
    %c0_i32_0 = arith.constant 0 : i32
    return %arg0, %c0_i32 : i32, i32
  }
}

module attributes {stable_mosaic.version = 11 : i64} {
  func.func @_fused_gemm_kernel(%arg0: i32, %arg1: memref<8x1152xbf16, #tpu.memory_space<vmem>>, %arg2: memref<1152x128xbf16, #tpu.memory_space<vmem>>, %arg3: memref<1x128xf32, #tpu.memory_space<vmem>>, %arg4: memref<8x128xbf16, #tpu.memory_space<vmem>>) attributes {dimension_semantics = [#tpu.dimension_semantics<parallel>], iteration_bounds = array<i64: 1>, scalar_prefetch = 0 : i64, scratch_operands = 0 : i64, tpu.core_type = #tpu.core_type<tc>, window_params = [{transform_indices = @transform_0, window_bounds = array<i64: 8, 1152>}, {pipeline_mode = #tpu.pipeline_mode<synchronous>, transform_indices = @transform_1, window_bounds = array<i64: 1152, 128>}, {pipeline_mode = #tpu.pipeline_mode<synchronous>, transform_indices = @transform_2, window_bounds = array<i64: 1, 128>}, {transform_indices = @transform_3, window_bounds = array<i64: 8, 128>}]} {
    %c0 = arith.constant 0 : index
    %c0_0 = arith.constant 0 : index
    %0 = vector.load %arg1[%c0, %c0_0] : memref<8x1152xbf16, #tpu.memory_space<vmem>>, vector<8x1152xbf16>
    %c0_1 = arith.constant 0 : index
    %c0_2 = arith.constant 0 : index
    %1 = vector.load %arg2[%c0_1, %c0_2] : memref<1152x128xbf16, #tpu.memory_space<vmem>>, vector<1152x128xbf16>
    %cst = arith.constant dense<0.000000e+00> : vector<8x128xf32>
    %2 = tpu.matmul %0, %1, %cst {dimension_numbers = #tpu.dot_dimension_numbers<[1], [0], [0], [1], [0, 0, 1, 1], [], []>} : vector<8x1152xbf16>, vector<1152x128xbf16>, vector<8x128xf32> -> vector<8x128xf32>
    %c0_3 = arith.constant 0 : index
    %c0_4 = arith.constant 0 : index
    %3 = vector.load %arg3[%c0_3, %c0_4] : memref<1x128xf32, #tpu.memory_space<vmem>>, vector<1x128xf32>
    %4 = vector.broadcast %3 : vector<1x128xf32> to vector<8x128xf32>
    %5 = arith.addf %2, %4 : vector<8x128xf32>
    %6 = arith.negf %5 : vector<8x128xf32>
    %7 = math.exp %6 : vector<8x128xf32>
    %cst_5 = arith.constant 1.000000e+00 : f32
    %8 = vector.broadcast %cst_5 : f32 to vector<8x128xf32>
    %9 = arith.addf %8, %7 : vector<8x128xf32>
    %10 = arith.divf %8, %9 : vector<8x128xf32>
    %11 = arith.truncf %10 : vector<8x128xf32> to vector<8x128xbf16>
    %c0_6 = arith.constant 0 : index
    %c0_7 = arith.constant 0 : index
    %12 = vector.load %arg4[%c0_6, %c0_7] : memref<8x128xbf16, #tpu.memory_space<vmem>>, vector<8x128xbf16>
    tpu.vector_store %arg4[%c0_6, %c0_7], %11 {strides = array<i32>} : memref<8x128xbf16, #tpu.memory_space<vmem>>, vector<8x128xbf16>,
    return
  }
  func.func @transform_0(%arg0: i32) -> (i32, i32) {
    %c0_i32 = arith.constant 0 : i32
    %c0_i32_0 = arith.constant 0 : i32
    return %arg0, %c0_i32 : i32, i32
  }
  func.func @transform_1(%arg0: i32) -> (i32, i32) {
    %c0_i32 = arith.constant 0 : i32
    %c0_i32_0 = arith.constant 0 : i32
    %c0_i32_1 = arith.constant 0 : i32
    return %c0_i32, %c0_i32_0 : i32, i32
  }
  func.func @transform_2(%arg0: i32) -> (i32, i32) {
    %c0_i32 = arith.constant 0 : i32
    %c0_i32_0 = arith.constant 0 : i32
    %c0_i32_1 = arith.constant 0 : i32
    return %c0_i32, %c0_i32_0 : i32, i32
  }
  func.func @transform_3(%arg0: i32) -> (i32, i32) {
    %c0_i32 = arith.constant 0 : i32
    %c0_i32_0 = arith.constant 0 : i32
    return %arg0, %c0_i32 : i32, i32
  }
}

module attributes {stable_mosaic.version = 11 : i64} {
  func.func @_fused_gemm_kernel(%arg0: i32, %arg1: memref<32x1152xbf16, #tpu.memory_space<vmem>>, %arg2: memref<1152x512xbf16, #tpu.memory_space<vmem>>, %arg3: memref<1x512xf32, #tpu.memory_space<vmem>>, %arg4: memref<128x128xf32, #tpu.memory_space<vmem>>, %arg5: memref<1x128xf32, #tpu.memory_space<vmem>>, %arg6: memref<32x512xbf16, #tpu.memory_space<vmem>>) attributes {dimension_semantics = [#tpu.dimension_semantics<parallel>], iteration_bounds = array<i64: 1>, scalar_prefetch = 0 : i64, scratch_operands = 0 : i64, tpu.core_type = #tpu.core_type<tc>, window_params = [{transform_indices = @transform_0, window_bounds = array<i64: 32, 1152>}, {pipeline_mode = #tpu.pipeline_mode<synchronous>, transform_indices = @transform_1, window_bounds = array<i64: 1152, 512>}, {pipeline_mode = #tpu.pipeline_mode<synchronous>, transform_indices = @transform_2, window_bounds = array<i64: 1, 512>}, {pipeline_mode = #tpu.pipeline_mode<synchronous>, transform_indices = @transform_3, window_bounds = array<i64: 128, 128>}, {pipeline_mode = #tpu.pipeline_mode<synchronous>, transform_indices = @transform_4, window_bounds = array<i64: 1, 128>}, {transform_indices = @transform_5, window_bounds = array<i64: 32, 512>}]} {
    %c0 = arith.constant 0 : index
    %c0_0 = arith.constant 0 : index
    %0 = vector.load %arg1[%c0, %c0_0] : memref<32x1152xbf16, #tpu.memory_space<vmem>>, vector<32x1152xbf16>
    %c0_1 = arith.constant 0 : index
    %c0_2 = arith.constant 0 : index
    %1 = vector.load %arg2[%c0_1, %c0_2] : memref<1152x512xbf16, #tpu.memory_space<vmem>>, vector<1152x512xbf16>
    %cst = arith.constant dense<0.000000e+00> : vector<32x512xf32>
    %2 = tpu.matmul %0, %1, %cst {dimension_numbers = #tpu.dot_dimension_numbers<[1], [0], [0], [1], [0, 0, 1, 1], [], []>} : vector<32x1152xbf16>, vector<1152x512xbf16>, vector<32x512xf32> -> vector<32x512xf32>
    %c0_3 = arith.constant 0 : index
    %c0_4 = arith.constant 0 : index
    %3 = vector.load %arg3[%c0_3, %c0_4] : memref<1x512xf32, #tpu.memory_space<vmem>>, vector<1x512xf32>
    %4 = vector.broadcast %3 : vector<1x512xf32> to vector<32x512xf32>
    %5 = arith.addf %2, %4 : vector<32x512xf32>
    %c0_5 = arith.constant 0 : index
    %c0_6 = arith.constant 0 : index
    %6 = vector.load %arg4[%c0_5, %c0_6] : memref<128x128xf32, #tpu.memory_space<vmem>>, vector<128x128xf32>
    %c0_7 = arith.constant 0 : index
    %c0_8 = arith.constant 0 : index
    %7 = vector.load %arg5[%c0_7, %c0_8] : memref<1x128xf32, #tpu.memory_space<vmem>>, vector<1x128xf32>
    %8 = vector.extract_strided_slice %5 {offsets = [0, 0], sizes = [32, 128], strides = [1, 1]} : vector<32x512xf32> to vector<32x128xf32>
    %9 = arith.mulf %8, %8 : vector<32x128xf32>
    %cst_9 = arith.constant dense<0.000000e+00> : vector<32x128xf32>
    %10 = tpu.matmul %9, %6, %cst_9 {dimension_numbers = #tpu.dot_dimension_numbers<[1], [0], [0], [1], [0, 0, 1, 1], [], []>} : vector<32x128xf32>, vector<128x128xf32>, vector<32x128xf32> -> vector<32x128xf32>
    %11 = vector.broadcast %7 : vector<1x128xf32> to vector<32x128xf32>
    %12 = arith.addf %10, %11 : vector<32x128xf32>
    %13 = math.sqrt %12 : vector<32x128xf32>
    %14 = arith.mulf %8, %13 : vector<32x128xf32>
    %15 = arith.truncf %14 : vector<32x128xf32> to vector<32x128xbf16>
    %c0_10 = arith.constant 0 : index
    %c0_11 = arith.constant 0 : index
    %16 = vector.load %arg6[%c0_10, %c0_11] : memref<32x512xbf16, #tpu.memory_space<vmem>>, vector<32x128xbf16>
    tpu.vector_store %arg6[%c0_10, %c0_11], %15 {strides = array<i32>} : memref<32x512xbf16, #tpu.memory_space<vmem>>, vector<32x128xbf16>,
    %17 = vector.extract_strided_slice %5 {offsets = [0, 128], sizes = [32, 128], strides = [1, 1]} : vector<32x512xf32> to vector<32x128xf32>
    %18 = arith.mulf %17, %17 : vector<32x128xf32>
    %cst_12 = arith.constant dense<0.000000e+00> : vector<32x128xf32>
    %19 = tpu.matmul %18, %6, %cst_12 {dimension_numbers = #tpu.dot_dimension_numbers<[1], [0], [0], [1], [0, 0, 1, 1], [], []>} : vector<32x128xf32>, vector<128x128xf32>, vector<32x128xf32> -> vector<32x128xf32>
    %20 = vector.broadcast %7 : vector<1x128xf32> to vector<32x128xf32>
    %21 = arith.addf %19, %20 : vector<32x128xf32>
    %22 = math.sqrt %21 : vector<32x128xf32>
    %23 = arith.mulf %17, %22 : vector<32x128xf32>
    %24 = arith.truncf %23 : vector<32x128xf32> to vector<32x128xbf16>
    %c0_13 = arith.constant 0 : index
    %c128 = arith.constant 128 : index
    %25 = vector.load %arg6[%c0_13, %c128] : memref<32x512xbf16, #tpu.memory_space<vmem>>, vector<32x128xbf16>
    tpu.vector_store %arg6[%c0_13, %c128], %24 {strides = array<i32>} : memref<32x512xbf16, #tpu.memory_space<vmem>>, vector<32x128xbf16>,
    %26 = vector.extract_strided_slice %5 {offsets = [0, 256], sizes = [32, 128], strides = [1, 1]} : vector<32x512xf32> to vector<32x128xf32>
    %27 = arith.mulf %26, %26 : vector<32x128xf32>
    %cst_14 = arith.constant dense<0.000000e+00> : vector<32x128xf32>
    %28 = tpu.matmul %27, %6, %cst_14 {dimension_numbers = #tpu.dot_dimension_numbers<[1], [0], [0], [1], [0, 0, 1, 1], [], []>} : vector<32x128xf32>, vector<128x128xf32>, vector<32x128xf32> -> vector<32x128xf32>
    %29 = vector.broadcast %7 : vector<1x128xf32> to vector<32x128xf32>
    %30 = arith.addf %28, %29 : vector<32x128xf32>
    %31 = math.sqrt %30 : vector<32x128xf32>
    %32 = arith.mulf %26, %31 : vector<32x128xf32>
    %33 = arith.truncf %32 : vector<32x128xf32> to vector<32x128xbf16>
    %c0_15 = arith.constant 0 : index
    %c256 = arith.constant 256 : index
    %34 = vector.load %arg6[%c0_15, %c256] : memref<32x512xbf16, #tpu.memory_space<vmem>>, vector<32x128xbf16>
    tpu.vector_store %arg6[%c0_15, %c256], %33 {strides = array<i32>} : memref<32x512xbf16, #tpu.memory_space<vmem>>, vector<32x128xbf16>,
    %35 = vector.extract_strided_slice %5 {offsets = [0, 384], sizes = [32, 128], strides = [1, 1]} : vector<32x512xf32> to vector<32x128xf32>
    %36 = arith.mulf %35, %35 : vector<32x128xf32>
    %cst_16 = arith.constant dense<0.000000e+00> : vector<32x128xf32>
    %37 = tpu.matmul %36, %6, %cst_16 {dimension_numbers = #tpu.dot_dimension_numbers<[1], [0], [0], [1], [0, 0, 1, 1], [], []>} : vector<32x128xf32>, vector<128x128xf32>, vector<32x128xf32> -> vector<32x128xf32>
    %38 = vector.broadcast %7 : vector<1x128xf32> to vector<32x128xf32>
    %39 = arith.addf %37, %38 : vector<32x128xf32>
    %40 = math.sqrt %39 : vector<32x128xf32>
    %41 = arith.mulf %35, %40 : vector<32x128xf32>
    %42 = arith.truncf %41 : vector<32x128xf32> to vector<32x128xbf16>
    %c0_17 = arith.constant 0 : index
    %c384 = arith.constant 384 : index
    %43 = vector.load %arg6[%c0_17, %c384] : memref<32x512xbf16, #tpu.memory_space<vmem>>, vector<32x128xbf16>
    tpu.vector_store %arg6[%c0_17, %c384], %42 {strides = array<i32>} : memref<32x512xbf16, #tpu.memory_space<vmem>>, vector<32x128xbf16>,
    return
  }
  func.func @transform_0(%arg0: i32) -> (i32, i32) {
    %c0_i32 = arith.constant 0 : i32
    %c0_i32_0 = arith.constant 0 : i32
    return %arg0, %c0_i32 : i32, i32
  }
  func.func @transform_1(%arg0: i32) -> (i32, i32) {
    %c0_i32 = arith.constant 0 : i32
    %c0_i32_0 = arith.constant 0 : i32
    %c0_i32_1 = arith.constant 0 : i32
    return %c0_i32, %c0_i32_0 : i32, i32
  }
  func.func @transform_2(%arg0: i32) -> (i32, i32) {
    %c0_i32 = arith.constant 0 : i32
    %c0_i32_0 = arith.constant 0 : i32
    %c0_i32_1 = arith.constant 0 : i32
    return %c0_i32, %c0_i32_0 : i32, i32
  }
  func.func @transform_3(%arg0: i32) -> (i32, i32) {
    %c0_i32 = arith.constant 0 : i32
    %c0_i32_0 = arith.constant 0 : i32
    %c0_i32_1 = arith.constant 0 : i32
    return %c0_i32, %c0_i32_0 : i32, i32
  }
  func.func @transform_4(%arg0: i32) -> (i32, i32) {
    %c0_i32 = arith.constant 0 : i32
    %c0_i32_0 = arith.constant 0 : i32
    %c0_i32_1 = arith.constant 0 : i32
    return %c0_i32, %c0_i32_0 : i32, i32
  }
  func.func @transform_5(%arg0: i32) -> (i32, i32) {
    %c0_i32 = arith.constant 0 : i32
    %c0_i32_0 = arith.constant 0 : i32
    return %arg0, %c0_i32 : i32, i32
  }
}

module attributes {stable_mosaic.version = 11 : i64} {
  func.func @_fused_gemm_kernel(%arg0: i32, %arg1: memref<64x1152xbf16, #tpu.memory_space<vmem>>, %arg2: memref<1152x512xbf16, #tpu.memory_space<vmem>>, %arg3: memref<1x512xf32, #tpu.memory_space<vmem>>, %arg4: memref<128x128xf32, #tpu.memory_space<vmem>>, %arg5: memref<1x128xf32, #tpu.memory_space<vmem>>, %arg6: memref<64x512xbf16, #tpu.memory_space<vmem>>) attributes {dimension_semantics = [#tpu.dimension_semantics<parallel>], iteration_bounds = array<i64: 2>, scalar_prefetch = 0 : i64, scratch_operands = 0 : i64, tpu.core_type = #tpu.core_type<tc>, window_params = [{transform_indices = @transform_0, window_bounds = array<i64: 64, 1152>}, {pipeline_mode = #tpu.pipeline_mode<synchronous>, transform_indices = @transform_1, window_bounds = array<i64: 1152, 512>}, {pipeline_mode = #tpu.pipeline_mode<synchronous>, transform_indices = @transform_2, window_bounds = array<i64: 1, 512>}, {pipeline_mode = #tpu.pipeline_mode<synchronous>, transform_indices = @transform_3, window_bounds = array<i64: 128, 128>}, {pipeline_mode = #tpu.pipeline_mode<synchronous>, transform_indices = @transform_4, window_bounds = array<i64: 1, 128>}, {transform_indices = @transform_5, window_bounds = array<i64: 64, 512>}]} {
    %c0 = arith.constant 0 : index
    %c0_0 = arith.constant 0 : index
    %0 = vector.load %arg1[%c0, %c0_0] : memref<64x1152xbf16, #tpu.memory_space<vmem>>, vector<64x1152xbf16>
    %c0_1 = arith.constant 0 : index
    %c0_2 = arith.constant 0 : index
    %1 = vector.load %arg2[%c0_1, %c0_2] : memref<1152x512xbf16, #tpu.memory_space<vmem>>, vector<1152x512xbf16>
    %cst = arith.constant dense<0.000000e+00> : vector<64x512xf32>
    %2 = tpu.matmul %0, %1, %cst {dimension_numbers = #tpu.dot_dimension_numbers<[1], [0], [0], [1], [0, 0, 1, 1], [], []>} : vector<64x1152xbf16>, vector<1152x512xbf16>, vector<64x512xf32> -> vector<64x512xf32>
    %c0_3 = arith.constant 0 : index
    %c0_4 = arith.constant 0 : index
    %3 = vector.load %arg3[%c0_3, %c0_4] : memref<1x512xf32, #tpu.memory_space<vmem>>, vector<1x512xf32>
    %4 = vector.broadcast %3 : vector<1x512xf32> to vector<64x512xf32>
    %5 = arith.addf %2, %4 : vector<64x512xf32>
    %c0_5 = arith.constant 0 : index
    %c0_6 = arith.constant 0 : index
    %6 = vector.load %arg4[%c0_5, %c0_6] : memref<128x128xf32, #tpu.memory_space<vmem>>, vector<128x128xf32>
    %c0_7 = arith.constant 0 : index
    %c0_8 = arith.constant 0 : index
    %7 = vector.load %arg5[%c0_7, %c0_8] : memref<1x128xf32, #tpu.memory_space<vmem>>, vector<1x128xf32>
    %8 = vector.extract_strided_slice %5 {offsets = [0, 0], sizes = [64, 128], strides = [1, 1]} : vector<64x512xf32> to vector<64x128xf32>
    %9 = arith.mulf %8, %8 : vector<64x128xf32>
    %cst_9 = arith.constant dense<0.000000e+00> : vector<64x128xf32>
    %10 = tpu.matmul %9, %6, %cst_9 {dimension_numbers = #tpu.dot_dimension_numbers<[1], [0], [0], [1], [0, 0, 1, 1], [], []>} : vector<64x128xf32>, vector<128x128xf32>, vector<64x128xf32> -> vector<64x128xf32>
    %11 = vector.broadcast %7 : vector<1x128xf32> to vector<64x128xf32>
    %12 = arith.addf %10, %11 : vector<64x128xf32>
    %13 = math.sqrt %12 : vector<64x128xf32>
    %14 = arith.mulf %8, %13 : vector<64x128xf32>
    %15 = arith.truncf %14 : vector<64x128xf32> to vector<64x128xbf16>
    %c0_10 = arith.constant 0 : index
    %c0_11 = arith.constant 0 : index
    %16 = vector.load %arg6[%c0_10, %c0_11] : memref<64x512xbf16, #tpu.memory_space<vmem>>, vector<64x128xbf16>
    tpu.vector_store %arg6[%c0_10, %c0_11], %15 {strides = array<i32>} : memref<64x512xbf16, #tpu.memory_space<vmem>>, vector<64x128xbf16>,
    %17 = vector.extract_strided_slice %5 {offsets = [0, 128], sizes = [64, 128], strides = [1, 1]} : vector<64x512xf32> to vector<64x128xf32>
    %18 = arith.mulf %17, %17 : vector<64x128xf32>
    %cst_12 = arith.constant dense<0.000000e+00> : vector<64x128xf32>
    %19 = tpu.matmul %18, %6, %cst_12 {dimension_numbers = #tpu.dot_dimension_numbers<[1], [0], [0], [1], [0, 0, 1, 1], [], []>} : vector<64x128xf32>, vector<128x128xf32>, vector<64x128xf32> -> vector<64x128xf32>
    %20 = vector.broadcast %7 : vector<1x128xf32> to vector<64x128xf32>
    %21 = arith.addf %19, %20 : vector<64x128xf32>
    %22 = math.sqrt %21 : vector<64x128xf32>
    %23 = arith.mulf %17, %22 : vector<64x128xf32>
    %24 = arith.truncf %23 : vector<64x128xf32> to vector<64x128xbf16>
    %c0_13 = arith.constant 0 : index
    %c128 = arith.constant 128 : index
    %25 = vector.load %arg6[%c0_13, %c128] : memref<64x512xbf16, #tpu.memory_space<vmem>>, vector<64x128xbf16>
    tpu.vector_store %arg6[%c0_13, %c128], %24 {strides = array<i32>} : memref<64x512xbf16, #tpu.memory_space<vmem>>, vector<64x128xbf16>,
    %26 = vector.extract_strided_slice %5 {offsets = [0, 256], sizes = [64, 128], strides = [1, 1]} : vector<64x512xf32> to vector<64x128xf32>
    %27 = arith.mulf %26, %26 : vector<64x128xf32>
    %cst_14 = arith.constant dense<0.000000e+00> : vector<64x128xf32>
    %28 = tpu.matmul %27, %6, %cst_14 {dimension_numbers = #tpu.dot_dimension_numbers<[1], [0], [0], [1], [0, 0, 1, 1], [], []>} : vector<64x128xf32>, vector<128x128xf32>, vector<64x128xf32> -> vector<64x128xf32>
    %29 = vector.broadcast %7 : vector<1x128xf32> to vector<64x128xf32>
    %30 = arith.addf %28, %29 : vector<64x128xf32>
    %31 = math.sqrt %30 : vector<64x128xf32>
    %32 = arith.mulf %26, %31 : vector<64x128xf32>
    %33 = arith.truncf %32 : vector<64x128xf32> to vector<64x128xbf16>
    %c0_15 = arith.constant 0 : index
    %c256 = arith.constant 256 : index
    %34 = vector.load %arg6[%c0_15, %c256] : memref<64x512xbf16, #tpu.memory_space<vmem>>, vector<64x128xbf16>
    tpu.vector_store %arg6[%c0_15, %c256], %33 {strides = array<i32>} : memref<64x512xbf16, #tpu.memory_space<vmem>>, vector<64x128xbf16>,
    %35 = vector.extract_strided_slice %5 {offsets = [0, 384], sizes = [64, 128], strides = [1, 1]} : vector<64x512xf32> to vector<64x128xf32>
    %36 = arith.mulf %35, %35 : vector<64x128xf32>
    %cst_16 = arith.constant dense<0.000000e+00> : vector<64x128xf32>
    %37 = tpu.matmul %36, %6, %cst_16 {dimension_numbers = #tpu.dot_dimension_numbers<[1], [0], [0], [1], [0, 0, 1, 1], [], []>} : vector<64x128xf32>, vector<128x128xf32>, vector<64x128xf32> -> vector<64x128xf32>
    %38 = vector.broadcast %7 : vector<1x128xf32> to vector<64x128xf32>
    %39 = arith.addf %37, %38 : vector<64x128xf32>
    %40 = math.sqrt %39 : vector<64x128xf32>
    %41 = arith.mulf %35, %40 : vector<64x128xf32>
    %42 = arith.truncf %41 : vector<64x128xf32> to vector<64x128xbf16>
    %c0_17 = arith.constant 0 : index
    %c384 = arith.constant 384 : index
    %43 = vector.load %arg6[%c0_17, %c384] : memref<64x512xbf16, #tpu.memory_space<vmem>>, vector<64x128xbf16>
    tpu.vector_store %arg6[%c0_17, %c384], %42 {strides = array<i32>} : memref<64x512xbf16, #tpu.memory_space<vmem>>, vector<64x128xbf16>,
    return
  }
  func.func @transform_0(%arg0: i32) -> (i32, i32) {
    %c0_i32 = arith.constant 0 : i32
    %c0_i32_0 = arith.constant 0 : i32
    return %arg0, %c0_i32 : i32, i32
  }
  func.func @transform_1(%arg0: i32) -> (i32, i32) {
    %c0_i32 = arith.constant 0 : i32
    %c0_i32_0 = arith.constant 0 : i32
    %c0_i32_1 = arith.constant 0 : i32
    return %c0_i32, %c0_i32_0 : i32, i32
  }
  func.func @transform_2(%arg0: i32) -> (i32, i32) {
    %c0_i32 = arith.constant 0 : i32
    %c0_i32_0 = arith.constant 0 : i32
    %c0_i32_1 = arith.constant 0 : i32
    return %c0_i32, %c0_i32_0 : i32, i32
  }
  func.func @transform_3(%arg0: i32) -> (i32, i32) {
    %c0_i32 = arith.constant 0 : i32
    %c0_i32_0 = arith.constant 0 : i32
    %c0_i32_1 = arith.constant 0 : i32
    return %c0_i32, %c0_i32_0 : i32, i32
  }
  func.func @transform_4(%arg0: i32) -> (i32, i32) {
    %c0_i32 = arith.constant 0 : i32
    %c0_i32_0 = arith.constant 0 : i32
    %c0_i32_1 = arith.constant 0 : i32
    return %c0_i32, %c0_i32_0 : i32, i32
  }
  func.func @transform_5(%arg0: i32) -> (i32, i32) {
    %c0_i32 = arith.constant 0 : i32
    %c0_i32_0 = arith.constant 0 : i32
    return %arg0, %c0_i32 : i32, i32
  }
}

module attributes {stable_mosaic.version = 11 : i64} {
  func.func @_fused_gemm_kernel(%arg0: i32, %arg1: memref<128x1152xbf16, #tpu.memory_space<vmem>>, %arg2: memref<1152x128xbf16, #tpu.memory_space<vmem>>, %arg3: memref<1x128xf32, #tpu.memory_space<vmem>>, %arg4: memref<128x128xf32, #tpu.memory_space<vmem>>) attributes {dimension_semantics = [#tpu.dimension_semantics<parallel>], iteration_bounds = array<i64: 4>, scalar_prefetch = 0 : i64, scratch_operands = 0 : i64, tpu.core_type = #tpu.core_type<tc>, window_params = [{transform_indices = @transform_0, window_bounds = array<i64: 128, 1152>}, {pipeline_mode = #tpu.pipeline_mode<synchronous>, transform_indices = @transform_1, window_bounds = array<i64: 1152, 128>}, {pipeline_mode = #tpu.pipeline_mode<synchronous>, transform_indices = @transform_2, window_bounds = array<i64: 1, 128>}, {transform_indices = @transform_3, window_bounds = array<i64: 128, 128>}]} {
    %c0 = arith.constant 0 : index
    %c0_0 = arith.constant 0 : index
    %0 = vector.load %arg1[%c0, %c0_0] : memref<128x1152xbf16, #tpu.memory_space<vmem>>, vector<128x1152xbf16>
    %c0_1 = arith.constant 0 : index
    %c0_2 = arith.constant 0 : index
    %1 = vector.load %arg2[%c0_1, %c0_2] : memref<1152x128xbf16, #tpu.memory_space<vmem>>, vector<1152x128xbf16>
    %cst = arith.constant dense<0.000000e+00> : vector<128x128xf32>
    %2 = tpu.matmul %0, %1, %cst {dimension_numbers = #tpu.dot_dimension_numbers<[1], [0], [0], [1], [0, 0, 1, 1], [], []>} : vector<128x1152xbf16>, vector<1152x128xbf16>, vector<128x128xf32> -> vector<128x128xf32>
    %c0_3 = arith.constant 0 : index
    %c0_4 = arith.constant 0 : index
    %3 = vector.load %arg3[%c0_3, %c0_4] : memref<1x128xf32, #tpu.memory_space<vmem>>, vector<1x128xf32>
    %4 = vector.broadcast %3 : vector<1x128xf32> to vector<128x128xf32>
    %5 = arith.addf %2, %4 : vector<128x128xf32>
    %c0_5 = arith.constant 0 : index
    %c0_6 = arith.constant 0 : index
    %6 = vector.load %arg4[%c0_5, %c0_6] : memref<128x128xf32, #tpu.memory_space<vmem>>, vector<128x128xf32>
    tpu.vector_store %arg4[%c0_5, %c0_6], %5 {strides = array<i32>} : memref<128x128xf32, #tpu.memory_space<vmem>>, vector<128x128xf32>,
    return
  }
  func.func @transform_0(%arg0: i32) -> (i32, i32) {
    %c0_i32 = arith.constant 0 : i32
    %c0_i32_0 = arith.constant 0 : i32
    return %arg0, %c0_i32 : i32, i32
  }
  func.func @transform_1(%arg0: i32) -> (i32, i32) {
    %c0_i32 = arith.constant 0 : i32
    %c0_i32_0 = arith.constant 0 : i32
    %c0_i32_1 = arith.constant 0 : i32
    return %c0_i32, %c0_i32_0 : i32, i32
  }
  func.func @transform_2(%arg0: i32) -> (i32, i32) {
    %c0_i32 = arith.constant 0 : i32
    %c0_i32_0 = arith.constant 0 : i32
    %c0_i32_1 = arith.constant 0 : i32
    return %c0_i32, %c0_i32_0 : i32, i32
  }
  func.func @transform_3(%arg0: i32) -> (i32, i32) {
    %c0_i32 = arith.constant 0 : i32
    %c0_i32_0 = arith.constant 0 : i32
    return %arg0, %c0_i32 : i32, i32
  }
}

</mosaic_0001>

<bundles_post_ra>
// kernel: gdn_net_forward.10
= control target key start
LH: loop header
LB: loop body
LE: loop exit
PB: predicated region body
PF: predicated region fallthrough
CT: control target
= control target key end

     0   :  { %s919_s18 = smov 0   ;;  %s1032_s0 = inlined_call_operand.vmem [shape: bf16[128,128], index: 0, kind: input, shape index: {}]   ;;  %s1033_s1 = inlined_call_operand.vmem [shape: bf16[128,128], index: 1, kind: input, shape index: {}]   ;;  %s1034_s2 = inlined_call_operand.vmem [shape: f32[1,128], index: 2, kind: input, shape index: {}]   ;;  %s1035_s3 = inlined_call_operand.vmem [shape: f32[128,128], index: 3, kind: input, shape index: {}]   ;;  %s1036_s4 = inlined_call_operand.vmem [shape: f32[1,128], index: 4, kind: input, shape index: {}]   ;;  %s1037_s5 = inlined_call_operand.vmem [shape: bf16[128,128], index: 5, kind: output, shape index: {}]  }
   0x1 LB: > { %s645_s19 = sadd.s32 4294967295, %s887_s18   ;;  %p649_p0 = scmp.ge.s32.totalorder %s887_s18, 1  ;;  %s887_s18 = sphi %s919_s18, %s15_s18  }
   0x2   : > { %p188_p1 = scmp.lt.s32.totalorder %s887_s18, 3 }
   0x4   : > { %p189_p2 = pnand %p649_p0, %p188_p1 }
   0x5   : > { %v853_v0 = vld [vmem:[%s1033_s1] sm:$0xff] (!%p189_p2)   ;;  %s650_s22 = sshll.u32 (!%p189_p2), %s645_s19, 3  ;;  %v854_v1 = vld [vmem:[%s1033_s1 + $0x8] sm:$0xff] (!%p189_p2)   ;;  %v855_v2 = vld [vmem:[%s1033_s1 + $0x10] sm:$0xff] (!%p189_p2)  }
   0x6   : > { %192 = sbr.rel (%p189_p2) target bundleno = 500 (0x1f4), region = 40  ;;  %p217_p3 = scmp.lt.s32.totalorder (!%p189_p2), %s650_s22, 15  ;;  %745 = vmatprep.subr.bf16.mxu0 (!%p189_p2), %v853_v0  ;;  %v856_v3 = vld [vmem:[%s1033_s1 + $0x18] sm:$0xff] (!%p189_p2)   ;;  %v857_v5 = vld [vmem:[%s1033_s1 + $0x20] sm:$0xff] (!%p189_p2)   ;;  %v398_v7 = vld [vmem:[%s1035_s3 + $0x8] sm:$0xff] (!%p189_p2) }
   0x7   : > { %746 = vmatpush3.bf16.msra.mxu0 (!%p189_p2), %v853_v0  ;;  %v397_v6 = vld [vmem:[%s1035_s3] sm:$0xff] (!%p189_p2)  ;;  %v399_v8 = vld [vmem:[%s1035_s3 + $0x10] sm:$0xff] (!%p189_p2)  ;;  %v400_v10 = vld [vmem:[%s1035_s3 + $0x18] sm:$0xff] (!%p189_p2) }
   0x8   : > { %747 = vmatprep.subr.bf16.mxu0 (!%p189_p2), %v854_v1  ;;  %v813_v9 = vpack.c.bf16 (!%p189_p2), %v398_v7, %v397_v6  ;;  %v817_v11 = vpack.c.bf16 (!%p189_p2), %v400_v10, %v399_v8  ;;  %v401_v12 = vld [vmem:[%s1035_s3 + $0x20] sm:$0xff] (!%p189_p2)  ;;  %v402_v13 = vld [vmem:[%s1035_s3 + $0x28] sm:$0xff] (!%p189_p2)  ;;  %v403_v16 = vld [vmem:[%s1035_s3 + $0x30] sm:$0xff] (!%p189_p2) }
   0x9   : > { %v858_v14 = vld [vmem:[%s1033_s1 + $0x28] sm:$0xff] (!%p189_p2)   ;;  %v821_v15 = vpack.c.bf16 (!%p189_p2), %v402_v13, %v401_v12  ;;  %v404_v17 = vld [vmem:[%s1035_s3 + $0x38] sm:$0xff] (!%p189_p2)  ;;  %v859_v18 = vld [vmem:[%s1033_s1 + $0x30] sm:$0xff] (!%p189_p2)  }
   0xa   : > { %814 = vmatprep.subr.bf16.mxu1 (!%p189_p2), %v813_v9  ;;  %v825_v19 = vpack.c.bf16 (!%p189_p2), %v404_v17, %v403_v16  ;;  %v405_v20 = vld [vmem:[%s1035_s3 + $0x40] sm:$0xff] (!%p189_p2)  ;;  %v406_v21 = vld [vmem:[%s1035_s3 + $0x48] sm:$0xff] (!%p189_p2)  ;;  %v860_v22 = vld [vmem:[%s1033_s1 + $0x38] sm:$0xff] (!%p189_p2)  }
   0xb   : > { %748 = vmatpush3.bf16.msra.mxu0 (!%p189_p2), %v854_v1  ;;  %816 = vmatpush3.bf16.msra.mxu1 (!%p189_p2), %v813_v9  ;;  %v829_v23 = vpack.c.bf16 (!%p189_p2), %v406_v21, %v405_v20  ;;  %v407_v24 = vld [vmem:[%s1035_s3 + $0x50] sm:$0xff] (!%p189_p2)  ;;  %v408_v25 = vld [vmem:[%s1035_s3 + $0x58] sm:$0xff] (!%p189_p2)  ;;  %v409_v30 = vld [vmem:[%s1035_s3 + $0x60] sm:$0xff] (!%p189_p2) }
   0xc   : > { %749 = vmatprep.subr.bf16.mxu0 (!%p189_p2), %v855_v2  ;;  %818 = vmatprep.subr.bf16.mxu1 (!%p189_p2), %v817_v11  ;;  %v833_v26 = vpack.c.bf16 (!%p189_p2), %v408_v25, %v407_v24  ;;  %v410_v31 = vld [vmem:[%s1035_s3 + $0x68] sm:$0xff] (!%p189_p2)  ;;  %v411_v33 = vld [vmem:[%s1035_s3 + $0x70] sm:$0xff] (!%p189_p2)  ;;  %v412_v34 = vld [vmem:[%s1035_s3 + $0x78] sm:$0xff] (!%p189_p2) }
   0xd   : > { %s1039_s22 = smov (!%p217_p3, %s650_s22), 15  ;;  %v837_v32 = vpack.c.bf16 %v410_v31, %v409_v30  ;;  %v841_v35 = vpack.c.bf16 %v412_v34, %v411_v33  ;;  %v654_v36 = vld [vmem:[%s1034_s2] ss:$0 sm:$0xff] }
   0xe   : > { %s651_s27 = sshll.u32 %s1039_s22, 2  ;;  %v667_v61 = vld [vmem:[%s1036_s4] ss:$0 sm:$0xff] }
   0xf   : > { %s944_s30 = scalar_lea.vmem %s1032_s0, %s651_s27  ;;  %750 = vmatpush3.bf16.msra.mxu0 %v855_v2  ;;  %820 = vmatpush3.bf16.msra.mxu1 %v817_v11  ;;  %s226_s11 = scalar_lea.vmem %s1037_s5, %s651_s27 }
  0x10   : > { %v861_v4 = vld [vmem:[%s944_s30] sm:$0xff]   ;;  %751 = vmatprep.subr.bf16.mxu0 %v856_v3  ;;  %822 = vmatprep.subr.bf16.mxu1 %v821_v15  ;;  %v862_v27 = vld [vmem:[%s944_s30 + $0x8] sm:$0xff]   ;;  %v863_v28 = vld [vmem:[%s944_s30 + $0x10] sm:$0xff]  }
  0x11   : > { %761 = vmatprep.mubr.bf16.mxu0 %v861_v4  ;;  %v864_v29 = vld [vmem:[%s944_s30 + $0x18] sm:$0xff]  }
  0x13   : > { %752 = vmatpush3.bf16.msra.mxu0 %v856_v3  ;;  %824 = vmatpush3.bf16.msra.mxu1 %v821_v15 }
  0x14   : > { %753 = vmatprep.subr.bf16.mxu0 %v857_v5  ;;  %826 = vmatprep.subr.bf16.mxu1 %v825_v19 }
  0x17   : > { %754 = vmatpush3.bf16.msra.mxu0 %v857_v5  ;;  %828 = vmatpush3.bf16.msra.mxu1 %v825_v19 }
  0x18   : > { %755 = vmatprep.subr.bf16.mxu0 %v858_v14  ;;  %830 = vmatprep.subr.bf16.mxu1 %v829_v23 }
  0x1b   : > { %756 = vmatpush3.bf16.msra.mxu0 %v858_v14  ;;  %832 = vmatpush3.bf16.msra.mxu1 %v829_v23 }
  0x1c   : > { %757 = vmatprep.subr.bf16.mxu0 %v859_v18  ;;  %834 = vmatprep.subr.bf16.mxu1 %v833_v26 }
  0x1f   : > { %758 = vmatpush3.bf16.msra.mxu0 %v859_v18  ;;  %836 = vmatpush3.bf16.msra.mxu1 %v833_v26 }
  0x20   : > { %759 = vmatprep.subr.bf16.mxu0 %v860_v22  ;;  %838 = vmatprep.subr.bf16.mxu1 %v837_v32 }
  0x23   : > { %760 = vmatpush3.bf16.msra.mxu0 %v860_v22  ;;  %840 = vmatpush3.bf16.msra.mxu1 %v837_v32 }
  0x24   : > { %842 = vmatprep.subr.bf16.mxu1 %v841_v35 }
  0x26   : > { %762 = vmatmul.mubr.bf16.vlgmr.msra.gmra.mrb[0].mxu0 %v862_v27 }
  0x27   : > { %765 = vmatprep.mubr.bf16.mxu0 %v863_v28  ;;  %844 = vmatpush3.bf16.msra.mxu1 %v841_v35 }
  0x2e   : > { %766 = vmatmul.mubr.bf16.gmra.mrb[4].mxu0 %v864_v29 }
  0xf9   : > { %v763_v37 = vpop.f32.mrb[0].mxu0 }
  0xfa   : > { %v366_v38 = vpop.f32.mrb[1].mxu0  ;;  %v1016_v41 = vadd.f32 %v763_v37, %v654_v36 }
  0xfb   : > { %v367_v39 = vadd.f32 %v654_v36, %v366_v38  ;;  %v764_v40 = vpop.f32.mrb[2].mxu0 }
  0xfc   : > { %v369_v42 = vpop.f32.mrb[3].mxu0  ;;  %v378_v45 = vadd.f32 %v764_v40, %v654_v36  ;;  %v416_v47 = vmul.f32 %v1016_v41, %v1016_v41 }
  0xfd   : > { %v370_v43 = vadd.f32 %v654_v36, %v369_v42  ;;  %v414_v44 = vmul.f32 %v367_v39, %v367_v39 }
  0xfe   : > { %v417_v50 = vmul.f32 %v378_v45, %v378_v45 }
  0xff   : > { %v415_v46 = vmul.f32 %v370_v43, %v370_v43  ;;  %801 = vmatprep.mubr.f32.mxu1 %v414_v44 }
 0x101   : > { %v767_v48 = vpop.f32.mrb[4].mxu0  ;;  %802 = vmatmul.mubr.f32.vlgmr.msra.gmra.mrb[0].mxu1 %v415_v46 }
 0x102   : > { %v382_v49 = vpop.f32.mrb[5].mxu0  ;;  %804 = vmatprep.mubr.f32.mxu1 %v416_v47  ;;  %v391_v53 = vadd.f32 %v767_v48, %v654_v36 }
 0x103   : > { %v383_v51 = vadd.f32 %v654_v36, %v382_v49  ;;  %v768_v52 = vpop.f32.mrb[6].mxu0 }
 0x104   : > { %v385_v54 = vpop.f32.mrb[7].mxu0  ;;  %v394_v57 = vadd.f32 %v768_v52, %v654_v36  ;;  %v420_v59 = vmul.f32 %v391_v53, %v391_v53 }
 0x105   : > { %v418_v55 = vmul.f32 %v383_v51, %v383_v51  ;;  %v386_v56 = vadd.f32 %v654_v36, %v385_v54  ;;  %805 = vmatmul.mubr.f32.gmra.mrb[2].mxu1 %v417_v50 }
 0x106   : > { %v421_v60 = vmul.f32 %v394_v57, %v394_v57 }
 0x107   : > { %v419_v58 = vmul.f32 %v386_v56, %v386_v56  ;;  %807 = vmatprep.mubr.f32.mxu1 %v418_v55 }
 0x109   : > { %808 = vmatmul.mubr.f32.gmra.mrb[4].mxu1 %v419_v58 }
 0x10a   : > { %810 = vmatprep.mubr.f32.mxu1 %v420_v59 }
 0x10d   : > { %811 = vmatmul.mubr.f32.gmra.mrb[6].mxu1 %v421_v60 }
 0x1d4   : > { %v803_v62 = vpop.f32.mrb[0].mxu1 }
 0x1d5   : > { %v500_v63 = vadd.f32 %v803_v62, %v667_v61  ;;  %v494_v0 = vpop.f32.mrb[1].mxu1 }
 0x1d6   : > { %v495_v1 = vadd.f32 %v667_v61, %v494_v0 }
 0x1d7   : > { %865 = vrsqrt.f32 %v500_v63 }
 0x1d8   : > { %867 = vrsqrt.f32 %v495_v1  ;;  %v806_v2 = vpop.f32.mrb[2].mxu1 }
 0x1d9   : > { %v510_v3 = vadd.f32 %v806_v2, %v667_v61  ;;  %v504_v4 = vpop.f32.mrb[3].mxu1 }
 0x1da   : > { %v505_v5 = vadd.f32 %v667_v61, %v504_v4 }
 0x1db   : > { %869 = vrsqrt.f32 %v510_v3 }
 0x1dc   : > { %871 = vrsqrt.f32 %v505_v5  ;;  %v809_v6 = vpop.f32.mrb[4].mxu1 }
 0x1dd   : > { %v520_v7 = vadd.f32 %v809_v6, %v667_v61  ;;  %v514_v8 = vpop.f32.mrb[5].mxu1 }
 0x1de   : > { %v515_v9 = vadd.f32 %v667_v61, %v514_v8 }
 0x1df   : > { %873 = vrsqrt.f32 %v520_v7 }
 0x1e0   : > { %875 = vrsqrt.f32 %v515_v9  ;;  %v812_v10 = vpop.f32.mrb[6].mxu1 }
 0x1e1   : > { %v866_v11 = vpop.eup %865  ;;  %v530_v12 = vadd.f32 %v812_v10, %v667_v61  ;;  %v524_v13 = vpop.f32.mrb[7].mxu1 }
 0x1e2   : > { %v868_v14 = vpop.eup %867  ;;  %v542_v15 = vmul.f32 %v866_v11, %v370_v43  ;;  %v525_v16 = vadd.f32 %v667_v61, %v524_v13 }
 0x1e3   : > { %v541_v17 = vmul.f32 %v868_v14, %v367_v39  ;;  %877 = vrsqrt.f32 %v530_v12 }
 0x1e4   : > { %879 = vrsqrt.f32 %v525_v16 }
 0x1e5   : > { %v870_v18 = vpop.eup %869  ;;  %v689_v19 = vpack.c.bf16 %v542_v15, %v541_v17 }
 0x1e6   : > { %v872_v20 = vpop.eup %871  ;;  %v544_v21 = vmul.f32 %v870_v18, %v378_v45 }
 0x1e7   : > { %690 = vst [vmem:[%s226_s11] sm:$0xff] %v689_v19   ;;  %v543_v22 = vmul.f32 %v872_v20, %v1016_v41 }
 0x1e9   : > { %v874_v23 = vpop.eup %873  ;;  %v694_v24 = vpack.c.bf16 %v544_v21, %v543_v22 }
 0x1ea   : > { %v876_v25 = vpop.eup %875  ;;  %v546_v26 = vmul.f32 %v874_v23, %v386_v56 }
 0x1eb   : > { %706 = vst [vmem:[%s226_s11 + $0x8] sm:$0xff] %v694_v24   ;;  %v545_v27 = vmul.f32 %v876_v25, %v383_v51 }
 0x1ed   : > { %v878_v28 = vpop.eup %877  ;;  %v699_v29 = vpack.c.bf16 %v546_v26, %v545_v27 }
 0x1ee   : > { %v880_v30 = vpop.eup %879  ;;  %v548_v31 = vmul.f32 %v878_v28, %v394_v57 }
 0x1ef   : > { %707 = vst [vmem:[%s226_s11 + $0x10] sm:$0xff] %v699_v29   ;;  %v547_v32 = vmul.f32 %v880_v30, %v391_v53 }
 0x1f1   : > { %v704_v33 = vpack.c.bf16 %v548_v31, %v547_v32 }
 0x1f3   : > { %708 = vst [vmem:[%s226_s11 + $0x18] sm:$0xff] %v704_v33  }
 0x1f4 PF: > { %s15_s18 = sadd.s32 1, %s887_s18  }
 0x1f5   : > { %p12_p4 = scmp.ge.s32.totalorder %s15_s18, 4  }
 0x1f7   :  { %14 = sbr.rel (!%p12_p4) target bundleno = 1 (0x1), region = 70 }

// kernel: gdn_net_forward.11
= control target key start
LH: loop header
LB: loop body
LE: loop exit
PB: predicated region body
PF: predicated region fallthrough
CT: control target
= control target key end

     0   :  { %s1914_s1 = inlined_call_operand.vmem [shape: bf16[1152,128], index: 1, kind: input, shape index: {}]   ;;  %s1915_s0 = inlined_call_operand.vmem [shape: bf16[32,1152], index: 0, kind: input, shape index: {}]   ;;  %s1916_s3 = inlined_call_operand.vmem [shape: f32[128,128], index: 3, kind: input, shape index: {}]   ;;  %s1917_s2 = inlined_call_operand.vmem [shape: f32[1,128], index: 2, kind: input, shape index: {}]   ;;  %s1918_s4 = inlined_call_operand.vmem [shape: f32[1,128], index: 4, kind: input, shape index: {}]   ;;  %s1919_s5 = inlined_call_operand.vmem [shape: bf16[32,128], index: 5, kind: output, shape index: {}]  }
   0x1   :  { %v1448_v0 = vld [vmem:[%s1914_s1 + $0x40] sm:$0xff]   ;;  %v1452_v4 = vld [vmem:[%s1914_s1 + $0x48] sm:$0xff]   ;;  %v1456_v8 = vld [vmem:[%s1914_s1 + $0x50] sm:$0xff]  }
   0x2   :  { %v1449_v1 = vld [vmem:[%s1914_s1] sm:$0xff]   ;;  %1216 = vmatprep.subr.bf16.mxu0 %v1448_v0  ;;  %v1453_v5 = vld [vmem:[%s1914_s1 + $0x8] sm:$0xff]   ;;  %v1457_v9 = vld [vmem:[%s1914_s1 + $0x10] sm:$0xff]  }
   0x3   :  { %v1450_v2 = vld [vmem:[%s1914_s1 + $0xc0] sm:$0xff]   ;;  %1217 = vmatpush3.bf16.msra.mxu0 %v1449_v1  ;;  %v1454_v6 = vld [vmem:[%s1914_s1 + $0xc8] sm:$0xff]   ;;  %v1458_v10 = vld [vmem:[%s1914_s1 + $0xd0] sm:$0xff]  }
   0x4   :  { %v1451_v3 = vld [vmem:[%s1914_s1 + $0x80] sm:$0xff]   ;;  %1244 = vmatprep.subr.bf16.mxu1 %v1450_v2  ;;  %1218 = vmatprep.subr.bf16.mxu0 %v1452_v4  ;;  %v1455_v7 = vld [vmem:[%s1914_s1 + $0x88] sm:$0xff]   ;;  %v1459_v11 = vld [vmem:[%s1914_s1 + $0x90] sm:$0xff]  }
   0x5   :  { %1245 = vmatpush3.bf16.msra.mxu1 %v1451_v3  ;;  %v1460_v12 = vld [vmem:[%s1914_s1 + $0x58] sm:$0xff]   ;;  %v1464_v16 = vld [vmem:[%s1914_s1 + $0x60] sm:$0xff]   ;;  %v1468_v20 = vld [vmem:[%s1914_s1 + $0x68] sm:$0xff]  }
   0x6   :  { %1246 = vmatprep.subr.bf16.mxu1 %v1454_v6  ;;  %v1461_v13 = vld [vmem:[%s1914_s1 + $0x18] sm:$0xff]   ;;  %v1465_v17 = vld [vmem:[%s1914_s1 + $0x20] sm:$0xff]   ;;  %v1469_v21 = vld [vmem:[%s1914_s1 + $0x28] sm:$0xff]  }
   0x7   :  { %1219 = vmatpush3.bf16.msra.mxu0 %v1453_v5  ;;  %v1462_v14 = vld [vmem:[%s1914_s1 + $0xd8] sm:$0xff]   ;;  %v1466_v18 = vld [vmem:[%s1914_s1 + $0xe0] sm:$0xff]   ;;  %v1470_v22 = vld [vmem:[%s1914_s1 + $0xe8] sm:$0xff]  }
   0x8   :  { %1220 = vmatprep.subr.bf16.mxu0 %v1456_v8  ;;  %v1463_v15 = vld [vmem:[%s1914_s1 + $0x98] sm:$0xff]   ;;  %v1467_v19 = vld [vmem:[%s1914_s1 + $0xa0] sm:$0xff]   ;;  %v1471_v23 = vld [vmem:[%s1914_s1 + $0xa8] sm:$0xff]  }
   0x9   :  { %1247 = vmatpush3.bf16.msra.mxu1 %v1455_v7  ;;  %v1472_v24 = vld [vmem:[%s1914_s1 + $0x70] sm:$0xff]   ;;  %v1476_v28 = vld [vmem:[%s1914_s1 + $0x78] sm:$0xff]   ;;  %v1479_v31 = vld [vmem:[%s1915_s0] ss:$36 sps:$4 sm:$0xff]  }
   0xa   :  { %1248 = vmatprep.subr.bf16.mxu1 %v1458_v10  ;;  %v1473_v25 = vld [vmem:[%s1914_s1 + $0x30] sm:$0xff]   ;;  %v1477_v29 = vld [vmem:[%s1914_s1 + $0x38] sm:$0xff]   ;;  %v1481_v32 = vld [vmem:[%s1915_s0 + $0x4] ss:$36 sps:$4 sm:$0xff]  }
   0xb   :  { %1221 = vmatpush3.bf16.msra.mxu0 %v1457_v9  ;;  %v1474_v26 = vld [vmem:[%s1914_s1 + $0xf0] sm:$0xff]   ;;  %v1478_v30 = vld [vmem:[%s1914_s1 + $0xf8] sm:$0xff]   ;;  %748 = vmatprep.mubr.bf16.mxu0 %v1481_v32  ;;  %v1483_v34 = vld [vmem:[%s1914_s1 + $0x140] sm:$0xff]  }
   0xc   :  { %1222 = vmatprep.subr.bf16.mxu0 %v1460_v12  ;;  %v1475_v27 = vld [vmem:[%s1914_s1 + $0xb0] sm:$0xff]   ;;  %v1482_v33 = vld [vmem:[%s1914_s1 + $0xb8] sm:$0xff]   ;;  %v1484_v35 = vld [vmem:[%s1915_s0 + $0x8] ss:$36 sps:$4 sm:$0xff]  }
   0xd   :  { %1249 = vmatpush3.bf16.msra.mxu1 %v1459_v11  ;;  %v1486_v36 = vld [vmem:[%s1915_s0 + $0xc] ss:$36 sps:$4 sm:$0xff]   ;;  %v1487_v37 = vld [vmem:[%s1914_s1 + $0x100] sm:$0xff]   ;;  %v1498_v48 = vld [vmem:[%s1914_s1 + $0x158] sm:$0xff]  }
   0xe   :  { %1250 = vmatprep.subr.bf16.mxu1 %v1462_v14  ;;  %797 = vmatprep.mubr.bf16.mxu1 %v1486_v36  ;;  %v1488_v38 = vld [vmem:[%s1914_s1 + $0x1c0] sm:$0xff]   ;;  %v1490_v40 = vld [vmem:[%s1914_s1 + $0x148] sm:$0xff]   ;;  %v1494_v44 = vld [vmem:[%s1914_s1 + $0x150] sm:$0xff]  }
   0xf   :  { %1223 = vmatpush3.bf16.msra.mxu0 %v1461_v13  ;;  %v1489_v39 = vld [vmem:[%s1914_s1 + $0x180] sm:$0xff]   ;;  %v1491_v41 = vld [vmem:[%s1914_s1 + $0x108] sm:$0xff]   ;;  %v1495_v45 = vld [vmem:[%s1914_s1 + $0x110] sm:$0xff]  }
  0x10   :  { %1224 = vmatprep.subr.bf16.mxu0 %v1464_v16  ;;  %v1492_v42 = vld [vmem:[%s1914_s1 + $0x1c8] sm:$0xff]   ;;  %v1496_v46 = vld [vmem:[%s1914_s1 + $0x1d0] sm:$0xff]   ;;  %v1499_v49 = vld [vmem:[%s1914_s1 + $0x118] sm:$0xff]  }
  0x11   :  { %1251 = vmatpush3.bf16.msra.mxu1 %v1463_v15  ;;  %v1493_v43 = vld [vmem:[%s1914_s1 + $0x188] sm:$0xff]   ;;  %v1497_v47 = vld [vmem:[%s1914_s1 + $0x190] sm:$0xff]   ;;  %v1500_v50 = vld [vmem:[%s1914_s1 + $0x1d8] sm:$0xff]  }
  0x12   :  { %1252 = vmatprep.subr.bf16.mxu1 %v1466_v18  ;;  %v1501_v51 = vld [vmem:[%s1914_s1 + $0x198] sm:$0xff]   ;;  %v1502_v52 = vld [vmem:[%s1914_s1 + $0x160] sm:$0xff]   ;;  %v1506_v56 = vld [vmem:[%s1914_s1 + $0x168] sm:$0xff]  }
  0x13   :  { %1225 = vmatpush3.bf16.msra.mxu0 %v1465_v17  ;;  %v1503_v53 = vld [vmem:[%s1914_s1 + $0x120] sm:$0xff]   ;;  %v1507_v57 = vld [vmem:[%s1915_s0 + $0x4c] ss:$36 sps:$4 sm:$0xff]   ;;  %v1512_v61 = vld [vmem:[%s1915_s0 + $0x54] ss:$36 sps:$4 sm:$0xff]  }
  0x14   :  { %1226 = vmatprep.subr.bf16.mxu0 %v1468_v20  ;;  %v1504_v54 = vld [vmem:[%s1914_s1 + $0x1e0] sm:$0xff]   ;;  %v1509_v58 = vld [vmem:[%s1914_s1 + $0x128] sm:$0xff]   ;;  %v1515_v63 = vld [vmem:[%s1915_s0 + $0x50] ss:$36 sps:$4 sm:$0xff]  }
  0x15   :  { %1253 = vmatpush3.bf16.msra.mxu1 %v1467_v19  ;;  %v1505_v55 = vld [vmem:[%s1914_s1 + $0x1a0] sm:$0xff]   ;;  %v1510_v59 = vld [vmem:[%s1915_s0 + $0x48] ss:$36 sps:$4 sm:$0xff]   ;;  %v1516_v0 = vld [vmem:[%s1914_s1 + $0x170] sm:$0xff]  }
  0x16   :  { %1254 = vmatprep.subr.bf16.mxu1 %v1470_v22  ;;  %v1511_v60 = vld [vmem:[%s1914_s1 + $0x1e8] sm:$0xff]   ;;  %v1517_v1 = vld [vmem:[%s1914_s1 + $0x130] sm:$0xff]   ;;  %v1520_v4 = vld [vmem:[%s1914_s1 + $0x178] sm:$0xff]  }
  0x17   :  { %1227 = vmatpush3.bf16.msra.mxu0 %v1469_v21  ;;  %v1514_v62 = vld [vmem:[%s1914_s1 + $0x1a8] sm:$0xff]   ;;  %v1518_v2 = vld [vmem:[%s1914_s1 + $0x1f0] sm:$0xff]   ;;  %v1521_v5 = vld [vmem:[%s1914_s1 + $0x138] sm:$0xff]  }
  0x18   :  { %1228 = vmatprep.subr.bf16.mxu0 %v1472_v24  ;;  %v1519_v3 = vld [vmem:[%s1914_s1 + $0x1b0] sm:$0xff]   ;;  %v1522_v6 = vld [vmem:[%s1914_s1 + $0x1f8] sm:$0xff]   ;;  %v1527_v10 = vld [vmem:[%s1914_s1 + $0x200] sm:$0xff]  }
  0x19   :  { %1255 = vmatpush3.bf16.msra.mxu1 %v1471_v23  ;;  %v1523_v7 = vld [vmem:[%s1915_s0 + $0x10] ss:$36 sps:$4 sm:$0xff]   ;;  %v1526_v9 = vld [vmem:[%s1914_s1 + $0x1b8] sm:$0xff]   ;;  %v1531_v13 = vld [vmem:[%s1914_s1 + $0x208] sm:$0xff]  }
  0x1a   :  { %1256 = vmatprep.subr.bf16.mxu1 %v1474_v26  ;;  %v1525_v8 = vld [vmem:[%s1915_s0 + $0x14] ss:$36 sps:$4 sm:$0xff]   ;;  %v1530_v12 = vld [vmem:[%s1915_s0 + $0x1c] ss:$36 sps:$4 sm:$0xff]   ;;  %v1536_v17 = vld [vmem:[%s1915_s0 + $0x64] ss:$36 sps:$4 sm:$0xff]  }
  0x1b   :  { %1229 = vmatpush3.bf16.msra.mxu0 %v1473_v25  ;;  %v1528_v11 = vld [vmem:[%s1915_s0 + $0x18] ss:$36 sps:$4 sm:$0xff]   ;;  %v1535_v16 = vld [vmem:[%s1914_s1 + $0x210] sm:$0xff]   ;;  %v1538_v18 = vld [vmem:[%s1915_s0 + $0x60] ss:$36 sps:$4 sm:$0xff]  }
  0x1c   :  { %1230 = vmatprep.subr.bf16.mxu0 %v1476_v28  ;;  %v1532_v14 = vld [vmem:[%s1915_s0 + $0x5c] ss:$36 sps:$4 sm:$0xff]   ;;  %v1541_v22 = vld [vmem:[%s1914_s1 + $0x228] sm:$0xff]   ;;  %v1542_v23 = vld [vmem:[%s1914_s1 + $0x230] sm:$0xff]  }
  0x1d   :  { %1257 = vmatpush3.bf16.msra.mxu1 %v1475_v27  ;;  %v1534_v15 = vld [vmem:[%s1915_s0 + $0x58] ss:$36 sps:$4 sm:$0xff]   ;;  %v1540_v20 = vld [vmem:[%s1914_s1 + $0x220] sm:$0xff]   ;;  %v1545_v25 = vld [vmem:[%s1915_s0 + $0x68] ss:$36 sps:$4 sm:$0xff]  }
  0x1e   :  { %1258 = vmatprep.subr.bf16.mxu1 %v1478_v30  ;;  %v1539_v19 = vld [vmem:[%s1914_s1 + $0x218] sm:$0xff]   ;;  %v1544_v21 = vld [vmem:[%s1915_s0 + $0x20] ss:$36 sps:$4 sm:$0xff]   ;;  %v962_v27 = vld [vmem:[%s1916_s3 + $0x8] sm:$0xff] }
  0x1f   :  { %1231 = vmatpush3.bf16.msra.mxu0 %v1477_v29  ;;  %v1543_v24 = vld [vmem:[%s1914_s1 + $0x238] sm:$0xff]   ;;  %v961_v26 = vld [vmem:[%s1916_s3] sm:$0xff]  ;;  %v963_v29 = vld [vmem:[%s1916_s3 + $0x10] sm:$0xff] }
  0x20   :  { %1272 = vmatprep.subr.bf16.mxu0 %v1483_v34  ;;  %v1416_v28 = vpack.c.bf16 %v962_v27, %v961_v26  ;;  %v964_v30 = vld [vmem:[%s1916_s3 + $0x18] sm:$0xff]  ;;  %v965_v32 = vld [vmem:[%s1916_s3 + $0x20] sm:$0xff] }
  0x21   :  { %1259 = vmatpush3.bf16.msra.mxu1 %v1482_v33  ;;  %v966_v33 = vld [vmem:[%s1916_s3 + $0x28] sm:$0xff]  ;;  %v968_v36 = vld [vmem:[%s1916_s3 + $0x38] sm:$0xff] }
  0x22   :  { %749 = vmatmul.mubr.bf16.vlgmr.msra.gmra.mrb[0].mxu0 %v1479_v31  ;;  %1300 = vmatprep.subr.bf16.mxu1 %v1488_v38  ;;  %v1420_v31 = vpack.c.bf16 %v964_v30, %v963_v29  ;;  %v1424_v34 = vpack.c.bf16 %v966_v33, %v965_v32  ;;  %v969_v38 = vld [vmem:[%s1916_s3 + $0x40] sm:$0xff] }
  0x23   :  { %1273 = vmatpush3.bf16.msra.mxu0 %v1487_v37  ;;  %756 = vmatprep.mubr.bf16.mxu0 %v1507_v57 }
  0x24   :  { %798 = vmatmul.mubr.bf16.vlgmr.msra.gmra.mrb[0].mxu1 %v1484_v35  ;;  %1274 = vmatprep.subr.bf16.mxu0 %v1490_v40  ;;  %v967_v35 = vld [vmem:[%s1916_s3 + $0x30] sm:$0xff] }
  0x25   :  { %1301 = vmatpush3.bf16.msra.mxu1 %v1489_v39  ;;  %805 = vmatprep.mubr.bf16.mxu1 %v1512_v61  ;;  %v1428_v37 = vpack.c.bf16 %v968_v36, %v967_v35  ;;  %v970_v39 = vld [vmem:[%s1916_s3 + $0x48] sm:$0xff] }
  0x26   :  { %1302 = vmatprep.subr.bf16.mxu1 %v1492_v42  ;;  %v1432_v40 = vpack.c.bf16 %v970_v39, %v969_v38  ;;  %v972_v42 = vld [vmem:[%s1916_s3 + $0x58] sm:$0xff] }
  0x27   :  { %1275 = vmatpush3.bf16.msra.mxu0 %v1491_v41  ;;  %v971_v41 = vld [vmem:[%s1916_s3 + $0x50] sm:$0xff] }
  0x28   :  { %1276 = vmatprep.subr.bf16.mxu0 %v1494_v44  ;;  %v973_v44 = vld [vmem:[%s1916_s3 + $0x60] sm:$0xff] }
  0x29   :  { %1303 = vmatpush3.bf16.msra.mxu1 %v1493_v43  ;;  %v1436_v43 = vpack.c.bf16 %v972_v42, %v971_v41 }
  0x2a   :  { %1304 = vmatprep.subr.bf16.mxu1 %v1496_v46  ;;  %757 = vmatmul.mubr.bf16.gmra.mrb[4].mxu0 %v1510_v59 }
  0x2b   :  { %1277 = vmatpush3.bf16.msra.mxu0 %v1495_v45  ;;  %846 = vmatprep.mubr.bf16.mxu0 %v1525_v8  ;;  %v974_v45 = vld [vmem:[%s1916_s3 + $0x68] sm:$0xff] }
  0x2c   :  { %1278 = vmatprep.subr.bf16.mxu0 %v1498_v48  ;;  %806 = vmatmul.mubr.bf16.gmra.mrb[4].mxu1 %v1515_v63  ;;  %v1440_v46 = vpack.c.bf16 %v974_v45, %v973_v44  ;;  %v976_v48 = vld [vmem:[%s1916_s3 + $0x78] sm:$0xff] }
  0x2d   :  { %1305 = vmatpush3.bf16.msra.mxu1 %v1497_v47  ;;  %895 = vmatprep.mubr.bf16.mxu1 %v1530_v12  ;;  %v975_v47 = vld [vmem:[%s1916_s3 + $0x70] sm:$0xff] }
  0x2e   :  { %1306 = vmatprep.subr.bf16.mxu1 %v1500_v50 }
  0x2f   :  { %1279 = vmatpush3.bf16.msra.mxu0 %v1499_v49  ;;  %v1444_v49 = vpack.c.bf16 %v976_v48, %v975_v47 }
  0x30   :  { %1280 = vmatprep.subr.bf16.mxu0 %v1502_v52 }
  0x31   :  { %1307 = vmatpush3.bf16.msra.mxu1 %v1501_v51  ;;  %v1105_v51 = vld [vmem:[%s1917_s2] ss:$0 sm:$0xff] }
  0x32   :  { %1308 = vmatprep.subr.bf16.mxu1 %v1504_v54 }
  0x33   :  { %1281 = vmatpush3.bf16.msra.mxu0 %v1503_v53 }
  0x34   :  { %1282 = vmatprep.subr.bf16.mxu0 %v1506_v56 }
  0x35   :  { %1309 = vmatpush3.bf16.msra.mxu1 %v1505_v55 }
  0x36   :  { %1310 = vmatprep.subr.bf16.mxu1 %v1511_v60 }
  0x37   :  { %1283 = vmatpush3.bf16.msra.mxu0 %v1509_v58 }
  0x38   :  { %1284 = vmatprep.subr.bf16.mxu0 %v1516_v0 }
  0x39   :  { %1311 = vmatpush3.bf16.msra.mxu1 %v1514_v62 }
  0x3a   :  { %1312 = vmatprep.subr.bf16.mxu1 %v1518_v2 }
  0x3b   :  { %1285 = vmatpush3.bf16.msra.mxu0 %v1517_v1 }
  0x3c   :  { %1286 = vmatprep.subr.bf16.mxu0 %v1520_v4 }
  0x3d   :  { %1313 = vmatpush3.bf16.msra.mxu1 %v1519_v3 }
  0x3e   :  { %1314 = vmatprep.subr.bf16.mxu1 %v1522_v6 }
  0x3f   :  { %1287 = vmatpush3.bf16.msra.mxu0 %v1521_v5 }
  0x40   :  { %1358 = vmatprep.subr.bf16.mxu0 %v1527_v10 }
  0x41   :  { %1315 = vmatpush3.bf16.msra.mxu1 %v1526_v9 }
  0x42   :  { %847 = vmatmul.mubr.bf16.vlgmr.msra.gmra.mrb[8].mxu0 %v1523_v7  ;;  %1417 = vmatprep.subr.bf16.mxu1 %v1416_v28 }
  0x43   :  { %1359 = vmatpush3.bf16.msra.mxu0 %v1527_v10  ;;  %854 = vmatprep.mubr.bf16.mxu0 %v1532_v14 }
  0x44   :  { %896 = vmatmul.mubr.bf16.vlgmr.msra.gmra.mrb[8].mxu1 %v1528_v11  ;;  %1360 = vmatprep.subr.bf16.mxu0 %v1531_v13 }
  0x45   :  { %903 = vmatprep.mubr.bf16.mxu1 %v1536_v17  ;;  %1419 = vmatpush3.bf16.msra.mxu1 %v1416_v28 }
  0x46   :  { %1421 = vmatprep.subr.bf16.mxu1 %v1420_v31 }
  0x47   :  { %1361 = vmatpush3.bf16.msra.mxu0 %v1531_v13 }
  0x48   :  { %1362 = vmatprep.subr.bf16.mxu0 %v1535_v16 }
  0x49   :  { %1423 = vmatpush3.bf16.msra.mxu1 %v1420_v31 }
  0x4a   :  { %855 = vmatmul.mubr.bf16.gmra.mrb[12].mxu0 %v1534_v15  ;;  %1425 = vmatprep.subr.bf16.mxu1 %v1424_v34 }
  0x4b   :  { %1363 = vmatpush3.bf16.msra.mxu0 %v1535_v16  ;;  %1374 = vmatprep.mubr.bf16.mxu0 %v1544_v21 }
  0x4c   :  { %904 = vmatmul.mubr.bf16.gmra.mrb[12].mxu1 %v1538_v18  ;;  %1364 = vmatprep.subr.bf16.mxu0 %v1539_v19 }
  0x4d   :  { %1427 = vmatpush3.bf16.msra.mxu1 %v1424_v34 }
  0x4e   :  { %1429 = vmatprep.subr.bf16.mxu1 %v1428_v37 }
  0x4f   :  { %1365 = vmatpush3.bf16.msra.mxu0 %v1539_v19 }
  0x50   :  { %1366 = vmatprep.subr.bf16.mxu0 %v1540_v20 }
  0x51   :  { %1431 = vmatpush3.bf16.msra.mxu1 %v1428_v37 }
  0x52   :  { %1433 = vmatprep.subr.bf16.mxu1 %v1432_v40 }
  0x53   :  { %1367 = vmatpush3.bf16.msra.mxu0 %v1540_v20 }
  0x54   :  { %1368 = vmatprep.subr.bf16.mxu0 %v1541_v22 }
  0x55   :  { %1435 = vmatpush3.bf16.msra.mxu1 %v1432_v40 }
  0x56   :  { %1437 = vmatprep.subr.bf16.mxu1 %v1436_v43 }
  0x57   :  { %1369 = vmatpush3.bf16.msra.mxu0 %v1541_v22 }
  0x58   :  { %1370 = vmatprep.subr.bf16.mxu0 %v1542_v23 }
  0x59   :  { %1439 = vmatpush3.bf16.msra.mxu1 %v1436_v43 }
  0x5a   :  { %1441 = vmatprep.subr.bf16.mxu1 %v1440_v46 }
  0x5b   :  { %1371 = vmatpush3.bf16.msra.mxu0 %v1542_v23 }
  0x5c   :  { %1372 = vmatprep.subr.bf16.mxu0 %v1543_v24 }
  0x5d   :  { %1443 = vmatpush3.bf16.msra.mxu1 %v1440_v46 }
  0x5e   :  { %1445 = vmatprep.subr.bf16.mxu1 %v1444_v49 }
  0x5f   :  { %1373 = vmatpush3.bf16.msra.mxu0 %v1543_v24 }
  0x61   :  { %1447 = vmatpush3.bf16.msra.mxu1 %v1444_v49 }
  0x62   :  { %1375 = vmatmul.mubr.bf16.vlgmr.msra.gmra.mrb[16].mxu0 %v1545_v25 }
  0xf5   :  { %v1232_v50 = vpop.f32.mrb[0].mxu0 }
  0xf6   :  { %v1233_v52 = vpop.f32.mrb[1].mxu0 }
  0xf7   :  { %v1234_v53 = vadd.f32 %v1233_v52, %v1232_v50  ;;  %v1235_v54 = vpop.f32.mrb[2].mxu0  ;;  %v1260_v55 = vpop.f32.mrb[0].mxu1 }
  0xf8   :  { %v1236_v56 = vpop.f32.mrb[3].mxu0  ;;  %v1261_v59 = vpop.f32.mrb[1].mxu1 }
  0xf9   :  { %v751_v57 = vadd.f32 %v1234_v53, %v1105_v51  ;;  %v1237_v58 = vadd.f32 %v1236_v56, %v1235_v54  ;;  %v1262_v60 = vadd.f32 %v1261_v59, %v1260_v55  ;;  %v1263_v61 = vpop.f32.mrb[2].mxu1 }
  0xfa   :  { %v1264_v63 = vpop.f32.mrb[3].mxu1 }
  0xfb   :  { %v754_v62 = vadd.f32 %v1237_v58, %v1105_v51  ;;  %v800_v0 = vadd.f32 %v1262_v60, %v751_v57  ;;  %v1265_v1 = vadd.f32 %v1264_v63, %v1263_v61  ;;  %v1196_v63 = vld [vmem:[%s1918_s4] ss:$0 sm:$0xff] }
  0xfd   :  { %v803_v2 = vadd.f32 %v1265_v1, %v754_v62  ;;  %v1238_v3 = vpop.f32.mrb[4].mxu0 }
  0xfe   :  { %v1239_v4 = vpop.f32.mrb[5].mxu0 }
  0xff   :  { %v1240_v5 = vadd.f32 %v1239_v4, %v1238_v3  ;;  %v1241_v6 = vpop.f32.mrb[6].mxu0  ;;  %v1266_v7 = vpop.f32.mrb[4].mxu1 }
 0x100   :  { %v1242_v8 = vpop.f32.mrb[7].mxu0  ;;  %v1267_v11 = vpop.f32.mrb[5].mxu1 }
 0x101   :  { %v759_v9 = vadd.f32 %v1240_v5, %v1105_v51  ;;  %v1243_v10 = vadd.f32 %v1242_v8, %v1241_v6  ;;  %v1268_v12 = vadd.f32 %v1267_v11, %v1266_v7  ;;  %v1269_v13 = vpop.f32.mrb[6].mxu1 }
 0x102   :  { %v1270_v15 = vpop.f32.mrb[7].mxu1 }
 0x103   :  { %v762_v14 = vadd.f32 %v1243_v10, %v1105_v51  ;;  %v808_v16 = vadd.f32 %v1268_v12, %v759_v9  ;;  %v1271_v17 = vadd.f32 %v1270_v15, %v1269_v13 }
 0x105   :  { %v811_v18 = vadd.f32 %v1271_v17, %v762_v14 }
 0x115   :  { %v1288_v19 = vpop.f32.mrb[8].mxu0 }
 0x116   :  { %v1289_v20 = vpop.f32.mrb[9].mxu0 }
 0x117   :  { %v1290_v21 = vadd.f32 %v1289_v20, %v1288_v19  ;;  %v1291_v22 = vpop.f32.mrb[10].mxu0  ;;  %v1316_v23 = vpop.f32.mrb[8].mxu1 }
 0x118   :  { %v1292_v24 = vpop.f32.mrb[11].mxu0  ;;  %v1317_v27 = vpop.f32.mrb[9].mxu1 }
 0x119   :  { %v849_v25 = vadd.f32 %v1290_v21, %v800_v0  ;;  %v1293_v26 = vadd.f32 %v1292_v24, %v1291_v22  ;;  %v1318_v28 = vadd.f32 %v1317_v27, %v1316_v23  ;;  %v1319_v29 = vpop.f32.mrb[10].mxu1 }
 0x11a   :  { %v1320_v31 = vpop.f32.mrb[11].mxu1 }
 0x11b   :  { %v852_v30 = vadd.f32 %v1293_v26, %v803_v2  ;;  %v1321_v32 = vadd.f32 %v1320_v31, %v1319_v29  ;;  %v898_v33 = vadd.f32 %v1318_v28, %v849_v25 }
 0x11d   :  { %v1294_v34 = vpop.f32.mrb[12].mxu0  ;;  %v901_v36 = vadd.f32 %v1321_v32, %v852_v30 }
 0x11e   :  { %v1295_v35 = vpop.f32.mrb[13].mxu0 }
 0x11f   :  { %v1296_v37 = vadd.f32 %v1295_v35, %v1294_v34  ;;  %v1297_v38 = vpop.f32.mrb[14].mxu0  ;;  %v1322_v39 = vpop.f32.mrb[12].mxu1 }
 0x120   :  { %v1298_v40 = vpop.f32.mrb[15].mxu0  ;;  %v1323_v43 = vpop.f32.mrb[13].mxu1 }
 0x121   :  { %v857_v41 = vadd.f32 %v1296_v37, %v808_v16  ;;  %v1299_v42 = vadd.f32 %v1298_v40, %v1297_v38  ;;  %v1324_v44 = vadd.f32 %v1323_v43, %v1322_v39  ;;  %v1325_v45 = vpop.f32.mrb[14].mxu1 }
 0x122   :  { %v1326_v47 = vpop.f32.mrb[15].mxu1 }
 0x123   :  { %v860_v46 = vadd.f32 %v1299_v42, %v811_v18  ;;  %v1327_v48 = vadd.f32 %v1326_v47, %v1325_v45  ;;  %v906_v49 = vadd.f32 %v1324_v44, %v857_v41 }
 0x125   :  { %v909_v50 = vadd.f32 %v1327_v48, %v860_v46 }
 0x135   :  { %v1376_v51 = vpop.f32.mrb[16].mxu0 }
 0x136   :  { %v955_v52 = vadd.f32 %v1376_v51, %v906_v49  ;;  %v946_v53 = vpop.f32.mrb[17].mxu0 }
 0x137   :  { %v947_v54 = vadd.f32 %v946_v53, %v898_v33  ;;  %v1377_v55 = vpop.f32.mrb[18].mxu0 }
 0x138   :  { %v958_v56 = vadd.f32 %v1377_v55, %v909_v50  ;;  %v949_v57 = vpop.f32.mrb[19].mxu0  ;;  %v980_v61 = vmul.f32 %v955_v52, %v955_v52 }
 0x139   :  { %v978_v58 = vmul.f32 %v947_v54, %v947_v54  ;;  %v950_v59 = vadd.f32 %v949_v57, %v901_v36 }
 0x13a   :  { %v981_v62 = vmul.f32 %v958_v56, %v958_v56 }
 0x13b   :  { %v979_v60 = vmul.f32 %v950_v59, %v950_v59  ;;  %1410 = vmatprep.mubr.f32.mxu1 %v978_v58 }
 0x13d   :  { %1411 = vmatmul.mubr.f32.vlgmr.msra.gmra.mrb[16].mxu1 %v979_v60 }
 0x13e   :  { %1413 = vmatprep.mubr.f32.mxu1 %v980_v61 }
 0x141   :  { %1414 = vmatmul.mubr.f32.gmra.mrb[18].mxu1 %v981_v62 }
 0x210   :  { %v1412_v0 = vpop.f32.mrb[16].mxu1 }
 0x211   :  { %v1060_v1 = vadd.f32 %v1412_v0, %v1196_v63  ;;  %v1054_v2 = vpop.f32.mrb[17].mxu1 }
 0x212   :  { %v1055_v3 = vadd.f32 %v1196_v63, %v1054_v2 }
 0x213   :  { %1546 = vrsqrt.f32 %v1060_v1 }
 0x214   :  { %1548 = vrsqrt.f32 %v1055_v3  ;;  %v1415_v4 = vpop.f32.mrb[18].mxu1 }
 0x215   :  { %v1070_v5 = vadd.f32 %v1415_v4, %v1196_v63  ;;  %v1064_v6 = vpop.f32.mrb[19].mxu1 }
 0x216   :  { %v1065_v7 = vadd.f32 %v1196_v63, %v1064_v6 }
 0x217   :  { %1550 = vrsqrt.f32 %v1070_v5 }
 0x218   :  { %1552 = vrsqrt.f32 %v1065_v7 }
 0x21d   :  { %v1547_v8 = vpop.eup %1546 }
 0x21e   :  { %v1549_v9 = vpop.eup %1548  ;;  %v1078_v10 = vmul.f32 %v1547_v8, %v950_v59 }
 0x21f   :  { %v1077_v11 = vmul.f32 %v1549_v9, %v947_v54 }
 0x221   :  { %v1551_v12 = vpop.eup %1550  ;;  %v1208_v13 = vpack.c.bf16 %v1078_v10, %v1077_v11 }
 0x222   :  { %v1553_v14 = vpop.eup %1552  ;;  %v1080_v15 = vmul.f32 %v1551_v12, %v958_v56 }
 0x223   :  { %1209 = vst [vmem:[%s1919_s5] sm:$0xff] %v1208_v13   ;;  %v1079_v16 = vmul.f32 %v1553_v14, %v955_v52 }
 0x225   :  { %v1213_v17 = vpack.c.bf16 %v1080_v15, %v1079_v16 }
 0x227   :  { %1215 = vst [vmem:[%s1919_s5 + $0x8] sm:$0xff] %v1213_v17  }

// kernel: gdn_net_forward.12
= control target key start
LH: loop header
LB: loop body
LE: loop exit
PB: predicated region body
PF: predicated region fallthrough
CT: control target
= control target key end

     0   :  { %vm1306_vm0 = vmmov 0   ;;  %s1626_s1 = inlined_call_operand.vmem [shape: bf16[1152,128], index: 1, kind: input, shape index: {}]   ;;  %s1627_s0 = inlined_call_operand.vmem [shape: bf16[8,1152], index: 0, kind: input, shape index: {}]   ;;  %s1628_s3 = inlined_call_operand.vmem [shape: f32[128,128], index: 3, kind: input, shape index: {}]   ;;  %s1629_s2 = inlined_call_operand.vmem [shape: f32[1,128], index: 2, kind: input, shape index: {}]   ;;  %s1630_s4 = inlined_call_operand.vmem [shape: f32[1,128], index: 4, kind: input, shape index: {}]   ;;  %s1631_s5 = inlined_call_operand.vmem [shape: bf16[8,128], index: 5, kind: output, shape index: {}]  }
   0x1   :  { %v1222_v0 = vld [vmem:[%s1626_s1 + $0x40] sm:$0xff]   ;;  %v1226_v4 = vld [vmem:[%s1626_s1 + $0x48] sm:$0xff]   ;;  %v1230_v8 = vld [vmem:[%s1626_s1 + $0x50] sm:$0xff]  }
   0x2   :  { %v1223_v1 = vld [vmem:[%s1626_s1] sm:$0xff]   ;;  %1026 = vmatprep.subr.bf16.mxu0 %v1222_v0  ;;  %v1227_v5 = vld [vmem:[%s1626_s1 + $0x8] sm:$0xff]   ;;  %v1231_v9 = vld [vmem:[%s1626_s1 + $0x10] sm:$0xff]  }
   0x3   :  { %v1224_v2 = vld [vmem:[%s1626_s1 + $0xc0] sm:$0xff]   ;;  %1027 = vmatpush3.bf16.msra.mxu0 %v1223_v1  ;;  %v1228_v6 = vld [vmem:[%s1626_s1 + $0xc8] sm:$0xff]   ;;  %v1232_v10 = vld [vmem:[%s1626_s1 + $0xd0] sm:$0xff]  }
   0x4   :  { %v1225_v3 = vld [vmem:[%s1626_s1 + $0x80] sm:$0xff]   ;;  %1048 = vmatprep.subr.bf16.mxu1 %v1224_v2  ;;  %1028 = vmatprep.subr.bf16.mxu0 %v1226_v4  ;;  %v1229_v7 = vld [vmem:[%s1626_s1 + $0x88] sm:$0xff]   ;;  %v1233_v11 = vld [vmem:[%s1626_s1 + $0x90] sm:$0xff]  }
   0x5   :  { %1049 = vmatpush3.bf16.msra.mxu1 %v1225_v3  ;;  %v1234_v12 = vld [vmem:[%s1626_s1 + $0x58] sm:$0xff]   ;;  %v1238_v16 = vld [vmem:[%s1626_s1 + $0x60] sm:$0xff]   ;;  %v1242_v20 = vld [vmem:[%s1626_s1 + $0x68] sm:$0xff]  }
   0x6   :  { %1050 = vmatprep.subr.bf16.mxu1 %v1228_v6  ;;  %v1235_v13 = vld [vmem:[%s1626_s1 + $0x18] sm:$0xff]   ;;  %v1239_v17 = vld [vmem:[%s1626_s1 + $0x20] sm:$0xff]   ;;  %v1243_v21 = vld [vmem:[%s1626_s1 + $0x28] sm:$0xff]  }
   0x7   :  { %1029 = vmatpush3.bf16.msra.mxu0 %v1227_v5  ;;  %v1236_v14 = vld [vmem:[%s1626_s1 + $0xd8] sm:$0xff]   ;;  %v1240_v18 = vld [vmem:[%s1626_s1 + $0xe0] sm:$0xff]   ;;  %v1244_v22 = vld [vmem:[%s1626_s1 + $0xe8] sm:$0xff]  }
   0x8   :  { %1030 = vmatprep.subr.bf16.mxu0 %v1230_v8  ;;  %v1237_v15 = vld [vmem:[%s1626_s1 + $0x98] sm:$0xff]   ;;  %v1241_v19 = vld [vmem:[%s1626_s1 + $0xa0] sm:$0xff]   ;;  %v1245_v23 = vld [vmem:[%s1626_s1 + $0xa8] sm:$0xff]  }
   0x9   :  { %1051 = vmatpush3.bf16.msra.mxu1 %v1229_v7  ;;  %v1246_v24 = vld [vmem:[%s1626_s1 + $0x70] sm:$0xff]   ;;  %v1250_v28 = vld [vmem:[%s1626_s1 + $0x78] sm:$0xff]   ;;  %v21_v31 = vld [vmem:[%s1627_s0] sm:$0xff] }
   0xa   :  { %1052 = vmatprep.subr.bf16.mxu1 %v1232_v10  ;;  %v1247_v25 = vld [vmem:[%s1626_s1 + $0x30] sm:$0xff]   ;;  %v1251_v29 = vld [vmem:[%s1626_s1 + $0x38] sm:$0xff]   ;;  %v944_v32 = vcombine.low %v21_v31, %v21_v31  ;;  %v945_v33 = vcombine.high %v21_v31, %v21_v31  ;;  %v1256_v35 = vld [vmem:[%s1626_s1 + $0x140] sm:$0xff]  }
   0xb   :  { %1031 = vmatpush3.bf16.msra.mxu0 %v1231_v9  ;;  %v1248_v26 = vld [vmem:[%s1626_s1 + $0xf0] sm:$0xff]   ;;  %v1252_v30 = vld [vmem:[%s1626_s1 + $0xf8] sm:$0xff]   ;;  %v22_v36 = vld [vmem:[%s1627_s0 + $0x8] sm:$0xff]  ;;  %v1305_v9 = vmov 0.0  }
   0xc   :  { %1032 = vmatprep.subr.bf16.mxu0 %v1234_v12  ;;  %v1249_v27 = vld [vmem:[%s1626_s1 + $0xb0] sm:$0xff]   ;;  %v1255_v34 = vld [vmem:[%s1626_s1 + $0xb8] sm:$0xff]   ;;  %673 = vmatprep.mubr.bf16.mxu0 %v945_v33  ;;  %v946_v37 = vcombine.low %v22_v36, %v22_v36  ;;  %v947_v38 = vcombine.high %v22_v36, %v22_v36  ;;  %v1259_v39 = vld [vmem:[%s1626_s1 + $0x100] sm:$0xff]  }
   0xd   :  { %1053 = vmatpush3.bf16.msra.mxu1 %v1233_v11  ;;  %v1260_v40 = vld [vmem:[%s1626_s1 + $0x1c0] sm:$0xff]   ;;  %v1262_v42 = vld [vmem:[%s1626_s1 + $0x148] sm:$0xff]   ;;  %v1266_v46 = vld [vmem:[%s1626_s1 + $0x150] sm:$0xff]  }
   0xe   :  { %1054 = vmatprep.subr.bf16.mxu1 %v1236_v14  ;;  %713 = vmatprep.mubr.bf16.mxu1 %v947_v38  ;;  %v1261_v41 = vld [vmem:[%s1626_s1 + $0x180] sm:$0xff]   ;;  %v1263_v43 = vld [vmem:[%s1626_s1 + $0x108] sm:$0xff]   ;;  %v1267_v47 = vld [vmem:[%s1626_s1 + $0x110] sm:$0xff]  }
   0xf   :  { %1033 = vmatpush3.bf16.msra.mxu0 %v1235_v13  ;;  %v1264_v44 = vld [vmem:[%s1626_s1 + $0x1c8] sm:$0xff]   ;;  %v1268_v48 = vld [vmem:[%s1626_s1 + $0x1d0] sm:$0xff]   ;;  %v1270_v50 = vld [vmem:[%s1626_s1 + $0x158] sm:$0xff]  }
  0x10   :  { %1034 = vmatprep.subr.bf16.mxu0 %v1238_v16  ;;  %v1265_v45 = vld [vmem:[%s1626_s1 + $0x188] sm:$0xff]   ;;  %v1269_v49 = vld [vmem:[%s1626_s1 + $0x190] sm:$0xff]   ;;  %v1271_v51 = vld [vmem:[%s1626_s1 + $0x118] sm:$0xff]  }
  0x11   :  { %1055 = vmatpush3.bf16.msra.mxu1 %v1237_v15  ;;  %v1272_v52 = vld [vmem:[%s1626_s1 + $0x1d8] sm:$0xff]   ;;  %v1274_v54 = vld [vmem:[%s1626_s1 + $0x160] sm:$0xff]   ;;  %v1278_v58 = vld [vmem:[%s1626_s1 + $0x168] sm:$0xff]  }
  0x12   :  { %1056 = vmatprep.subr.bf16.mxu1 %v1240_v18  ;;  %v1273_v53 = vld [vmem:[%s1626_s1 + $0x198] sm:$0xff]   ;;  %v1275_v55 = vld [vmem:[%s1626_s1 + $0x120] sm:$0xff]   ;;  %v1279_v59 = vld [vmem:[%s1626_s1 + $0x128] sm:$0xff]  }
  0x13   :  { %1035 = vmatpush3.bf16.msra.mxu0 %v1239_v17  ;;  %v1276_v56 = vld [vmem:[%s1626_s1 + $0x1e0] sm:$0xff]   ;;  %v1280_v60 = vld [vmem:[%s1626_s1 + $0x1e8] sm:$0xff]   ;;  %v1282_v62 = vld [vmem:[%s1626_s1 + $0x170] sm:$0xff]  }
  0x14   :  { %1036 = vmatprep.subr.bf16.mxu0 %v1242_v20  ;;  %v1277_v57 = vld [vmem:[%s1626_s1 + $0x1a0] sm:$0xff]   ;;  %v1281_v61 = vld [vmem:[%s1626_s1 + $0x1a8] sm:$0xff]   ;;  %v1283_v63 = vld [vmem:[%s1626_s1 + $0x130] sm:$0xff]  }
  0x15   :  { %1057 = vmatpush3.bf16.msra.mxu1 %v1241_v19  ;;  %v1284_v0 = vld [vmem:[%s1626_s1 + $0x1f0] sm:$0xff]   ;;  %v1286_v2 = vld [vmem:[%s1626_s1 + $0x178] sm:$0xff]   ;;  %v1294_v13 = vld [vmem:[%s1626_s1 + $0x200] sm:$0xff]  }
  0x16   :  { %1058 = vmatprep.subr.bf16.mxu1 %v1244_v22  ;;  %v1285_v1 = vld [vmem:[%s1626_s1 + $0x1b0] sm:$0xff]   ;;  %v1287_v3 = vld [vmem:[%s1626_s1 + $0x138] sm:$0xff]   ;;  %v1295_v14 = vld [vmem:[%s1626_s1 + $0x208] sm:$0xff]  }
  0x17   :  { %1037 = vmatpush3.bf16.msra.mxu0 %v1243_v21  ;;  %v1288_v4 = vld [vmem:[%s1626_s1 + $0x1f8] sm:$0xff]   ;;  %v23_v5 = vld [vmem:[%s1627_s0 + $0x10] sm:$0xff]  ;;  %v1298_v17 = vld [vmem:[%s1626_s1 + $0x220] sm:$0xff]  }
  0x18   :  { %1038 = vmatprep.subr.bf16.mxu0 %v1246_v24  ;;  %v948_v6 = vcombine.low %v23_v5, %v23_v5  ;;  %v949_v7 = vcombine.high %v23_v5, %v23_v5  ;;  %v1291_v8 = vld [vmem:[%s1626_s1 + $0x1b8] sm:$0xff]   ;;  %v1296_v15 = vld [vmem:[%s1626_s1 + $0x210] sm:$0xff]   ;;  %v1299_v18 = vld [vmem:[%s1626_s1 + $0x228] sm:$0xff]  }
  0x19   :  { %1059 = vmatpush3.bf16.msra.mxu1 %v1245_v23  ;;  %v24_v10 = vld [vmem:[%s1627_s0 + $0x18] sm:$0xff]  ;;  %v1300_v19 = vld [vmem:[%s1626_s1 + $0x230] sm:$0xff]   ;;  %v1302_v21 = vld [vmem:[%s1627_s0 + $0x20] ss:$0 sps:$4 sm:$0xff]  }
  0x1a   :  { %1060 = vmatprep.subr.bf16.mxu1 %v1248_v26  ;;  %v950_v11 = vcombine.low %v24_v10, %v24_v10  ;;  %v951_v12 = vcombine.high %v24_v10, %v24_v10  ;;  %v1297_v16 = vld [vmem:[%s1626_s1 + $0x218] sm:$0xff]   ;;  %v841_v22 = vld [vmem:[%s1628_s3] sm:$0xff]  ;;  %v842_v23 = vld [vmem:[%s1628_s3 + $0x8] sm:$0xff] }
  0x1b   :  { %1039 = vmatpush3.bf16.msra.mxu0 %v1247_v25  ;;  %v1301_v20 = vld [vmem:[%s1626_s1 + $0x238] sm:$0xff]   ;;  %v1196_v24 = vpack.c.bf16 %v842_v23, %v841_v22  ;;  %v843_v25 = vld [vmem:[%s1628_s3 + $0x10] sm:$0xff]  ;;  %v850_v36 = vld [vmem:[%s1628_s3 + $0x48] sm:$0xff] }
  0x1c   :  { %1040 = vmatprep.subr.bf16.mxu0 %v1250_v28  ;;  %v844_v26 = vld [vmem:[%s1628_s3 + $0x18] sm:$0xff]  ;;  %v851_v38 = vld [vmem:[%s1628_s3 + $0x50] sm:$0xff] }
  0x1d   :  { %1061 = vmatpush3.bf16.msra.mxu1 %v1249_v27  ;;  %v1307_v27 = vmov 0.0|0.0   ;;  %v1199_v28 = vpack.c.bf16 %v844_v26, %v843_v25  ;;  %v848_v33 = vld [vmem:[%s1628_s3 + $0x38] sm:$0xff] }
  0x1e   :  { %1062 = vmatprep.subr.bf16.mxu1 %v1252_v30  ;;  %v846_v30 = vld [vmem:[%s1628_s3 + $0x28] sm:$0xff] }
  0x1f   :  { %1041 = vmatpush3.bf16.msra.mxu0 %v1251_v29  ;;  %v845_v29 = vld [vmem:[%s1628_s3 + $0x20] sm:$0xff] }
  0x20   :  { %1070 = vmatprep.subr.bf16.mxu0 %v1256_v35  ;;  %v1202_v31 = vpack.c.bf16 %v846_v30, %v845_v29  ;;  %v849_v35 = vld [vmem:[%s1628_s3 + $0x40] sm:$0xff] }
  0x21   :  { %1063 = vmatpush3.bf16.msra.mxu1 %v1255_v34 }
  0x22   :  { %674 = vmatmul.mubr.bf16.vlgmr.msra.gmra.mrb[0].mxu0 %v944_v32  ;;  %1092 = vmatprep.subr.bf16.mxu1 %v1260_v40  ;;  %v847_v32 = vld [vmem:[%s1628_s3 + $0x30] sm:$0xff] }
  0x23   :  { %1071 = vmatpush3.bf16.msra.mxu0 %v1259_v39  ;;  %753 = vmatprep.mubr.bf16.mxu0 %v949_v7  ;;  %v1205_v34 = vpack.c.bf16 %v848_v33, %v847_v32  ;;  %v852_v39 = vld [vmem:[%s1628_s3 + $0x58] sm:$0xff] }
  0x24   :  { %714 = vmatmul.mubr.bf16.vlgmr.msra.gmra.mrb[0].mxu1 %v946_v37  ;;  %1072 = vmatprep.subr.bf16.mxu0 %v1262_v42  ;;  %v1208_v37 = vpack.c.bf16 %v850_v36, %v849_v35  ;;  %v1211_v40 = vpack.c.bf16 %v852_v39, %v851_v38  ;;  %v854_v42 = vld [vmem:[%s1628_s3 + $0x68] sm:$0xff] }
  0x25   :  { %1093 = vmatpush3.bf16.msra.mxu1 %v1261_v41  ;;  %793 = vmatprep.mubr.bf16.mxu1 %v951_v12  ;;  %v853_v41 = vld [vmem:[%s1628_s3 + $0x60] sm:$0xff] }
  0x26   :  { %1094 = vmatprep.subr.bf16.mxu1 %v1264_v44  ;;  %v855_v44 = vld [vmem:[%s1628_s3 + $0x70] sm:$0xff] }
  0x27   :  { %1073 = vmatpush3.bf16.msra.mxu0 %v1263_v43  ;;  %v1214_v43 = vpack.c.bf16 %v854_v42, %v853_v41 }
  0x28   :  { %1074 = vmatprep.subr.bf16.mxu0 %v1266_v46 }
  0x29   :  { %1095 = vmatpush3.bf16.msra.mxu1 %v1265_v45  ;;  %v856_v45 = vld [vmem:[%s1628_s3 + $0x78] sm:$0xff] }
  0x2a   :  { %1096 = vmatprep.subr.bf16.mxu1 %v1268_v48  ;;  %v1217_v46 = vpack.c.bf16 %v856_v45, %v855_v44  ;;  %v943_v48 = vld [vmem:[%s1629_s2] ss:$0 sm:$0xff] }
  0x2b   :  { %1075 = vmatpush3.bf16.msra.mxu0 %v1267_v47 }
  0x2c   :  { %1076 = vmatprep.subr.bf16.mxu0 %v1270_v50 }
  0x2d   :  { %1097 = vmatpush3.bf16.msra.mxu1 %v1269_v49 }
  0x2e   :  { %1098 = vmatprep.subr.bf16.mxu1 %v1272_v52 }
  0x2f   :  { %1077 = vmatpush3.bf16.msra.mxu0 %v1271_v51 }
  0x30   :  { %1078 = vmatprep.subr.bf16.mxu0 %v1274_v54 }
  0x31   :  { %1099 = vmatpush3.bf16.msra.mxu1 %v1273_v53 }
  0x32   :  { %1100 = vmatprep.subr.bf16.mxu1 %v1276_v56 }
  0x33   :  { %1079 = vmatpush3.bf16.msra.mxu0 %v1275_v55 }
  0x34   :  { %1080 = vmatprep.subr.bf16.mxu0 %v1278_v58 }
  0x35   :  { %1101 = vmatpush3.bf16.msra.mxu1 %v1277_v57 }
  0x36   :  { %1102 = vmatprep.subr.bf16.mxu1 %v1280_v60 }
  0x37   :  { %1081 = vmatpush3.bf16.msra.mxu0 %v1279_v59 }
  0x38   :  { %1082 = vmatprep.subr.bf16.mxu0 %v1282_v62 }
  0x39   :  { %1103 = vmatpush3.bf16.msra.mxu1 %v1281_v61 }
  0x3a   :  { %1104 = vmatprep.subr.bf16.mxu1 %v1284_v0 }
  0x3b   :  { %1083 = vmatpush3.bf16.msra.mxu0 %v1283_v63 }
  0x3c   :  { %1084 = vmatprep.subr.bf16.mxu0 %v1286_v2 }
  0x3d   :  { %1105 = vmatpush3.bf16.msra.mxu1 %v1285_v1 }
  0x3e   :  { %1106 = vmatprep.subr.bf16.mxu1 %v1288_v4 }
  0x3f   :  { %1085 = vmatpush3.bf16.msra.mxu0 %v1287_v3 }
  0x40   :  { %1140 = vmatprep.subr.bf16.mxu0 %v1305_v9 }
  0x41   :  { %1107 = vmatpush3.bf16.msra.mxu1 %v1291_v8 }
  0x42   :  { %754 = vmatmul.mubr.bf16.vlgmr.msra.gmra.mrb[4].mxu0 %v948_v6  ;;  %1195 = vmatprep.subr.bf16.mxu1 %v1307_v27 }
  0x43   :  { %1141 = vmatpush3.bf16.msra.mxu0 %v1294_v13  ;;  %1156 = vmatprep.mubr.msk.bf16.mxu0 %vm1306_vm0, %v1305_v9 }
  0x44   :  { %794 = vmatmul.mubr.bf16.vlgmr.msra.gmra.mrb[4].mxu1 %v950_v11  ;;  %1142 = vmatprep.subr.bf16.mxu0 %v1305_v9 }
  0x45   :  { %1192 = vmatprep.mubr.msk.f32.mxu1 %vm1306_vm0, %v1305_v9  ;;  %1197 = vmatpush3.bf16.msra.mxu1 %v1196_v24 }
  0x46   :  { %1198 = vmatprep.subr.bf16.mxu1 %v1307_v27 }
  0x47   :  { %1143 = vmatpush3.bf16.msra.mxu0 %v1295_v14  ;;  %v1025_v14 = vld [vmem:[%s1630_s4] ss:$0 sm:$0xff] }
  0x48   :  { %1144 = vmatprep.subr.bf16.mxu0 %v1305_v9 }
  0x49   :  { %1200 = vmatpush3.bf16.msra.mxu1 %v1199_v28 }
  0x4a   :  { %1201 = vmatprep.subr.bf16.mxu1 %v1307_v27 }
  0x4b   :  { %1145 = vmatpush3.bf16.msra.mxu0 %v1296_v15 }
  0x4c   :  { %1146 = vmatprep.subr.bf16.mxu0 %v1305_v9 }
  0x4d   :  { %1203 = vmatpush3.bf16.msra.mxu1 %v1202_v31 }
  0x4e   :  { %1204 = vmatprep.subr.bf16.mxu1 %v1307_v27 }
  0x4f   :  { %1147 = vmatpush3.bf16.msra.mxu0 %v1297_v16 }
  0x50   :  { %1148 = vmatprep.subr.bf16.mxu0 %v1305_v9 }
  0x51   :  { %1206 = vmatpush3.bf16.msra.mxu1 %v1205_v34 }
  0x52   :  { %1207 = vmatprep.subr.bf16.mxu1 %v1307_v27 }
  0x53   :  { %1149 = vmatpush3.bf16.msra.mxu0 %v1298_v17 }
  0x54   :  { %1150 = vmatprep.subr.bf16.mxu0 %v1305_v9 }
  0x55   :  { %1209 = vmatpush3.bf16.msra.mxu1 %v1208_v37 }
  0x56   :  { %1210 = vmatprep.subr.bf16.mxu1 %v1307_v27 }
  0x57   :  { %1151 = vmatpush3.bf16.msra.mxu0 %v1299_v18 }
  0x58   :  { %1152 = vmatprep.subr.bf16.mxu0 %v1305_v9 }
  0x59   :  { %1212 = vmatpush3.bf16.msra.mxu1 %v1211_v40 }
  0x5a   :  { %1213 = vmatprep.subr.bf16.mxu1 %v1307_v27 }
  0x5b   :  { %1153 = vmatpush3.bf16.msra.mxu0 %v1300_v19 }
  0x5c   :  { %1154 = vmatprep.subr.bf16.mxu0 %v1305_v9 }
  0x5d   :  { %1215 = vmatpush3.bf16.msra.mxu1 %v1214_v43 }
  0x5e   :  { %1216 = vmatprep.subr.bf16.mxu1 %v1307_v27 }
  0x5f   :  { %1155 = vmatpush3.bf16.msra.mxu0 %v1301_v20 }
  0x61   :  { %1218 = vmatpush3.bf16.msra.mxu1 %v1217_v46 }
  0x62   :  { %1157 = vmatmul.mubr.bf16.vlgmr.msra.gmra.mrb[8].mxu0 %v1302_v21 }
  0xf5   :  { %v1042_v47 = vpop.f32.mrb[0].mxu0 }
  0xf6   :  { %v1043_v49 = vpop.f32.mrb[1].mxu0 }
  0xf7   :  { %v1044_v50 = vadd.f32 %v1043_v49, %v1042_v47  ;;  %v1045_v51 = vpop.f32.mrb[2].mxu0  ;;  %v1064_v52 = vpop.f32.mrb[0].mxu1 }
  0xf8   :  { %v1046_v53 = vpop.f32.mrb[3].mxu0  ;;  %v1065_v54 = vpop.f32.mrb[1].mxu1 }
  0xf9   :  { %v676_v55 = vadd.f32 %v1044_v50, %v943_v48  ;;  %v1066_v56 = vadd.f32 %v1065_v54, %v1064_v52  ;;  %v1067_v57 = vpop.f32.mrb[2].mxu1 }
  0xfa   :  { %v1068_v58 = vpop.f32.mrb[3].mxu1 }
  0xfb   :  { %v716_v59 = vadd.f32 %v1066_v56, %v676_v55 }
 0x115   :  { %v1086_v60 = vpop.f32.mrb[4].mxu0 }
 0x116   :  { %v1087_v61 = vpop.f32.mrb[5].mxu0 }
 0x117   :  { %v1088_v62 = vadd.f32 %v1087_v61, %v1086_v60  ;;  %v1089_v63 = vpop.f32.mrb[6].mxu0  ;;  %v1108_v0 = vpop.f32.mrb[4].mxu1 }
 0x118   :  { %v1090_v1 = vpop.f32.mrb[7].mxu0  ;;  %v1109_v2 = vpop.f32.mrb[5].mxu1 }
 0x119   :  { %v756_v3 = vadd.f32 %v1088_v62, %v716_v59  ;;  %v1110_v4 = vadd.f32 %v1109_v2, %v1108_v0  ;;  %v1111_v5 = vpop.f32.mrb[6].mxu1 }
 0x11a   :  { %v1112_v6 = vpop.f32.mrb[7].mxu1 }
 0x11b   :  { %v796_v7 = vadd.f32 %v1110_v4, %v756_v3 }
 0x135   :  { %v835_v8 = vpop.f32.mrb[8].mxu0 }
 0x136   :  { %v836_v9 = vadd.f32 %v835_v8, %v796_v7  ;;  %v1158_v10 = vpop.f32.mrb[9].mxu0 }
 0x137   :  { %v838_v11 = vpop.f32.mrb[10].mxu0 }
 0x138   :  { %v858_v12 = vmul.f32 %v836_v9, %v836_v9  ;;  %v1159_v13 = vpop.f32.mrb[11].mxu0 }
 0x13a   :  { %1193 = vmatmul.mubr.f32.vlgmr.msra.gmra.mrb[8].mxu1 %v858_v12 }
 0x20d   :  { %v931_v15 = vpop.f32.mrb[8].mxu1 }
 0x20e   :  { %v932_v16 = vadd.f32 %v1025_v14, %v931_v15  ;;  %v1194_v17 = vpop.f32.mrb[9].mxu1 }
 0x210   :  { %1303 = vrsqrt.f32 %v932_v16 }
 0x21a   :  { %v1304_v18 = vpop.eup %1303 }
 0x21b   :  { %v936_v19 = vmul.f32 %v1304_v18, %v836_v9 }
 0x21d   :  { %v937_v20 = vpack.c.bf16 %v936_v19, %v936_v19 }
 0x21f   :  { %938 = vst [vmem:[%s1631_s5] sm:$0xf] %v937_v20 }

// kernel: gdn_net_forward.14
= control target key start
LH: loop header
LB: loop body
LE: loop exit
PB: predicated region body
PF: predicated region fallthrough
CT: control target
= control target key end

     0   :  { %vm1135_vm0 = vmmov 0   ;;  %s1393_s1 = inlined_call_operand.vmem [shape: bf16[1152,128], index: 1, kind: input, shape index: {}]   ;;  %s1394_s0 = inlined_call_operand.vmem [shape: bf16[8,1152], index: 0, kind: input, shape index: {}]   ;;  %s1395_s2 = inlined_call_operand.vmem [shape: f32[1,128], index: 2, kind: input, shape index: {}]   ;;  %s1396_s3 = inlined_call_operand.vmem [shape: bf16[8,128], index: 3, kind: output, shape index: {}]  }
   0x1   :  { %v1049_v0 = vld [vmem:[%s1393_s1 + $0x40] sm:$0xff]   ;;  %v1053_v4 = vld [vmem:[%s1393_s1 + $0x48] sm:$0xff]   ;;  %v1057_v8 = vld [vmem:[%s1393_s1 + $0x50] sm:$0xff]  }
   0x2   :  { %v1050_v1 = vld [vmem:[%s1393_s1] sm:$0xff]   ;;  %930 = vmatprep.subr.bf16.mxu0 %v1049_v0  ;;  %v1054_v5 = vld [vmem:[%s1393_s1 + $0x8] sm:$0xff]   ;;  %v1058_v9 = vld [vmem:[%s1393_s1 + $0x10] sm:$0xff]  }
   0x3   :  { %v1051_v2 = vld [vmem:[%s1393_s1 + $0xc0] sm:$0xff]   ;;  %931 = vmatpush3.bf16.msra.mxu0 %v1050_v1  ;;  %v1055_v6 = vld [vmem:[%s1393_s1 + $0xc8] sm:$0xff]   ;;  %v1059_v10 = vld [vmem:[%s1393_s1 + $0xd0] sm:$0xff]  }
   0x4   :  { %v1052_v3 = vld [vmem:[%s1393_s1 + $0x80] sm:$0xff]   ;;  %952 = vmatprep.subr.bf16.mxu1 %v1051_v2  ;;  %932 = vmatprep.subr.bf16.mxu0 %v1053_v4  ;;  %v1056_v7 = vld [vmem:[%s1393_s1 + $0x88] sm:$0xff]   ;;  %v1060_v11 = vld [vmem:[%s1393_s1 + $0x90] sm:$0xff]  }
   0x5   :  { %953 = vmatpush3.bf16.msra.mxu1 %v1052_v3  ;;  %v1061_v12 = vld [vmem:[%s1393_s1 + $0x58] sm:$0xff]   ;;  %v1065_v16 = vld [vmem:[%s1393_s1 + $0x60] sm:$0xff]   ;;  %v1069_v20 = vld [vmem:[%s1393_s1 + $0x68] sm:$0xff]  }
   0x6   :  { %954 = vmatprep.subr.bf16.mxu1 %v1055_v6  ;;  %v1062_v13 = vld [vmem:[%s1393_s1 + $0x18] sm:$0xff]   ;;  %v1066_v17 = vld [vmem:[%s1393_s1 + $0x20] sm:$0xff]   ;;  %v1070_v21 = vld [vmem:[%s1393_s1 + $0x28] sm:$0xff]  }
   0x7   :  { %933 = vmatpush3.bf16.msra.mxu0 %v1054_v5  ;;  %v1063_v14 = vld [vmem:[%s1393_s1 + $0xd8] sm:$0xff]   ;;  %v1067_v18 = vld [vmem:[%s1393_s1 + $0xe0] sm:$0xff]   ;;  %v1071_v22 = vld [vmem:[%s1393_s1 + $0xe8] sm:$0xff]  }
   0x8   :  { %934 = vmatprep.subr.bf16.mxu0 %v1057_v8  ;;  %v1064_v15 = vld [vmem:[%s1393_s1 + $0x98] sm:$0xff]   ;;  %v1068_v19 = vld [vmem:[%s1393_s1 + $0xa0] sm:$0xff]   ;;  %v1072_v23 = vld [vmem:[%s1393_s1 + $0xa8] sm:$0xff]  }
   0x9   :  { %955 = vmatpush3.bf16.msra.mxu1 %v1056_v7  ;;  %v1073_v24 = vld [vmem:[%s1393_s1 + $0x70] sm:$0xff]   ;;  %v1077_v28 = vld [vmem:[%s1393_s1 + $0x78] sm:$0xff]   ;;  %v15_v31 = vld [vmem:[%s1394_s0] sm:$0xff] }
   0xa   :  { %956 = vmatprep.subr.bf16.mxu1 %v1059_v10  ;;  %v1074_v25 = vld [vmem:[%s1393_s1 + $0x30] sm:$0xff]   ;;  %v1078_v29 = vld [vmem:[%s1393_s1 + $0x38] sm:$0xff]   ;;  %v848_v32 = vcombine.low %v15_v31, %v15_v31  ;;  %v849_v33 = vcombine.high %v15_v31, %v15_v31  ;;  %v1083_v35 = vld [vmem:[%s1393_s1 + $0x140] sm:$0xff]  }
   0xb   :  { %935 = vmatpush3.bf16.msra.mxu0 %v1058_v9  ;;  %v1075_v26 = vld [vmem:[%s1393_s1 + $0xf0] sm:$0xff]   ;;  %v1079_v30 = vld [vmem:[%s1393_s1 + $0xf8] sm:$0xff]   ;;  %v16_v36 = vld [vmem:[%s1394_s0 + $0x8] sm:$0xff]  ;;  %v1134_v9 = vmov 0.0  }
   0xc   :  { %936 = vmatprep.subr.bf16.mxu0 %v1061_v12  ;;  %v1076_v27 = vld [vmem:[%s1393_s1 + $0xb0] sm:$0xff]   ;;  %v1082_v34 = vld [vmem:[%s1393_s1 + $0xb8] sm:$0xff]   ;;  %667 = vmatprep.mubr.bf16.mxu0 %v849_v33  ;;  %v850_v37 = vcombine.low %v16_v36, %v16_v36  ;;  %v851_v38 = vcombine.high %v16_v36, %v16_v36  ;;  %v1086_v39 = vld [vmem:[%s1393_s1 + $0x100] sm:$0xff]  }
   0xd   :  { %957 = vmatpush3.bf16.msra.mxu1 %v1060_v11  ;;  %v1087_v40 = vld [vmem:[%s1393_s1 + $0x1c0] sm:$0xff]   ;;  %v1089_v42 = vld [vmem:[%s1393_s1 + $0x148] sm:$0xff]   ;;  %v1093_v46 = vld [vmem:[%s1393_s1 + $0x150] sm:$0xff]  }
   0xe   :  { %958 = vmatprep.subr.bf16.mxu1 %v1063_v14  ;;  %707 = vmatprep.mubr.bf16.mxu1 %v851_v38  ;;  %v1088_v41 = vld [vmem:[%s1393_s1 + $0x180] sm:$0xff]   ;;  %v1090_v43 = vld [vmem:[%s1393_s1 + $0x108] sm:$0xff]   ;;  %v1094_v47 = vld [vmem:[%s1393_s1 + $0x110] sm:$0xff]  }
   0xf   :  { %937 = vmatpush3.bf16.msra.mxu0 %v1062_v13  ;;  %v1091_v44 = vld [vmem:[%s1393_s1 + $0x1c8] sm:$0xff]   ;;  %v1095_v48 = vld [vmem:[%s1393_s1 + $0x1d0] sm:$0xff]   ;;  %v1097_v50 = vld [vmem:[%s1393_s1 + $0x158] sm:$0xff]  }
  0x10   :  { %938 = vmatprep.subr.bf16.mxu0 %v1065_v16  ;;  %v1092_v45 = vld [vmem:[%s1393_s1 + $0x188] sm:$0xff]   ;;  %v1096_v49 = vld [vmem:[%s1393_s1 + $0x190] sm:$0xff]   ;;  %v1098_v51 = vld [vmem:[%s1393_s1 + $0x118] sm:$0xff]  }
  0x11   :  { %959 = vmatpush3.bf16.msra.mxu1 %v1064_v15  ;;  %v1099_v52 = vld [vmem:[%s1393_s1 + $0x1d8] sm:$0xff]   ;;  %v1101_v54 = vld [vmem:[%s1393_s1 + $0x160] sm:$0xff]   ;;  %v1105_v58 = vld [vmem:[%s1393_s1 + $0x168] sm:$0xff]  }
  0x12   :  { %960 = vmatprep.subr.bf16.mxu1 %v1067_v18  ;;  %v1100_v53 = vld [vmem:[%s1393_s1 + $0x198] sm:$0xff]   ;;  %v1102_v55 = vld [vmem:[%s1393_s1 + $0x120] sm:$0xff]   ;;  %v1106_v59 = vld [vmem:[%s1393_s1 + $0x128] sm:$0xff]  }
  0x13   :  { %939 = vmatpush3.bf16.msra.mxu0 %v1066_v17  ;;  %v1103_v56 = vld [vmem:[%s1393_s1 + $0x1e0] sm:$0xff]   ;;  %v1107_v60 = vld [vmem:[%s1393_s1 + $0x1e8] sm:$0xff]   ;;  %v1109_v62 = vld [vmem:[%s1393_s1 + $0x170] sm:$0xff]  }
  0x14   :  { %940 = vmatprep.subr.bf16.mxu0 %v1069_v20  ;;  %v1104_v57 = vld [vmem:[%s1393_s1 + $0x1a0] sm:$0xff]   ;;  %v1108_v61 = vld [vmem:[%s1393_s1 + $0x1a8] sm:$0xff]   ;;  %v1110_v63 = vld [vmem:[%s1393_s1 + $0x130] sm:$0xff]  }
  0x15   :  { %961 = vmatpush3.bf16.msra.mxu1 %v1068_v19  ;;  %v1111_v0 = vld [vmem:[%s1393_s1 + $0x1f0] sm:$0xff]   ;;  %v1113_v2 = vld [vmem:[%s1393_s1 + $0x178] sm:$0xff]   ;;  %v1121_v13 = vld [vmem:[%s1393_s1 + $0x200] sm:$0xff]  }
  0x16   :  { %962 = vmatprep.subr.bf16.mxu1 %v1071_v22  ;;  %v1112_v1 = vld [vmem:[%s1393_s1 + $0x1b0] sm:$0xff]   ;;  %v1114_v3 = vld [vmem:[%s1393_s1 + $0x138] sm:$0xff]   ;;  %v1122_v14 = vld [vmem:[%s1393_s1 + $0x208] sm:$0xff]  }
  0x17   :  { %941 = vmatpush3.bf16.msra.mxu0 %v1070_v21  ;;  %v1115_v4 = vld [vmem:[%s1393_s1 + $0x1f8] sm:$0xff]   ;;  %v17_v5 = vld [vmem:[%s1394_s0 + $0x10] sm:$0xff]  ;;  %v1125_v17 = vld [vmem:[%s1393_s1 + $0x220] sm:$0xff]  }
  0x18   :  { %942 = vmatprep.subr.bf16.mxu0 %v1073_v24  ;;  %v852_v6 = vcombine.low %v17_v5, %v17_v5  ;;  %v853_v7 = vcombine.high %v17_v5, %v17_v5  ;;  %v1118_v8 = vld [vmem:[%s1393_s1 + $0x1b8] sm:$0xff]   ;;  %v1123_v15 = vld [vmem:[%s1393_s1 + $0x210] sm:$0xff]   ;;  %v1126_v18 = vld [vmem:[%s1393_s1 + $0x228] sm:$0xff]  }
  0x19   :  { %963 = vmatpush3.bf16.msra.mxu1 %v1072_v23  ;;  %v18_v10 = vld [vmem:[%s1394_s0 + $0x18] sm:$0xff]  ;;  %v1127_v19 = vld [vmem:[%s1393_s1 + $0x230] sm:$0xff]   ;;  %v1129_v21 = vld [vmem:[%s1394_s0 + $0x20] ss:$0 sps:$4 sm:$0xff]  }
  0x1a   :  { %964 = vmatprep.subr.bf16.mxu1 %v1075_v26  ;;  %v854_v11 = vcombine.low %v18_v10, %v18_v10  ;;  %v855_v12 = vcombine.high %v18_v10, %v18_v10  ;;  %v1124_v16 = vld [vmem:[%s1393_s1 + $0x218] sm:$0xff]   ;;  %v847_v23 = vld [vmem:[%s1395_s2] ss:$0 sm:$0xff] }
  0x1b   :  { %943 = vmatpush3.bf16.msra.mxu0 %v1074_v25  ;;  %v1128_v20 = vld [vmem:[%s1393_s1 + $0x238] sm:$0xff]  }
  0x1c   :  { %944 = vmatprep.subr.bf16.mxu0 %v1077_v28 }
  0x1d   :  { %965 = vmatpush3.bf16.msra.mxu1 %v1076_v27 }
  0x1e   :  { %966 = vmatprep.subr.bf16.mxu1 %v1079_v30 }
  0x1f   :  { %945 = vmatpush3.bf16.msra.mxu0 %v1078_v29 }
  0x20   :  { %974 = vmatprep.subr.bf16.mxu0 %v1083_v35 }
  0x21   :  { %967 = vmatpush3.bf16.msra.mxu1 %v1082_v34 }
  0x22   :  { %668 = vmatmul.mubr.bf16.vlgmr.msra.gmra.mrb[0].mxu0 %v848_v32  ;;  %996 = vmatprep.subr.bf16.mxu1 %v1087_v40 }
  0x23   :  { %975 = vmatpush3.bf16.msra.mxu0 %v1086_v39  ;;  %747 = vmatprep.mubr.bf16.mxu0 %v853_v7 }
  0x24   :  { %708 = vmatmul.mubr.bf16.vlgmr.msra.gmra.mrb[0].mxu1 %v850_v37  ;;  %976 = vmatprep.subr.bf16.mxu0 %v1089_v42 }
  0x25   :  { %997 = vmatpush3.bf16.msra.mxu1 %v1088_v41  ;;  %787 = vmatprep.mubr.bf16.mxu1 %v855_v12 }
  0x26   :  { %998 = vmatprep.subr.bf16.mxu1 %v1091_v44 }
  0x27   :  { %977 = vmatpush3.bf16.msra.mxu0 %v1090_v43 }
  0x28   :  { %978 = vmatprep.subr.bf16.mxu0 %v1093_v46 }
  0x29   :  { %999 = vmatpush3.bf16.msra.mxu1 %v1092_v45 }
  0x2a   :  { %1000 = vmatprep.subr.bf16.mxu1 %v1095_v48 }
  0x2b   :  { %979 = vmatpush3.bf16.msra.mxu0 %v1094_v47 }
  0x2c   :  { %980 = vmatprep.subr.bf16.mxu0 %v1097_v50 }
  0x2d   :  { %1001 = vmatpush3.bf16.msra.mxu1 %v1096_v49 }
  0x2e   :  { %1002 = vmatprep.subr.bf16.mxu1 %v1099_v52 }
  0x2f   :  { %981 = vmatpush3.bf16.msra.mxu0 %v1098_v51 }
  0x30   :  { %982 = vmatprep.subr.bf16.mxu0 %v1101_v54 }
  0x31   :  { %1003 = vmatpush3.bf16.msra.mxu1 %v1100_v53 }
  0x32   :  { %1004 = vmatprep.subr.bf16.mxu1 %v1103_v56 }
  0x33   :  { %983 = vmatpush3.bf16.msra.mxu0 %v1102_v55 }
  0x34   :  { %984 = vmatprep.subr.bf16.mxu0 %v1105_v58 }
  0x35   :  { %1005 = vmatpush3.bf16.msra.mxu1 %v1104_v57 }
  0x36   :  { %1006 = vmatprep.subr.bf16.mxu1 %v1107_v60 }
  0x37   :  { %985 = vmatpush3.bf16.msra.mxu0 %v1106_v59 }
  0x38   :  { %986 = vmatprep.subr.bf16.mxu0 %v1109_v62 }
  0x39   :  { %1007 = vmatpush3.bf16.msra.mxu1 %v1108_v61 }
  0x3a   :  { %1008 = vmatprep.subr.bf16.mxu1 %v1111_v0 }
  0x3b   :  { %987 = vmatpush3.bf16.msra.mxu0 %v1110_v63 }
  0x3c   :  { %988 = vmatprep.subr.bf16.mxu0 %v1113_v2 }
  0x3d   :  { %1009 = vmatpush3.bf16.msra.mxu1 %v1112_v1 }
  0x3e   :  { %1010 = vmatprep.subr.bf16.mxu1 %v1115_v4 }
  0x3f   :  { %989 = vmatpush3.bf16.msra.mxu0 %v1114_v3 }
  0x40   :  { %1027 = vmatprep.subr.bf16.mxu0 %v1134_v9 }
  0x41   :  { %1011 = vmatpush3.bf16.msra.mxu1 %v1118_v8 }
  0x42   :  { %748 = vmatmul.mubr.bf16.vlgmr.msra.gmra.mrb[4].mxu0 %v852_v6 }
  0x43   :  { %1028 = vmatpush3.bf16.msra.mxu0 %v1121_v13  ;;  %1043 = vmatprep.mubr.msk.bf16.mxu0 %vm1135_vm0, %v1134_v9 }
  0x44   :  { %788 = vmatmul.mubr.bf16.vlgmr.msra.gmra.mrb[4].mxu1 %v854_v11  ;;  %1029 = vmatprep.subr.bf16.mxu0 %v1134_v9 }
  0x47   :  { %1030 = vmatpush3.bf16.msra.mxu0 %v1122_v14 }
  0x48   :  { %1031 = vmatprep.subr.bf16.mxu0 %v1134_v9 }
  0x4b   :  { %1032 = vmatpush3.bf16.msra.mxu0 %v1123_v15 }
  0x4c   :  { %1033 = vmatprep.subr.bf16.mxu0 %v1134_v9 }
  0x4f   :  { %1034 = vmatpush3.bf16.msra.mxu0 %v1124_v16 }
  0x50   :  { %1035 = vmatprep.subr.bf16.mxu0 %v1134_v9 }
  0x53   :  { %1036 = vmatpush3.bf16.msra.mxu0 %v1125_v17 }
  0x54   :  { %1037 = vmatprep.subr.bf16.mxu0 %v1134_v9 }
  0x57   :  { %1038 = vmatpush3.bf16.msra.mxu0 %v1126_v18 }
  0x58   :  { %1039 = vmatprep.subr.bf16.mxu0 %v1134_v9 }
  0x5b   :  { %1040 = vmatpush3.bf16.msra.mxu0 %v1127_v19 }
  0x5c   :  { %1041 = vmatprep.subr.bf16.mxu0 %v1134_v9 }
  0x5f   :  { %1042 = vmatpush3.bf16.msra.mxu0 %v1128_v20 }
  0x62   :  { %1044 = vmatmul.mubr.bf16.vlgmr.msra.gmra.mrb[8].mxu0 %v1129_v21 }
  0xf5   :  { %v946_v22 = vpop.f32.mrb[0].mxu0 }
  0xf6   :  { %v947_v24 = vpop.f32.mrb[1].mxu0 }
  0xf7   :  { %v948_v25 = vadd.f32 %v947_v24, %v946_v22  ;;  %v949_v26 = vpop.f32.mrb[2].mxu0  ;;  %v968_v27 = vpop.f32.mrb[0].mxu1 }
  0xf8   :  { %v950_v28 = vpop.f32.mrb[3].mxu0  ;;  %v969_v29 = vpop.f32.mrb[1].mxu1 }
  0xf9   :  { %v670_v30 = vadd.f32 %v948_v25, %v847_v23  ;;  %v970_v31 = vadd.f32 %v969_v29, %v968_v27  ;;  %v971_v32 = vpop.f32.mrb[2].mxu1 }
  0xfa   :  { %v972_v33 = vpop.f32.mrb[3].mxu1 }
  0xfb   :  { %v710_v34 = vadd.f32 %v970_v31, %v670_v30 }
 0x115   :  { %v990_v35 = vpop.f32.mrb[4].mxu0 }
 0x116   :  { %v991_v36 = vpop.f32.mrb[5].mxu0 }
 0x117   :  { %v992_v37 = vadd.f32 %v991_v36, %v990_v35  ;;  %v993_v38 = vpop.f32.mrb[6].mxu0  ;;  %v1012_v39 = vpop.f32.mrb[4].mxu1 }
 0x118   :  { %v994_v40 = vpop.f32.mrb[7].mxu0  ;;  %v1013_v41 = vpop.f32.mrb[5].mxu1 }
 0x119   :  { %v750_v42 = vadd.f32 %v992_v37, %v710_v34  ;;  %v1014_v43 = vadd.f32 %v1013_v41, %v1012_v39  ;;  %v1015_v44 = vpop.f32.mrb[6].mxu1 }
 0x11a   :  { %v1016_v45 = vpop.f32.mrb[7].mxu1 }
 0x11b   :  { %v790_v46 = vadd.f32 %v1014_v43, %v750_v42 }
 0x135   :  { %v829_v47 = vpop.f32.mrb[8].mxu0 }
 0x136   :  { %v830_v48 = vadd.f32 %v829_v47, %v790_v46  ;;  %v1045_v49 = vpop.f32.mrb[9].mxu0 }
 0x137   :  { %v832_v50 = vpop.f32.mrb[10].mxu0 }
 0x138   :  { %v929_v51 = vmul.f32 -1.442695, %v830_v48  ;;  %v1046_v52 = vpop.f32.mrb[11].mxu0 }
 0x13a   :  { %1130 = vpow2.f32 %v929_v51 }
 0x144   :  { %v1131_v53 = vpop.eup %1130 }
 0x145   :  { %v838_v54 = vadd.f32 1.0, %v1131_v53 }
 0x147   :  { %1132 = vrcp.f32 %v838_v54 }
 0x151   :  { %v1133_v55 = vpop.eup %1132 }
 0x152   :  { %v841_v56 = vpack.c.bf16 %v1133_v55, %v1133_v55 }
 0x154   :  { %842 = vst [vmem:[%s1396_s3] sm:$0xf] %v841_v56 }

// kernel: gdn_net_forward.15
= control target key start
LH: loop header
LB: loop body
LE: loop exit
PB: predicated region body
PF: predicated region fallthrough
CT: control target
= control target key end

     0   :  { %vm3662_vm0 = vmmov 0   ;;  %s4761_s1 = inlined_call_operand.vmem [shape: bf16[1152,512], index: 1, kind: input, shape index: {}]   ;;  %s4762_s0 = inlined_call_operand.vmem [shape: bf16[8,1152], index: 0, kind: input, shape index: {}]   ;;  %s4763_s3 = inlined_call_operand.vmem [shape: f32[128,128], index: 3, kind: input, shape index: {}]   ;;  %s4764_s2 = inlined_call_operand.vmem [shape: f32[1,512], index: 2, kind: input, shape index: {}]   ;;  %s4765_s4 = inlined_call_operand.vmem [shape: f32[1,128], index: 4, kind: input, shape index: {}]   ;;  %s4766_s5 = inlined_call_operand.vmem [shape: bf16[8,512], index: 5, kind: output, shape index: {}]  }
   0x1   :  { %v3211_v0 = vld [vmem:[%s4761_s1 + $0x4] ss:$16 sps:$4 sm:$0xff]   ;;  %v3213_v1 = vld [vmem:[%s4761_s1 + $0xc] ss:$16 sps:$4 sm:$0xff]   ;;  %v3215_v2 = vld [vmem:[%s4761_s1] ss:$16 sps:$4 sm:$0xff]  }
   0x2   :  { %1808 = vmatprep.subr.bf16.mxu0 %v3211_v0  ;;  %v3216_v3 = vld [vmem:[%s4761_s1 + $0x8] ss:$16 sps:$4 sm:$0xff]   ;;  %2013 = vmatprep.subr.bf16.mxu1 %v3213_v1  ;;  %v3217_v4 = vld [vmem:[%s4761_s1 + $0x24] ss:$16 sps:$4 sm:$0xff]   ;;  %v3219_v5 = vld [vmem:[%s4761_s1 + $0x2c] ss:$16 sps:$4 sm:$0xff]  }
   0x3   :  { %1809 = vmatpush1.bf16.msra.mxu0 %v3215_v2  ;;  %2014 = vmatpush1.bf16.msra.mxu1 %v3216_v3  ;;  %v3221_v6 = vld [vmem:[%s4761_s1 + $0x20] ss:$16 sps:$4 sm:$0xff]   ;;  %v3222_v7 = vld [vmem:[%s4761_s1 + $0x28] ss:$16 sps:$4 sm:$0xff]   ;;  %v3223_v8 = vld [vmem:[%s4761_s1 + $0x44] ss:$16 sps:$4 sm:$0xff]  }
   0x4   :  { %1810 = vmatprep.subr.bf16.mxu0 %v3217_v4  ;;  %2015 = vmatprep.subr.bf16.mxu1 %v3219_v5  ;;  %v3225_v9 = vld [vmem:[%s4761_s1 + $0x4c] ss:$16 sps:$4 sm:$0xff]   ;;  %v3227_v10 = vld [vmem:[%s4761_s1 + $0x40] ss:$16 sps:$4 sm:$0xff]   ;;  %v3228_v11 = vld [vmem:[%s4761_s1 + $0x48] ss:$16 sps:$4 sm:$0xff]  }
   0x5   :  { %v3229_v12 = vld [vmem:[%s4761_s1 + $0x64] ss:$16 sps:$4 sm:$0xff]   ;;  %v3231_v13 = vld [vmem:[%s4761_s1 + $0x6c] ss:$16 sps:$4 sm:$0xff]   ;;  %v3233_v14 = vld [vmem:[%s4761_s1 + $0x60] ss:$16 sps:$4 sm:$0xff]  }
   0x6   :  { %v3234_v15 = vld [vmem:[%s4761_s1 + $0x68] ss:$16 sps:$4 sm:$0xff]   ;;  %v3235_v16 = vld [vmem:[%s4761_s1 + $0x84] ss:$16 sps:$4 sm:$0xff]   ;;  %v3237_v17 = vld [vmem:[%s4761_s1 + $0x8c] ss:$16 sps:$4 sm:$0xff]  }
   0x7   :  { %1811 = vmatpush1.bf16.msra.mxu0 %v3221_v6  ;;  %2016 = vmatpush1.bf16.msra.mxu1 %v3222_v7  ;;  %v3239_v18 = vld [vmem:[%s4761_s1 + $0x80] ss:$16 sps:$4 sm:$0xff]   ;;  %v3240_v19 = vld [vmem:[%s4761_s1 + $0x88] ss:$16 sps:$4 sm:$0xff]   ;;  %v3241_v20 = vld [vmem:[%s4761_s1 + $0xa4] ss:$16 sps:$4 sm:$0xff]  }
   0x8   :  { %1812 = vmatprep.subr.bf16.mxu0 %v3223_v8  ;;  %2017 = vmatprep.subr.bf16.mxu1 %v3225_v9  ;;  %v3243_v21 = vld [vmem:[%s4761_s1 + $0xac] ss:$16 sps:$4 sm:$0xff]   ;;  %v3245_v22 = vld [vmem:[%s4761_s1 + $0xa0] ss:$16 sps:$4 sm:$0xff]   ;;  %v3246_v23 = vld [vmem:[%s4761_s1 + $0xa8] ss:$16 sps:$4 sm:$0xff]  }
   0x9   :  { %v3247_v24 = vld [vmem:[%s4761_s1 + $0xc4] ss:$16 sps:$4 sm:$0xff]   ;;  %v3249_v25 = vld [vmem:[%s4761_s1 + $0xcc] ss:$16 sps:$4 sm:$0xff]   ;;  %v3251_v26 = vld [vmem:[%s4761_s1 + $0xc0] ss:$16 sps:$4 sm:$0xff]  }
   0xa   :  { %v3252_v27 = vld [vmem:[%s4761_s1 + $0xc8] ss:$16 sps:$4 sm:$0xff]   ;;  %v3253_v28 = vld [vmem:[%s4761_s1 + $0xe4] ss:$16 sps:$4 sm:$0xff]   ;;  %v3255_v29 = vld [vmem:[%s4761_s1 + $0xec] ss:$16 sps:$4 sm:$0xff]  }
   0xb   :  { %1813 = vmatpush1.bf16.msra.mxu0 %v3227_v10  ;;  %2018 = vmatpush1.bf16.msra.mxu1 %v3228_v11  ;;  %v3257_v30 = vld [vmem:[%s4761_s1 + $0xe0] ss:$16 sps:$4 sm:$0xff]   ;;  %v3258_v31 = vld [vmem:[%s4761_s1 + $0xe8] ss:$16 sps:$4 sm:$0xff]   ;;  %v3259_v32 = vld [vmem:[%s4761_s1 + $0x104] ss:$16 sps:$4 sm:$0xff]  }
   0xc   :  { %1814 = vmatprep.subr.bf16.mxu0 %v3229_v12  ;;  %2019 = vmatprep.subr.bf16.mxu1 %v3231_v13  ;;  %v3261_v33 = vld [vmem:[%s4761_s1 + $0x10c] ss:$16 sps:$4 sm:$0xff]   ;;  %v3263_v34 = vld [vmem:[%s4761_s1 + $0x100] ss:$16 sps:$4 sm:$0xff]   ;;  %v3264_v35 = vld [vmem:[%s4761_s1 + $0x108] ss:$16 sps:$4 sm:$0xff]  }
   0xd   :  { %v3265_v36 = vld [vmem:[%s4761_s1 + $0x124] ss:$16 sps:$4 sm:$0xff]   ;;  %v3267_v37 = vld [vmem:[%s4761_s1 + $0x12c] ss:$16 sps:$4 sm:$0xff]   ;;  %v3269_v38 = vld [vmem:[%s4761_s1 + $0x120] ss:$16 sps:$4 sm:$0xff]  }
   0xe   :  { %v3270_v39 = vld [vmem:[%s4761_s1 + $0x128] ss:$16 sps:$4 sm:$0xff]   ;;  %v3271_v40 = vld [vmem:[%s4761_s1 + $0x144] ss:$16 sps:$4 sm:$0xff]   ;;  %v3273_v41 = vld [vmem:[%s4761_s1 + $0x14c] ss:$16 sps:$4 sm:$0xff]  }
   0xf   :  { %1815 = vmatpush1.bf16.msra.mxu0 %v3233_v14  ;;  %2020 = vmatpush1.bf16.msra.mxu1 %v3234_v15  ;;  %v3275_v42 = vld [vmem:[%s4761_s1 + $0x140] ss:$16 sps:$4 sm:$0xff]   ;;  %v3276_v43 = vld [vmem:[%s4761_s1 + $0x148] ss:$16 sps:$4 sm:$0xff]   ;;  %v3277_v44 = vld [vmem:[%s4761_s1 + $0x164] ss:$16 sps:$4 sm:$0xff]  }
  0x10   :  { %1816 = vmatprep.subr.bf16.mxu0 %v3235_v16  ;;  %2021 = vmatprep.subr.bf16.mxu1 %v3237_v17  ;;  %v3279_v45 = vld [vmem:[%s4761_s1 + $0x16c] ss:$16 sps:$4 sm:$0xff]   ;;  %v21_v46 = vld [vmem:[%s4762_s0] sm:$0xff]  ;;  %v3282_v49 = vld [vmem:[%s4761_s1 + $0x168] ss:$16 sps:$4 sm:$0xff]  }
  0x11   :  { %v3281_v47 = vld [vmem:[%s4761_s1 + $0x160] ss:$16 sps:$4 sm:$0xff]   ;;  %v2570_v48 = vcombine.high %v21_v46, %v21_v46  ;;  %v3283_v50 = vld [vmem:[%s4761_s1 + $0x184] ss:$16 sps:$4 sm:$0xff]   ;;  %v3285_v51 = vld [vmem:[%s4761_s1 + $0x18c] ss:$16 sps:$4 sm:$0xff]   ;;  %v2569_v4 = vcombine.low %v21_v46, %v21_v46 }
  0x12   :  { %v3287_v52 = vld [vmem:[%s4761_s1 + $0x180] ss:$16 sps:$4 sm:$0xff]   ;;  %v3288_v53 = vld [vmem:[%s4761_s1 + $0x188] ss:$16 sps:$4 sm:$0xff]   ;;  %v3289_v54 = vld [vmem:[%s4761_s1 + $0x1a4] ss:$16 sps:$4 sm:$0xff]  }
  0x13   :  { %1817 = vmatpush1.bf16.msra.mxu0 %v3239_v18  ;;  %2022 = vmatpush1.bf16.msra.mxu1 %v3240_v19  ;;  %v3291_v55 = vld [vmem:[%s4761_s1 + $0x1ac] ss:$16 sps:$4 sm:$0xff]   ;;  %v3293_v56 = vld [vmem:[%s4761_s1 + $0x1a0] ss:$16 sps:$4 sm:$0xff]   ;;  %v3294_v57 = vld [vmem:[%s4761_s1 + $0x1a8] ss:$16 sps:$4 sm:$0xff]  }
  0x14   :  { %1818 = vmatprep.subr.bf16.mxu0 %v3241_v20  ;;  %2023 = vmatprep.subr.bf16.mxu1 %v3243_v21  ;;  %v3295_v58 = vld [vmem:[%s4761_s1 + $0x1c4] ss:$16 sps:$4 sm:$0xff]   ;;  %v3297_v59 = vld [vmem:[%s4761_s1 + $0x1cc] ss:$16 sps:$4 sm:$0xff]   ;;  %v3299_v60 = vld [vmem:[%s4761_s1 + $0x1c0] ss:$16 sps:$4 sm:$0xff]  }
  0x15   :  { %1840 = vmatprep.mubr.bf16.mxu0 %v2570_v48  ;;  %2045 = vmatprep.mubr.bf16.mxu1 %v2570_v48  ;;  %v3300_v61 = vld [vmem:[%s4761_s1 + $0x1c8] ss:$16 sps:$4 sm:$0xff]   ;;  %v3301_v62 = vld [vmem:[%s4761_s1 + $0x1e4] ss:$16 sps:$4 sm:$0xff]   ;;  %v3303_v63 = vld [vmem:[%s4761_s1 + $0x1ec] ss:$16 sps:$4 sm:$0xff]  }
  0x16   :  { %v3305_v0 = vld [vmem:[%s4761_s1 + $0x1e0] ss:$16 sps:$4 sm:$0xff]   ;;  %v3306_v1 = vld [vmem:[%s4761_s1 + $0x1e8] ss:$16 sps:$4 sm:$0xff]   ;;  %v3311_v2 = vld [vmem:[%s4761_s1 + $0x204] ss:$16 sps:$4 sm:$0xff]  }
  0x17   :  { %1819 = vmatpush1.bf16.msra.mxu0 %v3245_v22  ;;  %2024 = vmatpush1.bf16.msra.mxu1 %v3246_v23  ;;  %v3314_v3 = vld [vmem:[%s4761_s1 + $0x20c] ss:$16 sps:$4 sm:$0xff]   ;;  %v3309_v5 = vld [vmem:[%s4761_s1 + $0x200] ss:$16 sps:$4 sm:$0xff]   ;;  %v3312_v6 = vld [vmem:[%s4761_s1 + $0x208] ss:$16 sps:$4 sm:$0xff]  }
  0x18   :  { %1820 = vmatprep.subr.bf16.mxu0 %v3247_v24  ;;  %2025 = vmatprep.subr.bf16.mxu1 %v3249_v25  ;;  %v3317_v7 = vld [vmem:[%s4761_s1 + $0x224] ss:$16 sps:$4 sm:$0xff]   ;;  %v3320_v8 = vld [vmem:[%s4761_s1 + $0x22c] ss:$16 sps:$4 sm:$0xff]   ;;  %v3315_v9 = vld [vmem:[%s4761_s1 + $0x220] ss:$16 sps:$4 sm:$0xff]  }
  0x19   :  { %v3318_v10 = vld [vmem:[%s4761_s1 + $0x228] ss:$16 sps:$4 sm:$0xff]   ;;  %v3323_v11 = vld [vmem:[%s4761_s1 + $0x244] ss:$16 sps:$4 sm:$0xff]   ;;  %v3326_v12 = vld [vmem:[%s4761_s1 + $0x24c] ss:$16 sps:$4 sm:$0xff]  }
  0x1a   :  { %v3321_v13 = vld [vmem:[%s4761_s1 + $0x240] ss:$16 sps:$4 sm:$0xff]   ;;  %v3324_v14 = vld [vmem:[%s4761_s1 + $0x248] ss:$16 sps:$4 sm:$0xff]   ;;  %v3329_v15 = vld [vmem:[%s4761_s1 + $0x264] ss:$16 sps:$4 sm:$0xff]  }
  0x1b   :  { %1821 = vmatpush1.bf16.msra.mxu0 %v3251_v26  ;;  %2026 = vmatpush1.bf16.msra.mxu1 %v3252_v27  ;;  %v3332_v16 = vld [vmem:[%s4761_s1 + $0x26c] ss:$16 sps:$4 sm:$0xff]   ;;  %v3327_v17 = vld [vmem:[%s4761_s1 + $0x260] ss:$16 sps:$4 sm:$0xff]   ;;  %v3330_v18 = vld [vmem:[%s4761_s1 + $0x268] ss:$16 sps:$4 sm:$0xff]  }
  0x1c   :  { %1822 = vmatprep.subr.bf16.mxu0 %v3253_v28  ;;  %2027 = vmatprep.subr.bf16.mxu1 %v3255_v29  ;;  %v3335_v19 = vld [vmem:[%s4761_s1 + $0x284] ss:$16 sps:$4 sm:$0xff]   ;;  %v3338_v20 = vld [vmem:[%s4761_s1 + $0x28c] ss:$16 sps:$4 sm:$0xff]   ;;  %v3333_v21 = vld [vmem:[%s4761_s1 + $0x280] ss:$16 sps:$4 sm:$0xff]  }
  0x1d   :  { %v3336_v22 = vld [vmem:[%s4761_s1 + $0x288] ss:$16 sps:$4 sm:$0xff]   ;;  %v3341_v23 = vld [vmem:[%s4761_s1 + $0x2a4] ss:$16 sps:$4 sm:$0xff]   ;;  %v3344_v24 = vld [vmem:[%s4761_s1 + $0x2ac] ss:$16 sps:$4 sm:$0xff]  }
  0x1e   :  { %v3339_v25 = vld [vmem:[%s4761_s1 + $0x2a0] ss:$16 sps:$4 sm:$0xff]   ;;  %v3342_v26 = vld [vmem:[%s4761_s1 + $0x2a8] ss:$16 sps:$4 sm:$0xff]   ;;  %v3347_v27 = vld [vmem:[%s4761_s1 + $0x2c4] ss:$16 sps:$4 sm:$0xff]  }
  0x1f   :  { %1823 = vmatpush1.bf16.msra.mxu0 %v3257_v30  ;;  %2028 = vmatpush1.bf16.msra.mxu1 %v3258_v31  ;;  %v3350_v28 = vld [vmem:[%s4761_s1 + $0x2cc] ss:$16 sps:$4 sm:$0xff]   ;;  %v3345_v31 = vld [vmem:[%s4761_s1 + $0x2c0] ss:$16 sps:$4 sm:$0xff]   ;;  %v3372_v48 = vld [vmem:[%s4761_s1 + $0x348] ss:$16 sps:$4 sm:$0xff]  }
  0x20   :  { %1824 = vmatprep.subr.bf16.mxu0 %v3259_v32  ;;  %2029 = vmatprep.subr.bf16.mxu1 %v3261_v33  ;;  %v3970_v29 = vld [vmem:[%s4762_s0 + $0x8] sm:$0xff]  ;;  %v3353_v33 = vld [vmem:[%s4761_s1 + $0x2e4] ss:$16 sps:$4 sm:$0xff]  }
  0x21   :  { %v2572_v30 = vcombine.high %v3970_v29, %v3970_v29  ;;  %v3348_v32 = vld [vmem:[%s4761_s1 + $0x2c8] ss:$16 sps:$4 sm:$0xff]   ;;  %v3374_v46 = vld [vmem:[%s4761_s1 + $0x34c] ss:$16 sps:$4 sm:$0xff]  }
  0x23   :  { %1825 = vmatpush1.bf16.msra.mxu0 %v3263_v34  ;;  %2030 = vmatpush1.bf16.msra.mxu1 %v3264_v35  ;;  %v3356_v34 = vld [vmem:[%s4761_s1 + $0x2ec] ss:$16 sps:$4 sm:$0xff]   ;;  %v3351_v35 = vld [vmem:[%s4761_s1 + $0x2e0] ss:$16 sps:$4 sm:$0xff]  }
  0x24   :  { %1826 = vmatprep.subr.bf16.mxu0 %v3265_v36  ;;  %2031 = vmatprep.subr.bf16.mxu1 %v3267_v37  ;;  %v3354_v36 = vld [vmem:[%s4761_s1 + $0x2e8] ss:$16 sps:$4 sm:$0xff]   ;;  %v3359_v37 = vld [vmem:[%s4761_s1 + $0x304] ss:$16 sps:$4 sm:$0xff]  }
  0x27   :  { %1827 = vmatpush1.bf16.msra.mxu0 %v3269_v38  ;;  %2032 = vmatpush1.bf16.msra.mxu1 %v3270_v39  ;;  %v3362_v38 = vld [vmem:[%s4761_s1 + $0x30c] ss:$16 sps:$4 sm:$0xff]   ;;  %v3357_v39 = vld [vmem:[%s4761_s1 + $0x300] ss:$16 sps:$4 sm:$0xff]  }
  0x28   :  { %1828 = vmatprep.subr.bf16.mxu0 %v3271_v40  ;;  %2033 = vmatprep.subr.bf16.mxu1 %v3273_v41  ;;  %v3360_v40 = vld [vmem:[%s4761_s1 + $0x308] ss:$16 sps:$4 sm:$0xff]   ;;  %v3365_v41 = vld [vmem:[%s4761_s1 + $0x324] ss:$16 sps:$4 sm:$0xff]  }
  0x2b   :  { %1829 = vmatpush1.bf16.msra.mxu0 %v3275_v42  ;;  %2034 = vmatpush1.bf16.msra.mxu1 %v3276_v43  ;;  %v3368_v42 = vld [vmem:[%s4761_s1 + $0x32c] ss:$16 sps:$4 sm:$0xff]   ;;  %v3363_v43 = vld [vmem:[%s4761_s1 + $0x320] ss:$16 sps:$4 sm:$0xff]  }
  0x2c   :  { %1830 = vmatprep.subr.bf16.mxu0 %v3277_v44  ;;  %2035 = vmatprep.subr.bf16.mxu1 %v3279_v45  ;;  %v3366_v44 = vld [vmem:[%s4761_s1 + $0x328] ss:$16 sps:$4 sm:$0xff]   ;;  %v3371_v45 = vld [vmem:[%s4761_s1 + $0x344] ss:$16 sps:$4 sm:$0xff]  }
  0x2f   :  { %1831 = vmatpush1.bf16.msra.mxu0 %v3281_v47  ;;  %2036 = vmatpush1.bf16.msra.mxu1 %v3282_v49  ;;  %v3369_v47 = vld [vmem:[%s4761_s1 + $0x340] ss:$16 sps:$4 sm:$0xff]   ;;  %v3377_v49 = vld [vmem:[%s4761_s1 + $0x364] ss:$16 sps:$4 sm:$0xff]  }
  0x30   :  { %1832 = vmatprep.subr.bf16.mxu0 %v3283_v50  ;;  %2037 = vmatprep.subr.bf16.mxu1 %v3285_v51  ;;  %v3380_v50 = vld [vmem:[%s4761_s1 + $0x36c] ss:$16 sps:$4 sm:$0xff]   ;;  %v3375_v51 = vld [vmem:[%s4761_s1 + $0x360] ss:$16 sps:$4 sm:$0xff]  }
  0x33   :  { %1833 = vmatpush1.bf16.msra.mxu0 %v3287_v52  ;;  %2038 = vmatpush1.bf16.msra.mxu1 %v3288_v53  ;;  %v3378_v52 = vld [vmem:[%s4761_s1 + $0x368] ss:$16 sps:$4 sm:$0xff]   ;;  %v3383_v53 = vld [vmem:[%s4761_s1 + $0x384] ss:$16 sps:$4 sm:$0xff]  }
  0x34   :  { %1834 = vmatprep.subr.bf16.mxu0 %v3289_v54  ;;  %2039 = vmatprep.subr.bf16.mxu1 %v3291_v55  ;;  %v3386_v54 = vld [vmem:[%s4761_s1 + $0x38c] ss:$16 sps:$4 sm:$0xff]   ;;  %v3381_v55 = vld [vmem:[%s4761_s1 + $0x380] ss:$16 sps:$4 sm:$0xff]  }
  0x37   :  { %1835 = vmatpush1.bf16.msra.mxu0 %v3293_v56  ;;  %2040 = vmatpush1.bf16.msra.mxu1 %v3294_v57  ;;  %v3384_v56 = vld [vmem:[%s4761_s1 + $0x388] ss:$16 sps:$4 sm:$0xff]   ;;  %v3389_v57 = vld [vmem:[%s4761_s1 + $0x3a4] ss:$16 sps:$4 sm:$0xff]  }
  0x38   :  { %1836 = vmatprep.subr.bf16.mxu0 %v3295_v58  ;;  %2041 = vmatprep.subr.bf16.mxu1 %v3297_v59  ;;  %v3392_v58 = vld [vmem:[%s4761_s1 + $0x3ac] ss:$16 sps:$4 sm:$0xff]   ;;  %v3387_v59 = vld [vmem:[%s4761_s1 + $0x3a0] ss:$16 sps:$4 sm:$0xff]  }
  0x3b   :  { %1837 = vmatpush1.bf16.msra.mxu0 %v3299_v60  ;;  %2042 = vmatpush1.bf16.msra.mxu1 %v3300_v61  ;;  %v3390_v60 = vld [vmem:[%s4761_s1 + $0x3a8] ss:$16 sps:$4 sm:$0xff]   ;;  %v3395_v61 = vld [vmem:[%s4761_s1 + $0x3c4] ss:$16 sps:$4 sm:$0xff]  }
  0x3c   :  { %1838 = vmatprep.subr.bf16.mxu0 %v3301_v62  ;;  %2043 = vmatprep.subr.bf16.mxu1 %v3303_v63  ;;  %v3398_v62 = vld [vmem:[%s4761_s1 + $0x3cc] ss:$16 sps:$4 sm:$0xff]   ;;  %v3393_v63 = vld [vmem:[%s4761_s1 + $0x3c0] ss:$16 sps:$4 sm:$0xff]  }
  0x3f   :  { %1839 = vmatpush1.bf16.msra.mxu0 %v3305_v0  ;;  %2044 = vmatpush1.bf16.msra.mxu1 %v3306_v1  ;;  %v3396_v0 = vld [vmem:[%s4761_s1 + $0x3c8] ss:$16 sps:$4 sm:$0xff]   ;;  %v3401_v1 = vld [vmem:[%s4761_s1 + $0x3e4] ss:$16 sps:$4 sm:$0xff]  }
  0x40   :  { %1849 = vmatprep.subr.bf16.mxu0 %v3311_v2  ;;  %2054 = vmatprep.subr.bf16.mxu1 %v3314_v3  ;;  %v3404_v2 = vld [vmem:[%s4761_s1 + $0x3ec] ss:$16 sps:$4 sm:$0xff]   ;;  %v3399_v3 = vld [vmem:[%s4761_s1 + $0x3e0] ss:$16 sps:$4 sm:$0xff]  }
  0x42   :  { %1841 = vmatmul.mubr.bf16.vlgmr.msra.gmra.mrb[0].mxu0 %v2569_v4  ;;  %2046 = vmatmul.mubr.bf16.vlgmr.msra.gmra.mrb[0].mxu1 %v2569_v4  ;;  %v3402_v4 = vld [vmem:[%s4761_s1 + $0x3e8] ss:$16 sps:$4 sm:$0xff]  }
  0x43   :  { %1850 = vmatpush1.bf16.msra.mxu0 %v3309_v5  ;;  %2055 = vmatpush1.bf16.msra.mxu1 %v3312_v6  ;;  %v3409_v5 = vld [vmem:[%s4761_s1 + $0x404] ss:$16 sps:$4 sm:$0xff]   ;;  %v3412_v6 = vld [vmem:[%s4761_s1 + $0x40c] ss:$16 sps:$4 sm:$0xff]  }
  0x44   :  { %1851 = vmatprep.subr.bf16.mxu0 %v3317_v7  ;;  %2056 = vmatprep.subr.bf16.mxu1 %v3320_v8  ;;  %v2571_v7 = vcombine.low %v3970_v29, %v3970_v29  ;;  %v3407_v8 = vld [vmem:[%s4761_s1 + $0x400] ss:$16 sps:$4 sm:$0xff]   ;;  %v3442_v29 = vld [vmem:[%s4761_s1 + $0x4ac] ss:$16 sps:$4 sm:$0xff]  }
  0x45   :  { %1881 = vmatprep.mubr.bf16.mxu0 %v2572_v30  ;;  %2086 = vmatprep.mubr.bf16.mxu1 %v2572_v30  ;;  %v3437_v30 = vld [vmem:[%s4761_s1 + $0x4a0] ss:$16 sps:$4 sm:$0xff]  }
  0x47   :  { %1852 = vmatpush1.bf16.msra.mxu0 %v3315_v9  ;;  %2057 = vmatpush1.bf16.msra.mxu1 %v3318_v10  ;;  %v3410_v9 = vld [vmem:[%s4761_s1 + $0x408] ss:$16 sps:$4 sm:$0xff]   ;;  %v3415_v10 = vld [vmem:[%s4761_s1 + $0x424] ss:$16 sps:$4 sm:$0xff]  }
  0x48   :  { %1853 = vmatprep.subr.bf16.mxu0 %v3323_v11  ;;  %2058 = vmatprep.subr.bf16.mxu1 %v3326_v12  ;;  %v4108_v11 = vld [vmem:[%s4762_s0 + $0x10] sm:$0xff]  ;;  %v3418_v12 = vld [vmem:[%s4761_s1 + $0x42c] ss:$16 sps:$4 sm:$0xff]  }
  0x4b   :  { %1854 = vmatpush1.bf16.msra.mxu0 %v3321_v13  ;;  %2059 = vmatpush1.bf16.msra.mxu1 %v3324_v14  ;;  %v2574_v13 = vcombine.high %v4108_v11, %v4108_v11  ;;  %v3413_v14 = vld [vmem:[%s4761_s1 + $0x420] ss:$16 sps:$4 sm:$0xff]  }
  0x4c   :  { %1855 = vmatprep.subr.bf16.mxu0 %v3329_v15  ;;  %2060 = vmatprep.subr.bf16.mxu1 %v3332_v16  ;;  %v3416_v15 = vld [vmem:[%s4761_s1 + $0x428] ss:$16 sps:$4 sm:$0xff]   ;;  %v3421_v16 = vld [vmem:[%s4761_s1 + $0x444] ss:$16 sps:$4 sm:$0xff]  }
  0x4f   :  { %1856 = vmatpush1.bf16.msra.mxu0 %v3327_v17  ;;  %2061 = vmatpush1.bf16.msra.mxu1 %v3330_v18  ;;  %v3424_v17 = vld [vmem:[%s4761_s1 + $0x44c] ss:$16 sps:$4 sm:$0xff]   ;;  %v3419_v18 = vld [vmem:[%s4761_s1 + $0x440] ss:$16 sps:$4 sm:$0xff]  }
  0x50   :  { %1857 = vmatprep.subr.bf16.mxu0 %v3335_v19  ;;  %2062 = vmatprep.subr.bf16.mxu1 %v3338_v20  ;;  %v3422_v19 = vld [vmem:[%s4761_s1 + $0x448] ss:$16 sps:$4 sm:$0xff]   ;;  %v3427_v20 = vld [vmem:[%s4761_s1 + $0x464] ss:$16 sps:$4 sm:$0xff]  }
  0x53   :  { %1858 = vmatpush1.bf16.msra.mxu0 %v3333_v21  ;;  %2063 = vmatpush1.bf16.msra.mxu1 %v3336_v22  ;;  %v3430_v21 = vld [vmem:[%s4761_s1 + $0x46c] ss:$16 sps:$4 sm:$0xff]   ;;  %v3425_v22 = vld [vmem:[%s4761_s1 + $0x460] ss:$16 sps:$4 sm:$0xff]  }
  0x54   :  { %1859 = vmatprep.subr.bf16.mxu0 %v3341_v23  ;;  %2064 = vmatprep.subr.bf16.mxu1 %v3344_v24  ;;  %v3428_v23 = vld [vmem:[%s4761_s1 + $0x468] ss:$16 sps:$4 sm:$0xff]   ;;  %v3433_v24 = vld [vmem:[%s4761_s1 + $0x484] ss:$16 sps:$4 sm:$0xff]  }
  0x57   :  { %1860 = vmatpush1.bf16.msra.mxu0 %v3339_v25  ;;  %2065 = vmatpush1.bf16.msra.mxu1 %v3342_v26  ;;  %v3436_v25 = vld [vmem:[%s4761_s1 + $0x48c] ss:$16 sps:$4 sm:$0xff]   ;;  %v3431_v26 = vld [vmem:[%s4761_s1 + $0x480] ss:$16 sps:$4 sm:$0xff]  }
  0x58   :  { %1861 = vmatprep.subr.bf16.mxu0 %v3347_v27  ;;  %2066 = vmatprep.subr.bf16.mxu1 %v3350_v28  ;;  %v3434_v27 = vld [vmem:[%s4761_s1 + $0x488] ss:$16 sps:$4 sm:$0xff]   ;;  %v3439_v28 = vld [vmem:[%s4761_s1 + $0x4a4] ss:$16 sps:$4 sm:$0xff]  }
  0x5b   :  { %1862 = vmatpush1.bf16.msra.mxu0 %v3345_v31  ;;  %2067 = vmatpush1.bf16.msra.mxu1 %v3348_v32  ;;  %v3440_v31 = vld [vmem:[%s4761_s1 + $0x4a8] ss:$16 sps:$4 sm:$0xff]   ;;  %v3445_v32 = vld [vmem:[%s4761_s1 + $0x4c4] ss:$16 sps:$4 sm:$0xff]  }
  0x5c   :  { %1863 = vmatprep.subr.bf16.mxu0 %v3353_v33  ;;  %2068 = vmatprep.subr.bf16.mxu1 %v3356_v34  ;;  %v3448_v33 = vld [vmem:[%s4761_s1 + $0x4cc] ss:$16 sps:$4 sm:$0xff]   ;;  %v3443_v34 = vld [vmem:[%s4761_s1 + $0x4c0] ss:$16 sps:$4 sm:$0xff]  }
  0x5f   :  { %1864 = vmatpush1.bf16.msra.mxu0 %v3351_v35  ;;  %2069 = vmatpush1.bf16.msra.mxu1 %v3354_v36  ;;  %v3446_v35 = vld [vmem:[%s4761_s1 + $0x4c8] ss:$16 sps:$4 sm:$0xff]   ;;  %v3451_v36 = vld [vmem:[%s4761_s1 + $0x4e4] ss:$16 sps:$4 sm:$0xff]  }
  0x60   :  { %1865 = vmatprep.subr.bf16.mxu0 %v3359_v37  ;;  %2070 = vmatprep.subr.bf16.mxu1 %v3362_v38  ;;  %v3454_v37 = vld [vmem:[%s4761_s1 + $0x4ec] ss:$16 sps:$4 sm:$0xff]   ;;  %v3449_v38 = vld [vmem:[%s4761_s1 + $0x4e0] ss:$16 sps:$4 sm:$0xff]  }
  0x63   :  { %1866 = vmatpush1.bf16.msra.mxu0 %v3357_v39  ;;  %2071 = vmatpush1.bf16.msra.mxu1 %v3360_v40  ;;  %v3452_v39 = vld [vmem:[%s4761_s1 + $0x4e8] ss:$16 sps:$4 sm:$0xff]   ;;  %v3457_v40 = vld [vmem:[%s4761_s1 + $0x504] ss:$16 sps:$4 sm:$0xff]  }
  0x64   :  { %1867 = vmatprep.subr.bf16.mxu0 %v3365_v41  ;;  %2072 = vmatprep.subr.bf16.mxu1 %v3368_v42  ;;  %v3460_v41 = vld [vmem:[%s4761_s1 + $0x50c] ss:$16 sps:$4 sm:$0xff]   ;;  %v3455_v42 = vld [vmem:[%s4761_s1 + $0x500] ss:$16 sps:$4 sm:$0xff]  }
  0x67   :  { %1868 = vmatpush1.bf16.msra.mxu0 %v3363_v43  ;;  %2073 = vmatpush1.bf16.msra.mxu1 %v3366_v44  ;;  %v3458_v43 = vld [vmem:[%s4761_s1 + $0x508] ss:$16 sps:$4 sm:$0xff]   ;;  %v3463_v44 = vld [vmem:[%s4761_s1 + $0x524] ss:$16 sps:$4 sm:$0xff]  }
  0x68   :  { %1869 = vmatprep.subr.bf16.mxu0 %v3371_v45  ;;  %2074 = vmatprep.subr.bf16.mxu1 %v3374_v46  ;;  %v3466_v45 = vld [vmem:[%s4761_s1 + $0x52c] ss:$16 sps:$4 sm:$0xff]   ;;  %v3461_v46 = vld [vmem:[%s4761_s1 + $0x520] ss:$16 sps:$4 sm:$0xff]  }
  0x6b   :  { %1870 = vmatpush1.bf16.msra.mxu0 %v3369_v47  ;;  %2075 = vmatpush1.bf16.msra.mxu1 %v3372_v48  ;;  %v3464_v47 = vld [vmem:[%s4761_s1 + $0x528] ss:$16 sps:$4 sm:$0xff]   ;;  %v3469_v48 = vld [vmem:[%s4761_s1 + $0x544] ss:$16 sps:$4 sm:$0xff]  }
  0x6c   :  { %1871 = vmatprep.subr.bf16.mxu0 %v3377_v49  ;;  %2076 = vmatprep.subr.bf16.mxu1 %v3380_v50  ;;  %v3472_v49 = vld [vmem:[%s4761_s1 + $0x54c] ss:$16 sps:$4 sm:$0xff]   ;;  %v3467_v50 = vld [vmem:[%s4761_s1 + $0x540] ss:$16 sps:$4 sm:$0xff]  }
  0x6f   :  { %1872 = vmatpush1.bf16.msra.mxu0 %v3375_v51  ;;  %2077 = vmatpush1.bf16.msra.mxu1 %v3378_v52  ;;  %v3470_v51 = vld [vmem:[%s4761_s1 + $0x548] ss:$16 sps:$4 sm:$0xff]   ;;  %v3475_v52 = vld [vmem:[%s4761_s1 + $0x564] ss:$16 sps:$4 sm:$0xff]  }
  0x70   :  { %1873 = vmatprep.subr.bf16.mxu0 %v3383_v53  ;;  %2078 = vmatprep.subr.bf16.mxu1 %v3386_v54  ;;  %v3478_v53 = vld [vmem:[%s4761_s1 + $0x56c] ss:$16 sps:$4 sm:$0xff]   ;;  %v3473_v54 = vld [vmem:[%s4761_s1 + $0x560] ss:$16 sps:$4 sm:$0xff]  }
  0x73   :  { %1874 = vmatpush1.bf16.msra.mxu0 %v3381_v55  ;;  %2079 = vmatpush1.bf16.msra.mxu1 %v3384_v56  ;;  %v3476_v55 = vld [vmem:[%s4761_s1 + $0x568] ss:$16 sps:$4 sm:$0xff]   ;;  %v3481_v56 = vld [vmem:[%s4761_s1 + $0x584] ss:$16 sps:$4 sm:$0xff]  }
  0x74   :  { %1875 = vmatprep.subr.bf16.mxu0 %v3389_v57  ;;  %2080 = vmatprep.subr.bf16.mxu1 %v3392_v58  ;;  %v3484_v57 = vld [vmem:[%s4761_s1 + $0x58c] ss:$16 sps:$4 sm:$0xff]   ;;  %v3479_v58 = vld [vmem:[%s4761_s1 + $0x580] ss:$16 sps:$4 sm:$0xff]  }
  0x77   :  { %1876 = vmatpush1.bf16.msra.mxu0 %v3387_v59  ;;  %2081 = vmatpush1.bf16.msra.mxu1 %v3390_v60  ;;  %v3482_v59 = vld [vmem:[%s4761_s1 + $0x588] ss:$16 sps:$4 sm:$0xff]   ;;  %v3487_v60 = vld [vmem:[%s4761_s1 + $0x5a4] ss:$16 sps:$4 sm:$0xff]  }
  0x78   :  { %1877 = vmatprep.subr.bf16.mxu0 %v3395_v61  ;;  %2082 = vmatprep.subr.bf16.mxu1 %v3398_v62  ;;  %v3490_v61 = vld [vmem:[%s4761_s1 + $0x5ac] ss:$16 sps:$4 sm:$0xff]   ;;  %v3485_v62 = vld [vmem:[%s4761_s1 + $0x5a0] ss:$16 sps:$4 sm:$0xff]  }
  0x7b   :  { %1878 = vmatpush1.bf16.msra.mxu0 %v3393_v63  ;;  %2083 = vmatpush1.bf16.msra.mxu1 %v3396_v0  ;;  %v3488_v63 = vld [vmem:[%s4761_s1 + $0x5a8] ss:$16 sps:$4 sm:$0xff]   ;;  %v3493_v0 = vld [vmem:[%s4761_s1 + $0x5c4] ss:$16 sps:$4 sm:$0xff]  }
  0x7c   :  { %1879 = vmatprep.subr.bf16.mxu0 %v3401_v1  ;;  %2084 = vmatprep.subr.bf16.mxu1 %v3404_v2  ;;  %v3496_v1 = vld [vmem:[%s4761_s1 + $0x5cc] ss:$16 sps:$4 sm:$0xff]   ;;  %v3491_v2 = vld [vmem:[%s4761_s1 + $0x5c0] ss:$16 sps:$4 sm:$0xff]  }
  0x7f   :  { %1880 = vmatpush1.bf16.msra.mxu0 %v3399_v3  ;;  %2085 = vmatpush1.bf16.msra.mxu1 %v3402_v4  ;;  %v3494_v3 = vld [vmem:[%s4761_s1 + $0x5c8] ss:$16 sps:$4 sm:$0xff]   ;;  %v3499_v4 = vld [vmem:[%s4761_s1 + $0x5e4] ss:$16 sps:$4 sm:$0xff]  }
  0x80   :  { %1890 = vmatprep.subr.bf16.mxu0 %v3409_v5  ;;  %2095 = vmatprep.subr.bf16.mxu1 %v3412_v6  ;;  %v3502_v5 = vld [vmem:[%s4761_s1 + $0x5ec] ss:$16 sps:$4 sm:$0xff]   ;;  %v3497_v6 = vld [vmem:[%s4761_s1 + $0x5e0] ss:$16 sps:$4 sm:$0xff]  }
  0x82   :  { %1882 = vmatmul.mubr.bf16.vlgmr.msra.gmra.mrb[0].mxu0 %v2571_v7  ;;  %2087 = vmatmul.mubr.bf16.vlgmr.msra.gmra.mrb[0].mxu1 %v2571_v7  ;;  %v3500_v7 = vld [vmem:[%s4761_s1 + $0x5e8] ss:$16 sps:$4 sm:$0xff]  }
  0x83   :  { %1891 = vmatpush1.bf16.msra.mxu0 %v3407_v8  ;;  %2096 = vmatpush1.bf16.msra.mxu1 %v3410_v9  ;;  %v3507_v8 = vld [vmem:[%s4761_s1 + $0x604] ss:$16 sps:$4 sm:$0xff]   ;;  %v3510_v9 = vld [vmem:[%s4761_s1 + $0x60c] ss:$16 sps:$4 sm:$0xff]  }
  0x84   :  { %1892 = vmatprep.subr.bf16.mxu0 %v3415_v10  ;;  %2097 = vmatprep.subr.bf16.mxu1 %v3418_v12  ;;  %v2573_v10 = vcombine.low %v4108_v11, %v4108_v11  ;;  %v3505_v12 = vld [vmem:[%s4761_s1 + $0x600] ss:$16 sps:$4 sm:$0xff]   ;;  %v3513_v11 = vld [vmem:[%s4761_s1 + $0x624] ss:$16 sps:$4 sm:$0xff]  }
  0x85   :  { %1922 = vmatprep.mubr.bf16.mxu0 %v2574_v13  ;;  %2127 = vmatprep.mubr.bf16.mxu1 %v2574_v13  ;;  %v4303_v13 = vld [vmem:[%s4762_s0 + $0x18] sm:$0xff] }
  0x87   :  { %1893 = vmatpush1.bf16.msra.mxu0 %v3413_v14  ;;  %2098 = vmatpush1.bf16.msra.mxu1 %v3416_v15  ;;  %v3508_v14 = vld [vmem:[%s4761_s1 + $0x608] ss:$16 sps:$4 sm:$0xff]   ;;  %v3516_v15 = vld [vmem:[%s4761_s1 + $0x62c] ss:$16 sps:$4 sm:$0xff]  }
  0x88   :  { %1894 = vmatprep.subr.bf16.mxu0 %v3421_v16  ;;  %2099 = vmatprep.subr.bf16.mxu1 %v3424_v17  ;;  %v2576_v16 = vcombine.high %v4303_v13, %v4303_v13  ;;  %v3511_v17 = vld [vmem:[%s4761_s1 + $0x620] ss:$16 sps:$4 sm:$0xff]  }
  0x8b   :  { %1895 = vmatpush1.bf16.msra.mxu0 %v3419_v18  ;;  %2100 = vmatpush1.bf16.msra.mxu1 %v3422_v19  ;;  %v3514_v18 = vld [vmem:[%s4761_s1 + $0x628] ss:$16 sps:$4 sm:$0xff]   ;;  %v3519_v19 = vld [vmem:[%s4761_s1 + $0x644] ss:$16 sps:$4 sm:$0xff]  }
  0x8c   :  { %1896 = vmatprep.subr.bf16.mxu0 %v3427_v20  ;;  %2101 = vmatprep.subr.bf16.mxu1 %v3430_v21  ;;  %v3522_v20 = vld [vmem:[%s4761_s1 + $0x64c] ss:$16 sps:$4 sm:$0xff]   ;;  %v3517_v21 = vld [vmem:[%s4761_s1 + $0x640] ss:$16 sps:$4 sm:$0xff]  }
  0x8f   :  { %1897 = vmatpush1.bf16.msra.mxu0 %v3425_v22  ;;  %2102 = vmatpush1.bf16.msra.mxu1 %v3428_v23  ;;  %v3520_v22 = vld [vmem:[%s4761_s1 + $0x648] ss:$16 sps:$4 sm:$0xff]   ;;  %v3525_v23 = vld [vmem:[%s4761_s1 + $0x664] ss:$16 sps:$4 sm:$0xff]  }
  0x90   :  { %1898 = vmatprep.subr.bf16.mxu0 %v3433_v24  ;;  %2103 = vmatprep.subr.bf16.mxu1 %v3436_v25  ;;  %v3528_v24 = vld [vmem:[%s4761_s1 + $0x66c] ss:$16 sps:$4 sm:$0xff]   ;;  %v3523_v25 = vld [vmem:[%s4761_s1 + $0x660] ss:$16 sps:$4 sm:$0xff]  }
  0x93   :  { %1899 = vmatpush1.bf16.msra.mxu0 %v3431_v26  ;;  %2104 = vmatpush1.bf16.msra.mxu1 %v3434_v27  ;;  %v3526_v26 = vld [vmem:[%s4761_s1 + $0x668] ss:$16 sps:$4 sm:$0xff]   ;;  %v3531_v27 = vld [vmem:[%s4761_s1 + $0x684] ss:$16 sps:$4 sm:$0xff]  }
  0x94   :  { %1900 = vmatprep.subr.bf16.mxu0 %v3439_v28  ;;  %2105 = vmatprep.subr.bf16.mxu1 %v3442_v29  ;;  %v3534_v28 = vld [vmem:[%s4761_s1 + $0x68c] ss:$16 sps:$4 sm:$0xff]   ;;  %v3529_v29 = vld [vmem:[%s4761_s1 + $0x680] ss:$16 sps:$4 sm:$0xff]  }
  0x97   :  { %1901 = vmatpush1.bf16.msra.mxu0 %v3437_v30  ;;  %2106 = vmatpush1.bf16.msra.mxu1 %v3440_v31  ;;  %v3532_v30 = vld [vmem:[%s4761_s1 + $0x688] ss:$16 sps:$4 sm:$0xff]   ;;  %v3537_v31 = vld [vmem:[%s4761_s1 + $0x6a4] ss:$16 sps:$4 sm:$0xff]  }
  0x98   :  { %1902 = vmatprep.subr.bf16.mxu0 %v3445_v32  ;;  %2107 = vmatprep.subr.bf16.mxu1 %v3448_v33  ;;  %v3540_v32 = vld [vmem:[%s4761_s1 + $0x6ac] ss:$16 sps:$4 sm:$0xff]   ;;  %v3535_v33 = vld [vmem:[%s4761_s1 + $0x6a0] ss:$16 sps:$4 sm:$0xff]  }
  0x9b   :  { %1903 = vmatpush1.bf16.msra.mxu0 %v3443_v34  ;;  %2108 = vmatpush1.bf16.msra.mxu1 %v3446_v35  ;;  %v3538_v34 = vld [vmem:[%s4761_s1 + $0x6a8] ss:$16 sps:$4 sm:$0xff]   ;;  %v3543_v35 = vld [vmem:[%s4761_s1 + $0x6c4] ss:$16 sps:$4 sm:$0xff]  }
  0x9c   :  { %1904 = vmatprep.subr.bf16.mxu0 %v3451_v36  ;;  %2109 = vmatprep.subr.bf16.mxu1 %v3454_v37  ;;  %v3546_v36 = vld [vmem:[%s4761_s1 + $0x6cc] ss:$16 sps:$4 sm:$0xff]   ;;  %v3541_v37 = vld [vmem:[%s4761_s1 + $0x6c0] ss:$16 sps:$4 sm:$0xff]  }
  0x9f   :  { %1905 = vmatpush1.bf16.msra.mxu0 %v3449_v38  ;;  %2110 = vmatpush1.bf16.msra.mxu1 %v3452_v39  ;;  %v3544_v38 = vld [vmem:[%s4761_s1 + $0x6c8] ss:$16 sps:$4 sm:$0xff]   ;;  %v3549_v39 = vld [vmem:[%s4761_s1 + $0x6e4] ss:$16 sps:$4 sm:$0xff]  }
  0xa0   :  { %1906 = vmatprep.subr.bf16.mxu0 %v3457_v40  ;;  %2111 = vmatprep.subr.bf16.mxu1 %v3460_v41  ;;  %v3552_v40 = vld [vmem:[%s4761_s1 + $0x6ec] ss:$16 sps:$4 sm:$0xff]   ;;  %v3547_v41 = vld [vmem:[%s4761_s1 + $0x6e0] ss:$16 sps:$4 sm:$0xff]  }
  0xa3   :  { %1907 = vmatpush1.bf16.msra.mxu0 %v3455_v42  ;;  %2112 = vmatpush1.bf16.msra.mxu1 %v3458_v43  ;;  %v3550_v42 = vld [vmem:[%s4761_s1 + $0x6e8] ss:$16 sps:$4 sm:$0xff]   ;;  %v3555_v43 = vld [vmem:[%s4761_s1 + $0x704] ss:$16 sps:$4 sm:$0xff]  }
  0xa4   :  { %1908 = vmatprep.subr.bf16.mxu0 %v3463_v44  ;;  %2113 = vmatprep.subr.bf16.mxu1 %v3466_v45  ;;  %v3558_v44 = vld [vmem:[%s4761_s1 + $0x70c] ss:$16 sps:$4 sm:$0xff]   ;;  %v3553_v45 = vld [vmem:[%s4761_s1 + $0x700] ss:$16 sps:$4 sm:$0xff]  }
  0xa7   :  { %1909 = vmatpush1.bf16.msra.mxu0 %v3461_v46  ;;  %2114 = vmatpush1.bf16.msra.mxu1 %v3464_v47  ;;  %v3556_v46 = vld [vmem:[%s4761_s1 + $0x708] ss:$16 sps:$4 sm:$0xff]   ;;  %v3561_v47 = vld [vmem:[%s4761_s1 + $0x724] ss:$16 sps:$4 sm:$0xff]  }
  0xa8   :  { %1910 = vmatprep.subr.bf16.mxu0 %v3469_v48  ;;  %2115 = vmatprep.subr.bf16.mxu1 %v3472_v49  ;;  %v3564_v48 = vld [vmem:[%s4761_s1 + $0x72c] ss:$16 sps:$4 sm:$0xff]   ;;  %v3559_v49 = vld [vmem:[%s4761_s1 + $0x720] ss:$16 sps:$4 sm:$0xff]  }
  0xab   :  { %1911 = vmatpush1.bf16.msra.mxu0 %v3467_v50  ;;  %2116 = vmatpush1.bf16.msra.mxu1 %v3470_v51  ;;  %v3562_v50 = vld [vmem:[%s4761_s1 + $0x728] ss:$16 sps:$4 sm:$0xff]   ;;  %v3567_v51 = vld [vmem:[%s4761_s1 + $0x744] ss:$16 sps:$4 sm:$0xff]  }
  0xac   :  { %1912 = vmatprep.subr.bf16.mxu0 %v3475_v52  ;;  %2117 = vmatprep.subr.bf16.mxu1 %v3478_v53  ;;  %v3570_v52 = vld [vmem:[%s4761_s1 + $0x74c] ss:$16 sps:$4 sm:$0xff]   ;;  %v3565_v53 = vld [vmem:[%s4761_s1 + $0x740] ss:$16 sps:$4 sm:$0xff]  }
  0xaf   :  { %1913 = vmatpush1.bf16.msra.mxu0 %v3473_v54  ;;  %2118 = vmatpush1.bf16.msra.mxu1 %v3476_v55  ;;  %v3568_v54 = vld [vmem:[%s4761_s1 + $0x748] ss:$16 sps:$4 sm:$0xff]   ;;  %v3573_v55 = vld [vmem:[%s4761_s1 + $0x764] ss:$16 sps:$4 sm:$0xff]  }
  0xb0   :  { %1914 = vmatprep.subr.bf16.mxu0 %v3481_v56  ;;  %2119 = vmatprep.subr.bf16.mxu1 %v3484_v57  ;;  %v3576_v56 = vld [vmem:[%s4761_s1 + $0x76c] ss:$16 sps:$4 sm:$0xff]   ;;  %v3571_v57 = vld [vmem:[%s4761_s1 + $0x760] ss:$16 sps:$4 sm:$0xff]  }
  0xb3   :  { %1915 = vmatpush1.bf16.msra.mxu0 %v3479_v58  ;;  %2120 = vmatpush1.bf16.msra.mxu1 %v3482_v59  ;;  %v3574_v58 = vld [vmem:[%s4761_s1 + $0x768] ss:$16 sps:$4 sm:$0xff]   ;;  %v3579_v59 = vld [vmem:[%s4761_s1 + $0x784] ss:$16 sps:$4 sm:$0xff]  }
  0xb4   :  { %1916 = vmatprep.subr.bf16.mxu0 %v3487_v60  ;;  %2121 = vmatprep.subr.bf16.mxu1 %v3490_v61  ;;  %v3582_v60 = vld [vmem:[%s4761_s1 + $0x78c] ss:$16 sps:$4 sm:$0xff]   ;;  %v3577_v61 = vld [vmem:[%s4761_s1 + $0x780] ss:$16 sps:$4 sm:$0xff]  }
  0xb7   :  { %1917 = vmatpush1.bf16.msra.mxu0 %v3485_v62  ;;  %2122 = vmatpush1.bf16.msra.mxu1 %v3488_v63  ;;  %v3580_v62 = vld [vmem:[%s4761_s1 + $0x788] ss:$16 sps:$4 sm:$0xff]   ;;  %v3585_v63 = vld [vmem:[%s4761_s1 + $0x7a4] ss:$16 sps:$4 sm:$0xff]  }
  0xb8   :  { %1918 = vmatprep.subr.bf16.mxu0 %v3493_v0  ;;  %2123 = vmatprep.subr.bf16.mxu1 %v3496_v1  ;;  %v3588_v0 = vld [vmem:[%s4761_s1 + $0x7ac] ss:$16 sps:$4 sm:$0xff]   ;;  %v3583_v1 = vld [vmem:[%s4761_s1 + $0x7a0] ss:$16 sps:$4 sm:$0xff]  }
  0xbb   :  { %1919 = vmatpush1.bf16.msra.mxu0 %v3491_v2  ;;  %2124 = vmatpush1.bf16.msra.mxu1 %v3494_v3  ;;  %v3586_v2 = vld [vmem:[%s4761_s1 + $0x7a8] ss:$16 sps:$4 sm:$0xff]   ;;  %v3591_v3 = vld [vmem:[%s4761_s1 + $0x7c4] ss:$16 sps:$4 sm:$0xff]  }
  0xbc   :  { %1920 = vmatprep.subr.bf16.mxu0 %v3499_v4  ;;  %2125 = vmatprep.subr.bf16.mxu1 %v3502_v5  ;;  %v3594_v4 = vld [vmem:[%s4761_s1 + $0x7cc] ss:$16 sps:$4 sm:$0xff]   ;;  %v3589_v5 = vld [vmem:[%s4761_s1 + $0x7c0] ss:$16 sps:$4 sm:$0xff]  }
  0xbf   :  { %1921 = vmatpush1.bf16.msra.mxu0 %v3497_v6  ;;  %2126 = vmatpush1.bf16.msra.mxu1 %v3500_v7  ;;  %v3592_v6 = vld [vmem:[%s4761_s1 + $0x7c8] ss:$16 sps:$4 sm:$0xff]   ;;  %v3597_v7 = vld [vmem:[%s4761_s1 + $0x7e4] ss:$16 sps:$4 sm:$0xff]  }
  0xc0   :  { %1931 = vmatprep.subr.bf16.mxu0 %v3507_v8  ;;  %2136 = vmatprep.subr.bf16.mxu1 %v3510_v9  ;;  %v3600_v8 = vld [vmem:[%s4761_s1 + $0x7ec] ss:$16 sps:$4 sm:$0xff]   ;;  %v3595_v9 = vld [vmem:[%s4761_s1 + $0x7e0] ss:$16 sps:$4 sm:$0xff]  }
  0xc2   :  { %1923 = vmatmul.mubr.bf16.vlgmr.msra.gmra.mrb[0].mxu0 %v2573_v10  ;;  %2128 = vmatmul.mubr.bf16.vlgmr.msra.gmra.mrb[0].mxu1 %v2573_v10  ;;  %v3598_v10 = vld [vmem:[%s4761_s1 + $0x7e8] ss:$16 sps:$4 sm:$0xff]  }
  0xc3   :  { %1932 = vmatpush1.bf16.msra.mxu0 %v3505_v12  ;;  %2137 = vmatpush1.bf16.msra.mxu1 %v3508_v14  ;;  %v3605_v12 = vld [vmem:[%s4761_s1 + $0x804] ss:$16 sps:$4 sm:$0xff]   ;;  %v3608_v14 = vld [vmem:[%s4761_s1 + $0x80c] ss:$16 sps:$4 sm:$0xff]  }
  0xc4   :  { %1933 = vmatprep.subr.bf16.mxu0 %v3513_v11  ;;  %2138 = vmatprep.subr.bf16.mxu1 %v3516_v15  ;;  %v2575_v11 = vcombine.low %v4303_v13, %v4303_v13  ;;  %v3603_v15 = vld [vmem:[%s4761_s1 + $0x800] ss:$16 sps:$4 sm:$0xff]   ;;  %v3614_v13 = vld [vmem:[%s4761_s1 + $0x82c] ss:$16 sps:$4 sm:$0xff]  }
  0xc5   :  { %1963 = vmatprep.mubr.bf16.mxu0 %v2576_v16  ;;  %2168 = vmatprep.mubr.bf16.mxu1 %v2576_v16  ;;  %v3606_v16 = vld [vmem:[%s4761_s1 + $0x808] ss:$16 sps:$4 sm:$0xff]  }
  0xc7   :  { %1934 = vmatpush1.bf16.msra.mxu0 %v3511_v17  ;;  %2139 = vmatpush1.bf16.msra.mxu1 %v3514_v18  ;;  %v3611_v17 = vld [vmem:[%s4761_s1 + $0x824] ss:$16 sps:$4 sm:$0xff]   ;;  %v3609_v18 = vld [vmem:[%s4761_s1 + $0x820] ss:$16 sps:$4 sm:$0xff]  }
  0xc8   :  { %1935 = vmatprep.subr.bf16.mxu0 %v3519_v19  ;;  %2140 = vmatprep.subr.bf16.mxu1 %v3522_v20  ;;  %v3612_v19 = vld [vmem:[%s4761_s1 + $0x828] ss:$16 sps:$4 sm:$0xff]   ;;  %v3617_v20 = vld [vmem:[%s4761_s1 + $0x844] ss:$16 sps:$4 sm:$0xff]  }
  0xcb   :  { %1936 = vmatpush1.bf16.msra.mxu0 %v3517_v21  ;;  %2141 = vmatpush1.bf16.msra.mxu1 %v3520_v22  ;;  %v3620_v21 = vld [vmem:[%s4761_s1 + $0x84c] ss:$16 sps:$4 sm:$0xff]   ;;  %v3660_v22 = vmov 0  }
  0xcc   :  { %1937 = vmatprep.subr.bf16.mxu0 %v3525_v23  ;;  %2142 = vmatprep.subr.bf16.mxu1 %v3528_v24  ;;  %v3615_v23 = vld [vmem:[%s4761_s1 + $0x840] ss:$16 sps:$4 sm:$0xff]   ;;  %v3618_v24 = vld [vmem:[%s4761_s1 + $0x848] ss:$16 sps:$4 sm:$0xff]  }
  0xcf   :  { %1938 = vmatpush1.bf16.msra.mxu0 %v3523_v25  ;;  %2143 = vmatpush1.bf16.msra.mxu1 %v3526_v26  ;;  %v3623_v25 = vld [vmem:[%s4761_s1 + $0x864] ss:$16 sps:$4 sm:$0xff]   ;;  %v3626_v26 = vld [vmem:[%s4761_s1 + $0x86c] ss:$16 sps:$4 sm:$0xff]  }
  0xd0   :  { %1939 = vmatprep.subr.bf16.mxu0 %v3531_v27  ;;  %2144 = vmatprep.subr.bf16.mxu1 %v3534_v28  ;;  %v3621_v27 = vld [vmem:[%s4761_s1 + $0x860] ss:$16 sps:$4 sm:$0xff]   ;;  %v3624_v28 = vld [vmem:[%s4761_s1 + $0x868] ss:$16 sps:$4 sm:$0xff]  }
  0xd3   :  { %1940 = vmatpush1.bf16.msra.mxu0 %v3529_v29  ;;  %2145 = vmatpush1.bf16.msra.mxu1 %v3532_v30  ;;  %v3629_v29 = vld [vmem:[%s4761_s1 + $0x884] ss:$16 sps:$4 sm:$0xff]   ;;  %v3632_v30 = vld [vmem:[%s4761_s1 + $0x88c] ss:$16 sps:$4 sm:$0xff]  }
  0xd4   :  { %1941 = vmatprep.subr.bf16.mxu0 %v3537_v31  ;;  %2146 = vmatprep.subr.bf16.mxu1 %v3540_v32  ;;  %v3627_v31 = vld [vmem:[%s4761_s1 + $0x880] ss:$16 sps:$4 sm:$0xff]   ;;  %v3630_v32 = vld [vmem:[%s4761_s1 + $0x888] ss:$16 sps:$4 sm:$0xff]  }
  0xd7   :  { %1942 = vmatpush1.bf16.msra.mxu0 %v3535_v33  ;;  %2147 = vmatpush1.bf16.msra.mxu1 %v3538_v34  ;;  %v3635_v33 = vld [vmem:[%s4761_s1 + $0x8a4] ss:$16 sps:$4 sm:$0xff]   ;;  %v3638_v34 = vld [vmem:[%s4761_s1 + $0x8ac] ss:$16 sps:$4 sm:$0xff]  }
  0xd8   :  { %1943 = vmatprep.subr.bf16.mxu0 %v3543_v35  ;;  %2148 = vmatprep.subr.bf16.mxu1 %v3546_v36  ;;  %v3633_v35 = vld [vmem:[%s4761_s1 + $0x8a0] ss:$16 sps:$4 sm:$0xff]   ;;  %v3636_v36 = vld [vmem:[%s4761_s1 + $0x8a8] ss:$16 sps:$4 sm:$0xff]  }
  0xdb   :  { %1944 = vmatpush1.bf16.msra.mxu0 %v3541_v37  ;;  %2149 = vmatpush1.bf16.msra.mxu1 %v3544_v38  ;;  %v3641_v37 = vld [vmem:[%s4761_s1 + $0x8c4] ss:$16 sps:$4 sm:$0xff]   ;;  %v3644_v38 = vld [vmem:[%s4761_s1 + $0x8cc] ss:$16 sps:$4 sm:$0xff]  }
  0xdc   :  { %1945 = vmatprep.subr.bf16.mxu0 %v3549_v39  ;;  %2150 = vmatprep.subr.bf16.mxu1 %v3552_v40  ;;  %v3639_v39 = vld [vmem:[%s4761_s1 + $0x8c0] ss:$16 sps:$4 sm:$0xff]   ;;  %v3642_v40 = vld [vmem:[%s4761_s1 + $0x8c8] ss:$16 sps:$4 sm:$0xff]  }
  0xdf   :  { %1946 = vmatpush1.bf16.msra.mxu0 %v3547_v41  ;;  %2151 = vmatpush1.bf16.msra.mxu1 %v3550_v42  ;;  %v3647_v41 = vld [vmem:[%s4761_s1 + $0x8e4] ss:$16 sps:$4 sm:$0xff]   ;;  %v3650_v42 = vld [vmem:[%s4761_s1 + $0x8ec] ss:$16 sps:$4 sm:$0xff]  }
  0xe0   :  { %1947 = vmatprep.subr.bf16.mxu0 %v3555_v43  ;;  %2152 = vmatprep.subr.bf16.mxu1 %v3558_v44  ;;  %v3645_v43 = vld [vmem:[%s4761_s1 + $0x8e0] ss:$16 sps:$4 sm:$0xff]   ;;  %v3648_v44 = vld [vmem:[%s4761_s1 + $0x8e8] ss:$16 sps:$4 sm:$0xff]  }
  0xe3   :  { %1948 = vmatpush1.bf16.msra.mxu0 %v3553_v45  ;;  %2153 = vmatpush1.bf16.msra.mxu1 %v3556_v46  ;;  %v2218_v45 = vld [vmem:[%s4763_s3] sm:$0xff]  ;;  %v2219_v46 = vld [vmem:[%s4763_s3 + $0x8] sm:$0xff] }
  0xe4   :  { %1949 = vmatprep.subr.bf16.mxu0 %v3561_v47  ;;  %2154 = vmatprep.subr.bf16.mxu1 %v3564_v48  ;;  %v3651_v47 = vld [vmem:[%s4762_s0 + $0x20] ss:$0 sps:$4 sm:$0xff]   ;;  %v4597_v48 = vpack.c.bf16 %v2219_v46, %v2218_v45 }
  0xe7   :  { %1950 = vmatpush1.bf16.msra.mxu0 %v3559_v49  ;;  %2155 = vmatpush1.bf16.msra.mxu1 %v3562_v50  ;;  %v3661_v49 = vmov 0.0|0.0   ;;  %v2220_v50 = vld [vmem:[%s4763_s3 + $0x10] sm:$0xff] }
  0xe8   :  { %1951 = vmatprep.subr.bf16.mxu0 %v3567_v51  ;;  %2156 = vmatprep.subr.bf16.mxu1 %v3570_v52  ;;  %v2221_v51 = vld [vmem:[%s4763_s3 + $0x18] sm:$0xff] }
  0xe9   :  { %v4609_v52 = vpack.c.bf16 %v2221_v51, %v2220_v50 }
  0xeb   :  { %1952 = vmatpush1.bf16.msra.mxu0 %v3565_v53  ;;  %2157 = vmatpush1.bf16.msra.mxu1 %v3568_v54  ;;  %v2222_v53 = vld [vmem:[%s4763_s3 + $0x20] sm:$0xff]  ;;  %v2223_v54 = vld [vmem:[%s4763_s3 + $0x28] sm:$0xff] }
  0xec   :  { %1953 = vmatprep.subr.bf16.mxu0 %v3573_v55  ;;  %2158 = vmatprep.subr.bf16.mxu1 %v3576_v56  ;;  %v4621_v55 = vpack.c.bf16 %v2223_v54, %v2222_v53  ;;  %v2224_v56 = vld [vmem:[%s4763_s3 + $0x30] sm:$0xff] }
  0xef   :  { %1954 = vmatpush1.bf16.msra.mxu0 %v3571_v57  ;;  %2159 = vmatpush1.bf16.msra.mxu1 %v3574_v58  ;;  %v2225_v57 = vld [vmem:[%s4763_s3 + $0x38] sm:$0xff] }
  0xf0   :  { %1955 = vmatprep.subr.bf16.mxu0 %v3579_v59  ;;  %2160 = vmatprep.subr.bf16.mxu1 %v3582_v60  ;;  %v4633_v58 = vpack.c.bf16 %v2225_v57, %v2224_v56  ;;  %v2226_v59 = vld [vmem:[%s4763_s3 + $0x40] sm:$0xff]  ;;  %v2227_v60 = vld [vmem:[%s4763_s3 + $0x48] sm:$0xff] }
  0xf3   :  { %1956 = vmatpush1.bf16.msra.mxu0 %v3577_v61  ;;  %2161 = vmatpush1.bf16.msra.mxu1 %v3580_v62  ;;  %v4645_v61 = vpack.c.bf16 %v2227_v60, %v2226_v59  ;;  %v2228_v62 = vld [vmem:[%s4763_s3 + $0x50] sm:$0xff] }
  0xf4   :  { %1957 = vmatprep.subr.bf16.mxu0 %v3585_v63  ;;  %2162 = vmatprep.subr.bf16.mxu1 %v3588_v0  ;;  %v2229_v63 = vld [vmem:[%s4763_s3 + $0x58] sm:$0xff] }
  0xf5   :  { %v4657_v0 = vpack.c.bf16 %v2229_v63, %v2228_v62 }
  0xf7   :  { %1958 = vmatpush1.bf16.msra.mxu0 %v3583_v1  ;;  %2163 = vmatpush1.bf16.msra.mxu1 %v3586_v2  ;;  %v2230_v1 = vld [vmem:[%s4763_s3 + $0x60] sm:$0xff]  ;;  %v2231_v2 = vld [vmem:[%s4763_s3 + $0x68] sm:$0xff] }
  0xf8   :  { %1959 = vmatprep.subr.bf16.mxu0 %v3591_v3  ;;  %2164 = vmatprep.subr.bf16.mxu1 %v3594_v4  ;;  %v4669_v3 = vpack.c.bf16 %v2231_v2, %v2230_v1  ;;  %v2232_v4 = vld [vmem:[%s4763_s3 + $0x70] sm:$0xff] }
  0xfb   :  { %1960 = vmatpush1.bf16.msra.mxu0 %v3589_v5  ;;  %2165 = vmatpush1.bf16.msra.mxu1 %v3592_v6  ;;  %v2233_v5 = vld [vmem:[%s4763_s3 + $0x78] sm:$0xff] }
  0xfc   :  { %1961 = vmatprep.subr.bf16.mxu0 %v3597_v7  ;;  %2166 = vmatprep.subr.bf16.mxu1 %v3600_v8  ;;  %v4683_v6 = vpack.c.bf16 %v2233_v5, %v2232_v4  ;;  %v3663_v7 = vmov 0.0   ;;  %v316_v8 = vlaneseq }
  0xff   :  { %1962 = vmatpush1.bf16.msra.mxu0 %v3595_v9  ;;  %2167 = vmatpush1.bf16.msra.mxu1 %v3598_v10  ;;  %v317_v9 = vshrl.u32 %v316_v8, 7 }
 0x100   :  { %1972 = vmatprep.subr.bf16.mxu0 %v3605_v12  ;;  %2177 = vmatprep.subr.bf16.mxu1 %v3608_v14  ;;  %v314_v12 = vld [vmem:[%s4764_s2] sm:$0xf] }
 0x101   :  { %v318_v10 = vsub.s32 0, %v317_v9  ;;  %v322_v14 = vsub.s32 1, %v317_v9 }
 0x102   :  { %1964 = vmatmul.mubr.bf16.vlgmr.msra.gmra.mrb[0].mxu0 %v2575_v11  ;;  %2169 = vmatmul.mubr.bf16.vlgmr.msra.gmra.mrb[0].mxu1 %v2575_v11 }
 0x103   :  { %1973 = vmatpush1.bf16.msra.mxu0 %v3603_v15  ;;  %2178 = vmatpush1.bf16.msra.mxu1 %v3606_v16  ;;  %v319_v11 = vrot.slane %v314_v12, %v318_v10  ;;  %v323_v15 = vrot.slane %v314_v12, %v322_v14 }
 0x104   :  { %1974 = vmatprep.subr.bf16.mxu0 %v3611_v17  ;;  %2179 = vmatprep.subr.bf16.mxu1 %v3614_v13 }
 0x105   :  { %2004 = vmatprep.mubr.bf16.mxu0 %v3660_v22  ;;  %2209 = vmatprep.mubr.bf16.mxu1 %v3660_v22 }
 0x107   :  { %1975 = vmatpush1.bf16.msra.mxu0 %v3609_v18  ;;  %2180 = vmatpush1.bf16.msra.mxu1 %v3612_v19 }
 0x108   :  { %1976 = vmatprep.subr.bf16.mxu0 %v3617_v20  ;;  %2181 = vmatprep.subr.bf16.mxu1 %v3620_v21 }
 0x10b   :  { %1977 = vmatpush1.bf16.msra.mxu0 %v3615_v23  ;;  %2182 = vmatpush1.bf16.msra.mxu1 %v3618_v24 }
 0x10c   :  { %1978 = vmatprep.subr.bf16.mxu0 %v3623_v25  ;;  %2183 = vmatprep.subr.bf16.mxu1 %v3626_v26 }
 0x10f   :  { %1979 = vmatpush1.bf16.msra.mxu0 %v3621_v27  ;;  %2184 = vmatpush1.bf16.msra.mxu1 %v3624_v28  ;;  %v326_v27 = vsub.s32 2, %v317_v9  ;;  %v330_v28 = vsub.s32 3, %v317_v9 }
 0x110   :  { %1980 = vmatprep.subr.bf16.mxu0 %v3629_v29  ;;  %2185 = vmatprep.subr.bf16.mxu1 %v3632_v30 }
 0x111   :  { %v327_v29 = vrot.slane %v314_v12, %v326_v27  ;;  %v331_v30 = vrot.slane %v314_v12, %v330_v28 }
 0x113   :  { %1981 = vmatpush1.bf16.msra.mxu0 %v3627_v31  ;;  %2186 = vmatpush1.bf16.msra.mxu1 %v3630_v32 }
 0x114   :  { %1982 = vmatprep.subr.bf16.mxu0 %v3635_v33  ;;  %2187 = vmatprep.subr.bf16.mxu1 %v3638_v34 }
 0x117   :  { %1983 = vmatpush1.bf16.msra.mxu0 %v3633_v35  ;;  %2188 = vmatpush1.bf16.msra.mxu1 %v3636_v36  ;;  %v2866_v35 = vld [vmem:[%s4765_s4] ss:$0 sm:$0xff] }
 0x118   :  { %1984 = vmatprep.subr.bf16.mxu0 %v3641_v37  ;;  %2189 = vmatprep.subr.bf16.mxu1 %v3644_v38 }
 0x11b   :  { %1985 = vmatpush1.bf16.msra.mxu0 %v3639_v39  ;;  %2190 = vmatpush1.bf16.msra.mxu1 %v3642_v40 }
 0x11c   :  { %1986 = vmatprep.subr.bf16.mxu0 %v3647_v41  ;;  %2191 = vmatprep.subr.bf16.mxu1 %v3650_v42 }
 0x11f   :  { %1987 = vmatpush1.bf16.msra.mxu0 %v3645_v43  ;;  %2192 = vmatpush1.bf16.msra.mxu1 %v3648_v44 }
 0x120   :  { %3075 = vmatprep.subr.bf16.mxu0 %v3661_v49  ;;  %3099 = vmatprep.subr.bf16.mxu1 %v3661_v49 }
 0x122   :  { %2005 = vmatmul.mubr.bf16.vlgmr.msra.gmra.mrb[0].mxu0 %v3651_v47  ;;  %2210 = vmatmul.mubr.bf16.vlgmr.msra.gmra.mrb[0].mxu1 %v3651_v47 }
 0x123   :  { %3077 = vmatpush3.bf16.msra.mxu0 %v4597_v48  ;;  %3101 = vmatpush3.bf16.msra.mxu1 %v4597_v48 }
 0x124   :  { %3078 = vmatprep.subr.bf16.mxu0 %v3661_v49  ;;  %3102 = vmatprep.subr.bf16.mxu1 %v3661_v49 }
 0x125   :  { %2967 = vmatprep.mubr.msk.f32.mxu0 %vm3662_vm0, %v3663_v7  ;;  %3002 = vmatprep.mubr.msk.f32.mxu1 %vm3662_vm0, %v3663_v7 }
 0x127   :  { %3080 = vmatpush3.bf16.msra.mxu0 %v4609_v52  ;;  %3104 = vmatpush3.bf16.msra.mxu1 %v4609_v52 }
 0x128   :  { %3081 = vmatprep.subr.bf16.mxu0 %v3661_v49  ;;  %3105 = vmatprep.subr.bf16.mxu1 %v3661_v49 }
 0x12b   :  { %3083 = vmatpush3.bf16.msra.mxu0 %v4621_v55  ;;  %3107 = vmatpush3.bf16.msra.mxu1 %v4621_v55 }
 0x12c   :  { %3084 = vmatprep.subr.bf16.mxu0 %v3661_v49  ;;  %3108 = vmatprep.subr.bf16.mxu1 %v3661_v49 }
 0x12f   :  { %3086 = vmatpush3.bf16.msra.mxu0 %v4633_v58  ;;  %3110 = vmatpush3.bf16.msra.mxu1 %v4633_v58 }
 0x130   :  { %3087 = vmatprep.subr.bf16.mxu0 %v3661_v49  ;;  %3111 = vmatprep.subr.bf16.mxu1 %v3661_v49 }
 0x133   :  { %3089 = vmatpush3.bf16.msra.mxu0 %v4645_v61  ;;  %3113 = vmatpush3.bf16.msra.mxu1 %v4645_v61 }
 0x134   :  { %3090 = vmatprep.subr.bf16.mxu0 %v3661_v49  ;;  %3114 = vmatprep.subr.bf16.mxu1 %v3661_v49 }
 0x137   :  { %3092 = vmatpush3.bf16.msra.mxu0 %v4657_v0  ;;  %3116 = vmatpush3.bf16.msra.mxu1 %v4657_v0 }
 0x138   :  { %3093 = vmatprep.subr.bf16.mxu0 %v3661_v49  ;;  %3117 = vmatprep.subr.bf16.mxu1 %v3661_v49 }
 0x13b   :  { %3095 = vmatpush3.bf16.msra.mxu0 %v4669_v3  ;;  %3119 = vmatpush3.bf16.msra.mxu1 %v4669_v3 }
 0x13c   :  { %3096 = vmatprep.subr.bf16.mxu0 %v3661_v49  ;;  %3120 = vmatprep.subr.bf16.mxu1 %v3661_v49 }
 0x13f   :  { %3098 = vmatpush3.bf16.msra.mxu0 %v4683_v6  ;;  %3122 = vmatpush3.bf16.msra.mxu1 %v4683_v6 }
 0x140   :  { %3123 = vmatprep.subr.bf16.mxu0 %v3661_v49  ;;  %3147 = vmatprep.subr.bf16.mxu1 %v3661_v49 }
 0x1f5   :  { %v2006_v16 = vpop.f32.mrb[0].mxu0  ;;  %v2211_v17 = vpop.f32.mrb[0].mxu1 }
 0x1f6   :  { %v4694_v13 = vadd.f32 %v2006_v16, %v319_v11  ;;  %v2008_v18 = vpop.f32.mrb[1].mxu0  ;;  %v2213_v19 = vpop.f32.mrb[1].mxu1  ;;  %v4729_v31 = vadd.f32 %v2211_v17, %v327_v29 }
 0x1f7   :  { %v4696_v20 = vadd.f32 %v2008_v18, %v323_v15  ;;  %v2010_v21 = vpop.f32.mrb[2].mxu0  ;;  %v2215_v22 = vpop.f32.mrb[2].mxu1  ;;  %v4733_v32 = vadd.f32 %v2213_v19, %v331_v30 }
 0x1f8   :  { %v2235_v23 = vmul.f32 %v4694_v13, %v4694_v13  ;;  %v2011_v24 = vpop.f32.mrb[3].mxu0  ;;  %v2216_v25 = vpop.f32.mrb[3].mxu1  ;;  %v2403_v33 = vmul.f32 %v4729_v31, %v4729_v31 }
 0x1f9   :  { %v2322_v26 = vmul.f32 %v4696_v20, %v4696_v20  ;;  %v2484_v34 = vmul.f32 %v4733_v32, %v4733_v32 }
 0x1fa   :  { %2968 = vmatmul.mubr.f32.vlgmr.msra.gmra.mrb[4].mxu0 %v2235_v23 }
 0x1fb   :  { %3125 = vmatpush3.bf16.msra.mxu0 %v4597_v48  ;;  %3003 = vmatmul.mubr.f32.vlgmr.msra.gmra.mrb[4].mxu1 %v2322_v26 }
 0x1fc   :  { %3149 = vmatpush3.bf16.msra.mxu1 %v4597_v48  ;;  %3126 = vmatprep.subr.bf16.mxu0 %v3661_v49 }
 0x1fd   :  { %3150 = vmatprep.subr.bf16.mxu1 %v3661_v49  ;;  %3037 = vmatprep.mubr.msk.f32.mxu0 %vm3662_vm0, %v3663_v7 }
 0x1fe   :  { %3072 = vmatprep.mubr.msk.f32.mxu1 %vm3662_vm0, %v3663_v7 }
 0x1ff   :  { %3128 = vmatpush3.bf16.msra.mxu0 %v4609_v52 }
 0x200   :  { %3152 = vmatpush3.bf16.msra.mxu1 %v4609_v52  ;;  %3129 = vmatprep.subr.bf16.mxu0 %v3661_v49 }
 0x201   :  { %3153 = vmatprep.subr.bf16.mxu1 %v3661_v49 }
 0x203   :  { %3131 = vmatpush3.bf16.msra.mxu0 %v4621_v55 }
 0x204   :  { %3155 = vmatpush3.bf16.msra.mxu1 %v4621_v55  ;;  %3132 = vmatprep.subr.bf16.mxu0 %v3661_v49 }
 0x205   :  { %3156 = vmatprep.subr.bf16.mxu1 %v3661_v49 }
 0x207   :  { %3134 = vmatpush3.bf16.msra.mxu0 %v4633_v58 }
 0x208   :  { %3158 = vmatpush3.bf16.msra.mxu1 %v4633_v58  ;;  %3135 = vmatprep.subr.bf16.mxu0 %v3661_v49 }
 0x209   :  { %3159 = vmatprep.subr.bf16.mxu1 %v3661_v49 }
 0x20b   :  { %3137 = vmatpush3.bf16.msra.mxu0 %v4645_v61 }
 0x20c   :  { %3161 = vmatpush3.bf16.msra.mxu1 %v4645_v61  ;;  %3138 = vmatprep.subr.bf16.mxu0 %v3661_v49 }
 0x20d   :  { %3162 = vmatprep.subr.bf16.mxu1 %v3661_v49 }
 0x20f   :  { %3140 = vmatpush3.bf16.msra.mxu0 %v4657_v0 }
 0x210   :  { %3164 = vmatpush3.bf16.msra.mxu1 %v4657_v0  ;;  %3141 = vmatprep.subr.bf16.mxu0 %v3661_v49 }
 0x211   :  { %3165 = vmatprep.subr.bf16.mxu1 %v3661_v49 }
 0x213   :  { %3143 = vmatpush3.bf16.msra.mxu0 %v4669_v3 }
 0x214   :  { %3167 = vmatpush3.bf16.msra.mxu1 %v4669_v3  ;;  %3144 = vmatprep.subr.bf16.mxu0 %v3661_v49 }
 0x215   :  { %3168 = vmatprep.subr.bf16.mxu1 %v3661_v49 }
 0x217   :  { %3146 = vmatpush3.bf16.msra.mxu0 %v4683_v6 }
 0x218   :  { %3170 = vmatpush3.bf16.msra.mxu1 %v4683_v6 }
 0x21a   :  { %3038 = vmatmul.mubr.f32.vlgmr.msra.gmra.mrb[6].mxu0 %v2403_v33 }
 0x21b   :  { %3073 = vmatmul.mubr.f32.vlgmr.msra.gmra.mrb[6].mxu1 %v2484_v34 }
 0x2cd   :  { %v2308_v36 = vpop.f32.mrb[4].mxu0 }
 0x2ce   :  { %v2309_v37 = vadd.f32 %v2866_v35, %v2308_v36  ;;  %v2969_v38 = vpop.f32.mrb[5].mxu0  ;;  %v2389_v39 = vpop.f32.mrb[4].mxu1 }
 0x2cf   :  { %v2390_v40 = vadd.f32 %v2866_v35, %v2389_v39  ;;  %v3004_v41 = vpop.f32.mrb[5].mxu1 }
 0x2d0   :  { %3652 = vrsqrt.f32 %v2309_v37  ;;  %vm2314_vm1 = vcmp.eq.f32.partialorder %v2309_v37, inf  ;;  %v2317_v45 = vand.u32 2147483648, %v2309_v37  ;;  %vm2316_vm2 = vcmp.eq.f32.partialorder %v2309_v37, 0.0 }
 0x2d1   :  { %3654 = vrsqrt.f32 %v2390_v40  ;;  %vm2395_vm3 = vcmp.eq.f32.partialorder %v2390_v40, inf  ;;  %v2398_v48 = vand.u32 2147483648, %v2390_v40  ;;  %vm2397_vm4 = vcmp.eq.f32.partialorder %v2390_v40, 0.0 }
 0x2da   :  { %v3653_v42 = vpop.eup %3652 }
 0x2db   :  { %v3655_v43 = vpop.eup %3654  ;;  %v2313_v44 = vmul.f32 %v3653_v42, %v2309_v37 }
 0x2dc   :  { %v2394_v46 = vmul.f32 %v3655_v43, %v2390_v40 }
 0x2dd   :  { %v2315_v47 = vsel %vm2314_vm1, %v2309_v37, %v2313_v44 }
 0x2de   :  { %v2318_v49 = vsel %vm2316_vm2, %v2317_v45, %v2315_v47  ;;  %v2396_v50 = vsel %vm2395_vm3, %v2390_v40, %v2394_v46 }
 0x2df   :  { %v2319_v51 = vmul.f32 %v4694_v13, %v2318_v49  ;;  %v2399_v52 = vsel %vm2397_vm4, %v2398_v48, %v2396_v50 }
 0x2e0   :  { %v2400_v53 = vmul.f32 %v4696_v20, %v2399_v52 }
 0x2e1   :  { %v2320_v54 = vpack.c.bf16 %v2319_v51, %v2319_v51 }
 0x2e2   :  { %v2401_v55 = vpack.c.bf16 %v2400_v53, %v2400_v53 }
 0x2e3   :  { %2321 = vst [vmem:[%s4766_s5] sm:$0xf] %v2320_v54 }
 0x2e4   :  { %2402 = vst [vmem:[%s4766_s5 + $0x4] sm:$0xf] %v2401_v55 }
 0x2ed   :  { %v2470_v56 = vpop.f32.mrb[6].mxu0 }
 0x2ee   :  { %v2471_v57 = vadd.f32 %v2866_v35, %v2470_v56  ;;  %v3039_v58 = vpop.f32.mrb[7].mxu0  ;;  %v2551_v59 = vpop.f32.mrb[6].mxu1 }
 0x2ef   :  { %v2552_v60 = vadd.f32 %v2866_v35, %v2551_v59  ;;  %v3074_v61 = vpop.f32.mrb[7].mxu1 }
 0x2f0   :  { %3656 = vrsqrt.f32 %v2471_v57  ;;  %vm2476_vm5 = vcmp.eq.f32.partialorder %v2471_v57, inf  ;;  %v2479_v1 = vand.u32 2147483648, %v2471_v57  ;;  %vm2478_vm6 = vcmp.eq.f32.partialorder %v2471_v57, 0.0 }
 0x2f1   :  { %3658 = vrsqrt.f32 %v2552_v60  ;;  %vm2557_vm7 = vcmp.eq.f32.partialorder %v2552_v60, inf  ;;  %v2560_v4 = vand.u32 2147483648, %v2552_v60  ;;  %vm2559_vm8 = vcmp.eq.f32.partialorder %v2552_v60, 0.0 }
 0x2fa   :  { %v3657_v62 = vpop.eup %3656 }
 0x2fb   :  { %v3659_v63 = vpop.eup %3658  ;;  %v2475_v0 = vmul.f32 %v3657_v62, %v2471_v57 }
 0x2fc   :  { %v2556_v2 = vmul.f32 %v3659_v63, %v2552_v60 }
 0x2fd   :  { %v2477_v3 = vsel %vm2476_vm5, %v2471_v57, %v2475_v0 }
 0x2fe   :  { %v2480_v5 = vsel %vm2478_vm6, %v2479_v1, %v2477_v3  ;;  %v2558_v6 = vsel %vm2557_vm7, %v2552_v60, %v2556_v2 }
 0x2ff   :  { %v2481_v7 = vmul.f32 %v4729_v31, %v2480_v5  ;;  %v2561_v8 = vsel %vm2559_vm8, %v2560_v4, %v2558_v6 }
 0x300   :  { %v2562_v9 = vmul.f32 %v4733_v32, %v2561_v8 }
 0x301   :  { %v2482_v10 = vpack.c.bf16 %v2481_v7, %v2481_v7 }
 0x302   :  { %v2563_v12 = vpack.c.bf16 %v2562_v9, %v2562_v9 }
 0x303   :  { %2483 = vst [vmem:[%s4766_s5 + $0x8] sm:$0xf] %v2482_v10 }
 0x304   :  { %2564 = vst [vmem:[%s4766_s5 + $0xc] sm:$0xf] %v2563_v12 }

// kernel: gdn_net_forward.17
= control target key start
LH: loop header
LB: loop body
LE: loop exit
PB: predicated region body
PF: predicated region fallthrough
CT: control target
= control target key end

     0   :  { %s5621_s1 = inlined_call_operand.vmem [shape: bf16[1152,512], index: 1, kind: input, shape index: {}]   ;;  %s5622_s0 = inlined_call_operand.vmem [shape: bf16[32,1152], index: 0, kind: input, shape index: {}]   ;;  %s5623_s3 = inlined_call_operand.vmem [shape: f32[128,128], index: 3, kind: input, shape index: {}]   ;;  %s5624_s2 = inlined_call_operand.vmem [shape: f32[1,512], index: 2, kind: input, shape index: {}]   ;;  %s5625_s4 = inlined_call_operand.vmem [shape: f32[1,128], index: 4, kind: input, shape index: {}]   ;;  %s5626_s5 = inlined_call_operand.vmem [shape: bf16[32,512], index: 5, kind: output, shape index: {}]  }
   0x1   :  { %v3784_v0 = vld [vmem:[%s5621_s1 + $0x4] ss:$16 sps:$4 sm:$0xff]   ;;  %v3786_v1 = vld [vmem:[%s5621_s1 + $0xc] ss:$16 sps:$4 sm:$0xff]   ;;  %v3788_v2 = vld [vmem:[%s5621_s1] ss:$16 sps:$4 sm:$0xff]  }
   0x2   :  { %1883 = vmatprep.subr.bf16.mxu0 %v3784_v0  ;;  %v3789_v3 = vld [vmem:[%s5621_s1 + $0x8] ss:$16 sps:$4 sm:$0xff]   ;;  %2148 = vmatprep.subr.bf16.mxu1 %v3786_v1  ;;  %v3790_v4 = vld [vmem:[%s5621_s1 + $0x24] ss:$16 sps:$4 sm:$0xff]   ;;  %v3792_v5 = vld [vmem:[%s5621_s1 + $0x2c] ss:$16 sps:$4 sm:$0xff]  }
   0x3   :  { %1884 = vmatpush1.bf16.msra.mxu0 %v3788_v2  ;;  %2149 = vmatpush1.bf16.msra.mxu1 %v3789_v3  ;;  %v3794_v6 = vld [vmem:[%s5621_s1 + $0x20] ss:$16 sps:$4 sm:$0xff]   ;;  %v3795_v7 = vld [vmem:[%s5621_s1 + $0x28] ss:$16 sps:$4 sm:$0xff]   ;;  %v3796_v8 = vld [vmem:[%s5621_s1 + $0x44] ss:$16 sps:$4 sm:$0xff]  }
   0x4   :  { %1885 = vmatprep.subr.bf16.mxu0 %v3790_v4  ;;  %2150 = vmatprep.subr.bf16.mxu1 %v3792_v5  ;;  %v3798_v9 = vld [vmem:[%s5621_s1 + $0x4c] ss:$16 sps:$4 sm:$0xff]   ;;  %v3800_v10 = vld [vmem:[%s5621_s1 + $0x40] ss:$16 sps:$4 sm:$0xff]   ;;  %v3801_v11 = vld [vmem:[%s5621_s1 + $0x48] ss:$16 sps:$4 sm:$0xff]  }
   0x5   :  { %v3802_v12 = vld [vmem:[%s5621_s1 + $0x64] ss:$16 sps:$4 sm:$0xff]   ;;  %v3804_v13 = vld [vmem:[%s5621_s1 + $0x6c] ss:$16 sps:$4 sm:$0xff]   ;;  %v3806_v14 = vld [vmem:[%s5621_s1 + $0x60] ss:$16 sps:$4 sm:$0xff]  }
   0x6   :  { %v3807_v15 = vld [vmem:[%s5621_s1 + $0x68] ss:$16 sps:$4 sm:$0xff]   ;;  %v3808_v16 = vld [vmem:[%s5621_s1 + $0x84] ss:$16 sps:$4 sm:$0xff]   ;;  %v3810_v17 = vld [vmem:[%s5621_s1 + $0x8c] ss:$16 sps:$4 sm:$0xff]  }
   0x7   :  { %1886 = vmatpush1.bf16.msra.mxu0 %v3794_v6  ;;  %2151 = vmatpush1.bf16.msra.mxu1 %v3795_v7  ;;  %v3812_v18 = vld [vmem:[%s5621_s1 + $0x80] ss:$16 sps:$4 sm:$0xff]   ;;  %v3813_v19 = vld [vmem:[%s5621_s1 + $0x88] ss:$16 sps:$4 sm:$0xff]   ;;  %v3814_v20 = vld [vmem:[%s5621_s1 + $0xa4] ss:$16 sps:$4 sm:$0xff]  }
   0x8   :  { %1887 = vmatprep.subr.bf16.mxu0 %v3796_v8  ;;  %2152 = vmatprep.subr.bf16.mxu1 %v3798_v9  ;;  %v3816_v21 = vld [vmem:[%s5621_s1 + $0xac] ss:$16 sps:$4 sm:$0xff]   ;;  %v3818_v22 = vld [vmem:[%s5621_s1 + $0xa0] ss:$16 sps:$4 sm:$0xff]   ;;  %v3819_v23 = vld [vmem:[%s5621_s1 + $0xa8] ss:$16 sps:$4 sm:$0xff]  }
   0x9   :  { %v3820_v24 = vld [vmem:[%s5621_s1 + $0xc4] ss:$16 sps:$4 sm:$0xff]   ;;  %v3822_v25 = vld [vmem:[%s5621_s1 + $0xcc] ss:$16 sps:$4 sm:$0xff]   ;;  %v3824_v26 = vld [vmem:[%s5621_s1 + $0xc0] ss:$16 sps:$4 sm:$0xff]  }
   0xa   :  { %v3825_v27 = vld [vmem:[%s5621_s1 + $0xc8] ss:$16 sps:$4 sm:$0xff]   ;;  %v3826_v28 = vld [vmem:[%s5621_s1 + $0xe4] ss:$16 sps:$4 sm:$0xff]   ;;  %v3828_v29 = vld [vmem:[%s5621_s1 + $0xec] ss:$16 sps:$4 sm:$0xff]  }
   0xb   :  { %1888 = vmatpush1.bf16.msra.mxu0 %v3800_v10  ;;  %2153 = vmatpush1.bf16.msra.mxu1 %v3801_v11  ;;  %v3830_v30 = vld [vmem:[%s5621_s1 + $0xe0] ss:$16 sps:$4 sm:$0xff]   ;;  %v3831_v31 = vld [vmem:[%s5621_s1 + $0xe8] ss:$16 sps:$4 sm:$0xff]   ;;  %v3832_v32 = vld [vmem:[%s5621_s1 + $0x104] ss:$16 sps:$4 sm:$0xff]  }
   0xc   :  { %1889 = vmatprep.subr.bf16.mxu0 %v3802_v12  ;;  %2154 = vmatprep.subr.bf16.mxu1 %v3804_v13  ;;  %v3834_v33 = vld [vmem:[%s5621_s1 + $0x10c] ss:$16 sps:$4 sm:$0xff]   ;;  %v3836_v34 = vld [vmem:[%s5621_s1 + $0x100] ss:$16 sps:$4 sm:$0xff]   ;;  %v3837_v35 = vld [vmem:[%s5621_s1 + $0x108] ss:$16 sps:$4 sm:$0xff]  }
   0xd   :  { %v3838_v36 = vld [vmem:[%s5621_s1 + $0x124] ss:$16 sps:$4 sm:$0xff]   ;;  %v3840_v37 = vld [vmem:[%s5621_s1 + $0x12c] ss:$16 sps:$4 sm:$0xff]   ;;  %v3842_v38 = vld [vmem:[%s5621_s1 + $0x120] ss:$16 sps:$4 sm:$0xff]  }
   0xe   :  { %v3843_v39 = vld [vmem:[%s5621_s1 + $0x128] ss:$16 sps:$4 sm:$0xff]   ;;  %v3844_v40 = vld [vmem:[%s5621_s1 + $0x144] ss:$16 sps:$4 sm:$0xff]   ;;  %v3846_v41 = vld [vmem:[%s5621_s1 + $0x14c] ss:$16 sps:$4 sm:$0xff]  }
   0xf   :  { %1890 = vmatpush1.bf16.msra.mxu0 %v3806_v14  ;;  %2155 = vmatpush1.bf16.msra.mxu1 %v3807_v15  ;;  %v3848_v42 = vld [vmem:[%s5621_s1 + $0x140] ss:$16 sps:$4 sm:$0xff]   ;;  %v3849_v43 = vld [vmem:[%s5621_s1 + $0x148] ss:$16 sps:$4 sm:$0xff]   ;;  %v3850_v44 = vld [vmem:[%s5621_s1 + $0x164] ss:$16 sps:$4 sm:$0xff]  }
  0x10   :  { %1891 = vmatprep.subr.bf16.mxu0 %v3808_v16  ;;  %2156 = vmatprep.subr.bf16.mxu1 %v3810_v17  ;;  %v3852_v45 = vld [vmem:[%s5621_s1 + $0x16c] ss:$16 sps:$4 sm:$0xff]   ;;  %v3854_v46 = vld [vmem:[%s5621_s1 + $0x160] ss:$16 sps:$4 sm:$0xff]   ;;  %v3855_v47 = vld [vmem:[%s5621_s1 + $0x168] ss:$16 sps:$4 sm:$0xff]  }
  0x11   :  { %v3882_v48 = vld [vmem:[%s5622_s0 + $0x4] ss:$36 sps:$4 sm:$0xff]   ;;  %v3858_v50 = vld [vmem:[%s5621_s1 + $0x18c] ss:$16 sps:$4 sm:$0xff]   ;;  %v3860_v51 = vld [vmem:[%s5621_s1 + $0x180] ss:$16 sps:$4 sm:$0xff]  }
  0x12   :  { %v3856_v49 = vld [vmem:[%s5621_s1 + $0x184] ss:$16 sps:$4 sm:$0xff]   ;;  %1915 = vmatprep.mubr.bf16.mxu0 %v3882_v48  ;;  %2180 = vmatprep.mubr.bf16.mxu1 %v3882_v48  ;;  %v3861_v52 = vld [vmem:[%s5621_s1 + $0x188] ss:$16 sps:$4 sm:$0xff]   ;;  %v3864_v54 = vld [vmem:[%s5621_s1 + $0x1ac] ss:$16 sps:$4 sm:$0xff]  }
  0x13   :  { %1892 = vmatpush1.bf16.msra.mxu0 %v3812_v18  ;;  %2157 = vmatpush1.bf16.msra.mxu1 %v3813_v19  ;;  %v3862_v53 = vld [vmem:[%s5621_s1 + $0x1a4] ss:$16 sps:$4 sm:$0xff]   ;;  %v3866_v55 = vld [vmem:[%s5621_s1 + $0x1a0] ss:$16 sps:$4 sm:$0xff]   ;;  %v3867_v56 = vld [vmem:[%s5621_s1 + $0x1a8] ss:$16 sps:$4 sm:$0xff]  }
  0x14   :  { %1893 = vmatprep.subr.bf16.mxu0 %v3814_v20  ;;  %2158 = vmatprep.subr.bf16.mxu1 %v3816_v21  ;;  %v3868_v57 = vld [vmem:[%s5621_s1 + $0x1c4] ss:$16 sps:$4 sm:$0xff]   ;;  %v3870_v58 = vld [vmem:[%s5621_s1 + $0x1cc] ss:$16 sps:$4 sm:$0xff]   ;;  %v3872_v59 = vld [vmem:[%s5621_s1 + $0x1c0] ss:$16 sps:$4 sm:$0xff]  }
  0x15   :  { %v3873_v60 = vld [vmem:[%s5621_s1 + $0x1c8] ss:$16 sps:$4 sm:$0xff]   ;;  %v3874_v61 = vld [vmem:[%s5621_s1 + $0x1e4] ss:$16 sps:$4 sm:$0xff]   ;;  %v3876_v62 = vld [vmem:[%s5621_s1 + $0x1ec] ss:$16 sps:$4 sm:$0xff]  }
  0x16   :  { %v3878_v63 = vld [vmem:[%s5621_s1 + $0x1e0] ss:$16 sps:$4 sm:$0xff]   ;;  %v3879_v0 = vld [vmem:[%s5621_s1 + $0x1e8] ss:$16 sps:$4 sm:$0xff]   ;;  %v3885_v1 = vld [vmem:[%s5621_s1 + $0x204] ss:$16 sps:$4 sm:$0xff]  }
  0x17   :  { %1894 = vmatpush1.bf16.msra.mxu0 %v3818_v22  ;;  %2159 = vmatpush1.bf16.msra.mxu1 %v3819_v23  ;;  %v3888_v2 = vld [vmem:[%s5621_s1 + $0x20c] ss:$16 sps:$4 sm:$0xff]   ;;  %v3880_v3 = vld [vmem:[%s5622_s0] ss:$36 sps:$4 sm:$0xff]   ;;  %v3886_v5 = vld [vmem:[%s5621_s1 + $0x208] ss:$16 sps:$4 sm:$0xff]  }
  0x18   :  { %1895 = vmatprep.subr.bf16.mxu0 %v3820_v24  ;;  %2160 = vmatprep.subr.bf16.mxu1 %v3822_v25  ;;  %v3883_v4 = vld [vmem:[%s5621_s1 + $0x200] ss:$16 sps:$4 sm:$0xff]   ;;  %v3891_v6 = vld [vmem:[%s5621_s1 + $0x224] ss:$16 sps:$4 sm:$0xff]   ;;  %v3894_v7 = vld [vmem:[%s5621_s1 + $0x22c] ss:$16 sps:$4 sm:$0xff]  }
  0x19   :  { %v3889_v8 = vld [vmem:[%s5621_s1 + $0x220] ss:$16 sps:$4 sm:$0xff]   ;;  %v3892_v9 = vld [vmem:[%s5621_s1 + $0x228] ss:$16 sps:$4 sm:$0xff]   ;;  %v3897_v10 = vld [vmem:[%s5621_s1 + $0x244] ss:$16 sps:$4 sm:$0xff]  }
  0x1a   :  { %v3900_v11 = vld [vmem:[%s5621_s1 + $0x24c] ss:$16 sps:$4 sm:$0xff]   ;;  %v3895_v12 = vld [vmem:[%s5621_s1 + $0x240] ss:$16 sps:$4 sm:$0xff]   ;;  %v3898_v13 = vld [vmem:[%s5621_s1 + $0x248] ss:$16 sps:$4 sm:$0xff]  }
  0x1b   :  { %1896 = vmatpush1.bf16.msra.mxu0 %v3824_v26  ;;  %2161 = vmatpush1.bf16.msra.mxu1 %v3825_v27  ;;  %v3903_v14 = vld [vmem:[%s5621_s1 + $0x264] ss:$16 sps:$4 sm:$0xff]   ;;  %v3906_v15 = vld [vmem:[%s5621_s1 + $0x26c] ss:$16 sps:$4 sm:$0xff]   ;;  %v3901_v16 = vld [vmem:[%s5621_s1 + $0x260] ss:$16 sps:$4 sm:$0xff]  }
  0x1c   :  { %1897 = vmatprep.subr.bf16.mxu0 %v3826_v28  ;;  %2162 = vmatprep.subr.bf16.mxu1 %v3828_v29  ;;  %v3904_v17 = vld [vmem:[%s5621_s1 + $0x268] ss:$16 sps:$4 sm:$0xff]   ;;  %v3909_v18 = vld [vmem:[%s5621_s1 + $0x284] ss:$16 sps:$4 sm:$0xff]   ;;  %v3912_v19 = vld [vmem:[%s5621_s1 + $0x28c] ss:$16 sps:$4 sm:$0xff]  }
  0x1d   :  { %v3907_v20 = vld [vmem:[%s5621_s1 + $0x280] ss:$16 sps:$4 sm:$0xff]   ;;  %v3910_v21 = vld [vmem:[%s5621_s1 + $0x288] ss:$16 sps:$4 sm:$0xff]   ;;  %v3915_v22 = vld [vmem:[%s5621_s1 + $0x2a4] ss:$16 sps:$4 sm:$0xff]  }
  0x1e   :  { %v3918_v23 = vld [vmem:[%s5621_s1 + $0x2ac] ss:$16 sps:$4 sm:$0xff]   ;;  %v3913_v25 = vld [vmem:[%s5621_s1 + $0x2a0] ss:$16 sps:$4 sm:$0xff]   ;;  %v3916_v26 = vld [vmem:[%s5621_s1 + $0x2a8] ss:$16 sps:$4 sm:$0xff]  }
  0x1f   :  { %1898 = vmatpush1.bf16.msra.mxu0 %v3830_v30  ;;  %2163 = vmatpush1.bf16.msra.mxu1 %v3831_v31  ;;  %v3967_v24 = vld [vmem:[%s5622_s0 + $0x4c] ss:$36 sps:$4 sm:$0xff]   ;;  %v3921_v27 = vld [vmem:[%s5621_s1 + $0x2c4] ss:$16 sps:$4 sm:$0xff]   ;;  %v3922_v31 = vld [vmem:[%s5621_s1 + $0x2c8] ss:$16 sps:$4 sm:$0xff]  }
  0x20   :  { %1899 = vmatprep.subr.bf16.mxu0 %v3832_v32  ;;  %2164 = vmatprep.subr.bf16.mxu1 %v3834_v33  ;;  %v3924_v28 = vld [vmem:[%s5621_s1 + $0x2cc] ss:$16 sps:$4 sm:$0xff]   ;;  %v3919_v30 = vld [vmem:[%s5621_s1 + $0x2c0] ss:$16 sps:$4 sm:$0xff]   ;;  %v3927_v32 = vld [vmem:[%s5621_s1 + $0x2e4] ss:$16 sps:$4 sm:$0xff]  }
  0x21   :  { %v3975_v29 = vld [vmem:[%s5622_s0 + $0x48] ss:$36 sps:$4 sm:$0xff]  }
  0x22   :  { %v3930_v33 = vld [vmem:[%s5621_s1 + $0x2ec] ss:$16 sps:$4 sm:$0xff]   ;;  %v3946_v48 = vld [vmem:[%s5621_s1 + $0x348] ss:$16 sps:$4 sm:$0xff]  }
  0x23   :  { %1900 = vmatpush1.bf16.msra.mxu0 %v3836_v34  ;;  %2165 = vmatpush1.bf16.msra.mxu1 %v3837_v35  ;;  %v3984_v34 = vld [vmem:[%s5622_s0 + $0xc] ss:$36 sps:$4 sm:$0xff]  }
  0x24   :  { %1901 = vmatprep.subr.bf16.mxu0 %v3838_v36  ;;  %2166 = vmatprep.subr.bf16.mxu1 %v3840_v37  ;;  %v3925_v35 = vld [vmem:[%s5621_s1 + $0x2e0] ss:$16 sps:$4 sm:$0xff]   ;;  %v3928_v36 = vld [vmem:[%s5621_s1 + $0x2e8] ss:$16 sps:$4 sm:$0xff]   ;;  %v3933_v37 = vld [vmem:[%s5621_s1 + $0x304] ss:$16 sps:$4 sm:$0xff]  }
  0x27   :  { %1902 = vmatpush1.bf16.msra.mxu0 %v3842_v38  ;;  %2167 = vmatpush1.bf16.msra.mxu1 %v3843_v39  ;;  %v3936_v38 = vld [vmem:[%s5621_s1 + $0x30c] ss:$16 sps:$4 sm:$0xff]   ;;  %v3931_v39 = vld [vmem:[%s5621_s1 + $0x300] ss:$16 sps:$4 sm:$0xff]  }
  0x28   :  { %1903 = vmatprep.subr.bf16.mxu0 %v3844_v40  ;;  %2168 = vmatprep.subr.bf16.mxu1 %v3846_v41  ;;  %v3934_v40 = vld [vmem:[%s5621_s1 + $0x308] ss:$16 sps:$4 sm:$0xff]   ;;  %v3939_v41 = vld [vmem:[%s5621_s1 + $0x324] ss:$16 sps:$4 sm:$0xff]  }
  0x2b   :  { %1904 = vmatpush1.bf16.msra.mxu0 %v3848_v42  ;;  %2169 = vmatpush1.bf16.msra.mxu1 %v3849_v43  ;;  %v3942_v42 = vld [vmem:[%s5621_s1 + $0x32c] ss:$16 sps:$4 sm:$0xff]   ;;  %v3937_v43 = vld [vmem:[%s5621_s1 + $0x320] ss:$16 sps:$4 sm:$0xff]  }
  0x2c   :  { %1905 = vmatprep.subr.bf16.mxu0 %v3850_v44  ;;  %2170 = vmatprep.subr.bf16.mxu1 %v3852_v45  ;;  %v3940_v44 = vld [vmem:[%s5621_s1 + $0x328] ss:$16 sps:$4 sm:$0xff]   ;;  %v3945_v45 = vld [vmem:[%s5621_s1 + $0x344] ss:$16 sps:$4 sm:$0xff]  }
  0x2f   :  { %1906 = vmatpush1.bf16.msra.mxu0 %v3854_v46  ;;  %2171 = vmatpush1.bf16.msra.mxu1 %v3855_v47  ;;  %v3948_v46 = vld [vmem:[%s5621_s1 + $0x34c] ss:$16 sps:$4 sm:$0xff]   ;;  %v3943_v47 = vld [vmem:[%s5621_s1 + $0x340] ss:$16 sps:$4 sm:$0xff]  }
  0x30   :  { %1907 = vmatprep.subr.bf16.mxu0 %v3856_v49  ;;  %2172 = vmatprep.subr.bf16.mxu1 %v3858_v50  ;;  %v3951_v49 = vld [vmem:[%s5621_s1 + $0x364] ss:$16 sps:$4 sm:$0xff]   ;;  %v3954_v50 = vld [vmem:[%s5621_s1 + $0x36c] ss:$16 sps:$4 sm:$0xff]  }
  0x33   :  { %1908 = vmatpush1.bf16.msra.mxu0 %v3860_v51  ;;  %2173 = vmatpush1.bf16.msra.mxu1 %v3861_v52  ;;  %v3949_v51 = vld [vmem:[%s5621_s1 + $0x360] ss:$16 sps:$4 sm:$0xff]   ;;  %v3952_v52 = vld [vmem:[%s5621_s1 + $0x368] ss:$16 sps:$4 sm:$0xff]  }
  0x34   :  { %1909 = vmatprep.subr.bf16.mxu0 %v3862_v53  ;;  %2174 = vmatprep.subr.bf16.mxu1 %v3864_v54  ;;  %v3957_v53 = vld [vmem:[%s5621_s1 + $0x384] ss:$16 sps:$4 sm:$0xff]   ;;  %v3960_v54 = vld [vmem:[%s5621_s1 + $0x38c] ss:$16 sps:$4 sm:$0xff]  }
  0x37   :  { %1910 = vmatpush1.bf16.msra.mxu0 %v3866_v55  ;;  %2175 = vmatpush1.bf16.msra.mxu1 %v3867_v56  ;;  %v3955_v55 = vld [vmem:[%s5621_s1 + $0x380] ss:$16 sps:$4 sm:$0xff]   ;;  %v3958_v56 = vld [vmem:[%s5621_s1 + $0x388] ss:$16 sps:$4 sm:$0xff]  }
  0x38   :  { %1911 = vmatprep.subr.bf16.mxu0 %v3868_v57  ;;  %2176 = vmatprep.subr.bf16.mxu1 %v3870_v58  ;;  %v3963_v57 = vld [vmem:[%s5621_s1 + $0x3a4] ss:$16 sps:$4 sm:$0xff]   ;;  %v3966_v58 = vld [vmem:[%s5621_s1 + $0x3ac] ss:$16 sps:$4 sm:$0xff]  }
  0x3b   :  { %1912 = vmatpush1.bf16.msra.mxu0 %v3872_v59  ;;  %2177 = vmatpush1.bf16.msra.mxu1 %v3873_v60  ;;  %v3961_v59 = vld [vmem:[%s5621_s1 + $0x3a0] ss:$16 sps:$4 sm:$0xff]   ;;  %v3964_v60 = vld [vmem:[%s5621_s1 + $0x3a8] ss:$16 sps:$4 sm:$0xff]  }
  0x3c   :  { %1913 = vmatprep.subr.bf16.mxu0 %v3874_v61  ;;  %2178 = vmatprep.subr.bf16.mxu1 %v3876_v62  ;;  %v3971_v61 = vld [vmem:[%s5621_s1 + $0x3c4] ss:$16 sps:$4 sm:$0xff]   ;;  %v3974_v62 = vld [vmem:[%s5621_s1 + $0x3cc] ss:$16 sps:$4 sm:$0xff]  }
  0x3f   :  { %1914 = vmatpush1.bf16.msra.mxu0 %v3878_v63  ;;  %2179 = vmatpush1.bf16.msra.mxu1 %v3879_v0  ;;  %v3969_v63 = vld [vmem:[%s5621_s1 + $0x3c0] ss:$16 sps:$4 sm:$0xff]   ;;  %v3972_v0 = vld [vmem:[%s5621_s1 + $0x3c8] ss:$16 sps:$4 sm:$0xff]  }
  0x40   :  { %1936 = vmatprep.subr.bf16.mxu0 %v3885_v1  ;;  %2201 = vmatprep.subr.bf16.mxu1 %v3888_v2  ;;  %v3978_v1 = vld [vmem:[%s5621_s1 + $0x3e4] ss:$16 sps:$4 sm:$0xff]   ;;  %v3981_v2 = vld [vmem:[%s5621_s1 + $0x3ec] ss:$16 sps:$4 sm:$0xff]  }
  0x42   :  { %1916 = vmatmul.mubr.bf16.vlgmr.msra.gmra.mrb[0].mxu0 %v3880_v3  ;;  %2181 = vmatmul.mubr.bf16.vlgmr.msra.gmra.mrb[0].mxu1 %v3880_v3  ;;  %v3976_v3 = vld [vmem:[%s5621_s1 + $0x3e0] ss:$16 sps:$4 sm:$0xff]  }
  0x43   :  { %1937 = vmatpush1.bf16.msra.mxu0 %v3883_v4  ;;  %2202 = vmatpush1.bf16.msra.mxu1 %v3886_v5  ;;  %v3979_v4 = vld [vmem:[%s5621_s1 + $0x3e8] ss:$16 sps:$4 sm:$0xff]   ;;  %v3987_v5 = vld [vmem:[%s5621_s1 + $0x404] ss:$16 sps:$4 sm:$0xff]  }
  0x44   :  { %1938 = vmatprep.subr.bf16.mxu0 %v3891_v6  ;;  %2203 = vmatprep.subr.bf16.mxu1 %v3894_v7  ;;  %v3990_v6 = vld [vmem:[%s5621_s1 + $0x40c] ss:$16 sps:$4 sm:$0xff]  }
  0x45   :  { %1925 = vmatprep.mubr.bf16.mxu0 %v3967_v24  ;;  %2190 = vmatprep.mubr.bf16.mxu1 %v3967_v24  ;;  %v3982_v7 = vld [vmem:[%s5622_s0 + $0x8] ss:$36 sps:$4 sm:$0xff]  }
  0x46   :  { %v4006_v24 = vld [vmem:[%s5621_s1 + $0x468] ss:$16 sps:$4 sm:$0xff]  }
  0x47   :  { %1939 = vmatpush1.bf16.msra.mxu0 %v3889_v8  ;;  %2204 = vmatpush1.bf16.msra.mxu1 %v3892_v9  ;;  %v3985_v8 = vld [vmem:[%s5621_s1 + $0x400] ss:$16 sps:$4 sm:$0xff]   ;;  %v3988_v9 = vld [vmem:[%s5621_s1 + $0x408] ss:$16 sps:$4 sm:$0xff]  }
  0x48   :  { %1940 = vmatprep.subr.bf16.mxu0 %v3897_v10  ;;  %2205 = vmatprep.subr.bf16.mxu1 %v3900_v11  ;;  %v3993_v10 = vld [vmem:[%s5621_s1 + $0x424] ss:$16 sps:$4 sm:$0xff]   ;;  %v3996_v11 = vld [vmem:[%s5621_s1 + $0x42c] ss:$16 sps:$4 sm:$0xff]  }
  0x4a   :  { %1926 = vmatmul.mubr.bf16.gmra.mrb[4].mxu0 %v3975_v29  ;;  %2191 = vmatmul.mubr.bf16.gmra.mrb[4].mxu1 %v3975_v29  ;;  %v4017_v29 = vld [vmem:[%s5621_s1 + $0x4a4] ss:$16 sps:$4 sm:$0xff]  }
  0x4b   :  { %1941 = vmatpush1.bf16.msra.mxu0 %v3895_v12  ;;  %2206 = vmatpush1.bf16.msra.mxu1 %v3898_v13  ;;  %v4069_v12 = vld [vmem:[%s5622_s0 + $0x54] ss:$36 sps:$4 sm:$0xff]   ;;  %v3991_v13 = vld [vmem:[%s5621_s1 + $0x420] ss:$16 sps:$4 sm:$0xff]  }
  0x4c   :  { %1942 = vmatprep.subr.bf16.mxu0 %v3903_v14  ;;  %2207 = vmatprep.subr.bf16.mxu1 %v3906_v15  ;;  %v3994_v14 = vld [vmem:[%s5621_s1 + $0x428] ss:$16 sps:$4 sm:$0xff]   ;;  %v3999_v15 = vld [vmem:[%s5621_s1 + $0x444] ss:$16 sps:$4 sm:$0xff]  }
  0x4d   :  { %1968 = vmatprep.mubr.bf16.mxu0 %v3984_v34  ;;  %2233 = vmatprep.mubr.bf16.mxu1 %v3984_v34  ;;  %v4026_v34 = vld [vmem:[%s5621_s1 + $0x4cc] ss:$16 sps:$4 sm:$0xff]  }
  0x4f   :  { %1943 = vmatpush1.bf16.msra.mxu0 %v3901_v16  ;;  %2208 = vmatpush1.bf16.msra.mxu1 %v3904_v17  ;;  %v4002_v16 = vld [vmem:[%s5621_s1 + $0x44c] ss:$16 sps:$4 sm:$0xff]   ;;  %v3997_v17 = vld [vmem:[%s5621_s1 + $0x440] ss:$16 sps:$4 sm:$0xff]  }
  0x50   :  { %1944 = vmatprep.subr.bf16.mxu0 %v3909_v18  ;;  %2209 = vmatprep.subr.bf16.mxu1 %v3912_v19  ;;  %v4000_v18 = vld [vmem:[%s5621_s1 + $0x448] ss:$16 sps:$4 sm:$0xff]   ;;  %v4077_v19 = vld [vmem:[%s5622_s0 + $0x50] ss:$36 sps:$4 sm:$0xff]  }
  0x53   :  { %1945 = vmatpush1.bf16.msra.mxu0 %v3907_v20  ;;  %2210 = vmatpush1.bf16.msra.mxu1 %v3910_v21  ;;  %v4005_v20 = vld [vmem:[%s5621_s1 + $0x464] ss:$16 sps:$4 sm:$0xff]   ;;  %v4008_v21 = vld [vmem:[%s5621_s1 + $0x46c] ss:$16 sps:$4 sm:$0xff]  }
  0x54   :  { %1946 = vmatprep.subr.bf16.mxu0 %v3915_v22  ;;  %2211 = vmatprep.subr.bf16.mxu1 %v3918_v23  ;;  %v4086_v22 = vld [vmem:[%s5622_s0 + $0x14] ss:$36 sps:$4 sm:$0xff]   ;;  %v4003_v23 = vld [vmem:[%s5621_s1 + $0x460] ss:$16 sps:$4 sm:$0xff]  }
  0x57   :  { %1947 = vmatpush1.bf16.msra.mxu0 %v3913_v25  ;;  %2212 = vmatpush1.bf16.msra.mxu1 %v3916_v26  ;;  %v4011_v25 = vld [vmem:[%s5621_s1 + $0x484] ss:$16 sps:$4 sm:$0xff]   ;;  %v4014_v26 = vld [vmem:[%s5621_s1 + $0x48c] ss:$16 sps:$4 sm:$0xff]  }
  0x58   :  { %1948 = vmatprep.subr.bf16.mxu0 %v3921_v27  ;;  %2213 = vmatprep.subr.bf16.mxu1 %v3924_v28  ;;  %v4009_v27 = vld [vmem:[%s5621_s1 + $0x480] ss:$16 sps:$4 sm:$0xff]   ;;  %v4012_v28 = vld [vmem:[%s5621_s1 + $0x488] ss:$16 sps:$4 sm:$0xff]  }
  0x5b   :  { %1949 = vmatpush1.bf16.msra.mxu0 %v3919_v30  ;;  %2214 = vmatpush1.bf16.msra.mxu1 %v3922_v31  ;;  %v4020_v30 = vld [vmem:[%s5621_s1 + $0x4ac] ss:$16 sps:$4 sm:$0xff]   ;;  %v4015_v31 = vld [vmem:[%s5621_s1 + $0x4a0] ss:$16 sps:$4 sm:$0xff]  }
  0x5c   :  { %1950 = vmatprep.subr.bf16.mxu0 %v3927_v32  ;;  %2215 = vmatprep.subr.bf16.mxu1 %v3930_v33  ;;  %v4018_v32 = vld [vmem:[%s5621_s1 + $0x4a8] ss:$16 sps:$4 sm:$0xff]   ;;  %v4023_v33 = vld [vmem:[%s5621_s1 + $0x4c4] ss:$16 sps:$4 sm:$0xff]  }
  0x5f   :  { %1951 = vmatpush1.bf16.msra.mxu0 %v3925_v35  ;;  %2216 = vmatpush1.bf16.msra.mxu1 %v3928_v36  ;;  %v4021_v35 = vld [vmem:[%s5621_s1 + $0x4c0] ss:$16 sps:$4 sm:$0xff]   ;;  %v4024_v36 = vld [vmem:[%s5621_s1 + $0x4c8] ss:$16 sps:$4 sm:$0xff]  }
  0x60   :  { %1952 = vmatprep.subr.bf16.mxu0 %v3933_v37  ;;  %2217 = vmatprep.subr.bf16.mxu1 %v3936_v38  ;;  %v4029_v37 = vld [vmem:[%s5621_s1 + $0x4e4] ss:$16 sps:$4 sm:$0xff]   ;;  %v4032_v38 = vld [vmem:[%s5621_s1 + $0x4ec] ss:$16 sps:$4 sm:$0xff]  }
  0x63   :  { %1953 = vmatpush1.bf16.msra.mxu0 %v3931_v39  ;;  %2218 = vmatpush1.bf16.msra.mxu1 %v3934_v40  ;;  %v4027_v39 = vld [vmem:[%s5621_s1 + $0x4e0] ss:$16 sps:$4 sm:$0xff]   ;;  %v4030_v40 = vld [vmem:[%s5621_s1 + $0x4e8] ss:$16 sps:$4 sm:$0xff]  }
  0x64   :  { %1954 = vmatprep.subr.bf16.mxu0 %v3939_v41  ;;  %2219 = vmatprep.subr.bf16.mxu1 %v3942_v42  ;;  %v4035_v41 = vld [vmem:[%s5621_s1 + $0x504] ss:$16 sps:$4 sm:$0xff]   ;;  %v4038_v42 = vld [vmem:[%s5621_s1 + $0x50c] ss:$16 sps:$4 sm:$0xff]  }
  0x67   :  { %1955 = vmatpush1.bf16.msra.mxu0 %v3937_v43  ;;  %2220 = vmatpush1.bf16.msra.mxu1 %v3940_v44  ;;  %v4033_v43 = vld [vmem:[%s5621_s1 + $0x500] ss:$16 sps:$4 sm:$0xff]   ;;  %v4036_v44 = vld [vmem:[%s5621_s1 + $0x508] ss:$16 sps:$4 sm:$0xff]  }
  0x68   :  { %1956 = vmatprep.subr.bf16.mxu0 %v3945_v45  ;;  %2221 = vmatprep.subr.bf16.mxu1 %v3948_v46  ;;  %v4041_v45 = vld [vmem:[%s5621_s1 + $0x524] ss:$16 sps:$4 sm:$0xff]   ;;  %v4044_v46 = vld [vmem:[%s5621_s1 + $0x52c] ss:$16 sps:$4 sm:$0xff]  }
  0x6b   :  { %1957 = vmatpush1.bf16.msra.mxu0 %v3943_v47  ;;  %2222 = vmatpush1.bf16.msra.mxu1 %v3946_v48  ;;  %v4039_v47 = vld [vmem:[%s5621_s1 + $0x520] ss:$16 sps:$4 sm:$0xff]   ;;  %v4042_v48 = vld [vmem:[%s5621_s1 + $0x528] ss:$16 sps:$4 sm:$0xff]  }
  0x6c   :  { %1958 = vmatprep.subr.bf16.mxu0 %v3951_v49  ;;  %2223 = vmatprep.subr.bf16.mxu1 %v3954_v50  ;;  %v4047_v49 = vld [vmem:[%s5621_s1 + $0x544] ss:$16 sps:$4 sm:$0xff]   ;;  %v4050_v50 = vld [vmem:[%s5621_s1 + $0x54c] ss:$16 sps:$4 sm:$0xff]  }
  0x6f   :  { %1959 = vmatpush1.bf16.msra.mxu0 %v3949_v51  ;;  %2224 = vmatpush1.bf16.msra.mxu1 %v3952_v52  ;;  %v4045_v51 = vld [vmem:[%s5621_s1 + $0x540] ss:$16 sps:$4 sm:$0xff]   ;;  %v4048_v52 = vld [vmem:[%s5621_s1 + $0x548] ss:$16 sps:$4 sm:$0xff]  }
  0x70   :  { %1960 = vmatprep.subr.bf16.mxu0 %v3957_v53  ;;  %2225 = vmatprep.subr.bf16.mxu1 %v3960_v54  ;;  %v4053_v53 = vld [vmem:[%s5621_s1 + $0x564] ss:$16 sps:$4 sm:$0xff]   ;;  %v4056_v54 = vld [vmem:[%s5621_s1 + $0x56c] ss:$16 sps:$4 sm:$0xff]  }
  0x73   :  { %1961 = vmatpush1.bf16.msra.mxu0 %v3955_v55  ;;  %2226 = vmatpush1.bf16.msra.mxu1 %v3958_v56  ;;  %v4051_v55 = vld [vmem:[%s5621_s1 + $0x560] ss:$16 sps:$4 sm:$0xff]   ;;  %v4054_v56 = vld [vmem:[%s5621_s1 + $0x568] ss:$16 sps:$4 sm:$0xff]  }
  0x74   :  { %1962 = vmatprep.subr.bf16.mxu0 %v3963_v57  ;;  %2227 = vmatprep.subr.bf16.mxu1 %v3966_v58  ;;  %v4059_v57 = vld [vmem:[%s5621_s1 + $0x584] ss:$16 sps:$4 sm:$0xff]   ;;  %v4062_v58 = vld [vmem:[%s5621_s1 + $0x58c] ss:$16 sps:$4 sm:$0xff]  }
  0x77   :  { %1963 = vmatpush1.bf16.msra.mxu0 %v3961_v59  ;;  %2228 = vmatpush1.bf16.msra.mxu1 %v3964_v60  ;;  %v4057_v59 = vld [vmem:[%s5621_s1 + $0x580] ss:$16 sps:$4 sm:$0xff]   ;;  %v4060_v60 = vld [vmem:[%s5621_s1 + $0x588] ss:$16 sps:$4 sm:$0xff]  }
  0x78   :  { %1964 = vmatprep.subr.bf16.mxu0 %v3971_v61  ;;  %2229 = vmatprep.subr.bf16.mxu1 %v3974_v62  ;;  %v4065_v61 = vld [vmem:[%s5621_s1 + $0x5a4] ss:$16 sps:$4 sm:$0xff]   ;;  %v4068_v62 = vld [vmem:[%s5621_s1 + $0x5ac] ss:$16 sps:$4 sm:$0xff]  }
  0x7b   :  { %1965 = vmatpush1.bf16.msra.mxu0 %v3969_v63  ;;  %2230 = vmatpush1.bf16.msra.mxu1 %v3972_v0  ;;  %v4063_v63 = vld [vmem:[%s5621_s1 + $0x5a0] ss:$16 sps:$4 sm:$0xff]   ;;  %v4066_v0 = vld [vmem:[%s5621_s1 + $0x5a8] ss:$16 sps:$4 sm:$0xff]  }
  0x7c   :  { %1966 = vmatprep.subr.bf16.mxu0 %v3978_v1  ;;  %2231 = vmatprep.subr.bf16.mxu1 %v3981_v2  ;;  %v4073_v1 = vld [vmem:[%s5621_s1 + $0x5c4] ss:$16 sps:$4 sm:$0xff]   ;;  %v4076_v2 = vld [vmem:[%s5621_s1 + $0x5cc] ss:$16 sps:$4 sm:$0xff]  }
  0x7f   :  { %1967 = vmatpush1.bf16.msra.mxu0 %v3976_v3  ;;  %2232 = vmatpush1.bf16.msra.mxu1 %v3979_v4  ;;  %v4071_v3 = vld [vmem:[%s5621_s1 + $0x5c0] ss:$16 sps:$4 sm:$0xff]   ;;  %v4074_v4 = vld [vmem:[%s5621_s1 + $0x5c8] ss:$16 sps:$4 sm:$0xff]  }
  0x80   :  { %1989 = vmatprep.subr.bf16.mxu0 %v3987_v5  ;;  %2254 = vmatprep.subr.bf16.mxu1 %v3990_v6  ;;  %v4080_v5 = vld [vmem:[%s5621_s1 + $0x5e4] ss:$16 sps:$4 sm:$0xff]   ;;  %v4083_v6 = vld [vmem:[%s5621_s1 + $0x5ec] ss:$16 sps:$4 sm:$0xff]  }
  0x82   :  { %1969 = vmatmul.mubr.bf16.vlgmr.msra.gmra.mrb[0].mxu0 %v3982_v7  ;;  %2234 = vmatmul.mubr.bf16.vlgmr.msra.gmra.mrb[0].mxu1 %v3982_v7  ;;  %v4078_v7 = vld [vmem:[%s5621_s1 + $0x5e0] ss:$16 sps:$4 sm:$0xff]  }
  0x83   :  { %1990 = vmatpush1.bf16.msra.mxu0 %v3985_v8  ;;  %2255 = vmatpush1.bf16.msra.mxu1 %v3988_v9  ;;  %v4081_v8 = vld [vmem:[%s5621_s1 + $0x5e8] ss:$16 sps:$4 sm:$0xff]   ;;  %v4089_v9 = vld [vmem:[%s5621_s1 + $0x604] ss:$16 sps:$4 sm:$0xff]  }
  0x84   :  { %1991 = vmatprep.subr.bf16.mxu0 %v3993_v10  ;;  %2256 = vmatprep.subr.bf16.mxu1 %v3996_v11  ;;  %v4092_v10 = vld [vmem:[%s5621_s1 + $0x60c] ss:$16 sps:$4 sm:$0xff]   ;;  %v4084_v11 = vld [vmem:[%s5622_s0 + $0x10] ss:$36 sps:$4 sm:$0xff]  }
  0x85   :  { %1978 = vmatprep.mubr.bf16.mxu0 %v4069_v12  ;;  %2243 = vmatprep.mubr.bf16.mxu1 %v4069_v12  ;;  %v4087_v12 = vld [vmem:[%s5621_s1 + $0x600] ss:$16 sps:$4 sm:$0xff]  }
  0x87   :  { %1992 = vmatpush1.bf16.msra.mxu0 %v3991_v13  ;;  %2257 = vmatpush1.bf16.msra.mxu1 %v3994_v14  ;;  %v4090_v13 = vld [vmem:[%s5621_s1 + $0x608] ss:$16 sps:$4 sm:$0xff]   ;;  %v4095_v14 = vld [vmem:[%s5621_s1 + $0x624] ss:$16 sps:$4 sm:$0xff]  }
  0x88   :  { %1993 = vmatprep.subr.bf16.mxu0 %v3999_v15  ;;  %2258 = vmatprep.subr.bf16.mxu1 %v4002_v16  ;;  %v4098_v15 = vld [vmem:[%s5621_s1 + $0x62c] ss:$16 sps:$4 sm:$0xff]  }
  0x89   :  { %v4171_v16 = vld [vmem:[%s5622_s0 + $0x5c] ss:$36 sps:$4 sm:$0xff]  }
  0x8a   :  { %1979 = vmatmul.mubr.bf16.gmra.mrb[4].mxu0 %v4077_v19  ;;  %2244 = vmatmul.mubr.bf16.gmra.mrb[4].mxu1 %v4077_v19  ;;  %v4101_v19 = vld [vmem:[%s5621_s1 + $0x644] ss:$16 sps:$4 sm:$0xff]  }
  0x8b   :  { %1994 = vmatpush1.bf16.msra.mxu0 %v3997_v17  ;;  %2259 = vmatpush1.bf16.msra.mxu1 %v4000_v18  ;;  %v4093_v17 = vld [vmem:[%s5621_s1 + $0x620] ss:$16 sps:$4 sm:$0xff]   ;;  %v4096_v18 = vld [vmem:[%s5621_s1 + $0x628] ss:$16 sps:$4 sm:$0xff]  }
  0x8c   :  { %1995 = vmatprep.subr.bf16.mxu0 %v4005_v20  ;;  %2260 = vmatprep.subr.bf16.mxu1 %v4008_v21  ;;  %v4104_v20 = vld [vmem:[%s5621_s1 + $0x64c] ss:$16 sps:$4 sm:$0xff]   ;;  %v4099_v21 = vld [vmem:[%s5621_s1 + $0x640] ss:$16 sps:$4 sm:$0xff]  }
  0x8d   :  { %2021 = vmatprep.mubr.bf16.mxu0 %v4086_v22  ;;  %2286 = vmatprep.mubr.bf16.mxu1 %v4086_v22  ;;  %v4102_v22 = vld [vmem:[%s5621_s1 + $0x648] ss:$16 sps:$4 sm:$0xff]  }
  0x8f   :  { %1996 = vmatpush1.bf16.msra.mxu0 %v4003_v23  ;;  %2261 = vmatpush1.bf16.msra.mxu1 %v4006_v24  ;;  %v4179_v23 = vld [vmem:[%s5622_s0 + $0x58] ss:$36 sps:$4 sm:$0xff]   ;;  %v4107_v24 = vld [vmem:[%s5621_s1 + $0x664] ss:$16 sps:$4 sm:$0xff]  }
  0x90   :  { %1997 = vmatprep.subr.bf16.mxu0 %v4011_v25  ;;  %2262 = vmatprep.subr.bf16.mxu1 %v4014_v26  ;;  %v4110_v25 = vld [vmem:[%s5621_s1 + $0x66c] ss:$16 sps:$4 sm:$0xff]  }
  0x91   :  { %v4188_v26 = vld [vmem:[%s5622_s0 + $0x1c] ss:$36 sps:$4 sm:$0xff]  }
  0x93   :  { %1998 = vmatpush1.bf16.msra.mxu0 %v4009_v27  ;;  %2263 = vmatpush1.bf16.msra.mxu1 %v4012_v28  ;;  %v4105_v27 = vld [vmem:[%s5621_s1 + $0x660] ss:$16 sps:$4 sm:$0xff]   ;;  %v4108_v28 = vld [vmem:[%s5621_s1 + $0x668] ss:$16 sps:$4 sm:$0xff]  }
  0x94   :  { %1999 = vmatprep.subr.bf16.mxu0 %v4017_v29  ;;  %2264 = vmatprep.subr.bf16.mxu1 %v4020_v30  ;;  %v4113_v29 = vld [vmem:[%s5621_s1 + $0x684] ss:$16 sps:$4 sm:$0xff]   ;;  %v4116_v30 = vld [vmem:[%s5621_s1 + $0x68c] ss:$16 sps:$4 sm:$0xff]  }
  0x97   :  { %2000 = vmatpush1.bf16.msra.mxu0 %v4015_v31  ;;  %2265 = vmatpush1.bf16.msra.mxu1 %v4018_v32  ;;  %v4111_v31 = vld [vmem:[%s5621_s1 + $0x680] ss:$16 sps:$4 sm:$0xff]   ;;  %v4114_v32 = vld [vmem:[%s5621_s1 + $0x688] ss:$16 sps:$4 sm:$0xff]  }
  0x98   :  { %2001 = vmatprep.subr.bf16.mxu0 %v4023_v33  ;;  %2266 = vmatprep.subr.bf16.mxu1 %v4026_v34  ;;  %v4119_v33 = vld [vmem:[%s5621_s1 + $0x6a4] ss:$16 sps:$4 sm:$0xff]   ;;  %v4122_v34 = vld [vmem:[%s5621_s1 + $0x6ac] ss:$16 sps:$4 sm:$0xff]  }
  0x9b   :  { %2002 = vmatpush1.bf16.msra.mxu0 %v4021_v35  ;;  %2267 = vmatpush1.bf16.msra.mxu1 %v4024_v36  ;;  %v4117_v35 = vld [vmem:[%s5621_s1 + $0x6a0] ss:$16 sps:$4 sm:$0xff]   ;;  %v4120_v36 = vld [vmem:[%s5621_s1 + $0x6a8] ss:$16 sps:$4 sm:$0xff]  }
  0x9c   :  { %2003 = vmatprep.subr.bf16.mxu0 %v4029_v37  ;;  %2268 = vmatprep.subr.bf16.mxu1 %v4032_v38  ;;  %v4125_v37 = vld [vmem:[%s5621_s1 + $0x6c4] ss:$16 sps:$4 sm:$0xff]   ;;  %v4128_v38 = vld [vmem:[%s5621_s1 + $0x6cc] ss:$16 sps:$4 sm:$0xff]  }
  0x9f   :  { %2004 = vmatpush1.bf16.msra.mxu0 %v4027_v39  ;;  %2269 = vmatpush1.bf16.msra.mxu1 %v4030_v40  ;;  %v4123_v39 = vld [vmem:[%s5621_s1 + $0x6c0] ss:$16 sps:$4 sm:$0xff]   ;;  %v4126_v40 = vld [vmem:[%s5621_s1 + $0x6c8] ss:$16 sps:$4 sm:$0xff]  }
  0xa0   :  { %2005 = vmatprep.subr.bf16.mxu0 %v4035_v41  ;;  %2270 = vmatprep.subr.bf16.mxu1 %v4038_v42  ;;  %v4131_v41 = vld [vmem:[%s5621_s1 + $0x6e4] ss:$16 sps:$4 sm:$0xff]   ;;  %v4134_v42 = vld [vmem:[%s5621_s1 + $0x6ec] ss:$16 sps:$4 sm:$0xff]  }
  0xa3   :  { %2006 = vmatpush1.bf16.msra.mxu0 %v4033_v43  ;;  %2271 = vmatpush1.bf16.msra.mxu1 %v4036_v44  ;;  %v4129_v43 = vld [vmem:[%s5621_s1 + $0x6e0] ss:$16 sps:$4 sm:$0xff]   ;;  %v4132_v44 = vld [vmem:[%s5621_s1 + $0x6e8] ss:$16 sps:$4 sm:$0xff]  }
  0xa4   :  { %2007 = vmatprep.subr.bf16.mxu0 %v4041_v45  ;;  %2272 = vmatprep.subr.bf16.mxu1 %v4044_v46  ;;  %v4137_v45 = vld [vmem:[%s5621_s1 + $0x704] ss:$16 sps:$4 sm:$0xff]   ;;  %v4140_v46 = vld [vmem:[%s5621_s1 + $0x70c] ss:$16 sps:$4 sm:$0xff]  }
  0xa7   :  { %2008 = vmatpush1.bf16.msra.mxu0 %v4039_v47  ;;  %2273 = vmatpush1.bf16.msra.mxu1 %v4042_v48  ;;  %v4135_v47 = vld [vmem:[%s5621_s1 + $0x700] ss:$16 sps:$4 sm:$0xff]   ;;  %v4138_v48 = vld [vmem:[%s5621_s1 + $0x708] ss:$16 sps:$4 sm:$0xff]  }
  0xa8   :  { %2009 = vmatprep.subr.bf16.mxu0 %v4047_v49  ;;  %2274 = vmatprep.subr.bf16.mxu1 %v4050_v50  ;;  %v4143_v49 = vld [vmem:[%s5621_s1 + $0x724] ss:$16 sps:$4 sm:$0xff]   ;;  %v4146_v50 = vld [vmem:[%s5621_s1 + $0x72c] ss:$16 sps:$4 sm:$0xff]  }
  0xab   :  { %2010 = vmatpush1.bf16.msra.mxu0 %v4045_v51  ;;  %2275 = vmatpush1.bf16.msra.mxu1 %v4048_v52  ;;  %v4141_v51 = vld [vmem:[%s5621_s1 + $0x720] ss:$16 sps:$4 sm:$0xff]   ;;  %v4144_v52 = vld [vmem:[%s5621_s1 + $0x728] ss:$16 sps:$4 sm:$0xff]  }
  0xac   :  { %2011 = vmatprep.subr.bf16.mxu0 %v4053_v53  ;;  %2276 = vmatprep.subr.bf16.mxu1 %v4056_v54  ;;  %v4149_v53 = vld [vmem:[%s5621_s1 + $0x744] ss:$16 sps:$4 sm:$0xff]   ;;  %v4152_v54 = vld [vmem:[%s5621_s1 + $0x74c] ss:$16 sps:$4 sm:$0xff]  }
  0xaf   :  { %2012 = vmatpush1.bf16.msra.mxu0 %v4051_v55  ;;  %2277 = vmatpush1.bf16.msra.mxu1 %v4054_v56  ;;  %v4147_v55 = vld [vmem:[%s5621_s1 + $0x740] ss:$16 sps:$4 sm:$0xff]   ;;  %v4150_v56 = vld [vmem:[%s5621_s1 + $0x748] ss:$16 sps:$4 sm:$0xff]  }
  0xb0   :  { %2013 = vmatprep.subr.bf16.mxu0 %v4059_v57  ;;  %2278 = vmatprep.subr.bf16.mxu1 %v4062_v58  ;;  %v4155_v57 = vld [vmem:[%s5621_s1 + $0x764] ss:$16 sps:$4 sm:$0xff]   ;;  %v4158_v58 = vld [vmem:[%s5621_s1 + $0x76c] ss:$16 sps:$4 sm:$0xff]  }
  0xb3   :  { %2014 = vmatpush1.bf16.msra.mxu0 %v4057_v59  ;;  %2279 = vmatpush1.bf16.msra.mxu1 %v4060_v60  ;;  %v4153_v59 = vld [vmem:[%s5621_s1 + $0x760] ss:$16 sps:$4 sm:$0xff]   ;;  %v4156_v60 = vld [vmem:[%s5621_s1 + $0x768] ss:$16 sps:$4 sm:$0xff]  }
  0xb4   :  { %2015 = vmatprep.subr.bf16.mxu0 %v4065_v61  ;;  %2280 = vmatprep.subr.bf16.mxu1 %v4068_v62  ;;  %v4161_v61 = vld [vmem:[%s5621_s1 + $0x784] ss:$16 sps:$4 sm:$0xff]   ;;  %v4164_v62 = vld [vmem:[%s5621_s1 + $0x78c] ss:$16 sps:$4 sm:$0xff]  }
  0xb7   :  { %2016 = vmatpush1.bf16.msra.mxu0 %v4063_v63  ;;  %2281 = vmatpush1.bf16.msra.mxu1 %v4066_v0  ;;  %v4159_v63 = vld [vmem:[%s5621_s1 + $0x780] ss:$16 sps:$4 sm:$0xff]   ;;  %v4162_v0 = vld [vmem:[%s5621_s1 + $0x788] ss:$16 sps:$4 sm:$0xff]  }
  0xb8   :  { %2017 = vmatprep.subr.bf16.mxu0 %v4073_v1  ;;  %2282 = vmatprep.subr.bf16.mxu1 %v4076_v2  ;;  %v4167_v1 = vld [vmem:[%s5621_s1 + $0x7a4] ss:$16 sps:$4 sm:$0xff]   ;;  %v4170_v2 = vld [vmem:[%s5621_s1 + $0x7ac] ss:$16 sps:$4 sm:$0xff]  }
  0xbb   :  { %2018 = vmatpush1.bf16.msra.mxu0 %v4071_v3  ;;  %2283 = vmatpush1.bf16.msra.mxu1 %v4074_v4  ;;  %v4165_v3 = vld [vmem:[%s5621_s1 + $0x7a0] ss:$16 sps:$4 sm:$0xff]   ;;  %v4168_v4 = vld [vmem:[%s5621_s1 + $0x7a8] ss:$16 sps:$4 sm:$0xff]  }
  0xbc   :  { %2019 = vmatprep.subr.bf16.mxu0 %v4080_v5  ;;  %2284 = vmatprep.subr.bf16.mxu1 %v4083_v6  ;;  %v4175_v5 = vld [vmem:[%s5621_s1 + $0x7c4] ss:$16 sps:$4 sm:$0xff]   ;;  %v4178_v6 = vld [vmem:[%s5621_s1 + $0x7cc] ss:$16 sps:$4 sm:$0xff]  }
  0xbf   :  { %2020 = vmatpush1.bf16.msra.mxu0 %v4078_v7  ;;  %2285 = vmatpush1.bf16.msra.mxu1 %v4081_v8  ;;  %v4173_v7 = vld [vmem:[%s5621_s1 + $0x7c0] ss:$16 sps:$4 sm:$0xff]   ;;  %v4176_v8 = vld [vmem:[%s5621_s1 + $0x7c8] ss:$16 sps:$4 sm:$0xff]  }
  0xc0   :  { %2042 = vmatprep.subr.bf16.mxu0 %v4089_v9  ;;  %2307 = vmatprep.subr.bf16.mxu1 %v4092_v10  ;;  %v4182_v9 = vld [vmem:[%s5621_s1 + $0x7e4] ss:$16 sps:$4 sm:$0xff]   ;;  %v4185_v10 = vld [vmem:[%s5621_s1 + $0x7ec] ss:$16 sps:$4 sm:$0xff]  }
  0xc2   :  { %2022 = vmatmul.mubr.bf16.vlgmr.msra.gmra.mrb[0].mxu0 %v4084_v11  ;;  %2287 = vmatmul.mubr.bf16.vlgmr.msra.gmra.mrb[0].mxu1 %v4084_v11  ;;  %v4180_v11 = vld [vmem:[%s5621_s1 + $0x7e0] ss:$16 sps:$4 sm:$0xff]  }
  0xc3   :  { %2043 = vmatpush1.bf16.msra.mxu0 %v4087_v12  ;;  %2308 = vmatpush1.bf16.msra.mxu1 %v4090_v13  ;;  %v4183_v12 = vld [vmem:[%s5621_s1 + $0x7e8] ss:$16 sps:$4 sm:$0xff]   ;;  %v4191_v13 = vld [vmem:[%s5621_s1 + $0x804] ss:$16 sps:$4 sm:$0xff]  }
  0xc4   :  { %2044 = vmatprep.subr.bf16.mxu0 %v4095_v14  ;;  %2309 = vmatprep.subr.bf16.mxu1 %v4098_v15  ;;  %v4194_v14 = vld [vmem:[%s5621_s1 + $0x80c] ss:$16 sps:$4 sm:$0xff]  }
  0xc5   :  { %2031 = vmatprep.mubr.bf16.mxu0 %v4171_v16  ;;  %2296 = vmatprep.mubr.bf16.mxu1 %v4171_v16  ;;  %v4186_v15 = vld [vmem:[%s5622_s0 + $0x18] ss:$36 sps:$4 sm:$0xff]   ;;  %v4189_v16 = vld [vmem:[%s5621_s1 + $0x800] ss:$16 sps:$4 sm:$0xff]  }
  0xc7   :  { %2045 = vmatpush1.bf16.msra.mxu0 %v4093_v17  ;;  %2310 = vmatpush1.bf16.msra.mxu1 %v4096_v18  ;;  %v4192_v17 = vld [vmem:[%s5621_s1 + $0x808] ss:$16 sps:$4 sm:$0xff]   ;;  %v4197_v18 = vld [vmem:[%s5621_s1 + $0x824] ss:$16 sps:$4 sm:$0xff]  }
  0xc8   :  { %2046 = vmatprep.subr.bf16.mxu0 %v4101_v19  ;;  %2311 = vmatprep.subr.bf16.mxu1 %v4104_v20  ;;  %v4200_v19 = vld [vmem:[%s5621_s1 + $0x82c] ss:$16 sps:$4 sm:$0xff]   ;;  %v4225_v20 = vld [vmem:[%s5622_s0 + $0x64] ss:$36 sps:$4 sm:$0xff]  }
  0xca   :  { %2032 = vmatmul.mubr.bf16.gmra.mrb[4].mxu0 %v4179_v23  ;;  %2297 = vmatmul.mubr.bf16.gmra.mrb[4].mxu1 %v4179_v23  ;;  %v4203_v23 = vld [vmem:[%s5621_s1 + $0x844] ss:$16 sps:$4 sm:$0xff]  }
  0xcb   :  { %2047 = vmatpush1.bf16.msra.mxu0 %v4099_v21  ;;  %2312 = vmatpush1.bf16.msra.mxu1 %v4102_v22  ;;  %v4195_v21 = vld [vmem:[%s5621_s1 + $0x820] ss:$16 sps:$4 sm:$0xff]   ;;  %v4198_v22 = vld [vmem:[%s5621_s1 + $0x828] ss:$16 sps:$4 sm:$0xff]  }
  0xcc   :  { %2048 = vmatprep.subr.bf16.mxu0 %v4107_v24  ;;  %2313 = vmatprep.subr.bf16.mxu1 %v4110_v25  ;;  %v4206_v24 = vld [vmem:[%s5621_s1 + $0x84c] ss:$16 sps:$4 sm:$0xff]   ;;  %v4227_v25 = vld [vmem:[%s5622_s0 + $0x60] ss:$36 sps:$4 sm:$0xff]  }
  0xcd   :  { %2074 = vmatprep.mubr.bf16.mxu0 %v4188_v26  ;;  %2339 = vmatprep.mubr.bf16.mxu1 %v4188_v26  ;;  %v4201_v26 = vld [vmem:[%s5621_s1 + $0x840] ss:$16 sps:$4 sm:$0xff]  }
  0xcf   :  { %2049 = vmatpush1.bf16.msra.mxu0 %v4105_v27  ;;  %2314 = vmatpush1.bf16.msra.mxu1 %v4108_v28  ;;  %v4204_v27 = vld [vmem:[%s5621_s1 + $0x848] ss:$16 sps:$4 sm:$0xff]   ;;  %v4209_v28 = vld [vmem:[%s5621_s1 + $0x864] ss:$16 sps:$4 sm:$0xff]  }
  0xd0   :  { %2050 = vmatprep.subr.bf16.mxu0 %v4113_v29  ;;  %2315 = vmatprep.subr.bf16.mxu1 %v4116_v30  ;;  %v4212_v29 = vld [vmem:[%s5621_s1 + $0x86c] ss:$16 sps:$4 sm:$0xff]   ;;  %v4207_v30 = vld [vmem:[%s5621_s1 + $0x860] ss:$16 sps:$4 sm:$0xff]  }
  0xd3   :  { %2051 = vmatpush1.bf16.msra.mxu0 %v4111_v31  ;;  %2316 = vmatpush1.bf16.msra.mxu1 %v4114_v32  ;;  %v4210_v31 = vld [vmem:[%s5621_s1 + $0x868] ss:$16 sps:$4 sm:$0xff]   ;;  %v4215_v32 = vld [vmem:[%s5621_s1 + $0x884] ss:$16 sps:$4 sm:$0xff]  }
  0xd4   :  { %2052 = vmatprep.subr.bf16.mxu0 %v4119_v33  ;;  %2317 = vmatprep.subr.bf16.mxu1 %v4122_v34  ;;  %v4218_v33 = vld [vmem:[%s5621_s1 + $0x88c] ss:$16 sps:$4 sm:$0xff]   ;;  %v4274_v34 = vmov 0  }
  0xd7   :  { %2053 = vmatpush1.bf16.msra.mxu0 %v4117_v35  ;;  %2318 = vmatpush1.bf16.msra.mxu1 %v4120_v36  ;;  %v4213_v35 = vld [vmem:[%s5621_s1 + $0x880] ss:$16 sps:$4 sm:$0xff]   ;;  %v4216_v36 = vld [vmem:[%s5621_s1 + $0x888] ss:$16 sps:$4 sm:$0xff]  }
  0xd8   :  { %2054 = vmatprep.subr.bf16.mxu0 %v4125_v37  ;;  %2319 = vmatprep.subr.bf16.mxu1 %v4128_v38  ;;  %v4221_v37 = vld [vmem:[%s5621_s1 + $0x8a4] ss:$16 sps:$4 sm:$0xff]   ;;  %v4224_v38 = vld [vmem:[%s5621_s1 + $0x8ac] ss:$16 sps:$4 sm:$0xff]  }
  0xdb   :  { %2055 = vmatpush1.bf16.msra.mxu0 %v4123_v39  ;;  %2320 = vmatpush1.bf16.msra.mxu1 %v4126_v40  ;;  %v4219_v39 = vld [vmem:[%s5621_s1 + $0x8a0] ss:$16 sps:$4 sm:$0xff]   ;;  %v4222_v40 = vld [vmem:[%s5621_s1 + $0x8a8] ss:$16 sps:$4 sm:$0xff]  }
  0xdc   :  { %2056 = vmatprep.subr.bf16.mxu0 %v4131_v41  ;;  %2321 = vmatprep.subr.bf16.mxu1 %v4134_v42  ;;  %v4230_v41 = vld [vmem:[%s5621_s1 + $0x8c4] ss:$16 sps:$4 sm:$0xff]   ;;  %v4233_v42 = vld [vmem:[%s5621_s1 + $0x8cc] ss:$16 sps:$4 sm:$0xff]  }
  0xdf   :  { %2057 = vmatpush1.bf16.msra.mxu0 %v4129_v43  ;;  %2322 = vmatpush1.bf16.msra.mxu1 %v4132_v44  ;;  %v4228_v43 = vld [vmem:[%s5621_s1 + $0x8c0] ss:$16 sps:$4 sm:$0xff]   ;;  %v4231_v44 = vld [vmem:[%s5621_s1 + $0x8c8] ss:$16 sps:$4 sm:$0xff]  }
  0xe0   :  { %2058 = vmatprep.subr.bf16.mxu0 %v4137_v45  ;;  %2323 = vmatprep.subr.bf16.mxu1 %v4140_v46  ;;  %v4236_v45 = vld [vmem:[%s5621_s1 + $0x8e4] ss:$16 sps:$4 sm:$0xff]   ;;  %v4239_v46 = vld [vmem:[%s5621_s1 + $0x8ec] ss:$16 sps:$4 sm:$0xff]  }
  0xe3   :  { %2059 = vmatpush1.bf16.msra.mxu0 %v4135_v47  ;;  %2324 = vmatpush1.bf16.msra.mxu1 %v4138_v48  ;;  %v2413_v47 = vld [vmem:[%s5623_s3] sm:$0xff]  ;;  %v2414_v48 = vld [vmem:[%s5623_s3 + $0x8] sm:$0xff] }
  0xe4   :  { %2060 = vmatprep.subr.bf16.mxu0 %v4143_v49  ;;  %2325 = vmatprep.subr.bf16.mxu1 %v4146_v50  ;;  %v4234_v49 = vld [vmem:[%s5621_s1 + $0x8e0] ss:$16 sps:$4 sm:$0xff]   ;;  %v4237_v50 = vld [vmem:[%s5621_s1 + $0x8e8] ss:$16 sps:$4 sm:$0xff]  }
  0xe7   :  { %2061 = vmatpush1.bf16.msra.mxu0 %v4141_v51  ;;  %2326 = vmatpush1.bf16.msra.mxu1 %v4144_v52  ;;  %v5223_v51 = vpack.c.bf16 %v2414_v48, %v2413_v47  ;;  %v4240_v52 = vld [vmem:[%s5622_s0 + $0x20] ss:$36 sps:$4 sm:$0xff]  }
  0xe8   :  { %2062 = vmatprep.subr.bf16.mxu0 %v4149_v53  ;;  %2327 = vmatprep.subr.bf16.mxu1 %v4152_v54  ;;  %v2415_v53 = vld [vmem:[%s5623_s3 + $0x10] sm:$0xff]  ;;  %v2416_v54 = vld [vmem:[%s5623_s3 + $0x18] sm:$0xff] }
  0xeb   :  { %2063 = vmatpush1.bf16.msra.mxu0 %v4147_v55  ;;  %2328 = vmatpush1.bf16.msra.mxu1 %v4150_v56  ;;  %v5236_v55 = vpack.c.bf16 %v2416_v54, %v2415_v53  ;;  %v2417_v56 = vld [vmem:[%s5623_s3 + $0x20] sm:$0xff] }
  0xec   :  { %2064 = vmatprep.subr.bf16.mxu0 %v4155_v57  ;;  %2329 = vmatprep.subr.bf16.mxu1 %v4158_v58  ;;  %v2418_v57 = vld [vmem:[%s5623_s3 + $0x28] sm:$0xff] }
  0xed   :  { %v5248_v58 = vpack.c.bf16 %v2418_v57, %v2417_v56 }
  0xef   :  { %2065 = vmatpush1.bf16.msra.mxu0 %v4153_v59  ;;  %2330 = vmatpush1.bf16.msra.mxu1 %v4156_v60  ;;  %v4241_v59 = vld [vmem:[%s5622_s0 + $0x68] ss:$36 sps:$4 sm:$0xff]   ;;  %v2419_v60 = vld [vmem:[%s5623_s3 + $0x30] sm:$0xff] }
  0xf0   :  { %2066 = vmatprep.subr.bf16.mxu0 %v4161_v61  ;;  %2331 = vmatprep.subr.bf16.mxu1 %v4164_v62  ;;  %v2420_v61 = vld [vmem:[%s5623_s3 + $0x38] sm:$0xff] }
  0xf1   :  { %v5263_v62 = vpack.c.bf16 %v2420_v61, %v2419_v60 }
  0xf3   :  { %2067 = vmatpush1.bf16.msra.mxu0 %v4159_v63  ;;  %2332 = vmatpush1.bf16.msra.mxu1 %v4162_v0  ;;  %v2421_v63 = vld [vmem:[%s5623_s3 + $0x40] sm:$0xff]  ;;  %v2422_v0 = vld [vmem:[%s5623_s3 + $0x48] sm:$0xff] }
  0xf4   :  { %2068 = vmatprep.subr.bf16.mxu0 %v4167_v1  ;;  %2333 = vmatprep.subr.bf16.mxu1 %v4170_v2  ;;  %v5275_v1 = vpack.c.bf16 %v2422_v0, %v2421_v63  ;;  %v2423_v2 = vld [vmem:[%s5623_s3 + $0x50] sm:$0xff] }
  0xf7   :  { %2069 = vmatpush1.bf16.msra.mxu0 %v4165_v3  ;;  %2334 = vmatpush1.bf16.msra.mxu1 %v4168_v4  ;;  %v2424_v3 = vld [vmem:[%s5623_s3 + $0x58] sm:$0xff] }
  0xf8   :  { %2070 = vmatprep.subr.bf16.mxu0 %v4175_v5  ;;  %2335 = vmatprep.subr.bf16.mxu1 %v4178_v6  ;;  %v5287_v4 = vpack.c.bf16 %v2424_v3, %v2423_v2  ;;  %v2425_v5 = vld [vmem:[%s5623_s3 + $0x60] sm:$0xff]  ;;  %v2426_v6 = vld [vmem:[%s5623_s3 + $0x68] sm:$0xff] }
  0xfb   :  { %2071 = vmatpush1.bf16.msra.mxu0 %v4173_v7  ;;  %2336 = vmatpush1.bf16.msra.mxu1 %v4176_v8  ;;  %v5299_v7 = vpack.c.bf16 %v2426_v6, %v2425_v5  ;;  %v2427_v8 = vld [vmem:[%s5623_s3 + $0x70] sm:$0xff]  ;;  %v5439_v6 = vld [vmem:[%s5625_s4] ss:$0 sm:$0xff] }
  0xfc   :  { %2072 = vmatprep.subr.bf16.mxu0 %v4182_v9  ;;  %2337 = vmatprep.subr.bf16.mxu1 %v4185_v10  ;;  %v2428_v9 = vld [vmem:[%s5623_s3 + $0x78] sm:$0xff] }
  0xfd   :  { %v5313_v10 = vpack.c.bf16 %v2428_v9, %v2427_v8 }
  0xff   :  { %2073 = vmatpush1.bf16.msra.mxu0 %v4180_v11  ;;  %2338 = vmatpush1.bf16.msra.mxu1 %v4183_v12  ;;  %v331_v11 = vlaneseq }
 0x100   :  { %2095 = vmatprep.subr.bf16.mxu0 %v4191_v13  ;;  %2360 = vmatprep.subr.bf16.mxu1 %v4194_v14  ;;  %v329_v14 = vld [vmem:[%s5624_s2] sm:$0xf] }
 0x101   :  { %v332_v12 = vshrl.u32 %v331_v11, 7 }
 0x102   :  { %2075 = vmatmul.mubr.bf16.vlgmr.msra.gmra.mrb[0].mxu0 %v4186_v15  ;;  %2340 = vmatmul.mubr.bf16.vlgmr.msra.gmra.mrb[0].mxu1 %v4186_v15 }
 0x103   :  { %2096 = vmatpush1.bf16.msra.mxu0 %v4189_v16  ;;  %2361 = vmatpush1.bf16.msra.mxu1 %v4192_v17  ;;  %v333_v13 = vsub.s32 0, %v332_v12  ;;  %v337_v15 = vsub.s32 1, %v332_v12 }
 0x104   :  { %2097 = vmatprep.subr.bf16.mxu0 %v4197_v18  ;;  %2362 = vmatprep.subr.bf16.mxu1 %v4200_v19 }
 0x105   :  { %2084 = vmatprep.mubr.bf16.mxu0 %v4225_v20  ;;  %2349 = vmatprep.mubr.bf16.mxu1 %v4225_v20  ;;  %v334_v16 = vrot.slane %v329_v14, %v333_v13  ;;  %v338_v17 = vrot.slane %v329_v14, %v337_v15 }
 0x107   :  { %2098 = vmatpush1.bf16.msra.mxu0 %v4195_v21  ;;  %2363 = vmatpush1.bf16.msra.mxu1 %v4198_v22 }
 0x108   :  { %2099 = vmatprep.subr.bf16.mxu0 %v4203_v23  ;;  %2364 = vmatprep.subr.bf16.mxu1 %v4206_v24 }
 0x10a   :  { %2085 = vmatmul.mubr.bf16.gmra.mrb[4].mxu0 %v4227_v25  ;;  %2350 = vmatmul.mubr.bf16.gmra.mrb[4].mxu1 %v4227_v25 }
 0x10b   :  { %2100 = vmatpush1.bf16.msra.mxu0 %v4201_v26  ;;  %2365 = vmatpush1.bf16.msra.mxu1 %v4204_v27  ;;  %v341_v27 = vsub.s32 2, %v332_v12 }
 0x10c   :  { %2101 = vmatprep.subr.bf16.mxu0 %v4209_v28  ;;  %2366 = vmatprep.subr.bf16.mxu1 %v4212_v29 }
 0x10d   :  { %2127 = vmatprep.mubr.bf16.mxu0 %v4274_v34  ;;  %2392 = vmatprep.mubr.bf16.mxu1 %v4274_v34 }
 0x10f   :  { %2102 = vmatpush1.bf16.msra.mxu0 %v4207_v30  ;;  %2367 = vmatpush1.bf16.msra.mxu1 %v4210_v31 }
 0x110   :  { %2103 = vmatprep.subr.bf16.mxu0 %v4215_v32  ;;  %2368 = vmatprep.subr.bf16.mxu1 %v4218_v33  ;;  %v345_v32 = vsub.s32 3, %v332_v12 }
 0x113   :  { %2104 = vmatpush1.bf16.msra.mxu0 %v4213_v35  ;;  %2369 = vmatpush1.bf16.msra.mxu1 %v4216_v36  ;;  %v5344_v36 = vrot.slane %v329_v14, %v341_v27 }
 0x114   :  { %2105 = vmatprep.subr.bf16.mxu0 %v4221_v37  ;;  %2370 = vmatprep.subr.bf16.mxu1 %v4224_v38  ;;  %v5346_v37 = vrot.slane %v329_v14, %v345_v32 }
 0x117   :  { %2106 = vmatpush1.bf16.msra.mxu0 %v4219_v39  ;;  %2371 = vmatpush1.bf16.msra.mxu1 %v4222_v40 }
 0x118   :  { %2107 = vmatprep.subr.bf16.mxu0 %v4230_v41  ;;  %2372 = vmatprep.subr.bf16.mxu1 %v4233_v42 }
 0x11b   :  { %2108 = vmatpush1.bf16.msra.mxu0 %v4228_v43  ;;  %2373 = vmatpush1.bf16.msra.mxu1 %v4231_v44 }
 0x11c   :  { %2109 = vmatprep.subr.bf16.mxu0 %v4236_v45  ;;  %2374 = vmatprep.subr.bf16.mxu1 %v4239_v46 }
 0x11f   :  { %2110 = vmatpush1.bf16.msra.mxu0 %v4234_v49  ;;  %2375 = vmatpush1.bf16.msra.mxu1 %v4237_v50 }
 0x120   :  { %3576 = vmatprep.subr.bf16.mxu0 %v5223_v51  ;;  %3608 = vmatprep.subr.bf16.mxu1 %v5223_v51 }
 0x122   :  { %2128 = vmatmul.mubr.bf16.vlgmr.msra.gmra.mrb[0].mxu0 %v4240_v52  ;;  %2393 = vmatmul.mubr.bf16.vlgmr.msra.gmra.mrb[0].mxu1 %v4240_v52 }
 0x123   :  { %2137 = vmatprep.mubr.bf16.mxu0 %v4274_v34  ;;  %2402 = vmatprep.mubr.bf16.mxu1 %v4274_v34 }
 0x124   :  { %3578 = vmatpush3.bf16.msra.mxu0 %v5223_v51  ;;  %3610 = vmatpush3.bf16.msra.mxu1 %v5223_v51 }
 0x125   :  { %3580 = vmatprep.subr.bf16.mxu0 %v5236_v55  ;;  %3612 = vmatprep.subr.bf16.mxu1 %v5236_v55 }
 0x128   :  { %3582 = vmatpush3.bf16.msra.mxu0 %v5236_v55  ;;  %3614 = vmatpush3.bf16.msra.mxu1 %v5236_v55 }
 0x129   :  { %3584 = vmatprep.subr.bf16.mxu0 %v5248_v58  ;;  %3616 = vmatprep.subr.bf16.mxu1 %v5248_v58 }
 0x12a   :  { %2138 = vmatmul.mubr.bf16.gmra.mrb[4].mxu0 %v4241_v59  ;;  %2403 = vmatmul.mubr.bf16.gmra.mrb[4].mxu1 %v4241_v59 }
 0x12c   :  { %3586 = vmatpush3.bf16.msra.mxu0 %v5248_v58  ;;  %3618 = vmatpush3.bf16.msra.mxu1 %v5248_v58 }
 0x12d   :  { %3588 = vmatprep.subr.bf16.mxu0 %v5263_v62  ;;  %3620 = vmatprep.subr.bf16.mxu1 %v5263_v62 }
 0x130   :  { %3590 = vmatpush3.bf16.msra.mxu0 %v5263_v62  ;;  %3622 = vmatpush3.bf16.msra.mxu1 %v5263_v62 }
 0x131   :  { %3592 = vmatprep.subr.bf16.mxu0 %v5275_v1  ;;  %3624 = vmatprep.subr.bf16.mxu1 %v5275_v1 }
 0x134   :  { %3594 = vmatpush3.bf16.msra.mxu0 %v5275_v1  ;;  %3626 = vmatpush3.bf16.msra.mxu1 %v5275_v1 }
 0x135   :  { %3596 = vmatprep.subr.bf16.mxu0 %v5287_v4  ;;  %3628 = vmatprep.subr.bf16.mxu1 %v5287_v4 }
 0x138   :  { %3598 = vmatpush3.bf16.msra.mxu0 %v5287_v4  ;;  %3630 = vmatpush3.bf16.msra.mxu1 %v5287_v4 }
 0x139   :  { %3600 = vmatprep.subr.bf16.mxu0 %v5299_v7  ;;  %3632 = vmatprep.subr.bf16.mxu1 %v5299_v7 }
 0x13c   :  { %3602 = vmatpush3.bf16.msra.mxu0 %v5299_v7  ;;  %3634 = vmatpush3.bf16.msra.mxu1 %v5299_v7 }
 0x13d   :  { %3604 = vmatprep.subr.bf16.mxu0 %v5313_v10  ;;  %3636 = vmatprep.subr.bf16.mxu1 %v5313_v10 }
 0x140   :  { %3606 = vmatpush3.bf16.msra.mxu0 %v5313_v10  ;;  %3638 = vmatpush3.bf16.msra.mxu1 %v5313_v10 }
 0x141   :  { %3640 = vmatprep.subr.bf16.mxu0 %v5223_v51  ;;  %3672 = vmatprep.subr.bf16.mxu1 %v5223_v51 }
 0x1f5   :  { %v2129_v18 = vpop.f32.mrb[0].mxu0  ;;  %v2394_v19 = vpop.f32.mrb[0].mxu1 }
 0x1f6   :  { %v5324_v20 = vadd.f32 %v2129_v18, %v334_v16  ;;  %v2131_v21 = vpop.f32.mrb[1].mxu0  ;;  %v2396_v22 = vpop.f32.mrb[1].mxu1  ;;  %v5357_v46 = vadd.f32 %v2394_v19, %v5344_v36 }
 0x1f7   :  { %v5326_v23 = vadd.f32 %v2131_v21, %v338_v17  ;;  %v2133_v24 = vpop.f32.mrb[2].mxu0  ;;  %v5328_v25 = vpop.f32.mrb[2].mxu1 }
 0x1f8   :  { %v2430_v26 = vmul.f32 %v5324_v20, %v5324_v20  ;;  %v5332_v28 = vadd.f32 %v2133_v24, %v334_v16  ;;  %v2135_v29 = vpop.f32.mrb[3].mxu0  ;;  %v5334_v30 = vpop.f32.mrb[3].mxu1  ;;  %v2718_v57 = vmul.f32 %v5357_v46, %v5357_v46 }
 0x1f9   :  { %v2577_v31 = vmul.f32 %v5326_v23, %v5326_v23  ;;  %v5338_v33 = vadd.f32 %v2135_v29, %v338_v17 }
 0x1fa   :  { %v2431_v34 = vmul.f32 %v5332_v28, %v5332_v28  ;;  %3455 = vmatprep.mubr.f32.mxu0 %v2430_v26 }
 0x1fb   :  { %v2578_v35 = vmul.f32 %v5338_v33, %v5338_v33  ;;  %3493 = vmatprep.mubr.f32.mxu1 %v2577_v31 }
 0x1fc   :  { %3456 = vmatmul.mubr.f32.vlgmr.msra.gmra.mrb[8].mxu0 %v2431_v34 }
 0x1fd   :  { %3642 = vmatpush3.bf16.msra.mxu0 %v5223_v51  ;;  %v2139_v38 = vpop.f32.mrb[4].mxu0  ;;  %v2404_v39 = vpop.f32.mrb[4].mxu1  ;;  %3494 = vmatmul.mubr.f32.vlgmr.msra.gmra.mrb[8].mxu1 %v2578_v35 }
 0x1fe   :  { %v5349_v40 = vadd.f32 %v2139_v38, %v334_v16  ;;  %3674 = vmatpush3.bf16.msra.mxu1 %v5223_v51  ;;  %v2141_v41 = vpop.f32.mrb[5].mxu0  ;;  %v2406_v42 = vpop.f32.mrb[5].mxu1  ;;  %3644 = vmatprep.subr.bf16.mxu0 %v5236_v55  ;;  %v5364_v51 = vadd.f32 %v2396_v22, %v5346_v37  ;;  %v5410_v60 = vadd.f32 %v2404_v39, %v5344_v36 }
 0x1ff   :  { %v5353_v43 = vadd.f32 %v2141_v41, %v338_v17  ;;  %v2143_v44 = vpop.f32.mrb[6].mxu0  ;;  %v2408_v45 = vpop.f32.mrb[6].mxu1  ;;  %3676 = vmatprep.subr.bf16.mxu1 %v5236_v55  ;;  %v5414_v61 = vadd.f32 %v2406_v42, %v5346_v37 }
 0x200   :  { %v2432_v47 = vmul.f32 %v5349_v40, %v5349_v40  ;;  %v5361_v48 = vadd.f32 %v2143_v44, %v334_v16  ;;  %v2145_v49 = vpop.f32.mrb[7].mxu0  ;;  %v2410_v50 = vpop.f32.mrb[7].mxu1  ;;  %v2859_v59 = vmul.f32 %v5364_v51, %v5364_v51  ;;  %v5420_v63 = vadd.f32 %v2408_v45, %v5344_v36 }
 0x201   :  { %v2579_v52 = vmul.f32 %v5353_v43, %v5353_v43  ;;  %v5368_v53 = vadd.f32 %v2145_v49, %v338_v17  ;;  %3646 = vmatpush3.bf16.msra.mxu0 %v5236_v55  ;;  %v5428_v2 = vadd.f32 %v2410_v50, %v5346_v37  ;;  %v2861_v3 = vmul.f32 %v5414_v61, %v5414_v61 }
 0x202   :  { %v2433_v54 = vmul.f32 %v5361_v48, %v5361_v48  ;;  %3678 = vmatpush3.bf16.msra.mxu1 %v5236_v55  ;;  %3458 = vmatprep.mubr.f32.mxu0 %v2432_v47  ;;  %v5401_v55 = vadd.f32 %v5328_v25, %v5344_v36 }
 0x203   :  { %v2580_v56 = vmul.f32 %v5368_v53, %v5368_v53  ;;  %3496 = vmatprep.mubr.f32.mxu1 %v2579_v52  ;;  %3648 = vmatprep.subr.bf16.mxu0 %v5248_v58  ;;  %v2862_v5 = vmul.f32 %v5428_v2, %v5428_v2 }
 0x204   :  { %3459 = vmatmul.mubr.f32.gmra.mrb[10].mxu0 %v2433_v54  ;;  %3680 = vmatprep.subr.bf16.mxu1 %v5248_v58 }
 0x205   :  { %3650 = vmatpush3.bf16.msra.mxu0 %v5248_v58  ;;  %3497 = vmatmul.mubr.f32.gmra.mrb[10].mxu1 %v2580_v56 }
 0x206   :  { %3531 = vmatprep.mubr.f32.mxu0 %v2718_v57  ;;  %3682 = vmatpush3.bf16.msra.mxu1 %v5248_v58  ;;  %v5407_v58 = vadd.f32 %v5334_v30, %v5346_v37 }
 0x207   :  { %3569 = vmatprep.mubr.f32.mxu1 %v2859_v59  ;;  %3652 = vmatprep.subr.bf16.mxu0 %v5263_v62 }
 0x208   :  { %3684 = vmatprep.subr.bf16.mxu1 %v5263_v62  ;;  %v2860_v0 = vmul.f32 %v5407_v58, %v5407_v58 }
 0x209   :  { %3654 = vmatpush3.bf16.msra.mxu0 %v5263_v62 }
 0x20a   :  { %3686 = vmatpush3.bf16.msra.mxu1 %v5263_v62  ;;  %3656 = vmatprep.subr.bf16.mxu0 %v5275_v1  ;;  %v2719_v62 = vmul.f32 %v5401_v55, %v5401_v55 }
 0x20b   :  { %3688 = vmatprep.subr.bf16.mxu1 %v5275_v1 }
 0x20d   :  { %3658 = vmatpush3.bf16.msra.mxu0 %v5275_v1 }
 0x20e   :  { %3690 = vmatpush3.bf16.msra.mxu1 %v5275_v1  ;;  %3660 = vmatprep.subr.bf16.mxu0 %v5287_v4  ;;  %v2720_v1 = vmul.f32 %v5410_v60, %v5410_v60 }
 0x20f   :  { %3692 = vmatprep.subr.bf16.mxu1 %v5287_v4 }
 0x211   :  { %3662 = vmatpush3.bf16.msra.mxu0 %v5287_v4 }
 0x212   :  { %3694 = vmatpush3.bf16.msra.mxu1 %v5287_v4  ;;  %3664 = vmatprep.subr.bf16.mxu0 %v5299_v7  ;;  %v2721_v4 = vmul.f32 %v5420_v63, %v5420_v63 }
 0x213   :  { %3696 = vmatprep.subr.bf16.mxu1 %v5299_v7 }
 0x215   :  { %3666 = vmatpush3.bf16.msra.mxu0 %v5299_v7 }
 0x216   :  { %3698 = vmatpush3.bf16.msra.mxu1 %v5299_v7  ;;  %3668 = vmatprep.subr.bf16.mxu0 %v5313_v10 }
 0x217   :  { %3700 = vmatprep.subr.bf16.mxu1 %v5313_v10 }
 0x219   :  { %3670 = vmatpush3.bf16.msra.mxu0 %v5313_v10 }
 0x21a   :  { %3702 = vmatpush3.bf16.msra.mxu1 %v5313_v10 }
 0x21c   :  { %3532 = vmatmul.mubr.f32.vlgmr.msra.gmra.mrb[12].mxu0 %v2719_v62 }
 0x21d   :  { %3534 = vmatprep.mubr.f32.mxu0 %v2720_v1  ;;  %3570 = vmatmul.mubr.f32.vlgmr.msra.gmra.mrb[12].mxu1 %v2860_v0 }
 0x21e   :  { %3572 = vmatprep.mubr.f32.mxu1 %v2861_v3 }
 0x220   :  { %3535 = vmatmul.mubr.f32.gmra.mrb[14].mxu0 %v2721_v4 }
 0x221   :  { %3573 = vmatmul.mubr.f32.gmra.mrb[14].mxu1 %v2862_v5 }
 0x2cf   :  { %v3457_v7 = vpop.f32.mrb[8].mxu0 }
 0x2d0   :  { %v2512_v8 = vadd.f32 %v3457_v7, %v5439_v6  ;;  %v2506_v9 = vpop.f32.mrb[9].mxu0  ;;  %v3495_v10 = vpop.f32.mrb[8].mxu1 }
 0x2d1   :  { %v2507_v11 = vadd.f32 %v5439_v6, %v2506_v9  ;;  %v2653_v12 = vadd.f32 %v3495_v10, %v5439_v6  ;;  %v2647_v13 = vpop.f32.mrb[9].mxu1 }
 0x2d2   :  { %4242 = vrsqrt.f32 %v2512_v8  ;;  %v2648_v14 = vadd.f32 %v5439_v6, %v2647_v13  ;;  %vm2534_vm0 = vcmp.eq.f32.partialorder %v2512_v8, inf  ;;  %vm2536_vm1 = vcmp.eq.f32.partialorder %v2512_v8, 0.0 }
 0x2d3   :  { %4244 = vrsqrt.f32 %v2507_v11  ;;  %v2537_v30 = vand.u32 2147483648, %v2512_v8  ;;  %vm2527_vm2 = vcmp.eq.f32.partialorder %v2507_v11, inf  ;;  %vm2529_vm3 = vcmp.eq.f32.partialorder %v2507_v11, 0.0 }
 0x2d4   :  { %4246 = vrsqrt.f32 %v2653_v12  ;;  %v2530_v34 = vand.u32 2147483648, %v2507_v11  ;;  %vm2675_vm4 = vcmp.eq.f32.partialorder %v2653_v12, inf  ;;  %v2678_v38 = vand.u32 2147483648, %v2653_v12 }
 0x2d5   :  { %4248 = vrsqrt.f32 %v2648_v14  ;;  %vm2677_vm5 = vcmp.eq.f32.partialorder %v2653_v12, 0.0  ;;  %vm2668_vm6 = vcmp.eq.f32.partialorder %v2648_v14, inf  ;;  %vm2670_vm7 = vcmp.eq.f32.partialorder %v2648_v14, 0.0 }
 0x2d6   :  { %v2671_v54 = vand.u32 2147483648, %v2648_v14 }
 0x2d7   :  { %v3460_v15 = vpop.f32.mrb[10].mxu0 }
 0x2d8   :  { %v5446_v16 = vadd.f32 %v3460_v15, %v5439_v6  ;;  %v2516_v17 = vpop.f32.mrb[11].mxu0  ;;  %v3498_v18 = vpop.f32.mrb[10].mxu1 }
 0x2d9   :  { %v5449_v19 = vadd.f32 %v5439_v6, %v2516_v17  ;;  %v5452_v21 = vadd.f32 %v3498_v18, %v5439_v6  ;;  %v2657_v22 = vpop.f32.mrb[11].mxu1 }
 0x2da   :  { %4250 = vrsqrt.f32 %v5446_v16  ;;  %v5458_v27 = vadd.f32 %v5439_v6, %v2657_v22  ;;  %vm2548_vm8 = vcmp.eq.f32.partialorder %v5446_v16, inf  ;;  %vm2550_vm9 = vcmp.eq.f32.partialorder %v5446_v16, 0.0 }
 0x2db   :  { %4252 = vrsqrt.f32 %v5449_v19  ;;  %vm2541_vm10 = vcmp.eq.f32.partialorder %v5449_v19, inf  ;;  %vm2543_vm11 = vcmp.eq.f32.partialorder %v5449_v19, 0.0  ;;  %v2544_v7 = vand.u32 2147483648, %v5449_v19 }
 0x2dc   :  { %v4243_v24 = vpop.eup %4242  ;;  %4254 = vrsqrt.f32 %v5452_v21  ;;  %vm2689_vm12 = vcmp.eq.f32.partialorder %v5452_v21, inf  ;;  %vm2691_vm13 = vcmp.eq.f32.partialorder %v5452_v21, 0.0  ;;  %vm2682_vm14 = vcmp.eq.f32.partialorder %v5458_v27, inf }
 0x2dd   :  { %v4245_v25 = vpop.eup %4244  ;;  %v2533_v26 = vmul.f32 %v4243_v24, %v2512_v8  ;;  %4256 = vrsqrt.f32 %v5458_v27  ;;  %vm2684_vm15 = vcmp.eq.f32.partialorder %v5458_v27, 0.0 }
 0x2de   :  { %v4247_v29 = vpop.eup %4246  ;;  %v2526_v31 = vmul.f32 %v4245_v25, %v2507_v11 }
 0x2df   :  { %v2535_v32 = vsel %vm2534_vm0, %v2512_v8, %v2533_v26  ;;  %v2674_v35 = vmul.f32 %v4247_v29, %v2653_v12  ;;  %v4249_v39 = vpop.eup %4248 }
 0x2e0   :  { %v2538_v36 = vsel %vm2536_vm1, %v2537_v30, %v2535_v32  ;;  %v2528_v37 = vsel %vm2527_vm2, %v2507_v11, %v2526_v31  ;;  %v2667_v49 = vmul.f32 %v4249_v39, %v2648_v14  ;;  %v2692_v11 = vand.u32 2147483648, %v5452_v21 }
 0x2e1   :  { %v2554_v41 = vmul.f32 %v5332_v28, %v2538_v36  ;;  %v2531_v42 = vsel %vm2529_vm3, %v2530_v34, %v2528_v37  ;;  %v2676_v44 = vsel %vm2675_vm4, %v2653_v12, %v2674_v35 }
 0x2e2   :  { %v2553_v45 = vmul.f32 %v5324_v20, %v2531_v42  ;;  %v2679_v47 = vsel %vm2677_vm5, %v2678_v38, %v2676_v44  ;;  %v2669_v59 = vsel %vm2668_vm6, %v2648_v14, %v2667_v49 }
 0x2e3   :  { %v3328_v50 = vpack.c.bf16 %v2554_v41, %v2554_v41  ;;  %v2695_v52 = vmul.f32 %v5338_v33, %v2679_v47  ;;  %v2672_v62 = vsel %vm2670_vm7, %v2671_v54, %v2669_v59  ;;  %v2551_v33 = vand.u32 2147483648, %v5446_v16 }
 0x2e4   :  { %v4251_v56 = vpop.eup %4250  ;;  %v3327_v57 = vpack.c.bf16 %v2553_v45, %v2553_v45  ;;  %v2694_v3 = vmul.f32 %v5326_v23, %v2672_v62 }
 0x2e5   :  { %v4253_v28 = vpop.eup %4252  ;;  %2574 = vst [vmem:[%s5626_s5 + $0x10] sm:$0xf] %v3328_v50  ;;  %v3332_v20 = vpack.c.bf16 %v2695_v52, %v2695_v52  ;;  %v2547_v0 = vmul.f32 %v4251_v56, %v5446_v16 }
 0x2e6   :  { %v4255_v1 = vpop.eup %4254  ;;  %2573 = vst [vmem:[%s5626_s5] sm:$0xf] %v3327_v57  ;;  %v2540_v4 = vmul.f32 %v4253_v28, %v5449_v19  ;;  %v3331_v9 = vpack.c.bf16 %v2694_v3, %v2694_v3 }
 0x2e7   :  { %2715 = vst [vmem:[%s5626_s5 + $0x14] sm:$0xf] %v3332_v20  ;;  %v2549_v5 = vsel %vm2548_vm8, %v5446_v16, %v2547_v0  ;;  %v2688_v8 = vmul.f32 %v4255_v1, %v5452_v21  ;;  %v4257_v12 = vpop.eup %4256 }
 0x2e8   :  { %v2552_v23 = vsel %vm2550_vm9, %v2551_v33, %v2549_v5  ;;  %v2542_v10 = vsel %vm2541_vm10, %v5449_v19, %v2540_v4  ;;  %2714 = vst [vmem:[%s5626_s5 + $0x4] sm:$0xf] %v3331_v9  ;;  %v2681_v18 = vmul.f32 %v4257_v12, %v5458_v27 }
 0x2e9   :  { %v2556_v13 = vmul.f32 %v5361_v48, %v2552_v23  ;;  %v2545_v14 = vsel %vm2543_vm11, %v2544_v7, %v2542_v10  ;;  %v2690_v15 = vsel %vm2689_vm12, %v5452_v21, %v2688_v8  ;;  %v2685_v48 = vand.u32 2147483648, %v5458_v27 }
 0x2ea   :  { %v2555_v17 = vmul.f32 %v5349_v40, %v2545_v14  ;;  %v2693_v16 = vsel %vm2691_vm13, %v2692_v11, %v2690_v15  ;;  %v2683_v25 = vsel %vm2682_vm14, %v5458_v27, %v2681_v18 }
 0x2eb   :  { %v3330_v19 = vpack.c.bf16 %v2556_v13, %v2556_v13  ;;  %v2697_v22 = vmul.f32 %v5368_v53, %v2693_v16  ;;  %v2686_v21 = vsel %vm2684_vm15, %v2685_v48, %v2683_v25 }
 0x2ec   :  { %v3329_v24 = vpack.c.bf16 %v2555_v17, %v2555_v17  ;;  %v2696_v53 = vmul.f32 %v5353_v43, %v2686_v21 }
 0x2ed   :  { %2576 = vst [vmem:[%s5626_s5 + $0x30] sm:$0xf] %v3330_v19  ;;  %v3334_v40 = vpack.c.bf16 %v2697_v22, %v2697_v22 }
 0x2ee   :  { %2575 = vst [vmem:[%s5626_s5 + $0x20] sm:$0xf] %v3329_v24  ;;  %v3333_v29 = vpack.c.bf16 %v2696_v53, %v2696_v53 }
 0x2ef   :  { %2717 = vst [vmem:[%s5626_s5 + $0x34] sm:$0xf] %v3334_v40  ;;  %v3533_v26 = vpop.f32.mrb[12].mxu0 }
 0x2f0   :  { %v2794_v27 = vadd.f32 %v3533_v26, %v5439_v6  ;;  %v2788_v30 = vpop.f32.mrb[13].mxu0  ;;  %v3571_v31 = vpop.f32.mrb[12].mxu1  ;;  %2716 = vst [vmem:[%s5626_s5 + $0x24] sm:$0xf] %v3333_v29 }
 0x2f1   :  { %v2789_v32 = vadd.f32 %v5439_v6, %v2788_v30  ;;  %v2935_v34 = vadd.f32 %v3571_v31, %v5439_v6  ;;  %v2929_v35 = vpop.f32.mrb[13].mxu1 }
 0x2f2   :  { %4258 = vrsqrt.f32 %v2794_v27  ;;  %v5519_v38 = vadd.f32 %v5439_v6, %v2929_v35  ;;  %vm2816_vm0 = vcmp.eq.f32.partialorder %v2794_v27, inf  ;;  %vm2818_vm1 = vcmp.eq.f32.partialorder %v2794_v27, 0.0 }
 0x2f3   :  { %4260 = vrsqrt.f32 %v2789_v32  ;;  %v3536_v43 = vpop.f32.mrb[14].mxu0  ;;  %v2819_v47 = vand.u32 2147483648, %v2794_v27  ;;  %vm2809_vm2 = vcmp.eq.f32.partialorder %v2789_v32, inf  ;;  %vm2811_vm3 = vcmp.eq.f32.partialorder %v2789_v32, 0.0 }
 0x2f4   :  { %4262 = vrsqrt.f32 %v2935_v34  ;;  %v2798_v36 = vpop.f32.mrb[15].mxu0  ;;  %v3574_v37 = vpop.f32.mrb[14].mxu1  ;;  %v5522_v39 = vadd.f32 %v3536_v43, %v5439_v6  ;;  %v2812_v50 = vand.u32 2147483648, %v2789_v32  ;;  %vm2957_vm4 = vcmp.eq.f32.partialorder %v2935_v34, inf }
 0x2f5   :  { %v5525_v41 = vadd.f32 %v5439_v6, %v2798_v36  ;;  %v2939_v42 = vpop.f32.mrb[15].mxu1  ;;  %v5528_v44 = vadd.f32 %v3574_v37, %v5439_v6  ;;  %4264 = vrsqrt.f32 %v5519_v38  ;;  %vm2959_vm5 = vcmp.eq.f32.partialorder %v2935_v34, 0.0 }
 0x2f6   :  { %v5532_v45 = vadd.f32 %v5439_v6, %v2939_v42  ;;  %4266 = vrsqrt.f32 %v5522_v39  ;;  %v2960_v52 = vand.u32 2147483648, %v2935_v34  ;;  %vm2950_vm6 = vcmp.eq.f32.partialorder %v5519_v38, inf }
 0x2f7   :  { %4268 = vrsqrt.f32 %v5525_v41  ;;  %vm2952_vm7 = vcmp.eq.f32.partialorder %v5519_v38, 0.0  ;;  %v2953_v56 = vand.u32 2147483648, %v5519_v38  ;;  %vm2830_vm8 = vcmp.eq.f32.partialorder %v5522_v39, inf }
 0x2f8   :  { %4270 = vrsqrt.f32 %v5528_v44  ;;  %vm2832_vm9 = vcmp.eq.f32.partialorder %v5522_v39, 0.0  ;;  %v2833_v28 = vand.u32 2147483648, %v5522_v39  ;;  %vm2823_vm10 = vcmp.eq.f32.partialorder %v5525_v41, inf }
 0x2f9   :  { %4272 = vrsqrt.f32 %v5532_v45  ;;  %vm2825_vm11 = vcmp.eq.f32.partialorder %v5525_v41, 0.0  ;;  %v2826_v1 = vand.u32 2147483648, %v5525_v41  ;;  %vm2971_vm12 = vcmp.eq.f32.partialorder %v5528_v44, inf }
 0x2fa   :  { %vm2973_vm13 = vcmp.eq.f32.partialorder %v5528_v44, 0.0  ;;  %v2974_v11 = vand.u32 2147483648, %v5528_v44  ;;  %vm2964_vm14 = vcmp.eq.f32.partialorder %v5532_v45, inf  ;;  %vm2966_vm15 = vcmp.eq.f32.partialorder %v5532_v45, 0.0 }
 0x2fb   :  { %v2967_v29 = vand.u32 2147483648, %v5532_v45 }
 0x2fc   :  { %v4259_v49 = vpop.eup %4258 }
 0x2fd   :  { %v4261_v6 = vpop.eup %4260  ;;  %v2815_v54 = vmul.f32 %v4259_v49, %v2794_v27 }
 0x2fe   :  { %v4263_v57 = vpop.eup %4262  ;;  %v2808_v59 = vmul.f32 %v4261_v6, %v2789_v32 }
 0x2ff   :  { %v2817_v20 = vsel %vm2816_vm0, %v2794_v27, %v2815_v54  ;;  %v2956_v62 = vmul.f32 %v4263_v57, %v2935_v34  ;;  %v4265_v3 = vpop.eup %4264 }
 0x300   :  { %v2820_v0 = vsel %vm2818_vm1, %v2819_v47, %v2817_v20  ;;  %v2810_v33 = vsel %vm2809_vm2, %v2789_v32, %v2808_v59  ;;  %v4267_v8 = vpop.eup %4266  ;;  %v2949_v10 = vmul.f32 %v4265_v3, %v5519_v38 }
 0x301   :  { %v2836_v4 = vmul.f32 %v5401_v55, %v2820_v0  ;;  %v2813_v5 = vsel %vm2811_vm3, %v2812_v50, %v2810_v33  ;;  %v2958_v7 = vsel %vm2957_vm4, %v2935_v34, %v2956_v62  ;;  %v4269_v12 = vpop.eup %4268  ;;  %v2829_v55 = vmul.f32 %v4267_v8, %v5522_v39 }
 0x302   :  { %v2835_v9 = vmul.f32 %v5357_v46, %v2813_v5  ;;  %v2961_v23 = vsel %vm2959_vm5, %v2960_v52, %v2958_v7  ;;  %v4271_v15 = vpop.eup %4270  ;;  %v2951_v46 = vsel %vm2950_vm6, %v5519_v38, %v2949_v10  ;;  %v2822_v16 = vmul.f32 %v4269_v12, %v5525_v41 }
 0x303   :  { %v3336_v13 = vpack.c.bf16 %v2836_v4, %v2836_v4  ;;  %v2977_v14 = vmul.f32 %v5407_v58, %v2961_v23  ;;  %v4273_v18 = vpop.eup %4272  ;;  %v2954_v19 = vsel %vm2952_vm7, %v2953_v56, %v2951_v46  ;;  %v2831_v22 = vsel %vm2830_vm8, %v5522_v39, %v2829_v55 }
 0x304   :  { %v3335_v17 = vpack.c.bf16 %v2835_v9, %v2835_v9  ;;  %v2970_v48 = vmul.f32 %v4271_v15, %v5528_v44  ;;  %v2976_v24 = vmul.f32 %v5364_v51, %v2954_v19  ;;  %v2834_v25 = vsel %vm2832_vm9, %v2833_v28, %v2831_v22 }
 0x305   :  { %2856 = vst [vmem:[%s5626_s5 + $0x18] sm:$0xf] %v3336_v13  ;;  %v3340_v58 = vpack.c.bf16 %v2977_v14, %v2977_v14  ;;  %v2824_v40 = vsel %vm2823_vm10, %v5525_v41, %v2822_v16  ;;  %v2963_v21 = vmul.f32 %v4273_v18, %v5532_v45  ;;  %v2838_v53 = vmul.f32 %v5420_v63, %v2834_v25 }
 0x306   :  { %2855 = vst [vmem:[%s5626_s5 + $0x8] sm:$0xf] %v3335_v17  ;;  %v2827_v26 = vsel %vm2825_vm11, %v2826_v1, %v2824_v40  ;;  %v2972_v51 = vsel %vm2971_vm12, %v5528_v44, %v2970_v48  ;;  %v3339_v27 = vpack.c.bf16 %v2976_v24, %v2976_v24 }
 0x307   :  { %2997 = vst [vmem:[%s5626_s5 + $0x1c] sm:$0xf] %v3340_v58  ;;  %v2837_v30 = vmul.f32 %v5410_v60, %v2827_v26  ;;  %v2975_v31 = vsel %vm2973_vm13, %v2974_v11, %v2972_v51  ;;  %v2965_v32 = vsel %vm2964_vm14, %v5532_v45, %v2963_v21  ;;  %v3338_v63 = vpack.c.bf16 %v2838_v53, %v2838_v53 }
 0x308   :  { %v2979_v34 = vmul.f32 %v5428_v2, %v2975_v31  ;;  %v2968_v35 = vsel %vm2966_vm15, %v2967_v29, %v2965_v32  ;;  %2996 = vst [vmem:[%s5626_s5 + $0xc] sm:$0xf] %v3339_v27 }
 0x309   :  { %v3337_v43 = vpack.c.bf16 %v2837_v30, %v2837_v30  ;;  %v2978_v60 = vmul.f32 %v5414_v61, %v2968_v35  ;;  %2858 = vst [vmem:[%s5626_s5 + $0x38] sm:$0xf] %v3338_v63 }
 0x30a   :  { %v3342_v36 = vpack.c.bf16 %v2979_v34, %v2979_v34 }
 0x30b   :  { %2857 = vst [vmem:[%s5626_s5 + $0x28] sm:$0xf] %v3337_v43  ;;  %v3341_v2 = vpack.c.bf16 %v2978_v60, %v2978_v60 }
 0x30c   :  { %2999 = vst [vmem:[%s5626_s5 + $0x3c] sm:$0xf] %v3342_v36 }
 0x30d   :  { %2998 = vst [vmem:[%s5626_s5 + $0x2c] sm:$0xf] %v3341_v2 }

// kernel: gdn_net_forward.18
= control target key start
LH: loop header
LB: loop body
LE: loop exit
PB: predicated region body
PF: predicated region fallthrough
CT: control target
= control target key end

     0   :  { %s5446_s18 = smov 0   ;;  %s7150_s0 = inlined_call_operand.vmem [shape: bf16[128,1152], index: 0, kind: input, shape index: {}]   ;;  %s7151_s1 = inlined_call_operand.vmem [shape: bf16[1152,512], index: 1, kind: input, shape index: {}]   ;;  %s7152_s2 = inlined_call_operand.vmem [shape: f32[1,512], index: 2, kind: input, shape index: {}]   ;;  %s7153_s3 = inlined_call_operand.vmem [shape: f32[128,128], index: 3, kind: input, shape index: {}]   ;;  %s7154_s4 = inlined_call_operand.vmem [shape: f32[1,128], index: 4, kind: input, shape index: {}]   ;;  %s7155_s5 = inlined_call_operand.vmem [shape: bf16[128,512], index: 5, kind: output, shape index: {}]  }
   0x1 LB: > { %s3887_s19 = sadd.s32 4294967295, %s5413_s18   ;;  %p3891_p0 = scmp.ge.s32.totalorder %s5413_s18, 1  ;;  %s5413_s18 = sphi %s5446_s18, %s15_s18  }
   0x2   : > { %p189_p1 = scmp.lt.s32.totalorder %s5413_s18, 3 }
   0x4   : > { %p190_p2 = pnand %p3891_p0, %p189_p1 }
   0x5   : > { %v4859_v0 = vld [vmem:[%s7151_s1 + $0x4] ss:$16 sps:$4 sm:$0xff] (!%p190_p2)   ;;  %v4861_v1 = vld [vmem:[%s7151_s1 + $0xc] ss:$16 sps:$4 sm:$0xff] (!%p190_p2)   ;;  %v4863_v2 = vld [vmem:[%s7151_s1] ss:$16 sps:$4 sm:$0xff] (!%p190_p2)  }
   0x6   : > { %193 = sbr.rel (%p190_p2) target bundleno = 816 (0x330), region = 40  ;;  %2208 = vmatprep.subr.bf16.mxu0 (!%p190_p2), %v4859_v0  ;;  %v4864_v3 = vld [vmem:[%s7151_s1 + $0x8] ss:$16 sps:$4 sm:$0xff] (!%p190_p2)   ;;  %2573 = vmatprep.subr.bf16.mxu1 (!%p190_p2), %v4861_v1  ;;  %v4865_v4 = vld [vmem:[%s7151_s1 + $0x24] ss:$16 sps:$4 sm:$0xff] (!%p190_p2)   ;;  %s3892_s9 = sshll.u32 (!%p190_p2), %s3887_s19, 3 }
   0x7   : > { %2209 = vmatpush1.bf16.msra.mxu0 (!%p190_p2), %v4863_v2  ;;  %2574 = vmatpush1.bf16.msra.mxu1 (!%p190_p2), %v4864_v3  ;;  %v4867_v5 = vld [vmem:[%s7151_s1 + $0x2c] ss:$16 sps:$4 sm:$0xff] (!%p190_p2)   ;;  %v4869_v6 = vld [vmem:[%s7151_s1 + $0x20] ss:$16 sps:$4 sm:$0xff] (!%p190_p2)   ;;  %v4870_v7 = vld [vmem:[%s7151_s1 + $0x28] ss:$16 sps:$4 sm:$0xff] (!%p190_p2)  }
   0x8   : > { %2210 = vmatprep.subr.bf16.mxu0 (!%p190_p2), %v4865_v4  ;;  %2575 = vmatprep.subr.bf16.mxu1 (!%p190_p2), %v4867_v5  ;;  %v4871_v8 = vld [vmem:[%s7151_s1 + $0x44] ss:$16 sps:$4 sm:$0xff] (!%p190_p2)   ;;  %v4873_v9 = vld [vmem:[%s7151_s1 + $0x4c] ss:$16 sps:$4 sm:$0xff] (!%p190_p2)   ;;  %v4875_v10 = vld [vmem:[%s7151_s1 + $0x40] ss:$16 sps:$4 sm:$0xff] (!%p190_p2)  }
   0x9   : > { %v4876_v11 = vld [vmem:[%s7151_s1 + $0x48] ss:$16 sps:$4 sm:$0xff] (!%p190_p2)   ;;  %v4877_v12 = vld [vmem:[%s7151_s1 + $0x64] ss:$16 sps:$4 sm:$0xff] (!%p190_p2)   ;;  %v4879_v13 = vld [vmem:[%s7151_s1 + $0x6c] ss:$16 sps:$4 sm:$0xff] (!%p190_p2)  }
   0xa   : > { %v4881_v14 = vld [vmem:[%s7151_s1 + $0x60] ss:$16 sps:$4 sm:$0xff] (!%p190_p2)   ;;  %v4882_v15 = vld [vmem:[%s7151_s1 + $0x68] ss:$16 sps:$4 sm:$0xff] (!%p190_p2)   ;;  %v4883_v16 = vld [vmem:[%s7151_s1 + $0x84] ss:$16 sps:$4 sm:$0xff] (!%p190_p2)  }
   0xb   : > { %2211 = vmatpush1.bf16.msra.mxu0 (!%p190_p2), %v4869_v6  ;;  %2576 = vmatpush1.bf16.msra.mxu1 (!%p190_p2), %v4870_v7  ;;  %v4885_v17 = vld [vmem:[%s7151_s1 + $0x8c] ss:$16 sps:$4 sm:$0xff] (!%p190_p2)   ;;  %v4887_v18 = vld [vmem:[%s7151_s1 + $0x80] ss:$16 sps:$4 sm:$0xff] (!%p190_p2)   ;;  %v4888_v19 = vld [vmem:[%s7151_s1 + $0x88] ss:$16 sps:$4 sm:$0xff] (!%p190_p2)  }
   0xc   : > { %2212 = vmatprep.subr.bf16.mxu0 (!%p190_p2), %v4871_v8  ;;  %2577 = vmatprep.subr.bf16.mxu1 (!%p190_p2), %v4873_v9  ;;  %v4889_v20 = vld [vmem:[%s7151_s1 + $0xa4] ss:$16 sps:$4 sm:$0xff] (!%p190_p2)   ;;  %v4891_v21 = vld [vmem:[%s7151_s1 + $0xac] ss:$16 sps:$4 sm:$0xff] (!%p190_p2)   ;;  %v4893_v22 = vld [vmem:[%s7151_s1 + $0xa0] ss:$16 sps:$4 sm:$0xff] (!%p190_p2)  }
   0xd   : > { %v4894_v23 = vld [vmem:[%s7151_s1 + $0xa8] ss:$16 sps:$4 sm:$0xff]   ;;  %v4895_v24 = vld [vmem:[%s7151_s1 + $0xc4] ss:$16 sps:$4 sm:$0xff]   ;;  %v4897_v25 = vld [vmem:[%s7151_s1 + $0xcc] ss:$16 sps:$4 sm:$0xff]  }
   0xe   : > { %v4899_v26 = vld [vmem:[%s7151_s1 + $0xc0] ss:$16 sps:$4 sm:$0xff]   ;;  %v4900_v27 = vld [vmem:[%s7151_s1 + $0xc8] ss:$16 sps:$4 sm:$0xff]   ;;  %v4901_v28 = vld [vmem:[%s7151_s1 + $0xe4] ss:$16 sps:$4 sm:$0xff]  }
   0xf   : > { %2213 = vmatpush1.bf16.msra.mxu0 %v4875_v10  ;;  %2578 = vmatpush1.bf16.msra.mxu1 %v4876_v11  ;;  %v4903_v29 = vld [vmem:[%s7151_s1 + $0xec] ss:$16 sps:$4 sm:$0xff]   ;;  %v4905_v30 = vld [vmem:[%s7151_s1 + $0xe0] ss:$16 sps:$4 sm:$0xff]   ;;  %v4906_v31 = vld [vmem:[%s7151_s1 + $0xe8] ss:$16 sps:$4 sm:$0xff]  }
  0x10   : > { %2214 = vmatprep.subr.bf16.mxu0 %v4877_v12  ;;  %2579 = vmatprep.subr.bf16.mxu1 %v4879_v13  ;;  %v4907_v32 = vld [vmem:[%s7151_s1 + $0x104] ss:$16 sps:$4 sm:$0xff]   ;;  %p220_p3 = scmp.lt.s32.totalorder %s3892_s9, 15  ;;  %v4909_v33 = vld [vmem:[%s7151_s1 + $0x10c] ss:$16 sps:$4 sm:$0xff]  }
  0x11   : > { %v4911_v34 = vld [vmem:[%s7151_s1 + $0x100] ss:$16 sps:$4 sm:$0xff]   ;;  %v4912_v35 = vld [vmem:[%s7151_s1 + $0x108] ss:$16 sps:$4 sm:$0xff]   ;;  %v4913_v36 = vld [vmem:[%s7151_s1 + $0x124] ss:$16 sps:$4 sm:$0xff]  }
  0x12   : > { %s7157_s9 = smov (!%p220_p3, %s3892_s9), 15  ;;  %v4915_v37 = vld [vmem:[%s7151_s1 + $0x12c] ss:$16 sps:$4 sm:$0xff]   ;;  %v4917_v38 = vld [vmem:[%s7151_s1 + $0x120] ss:$16 sps:$4 sm:$0xff]  }
  0x13   : > { %2215 = vmatpush1.bf16.msra.mxu0 %v4881_v14  ;;  %2580 = vmatpush1.bf16.msra.mxu1 %v4882_v15  ;;  %v4918_v39 = vld [vmem:[%s7151_s1 + $0x128] ss:$16 sps:$4 sm:$0xff]   ;;  %v4919_v40 = vld [vmem:[%s7151_s1 + $0x144] ss:$16 sps:$4 sm:$0xff]   ;;  %s4849_s8 = smul.u32 36, %s7157_s9  ;;  %s4256_s13 = sshll.u32 %s7157_s9, 4 }
  0x14   : > { %2216 = vmatprep.subr.bf16.mxu0 %v4883_v16  ;;  %2581 = vmatprep.subr.bf16.mxu1 %v4885_v17  ;;  %v4921_v41 = vld [vmem:[%s7151_s1 + $0x14c] ss:$16 sps:$4 sm:$0xff]   ;;  %v4923_v42 = vld [vmem:[%s7151_s1 + $0x140] ss:$16 sps:$4 sm:$0xff]   ;;  %v4924_v43 = vld [vmem:[%s7151_s1 + $0x148] ss:$16 sps:$4 sm:$0xff]   ;;  %s6758_s15 = scalar_lea.vmem %s7155_s5, %s4256_s13 }
  0x15   : > { %v4925_v44 = vld [vmem:[%s7151_s1 + $0x164] ss:$16 sps:$4 sm:$0xff]   ;;  %s5597_s21 = scalar_lea.vmem %s7150_s0, %s4849_s8  ;;  %v4927_v45 = vld [vmem:[%s7151_s1 + $0x16c] ss:$16 sps:$4 sm:$0xff]   ;;  %v4929_v46 = vld [vmem:[%s7151_s1 + $0x160] ss:$16 sps:$4 sm:$0xff]  }
  0x16   : > { %v4930_v47 = vld [vmem:[%s7151_s1 + $0x168] ss:$16 sps:$4 sm:$0xff]   ;;  %v4931_v49 = vld [vmem:[%s7151_s1 + $0x184] ss:$16 sps:$4 sm:$0xff]   ;;  %v4933_v50 = vld [vmem:[%s7151_s1 + $0x18c] ss:$16 sps:$4 sm:$0xff]  }
  0x17   : > { %2217 = vmatpush1.bf16.msra.mxu0 %v4887_v18  ;;  %2582 = vmatpush1.bf16.msra.mxu1 %v4888_v19  ;;  %v4957_v48 = vld [vmem:[%s5597_s21 + $0x4] ss:$36 sps:$4 sm:$0xff]   ;;  %v4935_v51 = vld [vmem:[%s7151_s1 + $0x180] ss:$16 sps:$4 sm:$0xff]   ;;  %v4939_v54 = vld [vmem:[%s7151_s1 + $0x1ac] ss:$16 sps:$4 sm:$0xff]  }
  0x18   : > { %2218 = vmatprep.subr.bf16.mxu0 %v4889_v20  ;;  %2583 = vmatprep.subr.bf16.mxu1 %v4891_v21  ;;  %v4936_v52 = vld [vmem:[%s7151_s1 + $0x188] ss:$16 sps:$4 sm:$0xff]   ;;  %v4937_v53 = vld [vmem:[%s7151_s1 + $0x1a4] ss:$16 sps:$4 sm:$0xff]   ;;  %v4941_v55 = vld [vmem:[%s7151_s1 + $0x1a0] ss:$16 sps:$4 sm:$0xff]  }
  0x19   : > { %2240 = vmatprep.mubr.bf16.mxu0 %v4957_v48  ;;  %2605 = vmatprep.mubr.bf16.mxu1 %v4957_v48  ;;  %v4942_v56 = vld [vmem:[%s7151_s1 + $0x1a8] ss:$16 sps:$4 sm:$0xff]   ;;  %v4943_v57 = vld [vmem:[%s7151_s1 + $0x1c4] ss:$16 sps:$4 sm:$0xff]   ;;  %v4945_v58 = vld [vmem:[%s7151_s1 + $0x1cc] ss:$16 sps:$4 sm:$0xff]  }
  0x1a   : > { %v4947_v59 = vld [vmem:[%s7151_s1 + $0x1c0] ss:$16 sps:$4 sm:$0xff]   ;;  %v4948_v60 = vld [vmem:[%s7151_s1 + $0x1c8] ss:$16 sps:$4 sm:$0xff]   ;;  %v4949_v61 = vld [vmem:[%s7151_s1 + $0x1e4] ss:$16 sps:$4 sm:$0xff]  }
  0x1b   : > { %2219 = vmatpush1.bf16.msra.mxu0 %v4893_v22  ;;  %2584 = vmatpush1.bf16.msra.mxu1 %v4894_v23  ;;  %v4951_v62 = vld [vmem:[%s7151_s1 + $0x1ec] ss:$16 sps:$4 sm:$0xff]   ;;  %v4953_v63 = vld [vmem:[%s7151_s1 + $0x1e0] ss:$16 sps:$4 sm:$0xff]   ;;  %v4954_v0 = vld [vmem:[%s7151_s1 + $0x1e8] ss:$16 sps:$4 sm:$0xff]  }
  0x1c   : > { %2220 = vmatprep.subr.bf16.mxu0 %v4895_v24  ;;  %2585 = vmatprep.subr.bf16.mxu1 %v4897_v25  ;;  %v4960_v1 = vld [vmem:[%s7151_s1 + $0x204] ss:$16 sps:$4 sm:$0xff]   ;;  %v4963_v2 = vld [vmem:[%s7151_s1 + $0x20c] ss:$16 sps:$4 sm:$0xff]   ;;  %v4958_v4 = vld [vmem:[%s7151_s1 + $0x200] ss:$16 sps:$4 sm:$0xff]  }
  0x1d   : > { %v4955_v3 = vld [vmem:[%s5597_s21] ss:$36 sps:$4 sm:$0xff]   ;;  %v4961_v5 = vld [vmem:[%s7151_s1 + $0x208] ss:$16 sps:$4 sm:$0xff]   ;;  %v4969_v7 = vld [vmem:[%s7151_s1 + $0x22c] ss:$16 sps:$4 sm:$0xff]  }
  0x1e   : > { %v4966_v6 = vld [vmem:[%s7151_s1 + $0x224] ss:$16 sps:$4 sm:$0xff]   ;;  %v4964_v8 = vld [vmem:[%s7151_s1 + $0x220] ss:$16 sps:$4 sm:$0xff]   ;;  %v4967_v9 = vld [vmem:[%s7151_s1 + $0x228] ss:$16 sps:$4 sm:$0xff]  }
  0x1f   : > { %2221 = vmatpush1.bf16.msra.mxu0 %v4899_v26  ;;  %2586 = vmatpush1.bf16.msra.mxu1 %v4900_v27  ;;  %v4972_v10 = vld [vmem:[%s7151_s1 + $0x244] ss:$16 sps:$4 sm:$0xff]   ;;  %v4975_v11 = vld [vmem:[%s7151_s1 + $0x24c] ss:$16 sps:$4 sm:$0xff]   ;;  %v4970_v12 = vld [vmem:[%s7151_s1 + $0x240] ss:$16 sps:$4 sm:$0xff]  }
  0x20   : > { %2222 = vmatprep.subr.bf16.mxu0 %v4901_v28  ;;  %2587 = vmatprep.subr.bf16.mxu1 %v4903_v29  ;;  %v5018_v13 = vld [vmem:[%s5597_s21 + $0x4c] ss:$36 sps:$4 sm:$0xff]   ;;  %v4973_v14 = vld [vmem:[%s7151_s1 + $0x248] ss:$16 sps:$4 sm:$0xff]   ;;  %v4978_v15 = vld [vmem:[%s7151_s1 + $0x264] ss:$16 sps:$4 sm:$0xff]  }
  0x21   : > { %v4981_v16 = vld [vmem:[%s7151_s1 + $0x26c] ss:$16 sps:$4 sm:$0xff]   ;;  %v4976_v18 = vld [vmem:[%s7151_s1 + $0x260] ss:$16 sps:$4 sm:$0xff]   ;;  %v4979_v19 = vld [vmem:[%s7151_s1 + $0x268] ss:$16 sps:$4 sm:$0xff]  }
  0x22   : > { %v5026_v17 = vld [vmem:[%s5597_s21 + $0x48] ss:$36 sps:$4 sm:$0xff]   ;;  %v4984_v20 = vld [vmem:[%s7151_s1 + $0x284] ss:$16 sps:$4 sm:$0xff]   ;;  %v4982_v23 = vld [vmem:[%s7151_s1 + $0x280] ss:$16 sps:$4 sm:$0xff]  }
  0x23   : > { %2223 = vmatpush1.bf16.msra.mxu0 %v4905_v30  ;;  %2588 = vmatpush1.bf16.msra.mxu1 %v4906_v31  ;;  %v4987_v21 = vld [vmem:[%s7151_s1 + $0x28c] ss:$16 sps:$4 sm:$0xff]   ;;  %v5033_v22 = vld [vmem:[%s5597_s21 + $0x94] ss:$36 sps:$4 sm:$0xff]   ;;  %v4988_v27 = vld [vmem:[%s7151_s1 + $0x2a0] ss:$16 sps:$4 sm:$0xff]  }
  0x24   : > { %2224 = vmatprep.subr.bf16.mxu0 %v4907_v32  ;;  %2589 = vmatprep.subr.bf16.mxu1 %v4909_v33  ;;  %v4985_v24 = vld [vmem:[%s7151_s1 + $0x288] ss:$16 sps:$4 sm:$0xff]   ;;  %v4990_v25 = vld [vmem:[%s7151_s1 + $0x2a4] ss:$16 sps:$4 sm:$0xff]   ;;  %v4993_v26 = vld [vmem:[%s7151_s1 + $0x2ac] ss:$16 sps:$4 sm:$0xff]  }
  0x25   : > { %v5041_v28 = vld [vmem:[%s5597_s21 + $0x90] ss:$36 sps:$4 sm:$0xff]   ;;  %v4991_v29 = vld [vmem:[%s7151_s1 + $0x2a8] ss:$16 sps:$4 sm:$0xff]   ;;  %v5048_v31 = vld [vmem:[%s5597_s21 + $0xdc] ss:$36 sps:$4 sm:$0xff]  }
  0x26   : > { %v4996_v30 = vld [vmem:[%s7151_s1 + $0x2c4] ss:$16 sps:$4 sm:$0xff]   ;;  %v4999_v32 = vld [vmem:[%s7151_s1 + $0x2cc] ss:$16 sps:$4 sm:$0xff]   ;;  %v4994_v33 = vld [vmem:[%s7151_s1 + $0x2c0] ss:$16 sps:$4 sm:$0xff]  }
  0x27   : > { %2225 = vmatpush1.bf16.msra.mxu0 %v4911_v34  ;;  %2590 = vmatpush1.bf16.msra.mxu1 %v4912_v35  ;;  %v4997_v34 = vld [vmem:[%s7151_s1 + $0x2c8] ss:$16 sps:$4 sm:$0xff]   ;;  %v5002_v35 = vld [vmem:[%s7151_s1 + $0x2e4] ss:$16 sps:$4 sm:$0xff]  }
  0x28   : > { %2226 = vmatprep.subr.bf16.mxu0 %v4913_v36  ;;  %2591 = vmatprep.subr.bf16.mxu1 %v4915_v37  ;;  %v5005_v36 = vld [vmem:[%s7151_s1 + $0x2ec] ss:$16 sps:$4 sm:$0xff]   ;;  %v5000_v37 = vld [vmem:[%s7151_s1 + $0x2e0] ss:$16 sps:$4 sm:$0xff]   ;;  %v5015_v48 = vld [vmem:[%s7151_s1 + $0x328] ss:$16 sps:$4 sm:$0xff]  }
  0x2b   : > { %2227 = vmatpush1.bf16.msra.mxu0 %v4917_v38  ;;  %2592 = vmatpush1.bf16.msra.mxu1 %v4918_v39  ;;  %v5056_v38 = vld [vmem:[%s5597_s21 + $0xd8] ss:$36 sps:$4 sm:$0xff]  }
  0x2c   : > { %2228 = vmatprep.subr.bf16.mxu0 %v4919_v40  ;;  %2593 = vmatprep.subr.bf16.mxu1 %v4921_v41  ;;  %v5003_v39 = vld [vmem:[%s7151_s1 + $0x2e8] ss:$16 sps:$4 sm:$0xff]   ;;  %v5065_v40 = vld [vmem:[%s5597_s21 + $0xc] ss:$36 sps:$4 sm:$0xff]   ;;  %v5008_v41 = vld [vmem:[%s7151_s1 + $0x304] ss:$16 sps:$4 sm:$0xff]  }
  0x2f   : > { %2229 = vmatpush1.bf16.msra.mxu0 %v4923_v42  ;;  %2594 = vmatpush1.bf16.msra.mxu1 %v4924_v43  ;;  %v5011_v42 = vld [vmem:[%s7151_s1 + $0x30c] ss:$16 sps:$4 sm:$0xff]   ;;  %v5006_v43 = vld [vmem:[%s7151_s1 + $0x300] ss:$16 sps:$4 sm:$0xff]  }
  0x30   : > { %2230 = vmatprep.subr.bf16.mxu0 %v4925_v44  ;;  %2595 = vmatprep.subr.bf16.mxu1 %v4927_v45  ;;  %v5009_v44 = vld [vmem:[%s7151_s1 + $0x308] ss:$16 sps:$4 sm:$0xff]   ;;  %v5014_v45 = vld [vmem:[%s7151_s1 + $0x324] ss:$16 sps:$4 sm:$0xff]  }
  0x33   : > { %2231 = vmatpush1.bf16.msra.mxu0 %v4929_v46  ;;  %2596 = vmatpush1.bf16.msra.mxu1 %v4930_v47  ;;  %v5017_v46 = vld [vmem:[%s7151_s1 + $0x32c] ss:$16 sps:$4 sm:$0xff]   ;;  %v5012_v47 = vld [vmem:[%s7151_s1 + $0x320] ss:$16 sps:$4 sm:$0xff]  }
  0x34   : > { %2232 = vmatprep.subr.bf16.mxu0 %v4931_v49  ;;  %2597 = vmatprep.subr.bf16.mxu1 %v4933_v50  ;;  %v5022_v49 = vld [vmem:[%s7151_s1 + $0x344] ss:$16 sps:$4 sm:$0xff]   ;;  %v5025_v50 = vld [vmem:[%s7151_s1 + $0x34c] ss:$16 sps:$4 sm:$0xff]  }
  0x37   : > { %2233 = vmatpush1.bf16.msra.mxu0 %v4935_v51  ;;  %2598 = vmatpush1.bf16.msra.mxu1 %v4936_v52  ;;  %v5020_v51 = vld [vmem:[%s7151_s1 + $0x340] ss:$16 sps:$4 sm:$0xff]   ;;  %v5023_v52 = vld [vmem:[%s7151_s1 + $0x348] ss:$16 sps:$4 sm:$0xff]  }
  0x38   : > { %2234 = vmatprep.subr.bf16.mxu0 %v4937_v53  ;;  %2599 = vmatprep.subr.bf16.mxu1 %v4939_v54  ;;  %v5029_v53 = vld [vmem:[%s7151_s1 + $0x364] ss:$16 sps:$4 sm:$0xff]   ;;  %v5032_v54 = vld [vmem:[%s7151_s1 + $0x36c] ss:$16 sps:$4 sm:$0xff]  }
  0x3b   : > { %2235 = vmatpush1.bf16.msra.mxu0 %v4941_v55  ;;  %2600 = vmatpush1.bf16.msra.mxu1 %v4942_v56  ;;  %v5027_v55 = vld [vmem:[%s7151_s1 + $0x360] ss:$16 sps:$4 sm:$0xff]   ;;  %v5030_v56 = vld [vmem:[%s7151_s1 + $0x368] ss:$16 sps:$4 sm:$0xff]  }
  0x3c   : > { %2236 = vmatprep.subr.bf16.mxu0 %v4943_v57  ;;  %2601 = vmatprep.subr.bf16.mxu1 %v4945_v58  ;;  %v5037_v57 = vld [vmem:[%s7151_s1 + $0x384] ss:$16 sps:$4 sm:$0xff]   ;;  %v5040_v58 = vld [vmem:[%s7151_s1 + $0x38c] ss:$16 sps:$4 sm:$0xff]  }
  0x3f   : > { %2237 = vmatpush1.bf16.msra.mxu0 %v4947_v59  ;;  %2602 = vmatpush1.bf16.msra.mxu1 %v4948_v60  ;;  %v5035_v59 = vld [vmem:[%s7151_s1 + $0x380] ss:$16 sps:$4 sm:$0xff]   ;;  %v5038_v60 = vld [vmem:[%s7151_s1 + $0x388] ss:$16 sps:$4 sm:$0xff]  }
  0x40   : > { %2238 = vmatprep.subr.bf16.mxu0 %v4949_v61  ;;  %2603 = vmatprep.subr.bf16.mxu1 %v4951_v62  ;;  %v5044_v61 = vld [vmem:[%s7151_s1 + $0x3a4] ss:$16 sps:$4 sm:$0xff]   ;;  %v5047_v62 = vld [vmem:[%s7151_s1 + $0x3ac] ss:$16 sps:$4 sm:$0xff]  }
  0x43   : > { %2239 = vmatpush1.bf16.msra.mxu0 %v4953_v63  ;;  %2604 = vmatpush1.bf16.msra.mxu1 %v4954_v0  ;;  %v5042_v63 = vld [vmem:[%s7151_s1 + $0x3a0] ss:$16 sps:$4 sm:$0xff]   ;;  %v5045_v0 = vld [vmem:[%s7151_s1 + $0x3a8] ss:$16 sps:$4 sm:$0xff]  }
  0x44   : > { %2281 = vmatprep.subr.bf16.mxu0 %v4960_v1  ;;  %2646 = vmatprep.subr.bf16.mxu1 %v4963_v2  ;;  %v5052_v1 = vld [vmem:[%s7151_s1 + $0x3c4] ss:$16 sps:$4 sm:$0xff]   ;;  %v5055_v2 = vld [vmem:[%s7151_s1 + $0x3cc] ss:$16 sps:$4 sm:$0xff]  }
  0x46   : > { %2241 = vmatmul.mubr.bf16.vlgmr.msra.gmra.mrb[0].mxu0 %v4955_v3  ;;  %2606 = vmatmul.mubr.bf16.vlgmr.msra.gmra.mrb[0].mxu1 %v4955_v3  ;;  %v5050_v3 = vld [vmem:[%s7151_s1 + $0x3c0] ss:$16 sps:$4 sm:$0xff]  }
  0x47   : > { %2282 = vmatpush1.bf16.msra.mxu0 %v4958_v4  ;;  %2647 = vmatpush1.bf16.msra.mxu1 %v4961_v5  ;;  %v5053_v4 = vld [vmem:[%s7151_s1 + $0x3c8] ss:$16 sps:$4 sm:$0xff]   ;;  %v5059_v5 = vld [vmem:[%s7151_s1 + $0x3e4] ss:$16 sps:$4 sm:$0xff]  }
  0x48   : > { %2283 = vmatprep.subr.bf16.mxu0 %v4966_v6  ;;  %2648 = vmatprep.subr.bf16.mxu1 %v4969_v7  ;;  %v5062_v6 = vld [vmem:[%s7151_s1 + $0x3ec] ss:$16 sps:$4 sm:$0xff]   ;;  %v5057_v7 = vld [vmem:[%s7151_s1 + $0x3e0] ss:$16 sps:$4 sm:$0xff]  }
  0x49   : > { %2250 = vmatprep.mubr.bf16.mxu0 %v5018_v13  ;;  %2615 = vmatprep.mubr.bf16.mxu1 %v5018_v13  ;;  %v5069_v13 = vld [vmem:[%s7151_s1 + $0x408] ss:$16 sps:$4 sm:$0xff]  }
  0x4b   : > { %2284 = vmatpush1.bf16.msra.mxu0 %v4964_v8  ;;  %2649 = vmatpush1.bf16.msra.mxu1 %v4967_v9  ;;  %v5060_v8 = vld [vmem:[%s7151_s1 + $0x3e8] ss:$16 sps:$4 sm:$0xff]   ;;  %v5068_v9 = vld [vmem:[%s7151_s1 + $0x404] ss:$16 sps:$4 sm:$0xff]  }
  0x4c   : > { %2285 = vmatprep.subr.bf16.mxu0 %v4972_v10  ;;  %2650 = vmatprep.subr.bf16.mxu1 %v4975_v11  ;;  %v5071_v10 = vld [vmem:[%s7151_s1 + $0x40c] ss:$16 sps:$4 sm:$0xff]  }
  0x4d   : > { %v5063_v11 = vld [vmem:[%s5597_s21 + $0x8] ss:$36 sps:$4 sm:$0xff]  }
  0x4e   : > { %2251 = vmatmul.mubr.bf16.gmra.mrb[4].mxu0 %v5026_v17  ;;  %2616 = vmatmul.mubr.bf16.gmra.mrb[4].mxu1 %v5026_v17  ;;  %v5072_v17 = vld [vmem:[%s7151_s1 + $0x420] ss:$16 sps:$4 sm:$0xff]  }
  0x4f   : > { %2286 = vmatpush1.bf16.msra.mxu0 %v4970_v12  ;;  %2651 = vmatpush1.bf16.msra.mxu1 %v4973_v14  ;;  %v5066_v12 = vld [vmem:[%s7151_s1 + $0x400] ss:$16 sps:$4 sm:$0xff]   ;;  %v5074_v14 = vld [vmem:[%s7151_s1 + $0x424] ss:$16 sps:$4 sm:$0xff]  }
  0x50   : > { %2287 = vmatprep.subr.bf16.mxu0 %v4978_v15  ;;  %2652 = vmatprep.subr.bf16.mxu1 %v4981_v16  ;;  %v5077_v15 = vld [vmem:[%s7151_s1 + $0x42c] ss:$16 sps:$4 sm:$0xff]   ;;  %v5126_v16 = vld [vmem:[%s5597_s21 + $0x54] ss:$36 sps:$4 sm:$0xff]  }
  0x51   : > { %2260 = vmatprep.mubr.bf16.mxu0 %v5033_v22  ;;  %2625 = vmatprep.mubr.bf16.mxu1 %v5033_v22  ;;  %v5081_v22 = vld [vmem:[%s7151_s1 + $0x448] ss:$16 sps:$4 sm:$0xff]  }
  0x53   : > { %2288 = vmatpush1.bf16.msra.mxu0 %v4976_v18  ;;  %2653 = vmatpush1.bf16.msra.mxu1 %v4979_v19  ;;  %v5075_v18 = vld [vmem:[%s7151_s1 + $0x428] ss:$16 sps:$4 sm:$0xff]   ;;  %v5080_v19 = vld [vmem:[%s7151_s1 + $0x444] ss:$16 sps:$4 sm:$0xff]  }
  0x54   : > { %2289 = vmatprep.subr.bf16.mxu0 %v4984_v20  ;;  %2654 = vmatprep.subr.bf16.mxu1 %v4987_v21  ;;  %v5083_v20 = vld [vmem:[%s7151_s1 + $0x44c] ss:$16 sps:$4 sm:$0xff]   ;;  %v5078_v21 = vld [vmem:[%s7151_s1 + $0x440] ss:$16 sps:$4 sm:$0xff]  }
  0x56   : > { %2261 = vmatmul.mubr.bf16.gmra.mrb[8].mxu0 %v5041_v28  ;;  %2626 = vmatmul.mubr.bf16.gmra.mrb[8].mxu1 %v5041_v28  ;;  %v5087_v28 = vld [vmem:[%s7151_s1 + $0x468] ss:$16 sps:$4 sm:$0xff]  }
  0x57   : > { %2290 = vmatpush1.bf16.msra.mxu0 %v4982_v23  ;;  %2655 = vmatpush1.bf16.msra.mxu1 %v4985_v24  ;;  %v5134_v23 = vld [vmem:[%s5597_s21 + $0x50] ss:$36 sps:$4 sm:$0xff]  }
  0x58   : > { %2291 = vmatprep.subr.bf16.mxu0 %v4990_v25  ;;  %2656 = vmatprep.subr.bf16.mxu1 %v4993_v26  ;;  %v5086_v24 = vld [vmem:[%s7151_s1 + $0x464] ss:$16 sps:$4 sm:$0xff]   ;;  %v5089_v25 = vld [vmem:[%s7151_s1 + $0x46c] ss:$16 sps:$4 sm:$0xff]  }
  0x59   : > { %2270 = vmatprep.mubr.bf16.mxu0 %v5048_v31  ;;  %2635 = vmatprep.mubr.bf16.mxu1 %v5048_v31  ;;  %v5141_v26 = vld [vmem:[%s5597_s21 + $0x9c] ss:$36 sps:$4 sm:$0xff]  }
  0x5a   : > { %v5090_v31 = vld [vmem:[%s7151_s1 + $0x480] ss:$16 sps:$4 sm:$0xff]  }
  0x5b   : > { %2292 = vmatpush1.bf16.msra.mxu0 %v4988_v27  ;;  %2657 = vmatpush1.bf16.msra.mxu1 %v4991_v29  ;;  %v5084_v27 = vld [vmem:[%s7151_s1 + $0x460] ss:$16 sps:$4 sm:$0xff]   ;;  %v5092_v29 = vld [vmem:[%s7151_s1 + $0x484] ss:$16 sps:$4 sm:$0xff]  }
  0x5c   : > { %2293 = vmatprep.subr.bf16.mxu0 %v4996_v30  ;;  %2658 = vmatprep.subr.bf16.mxu1 %v4999_v32  ;;  %v5095_v30 = vld [vmem:[%s7151_s1 + $0x48c] ss:$16 sps:$4 sm:$0xff]   ;;  %v5093_v32 = vld [vmem:[%s7151_s1 + $0x488] ss:$16 sps:$4 sm:$0xff]  }
  0x5e   : > { %2271 = vmatmul.mubr.bf16.gmra.mrb[12].mxu0 %v5056_v38  ;;  %2636 = vmatmul.mubr.bf16.gmra.mrb[12].mxu1 %v5056_v38  ;;  %v5099_v38 = vld [vmem:[%s7151_s1 + $0x4a8] ss:$16 sps:$4 sm:$0xff]  }
  0x5f   : > { %2294 = vmatpush1.bf16.msra.mxu0 %v4994_v33  ;;  %2659 = vmatpush1.bf16.msra.mxu1 %v4997_v34  ;;  %v5149_v33 = vld [vmem:[%s5597_s21 + $0x98] ss:$36 sps:$4 sm:$0xff]   ;;  %v5098_v34 = vld [vmem:[%s7151_s1 + $0x4a4] ss:$16 sps:$4 sm:$0xff]  }
  0x60   : > { %2295 = vmatprep.subr.bf16.mxu0 %v5002_v35  ;;  %2660 = vmatprep.subr.bf16.mxu1 %v5005_v36  ;;  %v5101_v35 = vld [vmem:[%s7151_s1 + $0x4ac] ss:$16 sps:$4 sm:$0xff]   ;;  %v5156_v36 = vld [vmem:[%s5597_s21 + $0xe4] ss:$36 sps:$4 sm:$0xff]  }
  0x61   : > { %2313 = vmatprep.mubr.bf16.mxu0 %v5065_v40  ;;  %2678 = vmatprep.mubr.bf16.mxu1 %v5065_v40  ;;  %v5107_v40 = vld [vmem:[%s7151_s1 + $0x4cc] ss:$16 sps:$4 sm:$0xff]  }
  0x63   : > { %2296 = vmatpush1.bf16.msra.mxu0 %v5000_v37  ;;  %2661 = vmatpush1.bf16.msra.mxu1 %v5003_v39  ;;  %v5096_v37 = vld [vmem:[%s7151_s1 + $0x4a0] ss:$16 sps:$4 sm:$0xff]   ;;  %v5104_v39 = vld [vmem:[%s7151_s1 + $0x4c4] ss:$16 sps:$4 sm:$0xff]  }
  0x64   : > { %2297 = vmatprep.subr.bf16.mxu0 %v5008_v41  ;;  %2662 = vmatprep.subr.bf16.mxu1 %v5011_v42  ;;  %v5102_v41 = vld [vmem:[%s7151_s1 + $0x4c0] ss:$16 sps:$4 sm:$0xff]   ;;  %v5105_v42 = vld [vmem:[%s7151_s1 + $0x4c8] ss:$16 sps:$4 sm:$0xff]  }
  0x67   : > { %2298 = vmatpush1.bf16.msra.mxu0 %v5006_v43  ;;  %2663 = vmatpush1.bf16.msra.mxu1 %v5009_v44  ;;  %v5164_v43 = vld [vmem:[%s5597_s21 + $0xe0] ss:$36 sps:$4 sm:$0xff]  }
  0x68   : > { %2299 = vmatprep.subr.bf16.mxu0 %v5014_v45  ;;  %2664 = vmatprep.subr.bf16.mxu1 %v5017_v46  ;;  %v5110_v44 = vld [vmem:[%s7151_s1 + $0x4e4] ss:$16 sps:$4 sm:$0xff]   ;;  %v5113_v45 = vld [vmem:[%s7151_s1 + $0x4ec] ss:$16 sps:$4 sm:$0xff]  }
  0x69   : > { %v5173_v46 = vld [vmem:[%s5597_s21 + $0x14] ss:$36 sps:$4 sm:$0xff]  }
  0x6b   : > { %2300 = vmatpush1.bf16.msra.mxu0 %v5012_v47  ;;  %2665 = vmatpush1.bf16.msra.mxu1 %v5015_v48  ;;  %v5108_v47 = vld [vmem:[%s7151_s1 + $0x4e0] ss:$16 sps:$4 sm:$0xff]   ;;  %v5111_v48 = vld [vmem:[%s7151_s1 + $0x4e8] ss:$16 sps:$4 sm:$0xff]  }
  0x6c   : > { %2301 = vmatprep.subr.bf16.mxu0 %v5022_v49  ;;  %2666 = vmatprep.subr.bf16.mxu1 %v5025_v50  ;;  %v5116_v49 = vld [vmem:[%s7151_s1 + $0x504] ss:$16 sps:$4 sm:$0xff]   ;;  %v5119_v50 = vld [vmem:[%s7151_s1 + $0x50c] ss:$16 sps:$4 sm:$0xff]  }
  0x6f   : > { %2302 = vmatpush1.bf16.msra.mxu0 %v5020_v51  ;;  %2667 = vmatpush1.bf16.msra.mxu1 %v5023_v52  ;;  %v5114_v51 = vld [vmem:[%s7151_s1 + $0x500] ss:$16 sps:$4 sm:$0xff]   ;;  %v5117_v52 = vld [vmem:[%s7151_s1 + $0x508] ss:$16 sps:$4 sm:$0xff]  }
  0x70   : > { %2303 = vmatprep.subr.bf16.mxu0 %v5029_v53  ;;  %2668 = vmatprep.subr.bf16.mxu1 %v5032_v54  ;;  %v5122_v53 = vld [vmem:[%s7151_s1 + $0x524] ss:$16 sps:$4 sm:$0xff]   ;;  %v5125_v54 = vld [vmem:[%s7151_s1 + $0x52c] ss:$16 sps:$4 sm:$0xff]  }
  0x73   : > { %2304 = vmatpush1.bf16.msra.mxu0 %v5027_v55  ;;  %2669 = vmatpush1.bf16.msra.mxu1 %v5030_v56  ;;  %v5120_v55 = vld [vmem:[%s7151_s1 + $0x520] ss:$16 sps:$4 sm:$0xff]   ;;  %v5123_v56 = vld [vmem:[%s7151_s1 + $0x528] ss:$16 sps:$4 sm:$0xff]  }
  0x74   : > { %2305 = vmatprep.subr.bf16.mxu0 %v5037_v57  ;;  %2670 = vmatprep.subr.bf16.mxu1 %v5040_v58  ;;  %v5130_v57 = vld [vmem:[%s7151_s1 + $0x544] ss:$16 sps:$4 sm:$0xff]   ;;  %v5133_v58 = vld [vmem:[%s7151_s1 + $0x54c] ss:$16 sps:$4 sm:$0xff]  }
  0x77   : > { %2306 = vmatpush1.bf16.msra.mxu0 %v5035_v59  ;;  %2671 = vmatpush1.bf16.msra.mxu1 %v5038_v60  ;;  %v5128_v59 = vld [vmem:[%s7151_s1 + $0x540] ss:$16 sps:$4 sm:$0xff]   ;;  %v5131_v60 = vld [vmem:[%s7151_s1 + $0x548] ss:$16 sps:$4 sm:$0xff]  }
  0x78   : > { %2307 = vmatprep.subr.bf16.mxu0 %v5044_v61  ;;  %2672 = vmatprep.subr.bf16.mxu1 %v5047_v62  ;;  %v5137_v61 = vld [vmem:[%s7151_s1 + $0x564] ss:$16 sps:$4 sm:$0xff]   ;;  %v5140_v62 = vld [vmem:[%s7151_s1 + $0x56c] ss:$16 sps:$4 sm:$0xff]  }
  0x7b   : > { %2308 = vmatpush1.bf16.msra.mxu0 %v5042_v63  ;;  %2673 = vmatpush1.bf16.msra.mxu1 %v5045_v0  ;;  %v5135_v63 = vld [vmem:[%s7151_s1 + $0x560] ss:$16 sps:$4 sm:$0xff]   ;;  %v5138_v0 = vld [vmem:[%s7151_s1 + $0x568] ss:$16 sps:$4 sm:$0xff]  }
  0x7c   : > { %2309 = vmatprep.subr.bf16.mxu0 %v5052_v1  ;;  %2674 = vmatprep.subr.bf16.mxu1 %v5055_v2  ;;  %v5145_v1 = vld [vmem:[%s7151_s1 + $0x584] ss:$16 sps:$4 sm:$0xff]   ;;  %v5148_v2 = vld [vmem:[%s7151_s1 + $0x58c] ss:$16 sps:$4 sm:$0xff]  }
  0x7f   : > { %2310 = vmatpush1.bf16.msra.mxu0 %v5050_v3  ;;  %2675 = vmatpush1.bf16.msra.mxu1 %v5053_v4  ;;  %v5143_v3 = vld [vmem:[%s7151_s1 + $0x580] ss:$16 sps:$4 sm:$0xff]   ;;  %v5146_v4 = vld [vmem:[%s7151_s1 + $0x588] ss:$16 sps:$4 sm:$0xff]  }
  0x80   : > { %2311 = vmatprep.subr.bf16.mxu0 %v5059_v5  ;;  %2676 = vmatprep.subr.bf16.mxu1 %v5062_v6  ;;  %v5152_v5 = vld [vmem:[%s7151_s1 + $0x5a4] ss:$16 sps:$4 sm:$0xff]   ;;  %v5155_v6 = vld [vmem:[%s7151_s1 + $0x5ac] ss:$16 sps:$4 sm:$0xff]  }
  0x83   : > { %2312 = vmatpush1.bf16.msra.mxu0 %v5057_v7  ;;  %2677 = vmatpush1.bf16.msra.mxu1 %v5060_v8  ;;  %v5150_v7 = vld [vmem:[%s7151_s1 + $0x5a0] ss:$16 sps:$4 sm:$0xff]   ;;  %v5153_v8 = vld [vmem:[%s7151_s1 + $0x5a8] ss:$16 sps:$4 sm:$0xff]  }
  0x84   : > { %2354 = vmatprep.subr.bf16.mxu0 %v5068_v9  ;;  %2719 = vmatprep.subr.bf16.mxu1 %v5071_v10  ;;  %v5160_v9 = vld [vmem:[%s7151_s1 + $0x5c4] ss:$16 sps:$4 sm:$0xff]   ;;  %v5163_v10 = vld [vmem:[%s7151_s1 + $0x5cc] ss:$16 sps:$4 sm:$0xff]  }
  0x86   : > { %2314 = vmatmul.mubr.bf16.vlgmr.msra.gmra.mrb[0].mxu0 %v5063_v11  ;;  %2679 = vmatmul.mubr.bf16.vlgmr.msra.gmra.mrb[0].mxu1 %v5063_v11  ;;  %v5158_v11 = vld [vmem:[%s7151_s1 + $0x5c0] ss:$16 sps:$4 sm:$0xff]  }
  0x87   : > { %2355 = vmatpush1.bf16.msra.mxu0 %v5066_v12  ;;  %2720 = vmatpush1.bf16.msra.mxu1 %v5069_v13  ;;  %v5161_v12 = vld [vmem:[%s7151_s1 + $0x5c8] ss:$16 sps:$4 sm:$0xff]   ;;  %v5167_v13 = vld [vmem:[%s7151_s1 + $0x5e4] ss:$16 sps:$4 sm:$0xff]  }
  0x88   : > { %2356 = vmatprep.subr.bf16.mxu0 %v5074_v14  ;;  %2721 = vmatprep.subr.bf16.mxu1 %v5077_v15  ;;  %v5170_v14 = vld [vmem:[%s7151_s1 + $0x5ec] ss:$16 sps:$4 sm:$0xff]   ;;  %v5165_v15 = vld [vmem:[%s7151_s1 + $0x5e0] ss:$16 sps:$4 sm:$0xff]  }
  0x89   : > { %2323 = vmatprep.mubr.bf16.mxu0 %v5126_v16  ;;  %2688 = vmatprep.mubr.bf16.mxu1 %v5126_v16  ;;  %v5168_v16 = vld [vmem:[%s7151_s1 + $0x5e8] ss:$16 sps:$4 sm:$0xff]  }
  0x8b   : > { %2357 = vmatpush1.bf16.msra.mxu0 %v5072_v17  ;;  %2722 = vmatpush1.bf16.msra.mxu1 %v5075_v18  ;;  %v5176_v17 = vld [vmem:[%s7151_s1 + $0x604] ss:$16 sps:$4 sm:$0xff]   ;;  %v5179_v18 = vld [vmem:[%s7151_s1 + $0x60c] ss:$16 sps:$4 sm:$0xff]  }
  0x8c   : > { %2358 = vmatprep.subr.bf16.mxu0 %v5080_v19  ;;  %2723 = vmatprep.subr.bf16.mxu1 %v5083_v20  ;;  %v5171_v19 = vld [vmem:[%s5597_s21 + $0x10] ss:$36 sps:$4 sm:$0xff]  }
  0x8d   : > { %v5174_v20 = vld [vmem:[%s7151_s1 + $0x600] ss:$16 sps:$4 sm:$0xff]  }
  0x8e   : > { %2324 = vmatmul.mubr.bf16.gmra.mrb[4].mxu0 %v5134_v23  ;;  %2689 = vmatmul.mubr.bf16.gmra.mrb[4].mxu1 %v5134_v23  ;;  %v5185_v23 = vld [vmem:[%s7151_s1 + $0x62c] ss:$16 sps:$4 sm:$0xff]  }
  0x8f   : > { %2359 = vmatpush1.bf16.msra.mxu0 %v5078_v21  ;;  %2724 = vmatpush1.bf16.msra.mxu1 %v5081_v22  ;;  %v5177_v21 = vld [vmem:[%s7151_s1 + $0x608] ss:$16 sps:$4 sm:$0xff]   ;;  %v5182_v22 = vld [vmem:[%s7151_s1 + $0x624] ss:$16 sps:$4 sm:$0xff]  }
  0x90   : > { %2360 = vmatprep.subr.bf16.mxu0 %v5086_v24  ;;  %2725 = vmatprep.subr.bf16.mxu1 %v5089_v25  ;;  %v5234_v24 = vld [vmem:[%s5597_s21 + $0x5c] ss:$36 sps:$4 sm:$0xff]  }
  0x91   : > { %2333 = vmatprep.mubr.bf16.mxu0 %v5141_v26  ;;  %2698 = vmatprep.mubr.bf16.mxu1 %v5141_v26  ;;  %v5180_v25 = vld [vmem:[%s7151_s1 + $0x620] ss:$16 sps:$4 sm:$0xff]   ;;  %v5183_v26 = vld [vmem:[%s7151_s1 + $0x628] ss:$16 sps:$4 sm:$0xff]  }
  0x93   : > { %2361 = vmatpush1.bf16.msra.mxu0 %v5084_v27  ;;  %2726 = vmatpush1.bf16.msra.mxu1 %v5087_v28  ;;  %v5188_v27 = vld [vmem:[%s7151_s1 + $0x644] ss:$16 sps:$4 sm:$0xff]   ;;  %v5191_v28 = vld [vmem:[%s7151_s1 + $0x64c] ss:$16 sps:$4 sm:$0xff]  }
  0x94   : > { %2362 = vmatprep.subr.bf16.mxu0 %v5092_v29  ;;  %2727 = vmatprep.subr.bf16.mxu1 %v5095_v30  ;;  %v5186_v29 = vld [vmem:[%s7151_s1 + $0x640] ss:$16 sps:$4 sm:$0xff]   ;;  %v5189_v30 = vld [vmem:[%s7151_s1 + $0x648] ss:$16 sps:$4 sm:$0xff]  }
  0x96   : > { %2334 = vmatmul.mubr.bf16.gmra.mrb[8].mxu0 %v5149_v33  ;;  %2699 = vmatmul.mubr.bf16.gmra.mrb[8].mxu1 %v5149_v33  ;;  %v5197_v33 = vld [vmem:[%s7151_s1 + $0x66c] ss:$16 sps:$4 sm:$0xff]  }
  0x97   : > { %2363 = vmatpush1.bf16.msra.mxu0 %v5090_v31  ;;  %2728 = vmatpush1.bf16.msra.mxu1 %v5093_v32  ;;  %v5236_v31 = vld [vmem:[%s5597_s21 + $0x58] ss:$36 sps:$4 sm:$0xff]   ;;  %v5194_v32 = vld [vmem:[%s7151_s1 + $0x664] ss:$16 sps:$4 sm:$0xff]  }
  0x98   : > { %2364 = vmatprep.subr.bf16.mxu0 %v5098_v34  ;;  %2729 = vmatprep.subr.bf16.mxu1 %v5101_v35  ;;  %v5249_v34 = vld [vmem:[%s5597_s21 + $0xa4] ss:$36 sps:$4 sm:$0xff]   ;;  %v5192_v35 = vld [vmem:[%s7151_s1 + $0x660] ss:$16 sps:$4 sm:$0xff]  }
  0x99   : > { %2343 = vmatprep.mubr.bf16.mxu0 %v5156_v36  ;;  %2708 = vmatprep.mubr.bf16.mxu1 %v5156_v36  ;;  %v5195_v36 = vld [vmem:[%s7151_s1 + $0x668] ss:$16 sps:$4 sm:$0xff]  }
  0x9b   : > { %2365 = vmatpush1.bf16.msra.mxu0 %v5096_v37  ;;  %2730 = vmatpush1.bf16.msra.mxu1 %v5099_v38  ;;  %v5200_v37 = vld [vmem:[%s7151_s1 + $0x684] ss:$16 sps:$4 sm:$0xff]   ;;  %v5203_v38 = vld [vmem:[%s7151_s1 + $0x68c] ss:$16 sps:$4 sm:$0xff]  }
  0x9c   : > { %2366 = vmatprep.subr.bf16.mxu0 %v5104_v39  ;;  %2731 = vmatprep.subr.bf16.mxu1 %v5107_v40  ;;  %v5198_v39 = vld [vmem:[%s7151_s1 + $0x680] ss:$16 sps:$4 sm:$0xff]   ;;  %v5201_v40 = vld [vmem:[%s7151_s1 + $0x688] ss:$16 sps:$4 sm:$0xff]  }
  0x9e   : > { %2344 = vmatmul.mubr.bf16.gmra.mrb[12].mxu0 %v5164_v43  ;;  %2709 = vmatmul.mubr.bf16.gmra.mrb[12].mxu1 %v5164_v43  ;;  %v5209_v43 = vld [vmem:[%s7151_s1 + $0x6ac] ss:$16 sps:$4 sm:$0xff]  }
  0x9f   : > { %2367 = vmatpush1.bf16.msra.mxu0 %v5102_v41  ;;  %2732 = vmatpush1.bf16.msra.mxu1 %v5105_v42  ;;  %v5251_v41 = vld [vmem:[%s5597_s21 + $0xa0] ss:$36 sps:$4 sm:$0xff]  }
  0xa0   : > { %2368 = vmatprep.subr.bf16.mxu0 %v5110_v44  ;;  %2733 = vmatprep.subr.bf16.mxu1 %v5113_v45  ;;  %v5206_v42 = vld [vmem:[%s7151_s1 + $0x6a4] ss:$16 sps:$4 sm:$0xff]   ;;  %v5264_v44 = vld [vmem:[%s5597_s21 + $0xec] ss:$36 sps:$4 sm:$0xff]  }
  0xa1   : > { %2386 = vmatprep.mubr.bf16.mxu0 %v5173_v46  ;;  %2751 = vmatprep.mubr.bf16.mxu1 %v5173_v46  ;;  %v5204_v45 = vld [vmem:[%s7151_s1 + $0x6a0] ss:$16 sps:$4 sm:$0xff]   ;;  %v5207_v46 = vld [vmem:[%s7151_s1 + $0x6a8] ss:$16 sps:$4 sm:$0xff]  }
  0xa3   : > { %2369 = vmatpush1.bf16.msra.mxu0 %v5108_v47  ;;  %2734 = vmatpush1.bf16.msra.mxu1 %v5111_v48  ;;  %v5212_v47 = vld [vmem:[%s7151_s1 + $0x6c4] ss:$16 sps:$4 sm:$0xff]   ;;  %v5215_v48 = vld [vmem:[%s7151_s1 + $0x6cc] ss:$16 sps:$4 sm:$0xff]  }
  0xa4   : > { %2370 = vmatprep.subr.bf16.mxu0 %v5116_v49  ;;  %2735 = vmatprep.subr.bf16.mxu1 %v5119_v50  ;;  %v5210_v49 = vld [vmem:[%s7151_s1 + $0x6c0] ss:$16 sps:$4 sm:$0xff]   ;;  %v5266_v50 = vld [vmem:[%s5597_s21 + $0xe8] ss:$36 sps:$4 sm:$0xff]  }
  0xa7   : > { %2371 = vmatpush1.bf16.msra.mxu0 %v5114_v51  ;;  %2736 = vmatpush1.bf16.msra.mxu1 %v5117_v52  ;;  %v5213_v51 = vld [vmem:[%s7151_s1 + $0x6c8] ss:$16 sps:$4 sm:$0xff]   ;;  %v5218_v52 = vld [vmem:[%s7151_s1 + $0x6e4] ss:$16 sps:$4 sm:$0xff]  }
  0xa8   : > { %2372 = vmatprep.subr.bf16.mxu0 %v5122_v53  ;;  %2737 = vmatprep.subr.bf16.mxu1 %v5125_v54  ;;  %v5221_v53 = vld [vmem:[%s7151_s1 + $0x6ec] ss:$16 sps:$4 sm:$0xff]  }
  0xa9   : > { %v5281_v54 = vld [vmem:[%s5597_s21 + $0x1c] ss:$36 sps:$4 sm:$0xff]  }
  0xab   : > { %2373 = vmatpush1.bf16.msra.mxu0 %v5120_v55  ;;  %2738 = vmatpush1.bf16.msra.mxu1 %v5123_v56  ;;  %v5216_v55 = vld [vmem:[%s7151_s1 + $0x6e0] ss:$16 sps:$4 sm:$0xff]   ;;  %v5219_v56 = vld [vmem:[%s7151_s1 + $0x6e8] ss:$16 sps:$4 sm:$0xff]  }
  0xac   : > { %2374 = vmatprep.subr.bf16.mxu0 %v5130_v57  ;;  %2739 = vmatprep.subr.bf16.mxu1 %v5133_v58  ;;  %v5224_v57 = vld [vmem:[%s7151_s1 + $0x704] ss:$16 sps:$4 sm:$0xff]   ;;  %v5227_v58 = vld [vmem:[%s7151_s1 + $0x70c] ss:$16 sps:$4 sm:$0xff]  }
  0xaf   : > { %2375 = vmatpush1.bf16.msra.mxu0 %v5128_v59  ;;  %2740 = vmatpush1.bf16.msra.mxu1 %v5131_v60  ;;  %v5222_v59 = vld [vmem:[%s7151_s1 + $0x700] ss:$16 sps:$4 sm:$0xff]   ;;  %v5225_v60 = vld [vmem:[%s7151_s1 + $0x708] ss:$16 sps:$4 sm:$0xff]  }
  0xb0   : > { %2376 = vmatprep.subr.bf16.mxu0 %v5137_v61  ;;  %2741 = vmatprep.subr.bf16.mxu1 %v5140_v62  ;;  %v5230_v61 = vld [vmem:[%s7151_s1 + $0x724] ss:$16 sps:$4 sm:$0xff]   ;;  %v5233_v62 = vld [vmem:[%s7151_s1 + $0x72c] ss:$16 sps:$4 sm:$0xff]  }
  0xb3   : > { %2377 = vmatpush1.bf16.msra.mxu0 %v5135_v63  ;;  %2742 = vmatpush1.bf16.msra.mxu1 %v5138_v0  ;;  %v5228_v63 = vld [vmem:[%s7151_s1 + $0x720] ss:$16 sps:$4 sm:$0xff]   ;;  %v5231_v0 = vld [vmem:[%s7151_s1 + $0x728] ss:$16 sps:$4 sm:$0xff]  }
  0xb4   : > { %2378 = vmatprep.subr.bf16.mxu0 %v5145_v1  ;;  %2743 = vmatprep.subr.bf16.mxu1 %v5148_v2  ;;  %v5239_v1 = vld [vmem:[%s7151_s1 + $0x744] ss:$16 sps:$4 sm:$0xff]   ;;  %v5242_v2 = vld [vmem:[%s7151_s1 + $0x74c] ss:$16 sps:$4 sm:$0xff]  }
  0xb7   : > { %2379 = vmatpush1.bf16.msra.mxu0 %v5143_v3  ;;  %2744 = vmatpush1.bf16.msra.mxu1 %v5146_v4  ;;  %v5237_v3 = vld [vmem:[%s7151_s1 + $0x740] ss:$16 sps:$4 sm:$0xff]   ;;  %v5240_v4 = vld [vmem:[%s7151_s1 + $0x748] ss:$16 sps:$4 sm:$0xff]  }
  0xb8   : > { %2380 = vmatprep.subr.bf16.mxu0 %v5152_v5  ;;  %2745 = vmatprep.subr.bf16.mxu1 %v5155_v6  ;;  %v5245_v5 = vld [vmem:[%s7151_s1 + $0x764] ss:$16 sps:$4 sm:$0xff]   ;;  %v5248_v6 = vld [vmem:[%s7151_s1 + $0x76c] ss:$16 sps:$4 sm:$0xff]  }
  0xbb   : > { %2381 = vmatpush1.bf16.msra.mxu0 %v5150_v7  ;;  %2746 = vmatpush1.bf16.msra.mxu1 %v5153_v8  ;;  %v5243_v7 = vld [vmem:[%s7151_s1 + $0x760] ss:$16 sps:$4 sm:$0xff]   ;;  %v5246_v8 = vld [vmem:[%s7151_s1 + $0x768] ss:$16 sps:$4 sm:$0xff]  }
  0xbc   : > { %2382 = vmatprep.subr.bf16.mxu0 %v5160_v9  ;;  %2747 = vmatprep.subr.bf16.mxu1 %v5163_v10  ;;  %v5254_v9 = vld [vmem:[%s7151_s1 + $0x784] ss:$16 sps:$4 sm:$0xff]   ;;  %v5257_v10 = vld [vmem:[%s7151_s1 + $0x78c] ss:$16 sps:$4 sm:$0xff]  }
  0xbf   : > { %2383 = vmatpush1.bf16.msra.mxu0 %v5158_v11  ;;  %2748 = vmatpush1.bf16.msra.mxu1 %v5161_v12  ;;  %v5252_v11 = vld [vmem:[%s7151_s1 + $0x780] ss:$16 sps:$4 sm:$0xff]   ;;  %v5255_v12 = vld [vmem:[%s7151_s1 + $0x788] ss:$16 sps:$4 sm:$0xff]  }
  0xc0   : > { %2384 = vmatprep.subr.bf16.mxu0 %v5167_v13  ;;  %2749 = vmatprep.subr.bf16.mxu1 %v5170_v14  ;;  %v5260_v13 = vld [vmem:[%s7151_s1 + $0x7a4] ss:$16 sps:$4 sm:$0xff]   ;;  %v5263_v14 = vld [vmem:[%s7151_s1 + $0x7ac] ss:$16 sps:$4 sm:$0xff]  }
  0xc3   : > { %2385 = vmatpush1.bf16.msra.mxu0 %v5165_v15  ;;  %2750 = vmatpush1.bf16.msra.mxu1 %v5168_v16  ;;  %v5258_v15 = vld [vmem:[%s7151_s1 + $0x7a0] ss:$16 sps:$4 sm:$0xff]   ;;  %v5261_v16 = vld [vmem:[%s7151_s1 + $0x7a8] ss:$16 sps:$4 sm:$0xff]  }
  0xc4   : > { %2427 = vmatprep.subr.bf16.mxu0 %v5176_v17  ;;  %2792 = vmatprep.subr.bf16.mxu1 %v5179_v18  ;;  %v5269_v17 = vld [vmem:[%s7151_s1 + $0x7c4] ss:$16 sps:$4 sm:$0xff]   ;;  %v5272_v18 = vld [vmem:[%s7151_s1 + $0x7cc] ss:$16 sps:$4 sm:$0xff]  }
  0xc6   : > { %2387 = vmatmul.mubr.bf16.vlgmr.msra.gmra.mrb[0].mxu0 %v5171_v19  ;;  %2752 = vmatmul.mubr.bf16.vlgmr.msra.gmra.mrb[0].mxu1 %v5171_v19  ;;  %v5267_v19 = vld [vmem:[%s7151_s1 + $0x7c0] ss:$16 sps:$4 sm:$0xff]  }
  0xc7   : > { %2428 = vmatpush1.bf16.msra.mxu0 %v5174_v20  ;;  %2793 = vmatpush1.bf16.msra.mxu1 %v5177_v21  ;;  %v5270_v20 = vld [vmem:[%s7151_s1 + $0x7c8] ss:$16 sps:$4 sm:$0xff]   ;;  %v5275_v21 = vld [vmem:[%s7151_s1 + $0x7e4] ss:$16 sps:$4 sm:$0xff]  }
  0xc8   : > { %2429 = vmatprep.subr.bf16.mxu0 %v5182_v22  ;;  %2794 = vmatprep.subr.bf16.mxu1 %v5185_v23  ;;  %v5278_v22 = vld [vmem:[%s7151_s1 + $0x7ec] ss:$16 sps:$4 sm:$0xff]   ;;  %v5273_v23 = vld [vmem:[%s7151_s1 + $0x7e0] ss:$16 sps:$4 sm:$0xff]  }
  0xc9   : > { %2396 = vmatprep.mubr.bf16.mxu0 %v5234_v24  ;;  %2761 = vmatprep.mubr.bf16.mxu1 %v5234_v24  ;;  %v5276_v24 = vld [vmem:[%s7151_s1 + $0x7e8] ss:$16 sps:$4 sm:$0xff]  }
  0xcb   : > { %2430 = vmatpush1.bf16.msra.mxu0 %v5180_v25  ;;  %2795 = vmatpush1.bf16.msra.mxu1 %v5183_v26  ;;  %v5284_v25 = vld [vmem:[%s7151_s1 + $0x804] ss:$16 sps:$4 sm:$0xff]   ;;  %v5287_v26 = vld [vmem:[%s7151_s1 + $0x80c] ss:$16 sps:$4 sm:$0xff]  }
  0xcc   : > { %2431 = vmatprep.subr.bf16.mxu0 %v5188_v27  ;;  %2796 = vmatprep.subr.bf16.mxu1 %v5191_v28  ;;  %v5279_v27 = vld [vmem:[%s5597_s21 + $0x18] ss:$36 sps:$4 sm:$0xff]   ;;  %v5282_v28 = vld [vmem:[%s7151_s1 + $0x800] ss:$16 sps:$4 sm:$0xff]  }
  0xce   : > { %2397 = vmatmul.mubr.bf16.gmra.mrb[4].mxu0 %v5236_v31  ;;  %2762 = vmatmul.mubr.bf16.gmra.mrb[4].mxu1 %v5236_v31  ;;  %v5293_v31 = vld [vmem:[%s7151_s1 + $0x82c] ss:$16 sps:$4 sm:$0xff]  }
  0xcf   : > { %2432 = vmatpush1.bf16.msra.mxu0 %v5186_v29  ;;  %2797 = vmatpush1.bf16.msra.mxu1 %v5189_v30  ;;  %v5285_v29 = vld [vmem:[%s7151_s1 + $0x808] ss:$16 sps:$4 sm:$0xff]   ;;  %v5290_v30 = vld [vmem:[%s7151_s1 + $0x824] ss:$16 sps:$4 sm:$0xff]  }
  0xd0   : > { %2433 = vmatprep.subr.bf16.mxu0 %v5194_v32  ;;  %2798 = vmatprep.subr.bf16.mxu1 %v5197_v33  ;;  %v5294_v32 = vld [vmem:[%s5597_s21 + $0x64] ss:$36 sps:$4 sm:$0xff]   ;;  %v5288_v33 = vld [vmem:[%s7151_s1 + $0x820] ss:$16 sps:$4 sm:$0xff]  }
  0xd1   : > { %2406 = vmatprep.mubr.bf16.mxu0 %v5249_v34  ;;  %2771 = vmatprep.mubr.bf16.mxu1 %v5249_v34  ;;  %v5291_v34 = vld [vmem:[%s7151_s1 + $0x828] ss:$16 sps:$4 sm:$0xff]  }
  0xd3   : > { %2434 = vmatpush1.bf16.msra.mxu0 %v5192_v35  ;;  %2799 = vmatpush1.bf16.msra.mxu1 %v5195_v36  ;;  %v5299_v35 = vld [vmem:[%s7151_s1 + $0x844] ss:$16 sps:$4 sm:$0xff]   ;;  %v5302_v36 = vld [vmem:[%s7151_s1 + $0x84c] ss:$16 sps:$4 sm:$0xff]  }
  0xd4   : > { %2435 = vmatprep.subr.bf16.mxu0 %v5200_v37  ;;  %2800 = vmatprep.subr.bf16.mxu1 %v5203_v38  ;;  %v5296_v37 = vld [vmem:[%s5597_s21 + $0x60] ss:$36 sps:$4 sm:$0xff]  }
  0xd5   : > { %v5297_v38 = vld [vmem:[%s7151_s1 + $0x840] ss:$16 sps:$4 sm:$0xff]  }
  0xd6   : > { %2407 = vmatmul.mubr.bf16.gmra.mrb[8].mxu0 %v5251_v41  ;;  %2772 = vmatmul.mubr.bf16.gmra.mrb[8].mxu1 %v5251_v41  ;;  %v5308_v41 = vld [vmem:[%s7151_s1 + $0x86c] ss:$16 sps:$4 sm:$0xff]  }
  0xd7   : > { %2436 = vmatpush1.bf16.msra.mxu0 %v5198_v39  ;;  %2801 = vmatpush1.bf16.msra.mxu1 %v5201_v40  ;;  %v5300_v39 = vld [vmem:[%s7151_s1 + $0x848] ss:$16 sps:$4 sm:$0xff]   ;;  %v5305_v40 = vld [vmem:[%s7151_s1 + $0x864] ss:$16 sps:$4 sm:$0xff]  }
  0xd8   : > { %2437 = vmatprep.subr.bf16.mxu0 %v5206_v42  ;;  %2802 = vmatprep.subr.bf16.mxu1 %v5209_v43  ;;  %v5309_v42 = vld [vmem:[%s5597_s21 + $0xac] ss:$36 sps:$4 sm:$0xff]  }
  0xd9   : > { %2416 = vmatprep.mubr.bf16.mxu0 %v5264_v44  ;;  %2781 = vmatprep.mubr.bf16.mxu1 %v5264_v44  ;;  %v5303_v43 = vld [vmem:[%s7151_s1 + $0x860] ss:$16 sps:$4 sm:$0xff]   ;;  %v5306_v44 = vld [vmem:[%s7151_s1 + $0x868] ss:$16 sps:$4 sm:$0xff]  }
  0xdb   : > { %2438 = vmatpush1.bf16.msra.mxu0 %v5204_v45  ;;  %2803 = vmatpush1.bf16.msra.mxu1 %v5207_v46  ;;  %v5314_v45 = vld [vmem:[%s7151_s1 + $0x884] ss:$16 sps:$4 sm:$0xff]   ;;  %v5317_v46 = vld [vmem:[%s7151_s1 + $0x88c] ss:$16 sps:$4 sm:$0xff]  }
  0xdc   : > { %2439 = vmatprep.subr.bf16.mxu0 %v5212_v47  ;;  %2804 = vmatprep.subr.bf16.mxu1 %v5215_v48  ;;  %v5311_v47 = vld [vmem:[%s5597_s21 + $0xa8] ss:$36 sps:$4 sm:$0xff]   ;;  %v5312_v48 = vld [vmem:[%s7151_s1 + $0x880] ss:$16 sps:$4 sm:$0xff]  }
  0xde   : > { %2417 = vmatmul.mubr.bf16.gmra.mrb[12].mxu0 %v5266_v50  ;;  %2782 = vmatmul.mubr.bf16.gmra.mrb[12].mxu1 %v5266_v50  ;;  %v5320_v50 = vld [vmem:[%s7151_s1 + $0x8a4] ss:$16 sps:$4 sm:$0xff]  }
  0xdf   : > { %2440 = vmatpush1.bf16.msra.mxu0 %v5210_v49  ;;  %2805 = vmatpush1.bf16.msra.mxu1 %v5213_v51  ;;  %v5315_v49 = vld [vmem:[%s7151_s1 + $0x888] ss:$16 sps:$4 sm:$0xff]   ;;  %v5323_v51 = vld [vmem:[%s7151_s1 + $0x8ac] ss:$16 sps:$4 sm:$0xff]  }
  0xe0   : > { %2441 = vmatprep.subr.bf16.mxu0 %v5218_v52  ;;  %2806 = vmatprep.subr.bf16.mxu1 %v5221_v53  ;;  %v5324_v52 = vld [vmem:[%s5597_s21 + $0xf4] ss:$36 sps:$4 sm:$0xff]   ;;  %v5318_v53 = vld [vmem:[%s7151_s1 + $0x8a0] ss:$16 sps:$4 sm:$0xff]  }
  0xe1   : > { %2459 = vmatprep.mubr.bf16.mxu0 %v5281_v54  ;;  %2824 = vmatprep.mubr.bf16.mxu1 %v5281_v54  ;;  %v5321_v54 = vld [vmem:[%s7151_s1 + $0x8a8] ss:$16 sps:$4 sm:$0xff]  }
  0xe3   : > { %2442 = vmatpush1.bf16.msra.mxu0 %v5216_v55  ;;  %2807 = vmatpush1.bf16.msra.mxu1 %v5219_v56  ;;  %v5329_v55 = vld [vmem:[%s7151_s1 + $0x8c4] ss:$16 sps:$4 sm:$0xff]   ;;  %v5332_v56 = vld [vmem:[%s7151_s1 + $0x8cc] ss:$16 sps:$4 sm:$0xff]  }
  0xe4   : > { %2443 = vmatprep.subr.bf16.mxu0 %v5224_v57  ;;  %2808 = vmatprep.subr.bf16.mxu1 %v5227_v58  ;;  %v5326_v57 = vld [vmem:[%s5597_s21 + $0xf0] ss:$36 sps:$4 sm:$0xff]  }
  0xe5   : > { %v5327_v58 = vld [vmem:[%s7151_s1 + $0x8c0] ss:$16 sps:$4 sm:$0xff]  }
  0xe7   : > { %2444 = vmatpush1.bf16.msra.mxu0 %v5222_v59  ;;  %2809 = vmatpush1.bf16.msra.mxu1 %v5225_v60  ;;  %v5330_v59 = vld [vmem:[%s7151_s1 + $0x8c8] ss:$16 sps:$4 sm:$0xff]   ;;  %v5335_v60 = vld [vmem:[%s7151_s1 + $0x8e4] ss:$16 sps:$4 sm:$0xff]  }
  0xe8   : > { %2445 = vmatprep.subr.bf16.mxu0 %v5230_v61  ;;  %2810 = vmatprep.subr.bf16.mxu1 %v5233_v62  ;;  %v5338_v61 = vld [vmem:[%s7151_s1 + $0x8ec] ss:$16 sps:$4 sm:$0xff]   ;;  %v2938_v62 = vld [vmem:[%s7153_s3] sm:$0xff] }
  0xeb   : > { %2446 = vmatpush1.bf16.msra.mxu0 %v5228_v63  ;;  %2811 = vmatpush1.bf16.msra.mxu1 %v5231_v0  ;;  %v2939_v63 = vld [vmem:[%s7153_s3 + $0x8] sm:$0xff]  ;;  %v5333_v0 = vld [vmem:[%s7151_s1 + $0x8e0] ss:$16 sps:$4 sm:$0xff]  }
  0xec   : > { %2447 = vmatprep.subr.bf16.mxu0 %v5239_v1  ;;  %2812 = vmatprep.subr.bf16.mxu1 %v5242_v2  ;;  %v5336_v1 = vld [vmem:[%s7151_s1 + $0x8e8] ss:$16 sps:$4 sm:$0xff]   ;;  %v6366_v2 = vpack.c.bf16 %v2939_v63, %v2938_v62 }
  0xef   : > { %2448 = vmatpush1.bf16.msra.mxu0 %v5237_v3  ;;  %2813 = vmatpush1.bf16.msra.mxu1 %v5240_v4  ;;  %v5415_v3 = vmov 0   ;;  %v5339_v4 = vld [vmem:[%s5597_s21 + $0x20] ss:$36 sps:$4 sm:$0xff]  }
  0xf0   : > { %2449 = vmatprep.subr.bf16.mxu0 %v5245_v5  ;;  %2814 = vmatprep.subr.bf16.mxu1 %v5248_v6  ;;  %v2940_v5 = vld [vmem:[%s7153_s3 + $0x10] sm:$0xff]  ;;  %v2941_v6 = vld [vmem:[%s7153_s3 + $0x18] sm:$0xff] }
  0xf3   : > { %2450 = vmatpush1.bf16.msra.mxu0 %v5243_v7  ;;  %2815 = vmatpush1.bf16.msra.mxu1 %v5246_v8  ;;  %v6377_v7 = vpack.c.bf16 %v2941_v6, %v2940_v5  ;;  %v2942_v8 = vld [vmem:[%s7153_s3 + $0x20] sm:$0xff] }
  0xf4   : > { %2451 = vmatprep.subr.bf16.mxu0 %v5254_v9  ;;  %2816 = vmatprep.subr.bf16.mxu1 %v5257_v10  ;;  %v2943_v9 = vld [vmem:[%s7153_s3 + $0x28] sm:$0xff] }
  0xf5   : > { %v6389_v10 = vpack.c.bf16 %v2943_v9, %v2942_v8 }
  0xf7   : > { %2452 = vmatpush1.bf16.msra.mxu0 %v5252_v11  ;;  %2817 = vmatpush1.bf16.msra.mxu1 %v5255_v12  ;;  %v5340_v11 = vld [vmem:[%s5597_s21 + $0x68] ss:$36 sps:$4 sm:$0xff]   ;;  %v2944_v12 = vld [vmem:[%s7153_s3 + $0x30] sm:$0xff] }
  0xf8   : > { %2453 = vmatprep.subr.bf16.mxu0 %v5260_v13  ;;  %2818 = vmatprep.subr.bf16.mxu1 %v5263_v14  ;;  %v2945_v13 = vld [vmem:[%s7153_s3 + $0x38] sm:$0xff] }
  0xf9   : > { %v6402_v14 = vpack.c.bf16 %v2945_v13, %v2944_v12 }
  0xfb   : > { %2454 = vmatpush1.bf16.msra.mxu0 %v5258_v15  ;;  %2819 = vmatpush1.bf16.msra.mxu1 %v5261_v16  ;;  %v2946_v15 = vld [vmem:[%s7153_s3 + $0x40] sm:$0xff]  ;;  %v2947_v16 = vld [vmem:[%s7153_s3 + $0x48] sm:$0xff] }
  0xfc   : > { %2455 = vmatprep.subr.bf16.mxu0 %v5269_v17  ;;  %2820 = vmatprep.subr.bf16.mxu1 %v5272_v18  ;;  %v6414_v17 = vpack.c.bf16 %v2947_v16, %v2946_v15  ;;  %v5341_v18 = vld [vmem:[%s5597_s21 + $0xb0] ss:$36 sps:$4 sm:$0xff]  }
  0xff   : > { %2456 = vmatpush1.bf16.msra.mxu0 %v5267_v19  ;;  %2821 = vmatpush1.bf16.msra.mxu1 %v5270_v20  ;;  %v2948_v19 = vld [vmem:[%s7153_s3 + $0x50] sm:$0xff]  ;;  %v2949_v20 = vld [vmem:[%s7153_s3 + $0x58] sm:$0xff] }
 0x100   : > { %2457 = vmatprep.subr.bf16.mxu0 %v5275_v21  ;;  %2822 = vmatprep.subr.bf16.mxu1 %v5278_v22  ;;  %v6427_v21 = vpack.c.bf16 %v2949_v20, %v2948_v19  ;;  %v2950_v22 = vld [vmem:[%s7153_s3 + $0x60] sm:$0xff] }
 0x103   : > { %2458 = vmatpush1.bf16.msra.mxu0 %v5273_v23  ;;  %2823 = vmatpush1.bf16.msra.mxu1 %v5276_v24  ;;  %v2951_v23 = vld [vmem:[%s7153_s3 + $0x68] sm:$0xff] }
 0x104   : > { %2500 = vmatprep.subr.bf16.mxu0 %v5284_v25  ;;  %2865 = vmatprep.subr.bf16.mxu1 %v5287_v26  ;;  %v6439_v24 = vpack.c.bf16 %v2951_v23, %v2950_v22  ;;  %v5342_v25 = vld [vmem:[%s5597_s21 + $0xf8] ss:$36 sps:$4 sm:$0xff]   ;;  %v2952_v26 = vld [vmem:[%s7153_s3 + $0x70] sm:$0xff] }
 0x106   : > { %2460 = vmatmul.mubr.bf16.vlgmr.msra.gmra.mrb[0].mxu0 %v5279_v27  ;;  %2825 = vmatmul.mubr.bf16.vlgmr.msra.gmra.mrb[0].mxu1 %v5279_v27  ;;  %v2953_v27 = vld [vmem:[%s7153_s3 + $0x78] sm:$0xff] }
 0x107   : > { %2501 = vmatpush1.bf16.msra.mxu0 %v5282_v28  ;;  %2866 = vmatpush1.bf16.msra.mxu1 %v5285_v29  ;;  %v6454_v28 = vpack.c.bf16 %v2953_v27, %v2952_v26  ;;  %v564_v29 = vlaneseq }
 0x108   : > { %2502 = vmatprep.subr.bf16.mxu0 %v5290_v30  ;;  %2867 = vmatprep.subr.bf16.mxu1 %v5293_v31 }
 0x109   : > { %2469 = vmatprep.mubr.bf16.mxu0 %v5294_v32  ;;  %2834 = vmatprep.mubr.bf16.mxu1 %v5294_v32  ;;  %v6462_v30 = vshrl.u32 %v564_v29, 7  ;;  %v6468_v32 = vld [vmem:[%s7152_s2] sm:$0xf] }
 0x10b   : > { %2503 = vmatpush1.bf16.msra.mxu0 %v5288_v33  ;;  %2868 = vmatpush1.bf16.msra.mxu1 %v5291_v34  ;;  %v566_v31 = vsub.s32 0, %v6462_v30  ;;  %v570_v33 = vsub.s32 1, %v6462_v30  ;;  %v574_v13 = vsub.s32 2, %v6462_v30  ;;  %v578_v19 = vsub.s32 3, %v6462_v30 }
 0x10c   : > { %2504 = vmatprep.subr.bf16.mxu0 %v5299_v35  ;;  %2869 = vmatprep.subr.bf16.mxu1 %v5302_v36 }
 0x10d   : > { %v6472_v34 = vrot.slane %v6468_v32, %v566_v31  ;;  %v6475_v35 = vrot.slane %v6468_v32, %v570_v33  ;;  %v6579_v26 = vrot.slane %v6468_v32, %v574_v13  ;;  %v6583_v27 = vrot.slane %v6468_v32, %v578_v19 }
 0x10e   : > { %2470 = vmatmul.mubr.bf16.gmra.mrb[4].mxu0 %v5296_v37  ;;  %2835 = vmatmul.mubr.bf16.gmra.mrb[4].mxu1 %v5296_v37 }
 0x10f   : > { %2505 = vmatpush1.bf16.msra.mxu0 %v5297_v38  ;;  %2870 = vmatpush1.bf16.msra.mxu1 %v5300_v39 }
 0x110   : > { %2506 = vmatprep.subr.bf16.mxu0 %v5305_v40  ;;  %2871 = vmatprep.subr.bf16.mxu1 %v5308_v41 }
 0x111   : > { %2479 = vmatprep.mubr.bf16.mxu0 %v5309_v42  ;;  %2844 = vmatprep.mubr.bf16.mxu1 %v5309_v42 }
 0x113   : > { %2507 = vmatpush1.bf16.msra.mxu0 %v5303_v43  ;;  %2872 = vmatpush1.bf16.msra.mxu1 %v5306_v44 }
 0x114   : > { %2508 = vmatprep.subr.bf16.mxu0 %v5314_v45  ;;  %2873 = vmatprep.subr.bf16.mxu1 %v5317_v46 }
 0x116   : > { %2480 = vmatmul.mubr.bf16.gmra.mrb[8].mxu0 %v5311_v47  ;;  %2845 = vmatmul.mubr.bf16.gmra.mrb[8].mxu1 %v5311_v47 }
 0x117   : > { %2509 = vmatpush1.bf16.msra.mxu0 %v5312_v48  ;;  %2874 = vmatpush1.bf16.msra.mxu1 %v5315_v49 }
 0x118   : > { %2510 = vmatprep.subr.bf16.mxu0 %v5320_v50  ;;  %2875 = vmatprep.subr.bf16.mxu1 %v5323_v51 }
 0x119   : > { %2489 = vmatprep.mubr.bf16.mxu0 %v5324_v52  ;;  %2854 = vmatprep.mubr.bf16.mxu1 %v5324_v52 }
 0x11b   : > { %2511 = vmatpush1.bf16.msra.mxu0 %v5318_v53  ;;  %2876 = vmatpush1.bf16.msra.mxu1 %v5321_v54 }
 0x11c   : > { %2512 = vmatprep.subr.bf16.mxu0 %v5329_v55  ;;  %2877 = vmatprep.subr.bf16.mxu1 %v5332_v56 }
 0x11e   : > { %2490 = vmatmul.mubr.bf16.gmra.mrb[12].mxu0 %v5326_v57  ;;  %2855 = vmatmul.mubr.bf16.gmra.mrb[12].mxu1 %v5326_v57 }
 0x11f   : > { %2513 = vmatpush1.bf16.msra.mxu0 %v5327_v58  ;;  %2878 = vmatpush1.bf16.msra.mxu1 %v5330_v59 }
 0x120   : > { %2514 = vmatprep.subr.bf16.mxu0 %v5335_v60  ;;  %2879 = vmatprep.subr.bf16.mxu1 %v5338_v61 }
 0x121   : > { %2532 = vmatprep.mubr.bf16.mxu0 %v5415_v3  ;;  %2897 = vmatprep.mubr.bf16.mxu1 %v5415_v3 }
 0x123   : > { %2515 = vmatpush1.bf16.msra.mxu0 %v5333_v0  ;;  %2880 = vmatpush1.bf16.msra.mxu1 %v5336_v1 }
 0x124   : > { %4562 = vmatprep.subr.bf16.mxu0 %v6366_v2  ;;  %4594 = vmatprep.subr.bf16.mxu1 %v6366_v2 }
 0x126   : > { %2533 = vmatmul.mubr.bf16.vlgmr.msra.gmra.mrb[0].mxu0 %v5339_v4  ;;  %2898 = vmatmul.mubr.bf16.vlgmr.msra.gmra.mrb[0].mxu1 %v5339_v4 }
 0x127   : > { %2542 = vmatprep.mubr.bf16.mxu0 %v5415_v3  ;;  %2907 = vmatprep.mubr.bf16.mxu1 %v5415_v3 }
 0x128   : > { %4564 = vmatpush3.bf16.msra.mxu0 %v6366_v2  ;;  %4596 = vmatpush3.bf16.msra.mxu1 %v6366_v2 }
 0x129   : > { %4566 = vmatprep.subr.bf16.mxu0 %v6377_v7  ;;  %4598 = vmatprep.subr.bf16.mxu1 %v6377_v7 }
 0x12c   : > { %4568 = vmatpush3.bf16.msra.mxu0 %v6377_v7  ;;  %4600 = vmatpush3.bf16.msra.mxu1 %v6377_v7 }
 0x12d   : > { %4570 = vmatprep.subr.bf16.mxu0 %v6389_v10  ;;  %4602 = vmatprep.subr.bf16.mxu1 %v6389_v10 }
 0x12e   : > { %2543 = vmatmul.mubr.bf16.gmra.mrb[4].mxu0 %v5340_v11  ;;  %2908 = vmatmul.mubr.bf16.gmra.mrb[4].mxu1 %v5340_v11 }
 0x12f   : > { %2552 = vmatprep.mubr.bf16.mxu0 %v5415_v3  ;;  %2917 = vmatprep.mubr.bf16.mxu1 %v5415_v3 }
 0x130   : > { %4572 = vmatpush3.bf16.msra.mxu0 %v6389_v10  ;;  %4604 = vmatpush3.bf16.msra.mxu1 %v6389_v10 }
 0x131   : > { %4574 = vmatprep.subr.bf16.mxu0 %v6402_v14  ;;  %4606 = vmatprep.subr.bf16.mxu1 %v6402_v14 }
 0x134   : > { %4576 = vmatpush3.bf16.msra.mxu0 %v6402_v14  ;;  %4608 = vmatpush3.bf16.msra.mxu1 %v6402_v14 }
 0x135   : > { %4578 = vmatprep.subr.bf16.mxu0 %v6414_v17  ;;  %4610 = vmatprep.subr.bf16.mxu1 %v6414_v17 }
 0x136   : > { %2553 = vmatmul.mubr.bf16.gmra.mrb[8].mxu0 %v5341_v18  ;;  %2918 = vmatmul.mubr.bf16.gmra.mrb[8].mxu1 %v5341_v18 }
 0x137   : > { %2562 = vmatprep.mubr.bf16.mxu0 %v5415_v3  ;;  %2927 = vmatprep.mubr.bf16.mxu1 %v5415_v3 }
 0x138   : > { %4580 = vmatpush3.bf16.msra.mxu0 %v6414_v17  ;;  %4612 = vmatpush3.bf16.msra.mxu1 %v6414_v17 }
 0x139   : > { %4582 = vmatprep.subr.bf16.mxu0 %v6427_v21  ;;  %4614 = vmatprep.subr.bf16.mxu1 %v6427_v21 }
 0x13c   : > { %4584 = vmatpush3.bf16.msra.mxu0 %v6427_v21  ;;  %4616 = vmatpush3.bf16.msra.mxu1 %v6427_v21 }
 0x13d   : > { %4586 = vmatprep.subr.bf16.mxu0 %v6439_v24  ;;  %4618 = vmatprep.subr.bf16.mxu1 %v6439_v24 }
 0x13e   : > { %2563 = vmatmul.mubr.bf16.gmra.mrb[12].mxu0 %v5342_v25  ;;  %2928 = vmatmul.mubr.bf16.gmra.mrb[12].mxu1 %v5342_v25 }
 0x140   : > { %4588 = vmatpush3.bf16.msra.mxu0 %v6439_v24  ;;  %4620 = vmatpush3.bf16.msra.mxu1 %v6439_v24 }
 0x141   : > { %4590 = vmatprep.subr.bf16.mxu0 %v6454_v28  ;;  %4622 = vmatprep.subr.bf16.mxu1 %v6454_v28 }
 0x144   : > { %4592 = vmatpush3.bf16.msra.mxu0 %v6454_v28  ;;  %4624 = vmatpush3.bf16.msra.mxu1 %v6454_v28 }
 0x145   : > { %4626 = vmatprep.subr.bf16.mxu0 %v6366_v2  ;;  %4658 = vmatprep.subr.bf16.mxu1 %v6366_v2 }
 0x1f9   : > { %v2534_v36 = vpop.f32.mrb[0].mxu0  ;;  %v6477_v37 = vpop.f32.mrb[0].mxu1 }
 0x1fa   : > { %v6480_v38 = vadd.f32 %v2534_v36, %v6472_v34  ;;  %v2536_v39 = vpop.f32.mrb[1].mxu0  ;;  %v6482_v40 = vpop.f32.mrb[1].mxu1 }
 0x1fb   : > { %v6485_v41 = vadd.f32 %v2536_v39, %v6475_v35  ;;  %v2538_v42 = vpop.f32.mrb[2].mxu0  ;;  %v6487_v43 = vpop.f32.mrb[2].mxu1 }
 0x1fc   : > { %v2955_v44 = vmul.f32 %v6480_v38, %v6480_v38  ;;  %v6492_v45 = vadd.f32 %v2538_v42, %v6472_v34  ;;  %v2540_v46 = vpop.f32.mrb[3].mxu0  ;;  %v6494_v47 = vpop.f32.mrb[3].mxu1  ;;  %v6597_v42 = vadd.f32 %v6477_v37, %v6579_v26 }
 0x1fd   : > { %v3178_v48 = vmul.f32 %v6485_v41, %v6485_v41  ;;  %v6499_v49 = vadd.f32 %v2540_v46, %v6475_v35 }
 0x1fe   : > { %v2956_v50 = vmul.f32 %v6492_v45, %v6492_v45  ;;  %4417 = vmatprep.mubr.f32.mxu0 %v2955_v44 }
 0x1ff   : > { %v3179_v51 = vmul.f32 %v6499_v49, %v6499_v49  ;;  %4461 = vmatprep.mubr.f32.mxu1 %v3178_v48 }
 0x200   : > { %4418 = vmatmul.mubr.f32.vlgmr.msra.gmra.mrb[16].mxu0 %v2956_v50  ;;  %v6606_v50 = vadd.f32 %v6482_v40, %v6583_v27  ;;  %v3395_v40 = vmul.f32 %v6597_v42, %v6597_v42 }
 0x201   : > { %4628 = vmatpush3.bf16.msra.mxu0 %v6366_v2  ;;  %v2544_v52 = vpop.f32.mrb[4].mxu0  ;;  %v6506_v53 = vpop.f32.mrb[4].mxu1  ;;  %4462 = vmatmul.mubr.f32.vlgmr.msra.gmra.mrb[16].mxu1 %v3179_v51 }
 0x202   : > { %v6509_v54 = vadd.f32 %v2544_v52, %v6472_v34  ;;  %4660 = vmatpush3.bf16.msra.mxu1 %v6366_v2  ;;  %v2546_v55 = vpop.f32.mrb[5].mxu0  ;;  %v6512_v56 = vpop.f32.mrb[5].mxu1  ;;  %4630 = vmatprep.subr.bf16.mxu0 %v6377_v7 }
 0x203   : > { %v6516_v57 = vadd.f32 %v2546_v55, %v6475_v35  ;;  %v2548_v58 = vpop.f32.mrb[6].mxu0  ;;  %v6518_v59 = vpop.f32.mrb[6].mxu1  ;;  %4662 = vmatprep.subr.bf16.mxu1 %v6377_v7  ;;  %v6633_v55 = vadd.f32 %v6494_v47, %v6583_v27 }
 0x204   : > { %v2957_v60 = vmul.f32 %v6509_v54, %v6509_v54  ;;  %v6524_v61 = vadd.f32 %v2548_v58, %v6472_v34  ;;  %v2550_v62 = vpop.f32.mrb[7].mxu0  ;;  %v6526_v63 = vpop.f32.mrb[7].mxu1  ;;  %v6637_v58 = vadd.f32 %v6506_v53, %v6579_v26 }
 0x205   : > { %v3180_v0 = vmul.f32 %v6516_v57, %v6516_v57  ;;  %v6531_v1 = vadd.f32 %v2550_v62, %v6475_v35  ;;  %4632 = vmatpush3.bf16.msra.mxu0 %v6377_v7  ;;  %v3613_v47 = vmul.f32 %v6633_v55, %v6633_v55 }
 0x206   : > { %v2958_v2 = vmul.f32 %v6524_v61, %v6524_v61  ;;  %4664 = vmatpush3.bf16.msra.mxu1 %v6377_v7  ;;  %4420 = vmatprep.mubr.f32.mxu0 %v2957_v60  ;;  %v6642_v60 = vadd.f32 %v6512_v56, %v6583_v27  ;;  %v3397_v53 = vmul.f32 %v6637_v58, %v6637_v58 }
 0x207   : > { %v3181_v3 = vmul.f32 %v6531_v1, %v6531_v1  ;;  %4464 = vmatprep.mubr.f32.mxu1 %v3180_v0  ;;  %4634 = vmatprep.subr.bf16.mxu0 %v6389_v10  ;;  %v6659_v56 = vadd.f32 %v6526_v63, %v6583_v27 }
 0x208   : > { %4421 = vmatmul.mubr.f32.gmra.mrb[18].mxu0 %v2958_v2  ;;  %4666 = vmatprep.subr.bf16.mxu1 %v6389_v10 }
 0x209   : > { %4636 = vmatpush3.bf16.msra.mxu0 %v6389_v10  ;;  %v2554_v4 = vpop.f32.mrb[8].mxu0  ;;  %v6542_v5 = vpop.f32.mrb[8].mxu1  ;;  %4465 = vmatmul.mubr.f32.gmra.mrb[18].mxu1 %v3181_v3  ;;  %v3615_v2 = vmul.f32 %v6659_v56, %v6659_v56 }
 0x20a   : > { %v6545_v6 = vadd.f32 %v2554_v4, %v6472_v34  ;;  %4668 = vmatpush3.bf16.msra.mxu1 %v6389_v10  ;;  %v2556_v7 = vpop.f32.mrb[9].mxu0  ;;  %v6548_v8 = vpop.f32.mrb[9].mxu1  ;;  %4638 = vmatprep.subr.bf16.mxu0 %v6402_v14  ;;  %v6663_v62 = vadd.f32 %v6542_v5, %v6579_v26 }
 0x20b   : > { %v6552_v9 = vadd.f32 %v2556_v7, %v6475_v35  ;;  %v2558_v11 = vpop.f32.mrb[10].mxu0  ;;  %v6554_v12 = vpop.f32.mrb[10].mxu1  ;;  %4670 = vmatprep.subr.bf16.mxu1 %v6402_v14 }
 0x20c   : > { %v2959_v15 = vmul.f32 %v6545_v6, %v6545_v6  ;;  %v6561_v10 = vadd.f32 %v2558_v11, %v6472_v34  ;;  %v2560_v16 = vpop.f32.mrb[11].mxu0  ;;  %v6563_v18 = vpop.f32.mrb[11].mxu1  ;;  %v6675_v63 = vadd.f32 %v6554_v12, %v6579_v26  ;;  %v3399_v3 = vmul.f32 %v6663_v62, %v6663_v62 }
 0x20d   : > { %v3182_v20 = vmul.f32 %v6552_v9, %v6552_v9  ;;  %v6569_v22 = vadd.f32 %v2560_v16, %v6475_v35  ;;  %4640 = vmatpush3.bf16.msra.mxu0 %v6402_v14  ;;  %v6683_v4 = vadd.f32 %v6563_v18, %v6583_v27 }
 0x20e   : > { %v2960_v23 = vmul.f32 %v6561_v10, %v6561_v10  ;;  %4672 = vmatpush3.bf16.msra.mxu1 %v6402_v14  ;;  %4423 = vmatprep.mubr.f32.mxu0 %v2959_v15  ;;  %v3400_v11 = vmul.f32 %v6675_v63, %v6675_v63 }
 0x20f   : > { %v3183_v25 = vmul.f32 %v6569_v22, %v6569_v22  ;;  %4467 = vmatprep.mubr.f32.mxu1 %v3182_v20  ;;  %4642 = vmatprep.subr.bf16.mxu0 %v6414_v17  ;;  %v3617_v13 = vmul.f32 %v6683_v4, %v6683_v4 }
 0x210   : > { %4424 = vmatmul.mubr.f32.gmra.mrb[20].mxu0 %v2960_v23  ;;  %4674 = vmatprep.subr.bf16.mxu1 %v6414_v17  ;;  %v6714_v23 = vld [vmem:[%s7154_s4] ss:$0 sm:$0xff] }
 0x211   : > { %4644 = vmatpush3.bf16.msra.mxu0 %v6414_v17  ;;  %v2564_v29 = vpop.f32.mrb[12].mxu0  ;;  %v2929_v14 = vpop.f32.mrb[12].mxu1  ;;  %4468 = vmatmul.mubr.f32.gmra.mrb[20].mxu1 %v3183_v25 }
 0x212   : > { %v6587_v30 = vadd.f32 %v2564_v29, %v6472_v34  ;;  %4676 = vmatpush3.bf16.msra.mxu1 %v6414_v17  ;;  %v2566_v31 = vpop.f32.mrb[13].mxu0  ;;  %v2931_v33 = vpop.f32.mrb[13].mxu1  ;;  %4646 = vmatprep.subr.bf16.mxu0 %v6427_v21  ;;  %v6686_v5 = vadd.f32 %v2929_v14, %v6579_v26 }
 0x213   : > { %v6592_v36 = vadd.f32 %v2566_v31, %v6475_v35  ;;  %v2568_v39 = vpop.f32.mrb[14].mxu0  ;;  %v2933_v32 = vpop.f32.mrb[14].mxu1  ;;  %4678 = vmatprep.subr.bf16.mxu1 %v6427_v21 }
 0x214   : > { %v2961_v44 = vmul.f32 %v6587_v30, %v6587_v30  ;;  %v6602_v17 = vadd.f32 %v2568_v39, %v6472_v34  ;;  %v2570_v46 = vpop.f32.mrb[15].mxu0  ;;  %v2935_v48 = vpop.f32.mrb[15].mxu1  ;;  %v6696_v12 = vadd.f32 %v2933_v32, %v6579_v26  ;;  %v3401_v15 = vmul.f32 %v6686_v5, %v6686_v5 }
 0x215   : > { %v3184_v51 = vmul.f32 %v6592_v36, %v6592_v36  ;;  %v6611_v52 = vadd.f32 %v2570_v46, %v6475_v35  ;;  %4648 = vmatpush3.bf16.msra.mxu0 %v6427_v21  ;;  %v3612_v35 = vmul.f32 %v6606_v50, %v6606_v50  ;;  %v6703_v16 = vadd.f32 %v2935_v48, %v6583_v27 }
 0x216   : > { %v2962_v37 = vmul.f32 %v6602_v17, %v6602_v17  ;;  %4680 = vmatpush3.bf16.msra.mxu1 %v6427_v21  ;;  %4426 = vmatprep.mubr.f32.mxu0 %v2961_v44  ;;  %v6628_v21 = vadd.f32 %v6487_v43, %v6579_v26  ;;  %v6650_v43 = vadd.f32 %v6518_v59, %v6579_v26 }
 0x217   : > { %v3185_v34 = vmul.f32 %v6611_v52, %v6611_v52  ;;  %4470 = vmatprep.mubr.f32.mxu1 %v3184_v51  ;;  %4650 = vmatprep.subr.bf16.mxu0 %v6439_v24  ;;  %v3614_v59 = vmul.f32 %v6642_v60, %v6642_v60  ;;  %v3402_v19 = vmul.f32 %v6696_v12, %v6696_v12 }
 0x218   : > { %4427 = vmatmul.mubr.f32.gmra.mrb[22].mxu0 %v2962_v37  ;;  %4682 = vmatprep.subr.bf16.mxu1 %v6439_v24  ;;  %v3398_v0 = vmul.f32 %v6650_v43, %v6650_v43  ;;  %v3619_v20 = vmul.f32 %v6703_v16, %v6703_v16 }
 0x219   : > { %4652 = vmatpush3.bf16.msra.mxu0 %v6439_v24  ;;  %4471 = vmatmul.mubr.f32.gmra.mrb[22].mxu1 %v3185_v34 }
 0x21a   : > { %4505 = vmatprep.mubr.f32.mxu0 %v3395_v40  ;;  %4684 = vmatpush3.bf16.msra.mxu1 %v6439_v24  ;;  %v3396_v24 = vmul.f32 %v6628_v21, %v6628_v21 }
 0x21b   : > { %4549 = vmatprep.mubr.f32.mxu1 %v3612_v35  ;;  %4654 = vmatprep.subr.bf16.mxu0 %v6454_v28 }
 0x21c   : > { %4686 = vmatprep.subr.bf16.mxu1 %v6454_v28 }
 0x21d   : > { %4656 = vmatpush3.bf16.msra.mxu0 %v6454_v28 }
 0x21e   : > { %4688 = vmatpush3.bf16.msra.mxu1 %v6454_v28  ;;  %v6669_v28 = vadd.f32 %v6548_v8, %v6583_v27  ;;  %v6691_v8 = vadd.f32 %v2931_v33, %v6583_v27 }
 0x220   : > { %4506 = vmatmul.mubr.f32.vlgmr.msra.gmra.mrb[24].mxu0 %v3396_v24  ;;  %v3616_v7 = vmul.f32 %v6669_v28, %v6669_v28  ;;  %v3618_v18 = vmul.f32 %v6691_v8, %v6691_v8 }
 0x221   : > { %4508 = vmatprep.mubr.f32.mxu0 %v3397_v53  ;;  %4550 = vmatmul.mubr.f32.vlgmr.msra.gmra.mrb[24].mxu1 %v3613_v47 }
 0x222   : > { %4552 = vmatprep.mubr.f32.mxu1 %v3614_v59 }
 0x224   : > { %4509 = vmatmul.mubr.f32.gmra.mrb[26].mxu0 %v3398_v0 }
 0x225   : > { %4511 = vmatprep.mubr.f32.mxu0 %v3399_v3  ;;  %4553 = vmatmul.mubr.f32.gmra.mrb[26].mxu1 %v3615_v2 }
 0x226   : > { %4555 = vmatprep.mubr.f32.mxu1 %v3616_v7 }
 0x228   : > { %4512 = vmatmul.mubr.f32.gmra.mrb[28].mxu0 %v3400_v11 }
 0x229   : > { %4514 = vmatprep.mubr.f32.mxu0 %v3401_v15  ;;  %4556 = vmatmul.mubr.f32.gmra.mrb[28].mxu1 %v3617_v13 }
 0x22a   : > { %4558 = vmatprep.mubr.f32.mxu1 %v3618_v18 }
 0x22c   : > { %4515 = vmatmul.mubr.f32.gmra.mrb[30].mxu0 %v3402_v19 }
 0x22d   : > { %4559 = vmatmul.mubr.f32.gmra.mrb[30].mxu1 %v3619_v20 }
 0x2d3   : > { %v4419_v25 = vpop.f32.mrb[16].mxu0 }
 0x2d4   : > { %v3041_v26 = vadd.f32 %v4419_v25, %v6714_v23  ;;  %v3035_v27 = vpop.f32.mrb[17].mxu0  ;;  %v4463_v29 = vpop.f32.mrb[16].mxu1 }
 0x2d5   : > { %v3036_v14 = vadd.f32 %v6714_v23, %v3035_v27  ;;  %v3258_v31 = vadd.f32 %v4463_v29, %v6714_v23  ;;  %v3252_v33 = vpop.f32.mrb[17].mxu1 }
 0x2d6   : > { %5343 = vrsqrt.f32 %v3041_v26  ;;  %v6720_v39 = vadd.f32 %v6714_v23, %v3252_v33  ;;  %vm3083_vm0 = vcmp.eq.f32.partialorder %v3041_v26, inf  ;;  %vm3085_vm1 = vcmp.eq.f32.partialorder %v3041_v26, 0.0 }
 0x2d7   : > { %5345 = vrsqrt.f32 %v3036_v14  ;;  %v3086_v40 = vand.u32 2147483648, %v3041_v26  ;;  %vm3076_vm2 = vcmp.eq.f32.partialorder %v3036_v14, inf  ;;  %vm3078_vm3 = vcmp.eq.f32.partialorder %v3036_v14, 0.0 }
 0x2d8   : > { %5347 = vrsqrt.f32 %v3258_v31  ;;  %v3079_v24 = vand.u32 2147483648, %v3036_v14  ;;  %vm3300_vm4 = vcmp.eq.f32.partialorder %v3258_v31, inf  ;;  %vm3302_vm5 = vcmp.eq.f32.partialorder %v3258_v31, 0.0 }
 0x2d9   : > { %5349 = vrsqrt.f32 %v6720_v39  ;;  %v3303_v59 = vand.u32 2147483648, %v3258_v31  ;;  %vm3293_vm6 = vcmp.eq.f32.partialorder %v6720_v39, inf  ;;  %vm3295_vm7 = vcmp.eq.f32.partialorder %v6720_v39, 0.0 }
 0x2da   : > { %v3296_v7 = vand.u32 2147483648, %v6720_v39 }
 0x2db   : > { %v4422_v32 = vpop.f32.mrb[18].mxu0 }
 0x2dc   : > { %v6724_v44 = vadd.f32 %v4422_v32, %v6714_v23  ;;  %v3045_v46 = vpop.f32.mrb[19].mxu0  ;;  %v4466_v48 = vpop.f32.mrb[18].mxu1 }
 0x2dd   : > { %v6727_v51 = vadd.f32 %v6714_v23, %v3045_v46  ;;  %v6730_v37 = vadd.f32 %v4466_v48, %v6714_v23  ;;  %v3262_v34 = vpop.f32.mrb[19].mxu1 }
 0x2de   : > { %5351 = vrsqrt.f32 %v6724_v44  ;;  %v6736_v0 = vadd.f32 %v6714_v23, %v3262_v34  ;;  %vm3097_vm8 = vcmp.eq.f32.partialorder %v6724_v44, inf  ;;  %vm3099_vm9 = vcmp.eq.f32.partialorder %v6724_v44, 0.0 }
 0x2df   : > { %5353 = vrsqrt.f32 %v6727_v51  ;;  %v3100_v20 = vand.u32 2147483648, %v6724_v44  ;;  %vm3090_vm10 = vcmp.eq.f32.partialorder %v6727_v51, inf  ;;  %vm3092_vm11 = vcmp.eq.f32.partialorder %v6727_v51, 0.0 }
 0x2e0   : > { %v5344_v35 = vpop.eup %5343  ;;  %5355 = vrsqrt.f32 %v6730_v37  ;;  %vm3314_vm12 = vcmp.eq.f32.partialorder %v6730_v37, inf  ;;  %vm3316_vm13 = vcmp.eq.f32.partialorder %v6730_v37, 0.0  ;;  %vm3307_vm14 = vcmp.eq.f32.partialorder %v6736_v0, inf }
 0x2e1   : > { %v5346_v47 = vpop.eup %5345  ;;  %v3082_v53 = vmul.f32 %v5344_v35, %v3041_v26  ;;  %5357 = vrsqrt.f32 %v6736_v0  ;;  %vm3309_vm15 = vcmp.eq.f32.partialorder %v6736_v0, 0.0 }
 0x2e2   : > { %v5348_v2 = vpop.eup %5347  ;;  %v3075_v3 = vmul.f32 %v5346_v47, %v3036_v14 }
 0x2e3   : > { %v3084_v11 = vsel %vm3083_vm0, %v3041_v26, %v3082_v53  ;;  %v3299_v13 = vmul.f32 %v5348_v2, %v3258_v31  ;;  %v4425_v15 = vpop.f32.mrb[20].mxu0  ;;  %v5350_v29 = vpop.eup %5349 }
 0x2e4   : > { %v3087_v18 = vsel %vm3085_vm1, %v3086_v40, %v3084_v11  ;;  %v3077_v19 = vsel %vm3076_vm2, %v3036_v14, %v3075_v3  ;;  %v3055_v25 = vpop.f32.mrb[21].mxu0  ;;  %v4469_v27 = vpop.f32.mrb[20].mxu1  ;;  %v6753_v48 = vadd.f32 %v4425_v15, %v6714_v23 }
 0x2e5   : > { %v3131_v33 = vmul.f32 %v6492_v45, %v3087_v18  ;;  %v3080_v32 = vsel %vm3078_vm3, %v3079_v24, %v3077_v19  ;;  %v3301_v46 = vsel %vm3300_vm4, %v3258_v31, %v3299_v13  ;;  %v3272_v26 = vpop.f32.mrb[21].mxu1  ;;  %v3292_v45 = vmul.f32 %v5350_v29, %v6720_v39 }
 0x2e6   : > { %v3130_v34 = vmul.f32 %v6480_v38, %v3080_v32  ;;  %v3304_v40 = vsel %vm3302_vm5, %v3303_v59, %v3301_v46  ;;  %v6764_v14 = vadd.f32 %v6714_v23, %v3055_v25  ;;  %5359 = vrsqrt.f32 %v6753_v48 }
 0x2e7   : > { %v4258_v35 = vpack.c.bf16 %v3131_v33, %v3131_v33  ;;  %v3348_v24 = vmul.f32 %v6499_v49, %v3304_v40  ;;  %v3294_v38 = vsel %vm3293_vm6, %v6720_v39, %v3292_v45  ;;  %v3093_v31 = vand.u32 2147483648, %v6727_v51 }
 0x2e8   : > { %v5352_v47 = vpop.eup %5351  ;;  %v4257_v53 = vpack.c.bf16 %v3130_v34, %v3130_v34  ;;  %v3297_v49 = vsel %vm3295_vm7, %v3296_v7, %v3294_v38  ;;  %5361 = vrsqrt.f32 %v6764_v14  ;;  %v3317_v18 = vand.u32 2147483648, %v6730_v37 }
 0x2e9   : > { %v5354_v59 = vpop.eup %5353  ;;  %3171 = vst [vmem:[%s6758_s15 + $0x10] sm:$0xf] %v4258_v35  ;;  %v4266_v2 = vpack.c.bf16 %v3348_v24, %v3348_v24  ;;  %v3096_v3 = vmul.f32 %v5352_v47, %v6724_v44  ;;  %v3347_v13 = vmul.f32 %v6485_v41, %v3297_v49  ;;  %v6791_v19 = vadd.f32 %v4469_v27, %v6714_v23 }
 0x2ea   : > { %v5356_v11 = vpop.eup %5355  ;;  %3170 = vst [vmem:[%s6758_s15] sm:$0xf] %v4257_v53  ;;  %v3089_v15 = vmul.f32 %v5354_v59, %v6727_v51  ;;  %v6799_v32 = vadd.f32 %v6714_v23, %v3272_v26  ;;  %v3310_v47 = vand.u32 2147483648, %v6736_v0  ;;  %vm3111_vm0 = vcmp.eq.f32.partialorder %v6753_v48, inf }
 0x2eb   : > { %3388 = vst [vmem:[%s6758_s15 + $0x14] sm:$0xf] %v4266_v2  ;;  %v3098_v39 = vsel %vm3097_vm8, %v6724_v44, %v3096_v3  ;;  %v3313_v7 = vmul.f32 %v5356_v11, %v6730_v37  ;;  %v4428_v41 = vpop.f32.mrb[22].mxu0  ;;  %v4265_v25 = vpack.c.bf16 %v3347_v13, %v3347_v13  ;;  %v5358_v40 = vpop.eup %5357  ;;  %5363 = vrsqrt.f32 %v6791_v19 }
 0x2ec   : > { %v3101_v29 = vsel %vm3099_vm9, %v3100_v20, %v3098_v39  ;;  %v3091_v33 = vsel %vm3090_vm10, %v6727_v51, %v3089_v15  ;;  %v3065_v46 = vpop.f32.mrb[23].mxu0  ;;  %v4472_v34 = vpop.f32.mrb[22].mxu1  ;;  %5365 = vrsqrt.f32 %v6799_v32  ;;  %v6825_v2 = vadd.f32 %v4428_v41, %v6714_v23 }
 0x2ed   : > { %v3133_v45 = vmul.f32 %v6524_v61, %v3101_v29  ;;  %v3094_v27 = vsel %vm3092_vm11, %v3093_v31, %v3091_v33  ;;  %v3315_v44 = vsel %vm3314_vm12, %v6730_v37, %v3313_v7  ;;  %v3282_v20 = vpop.f32.mrb[23].mxu1  ;;  %3387 = vst [vmem:[%s6758_s15 + $0x4] sm:$0xf] %v4265_v25  ;;  %v3306_v61 = vmul.f32 %v5358_v40, %v6736_v0 }
 0x2ee   : > { %v3132_v26 = vmul.f32 %v6509_v54, %v3094_v27  ;;  %v3318_v35 = vsel %vm3316_vm13, %v3317_v18, %v3315_v44  ;;  %v6828_v49 = vadd.f32 %v6714_v23, %v3065_v46  ;;  %vm3113_vm1 = vcmp.eq.f32.partialorder %v6753_v48, 0.0 }
 0x2ef   : > { %v4260_v24 = vpack.c.bf16 %v3133_v45, %v3133_v45  ;;  %v3350_v51 = vmul.f32 %v6531_v1, %v3318_v35  ;;  %v3308_v38 = vsel %vm3307_vm14, %v6736_v0, %v3306_v61  ;;  %v3114_v3 = vand.u32 2147483648, %v6753_v48 }
 0x2f0   : > { %v4259_v53 = vpack.c.bf16 %v3132_v26, %v3132_v26  ;;  %v5360_v54 = vpop.eup %5359  ;;  %v3311_v31 = vsel %vm3309_vm15, %v3310_v47, %v3308_v38  ;;  %vm3104_vm2 = vcmp.eq.f32.partialorder %v6764_v14, inf  ;;  %v6835_v11 = vadd.f32 %v4472_v34, %v6714_v23 }
 0x2f1   : > { %3173 = vst [vmem:[%s6758_s15 + $0x30] sm:$0xf] %v4260_v24  ;;  %v4268_v37 = vpack.c.bf16 %v3350_v51, %v3350_v51  ;;  %v3349_v1 = vmul.f32 %v6516_v57, %v3311_v31  ;;  %v3110_v59 = vmul.f32 %v5360_v54, %v6753_v48  ;;  %5367 = vrsqrt.f32 %v6825_v2 }
 0x2f2   : > { %3172 = vst [vmem:[%s6758_s15 + $0x20] sm:$0xf] %v4259_v53  ;;  %v5362_v0 = vpop.eup %5361  ;;  %vm3106_vm3 = vcmp.eq.f32.partialorder %v6764_v14, 0.0  ;;  %v3107_v25 = vand.u32 2147483648, %v6764_v14  ;;  %v6843_v29 = vadd.f32 %v6714_v23, %v3282_v20  ;;  %vm3328_vm4 = vcmp.eq.f32.partialorder %v6791_v19, inf }
 0x2f3   : > { %3390 = vst [vmem:[%s6758_s15 + $0x34] sm:$0xf] %v4268_v37  ;;  %v4507_v57 = vpop.f32.mrb[24].mxu0  ;;  %v4267_v13 = vpack.c.bf16 %v3349_v1, %v3349_v1  ;;  %v3112_v15 = vsel %vm3111_vm0, %v6753_v48, %v3110_v59  ;;  %v3103_v39 = vmul.f32 %v5362_v0, %v6764_v14  ;;  %5369 = vrsqrt.f32 %v6828_v49 }
 0x2f4   : > { %v3469_v7 = vpop.f32.mrb[25].mxu0  ;;  %v4551_v18 = vpop.f32.mrb[24].mxu1  ;;  %v3115_v41 = vsel %vm3113_vm1, %v3114_v3, %v3112_v15  ;;  %vm3330_vm5 = vcmp.eq.f32.partialorder %v6791_v19, 0.0  ;;  %v3331_v45 = vand.u32 2147483648, %v6791_v19  ;;  %5371 = vrsqrt.f32 %v6835_v11 }
 0x2f5   : > { %v3686_v33 = vpop.f32.mrb[25].mxu1  ;;  %3389 = vst [vmem:[%s6758_s15 + $0x24] sm:$0xf] %v4267_v13  ;;  %v3135_v46 = vmul.f32 %v6561_v10, %v3115_v41  ;;  %v3105_v48 = vsel %vm3104_vm2, %v6764_v14, %v3103_v39  ;;  %v5364_v34 = vpop.eup %5363  ;;  %vm3321_vm6 = vcmp.eq.f32.partialorder %v6799_v32, inf  ;;  %vm3323_vm7 = vcmp.eq.f32.partialorder %v6799_v32, 0.0 }
 0x2f6   : > { %v3108_v40 = vsel %vm3106_vm3, %v3107_v25, %v3105_v48  ;;  %v3327_v20 = vmul.f32 %v5364_v34, %v6791_v19  ;;  %v3324_v35 = vand.u32 2147483648, %v6799_v32  ;;  %vm3125_vm8 = vcmp.eq.f32.partialorder %v6825_v2, inf }
 0x2f7   : > { %v4510_v27 = vpop.f32.mrb[26].mxu0  ;;  %v4262_v44 = vpack.c.bf16 %v3135_v46, %v3135_v46  ;;  %v3134_v10 = vmul.f32 %v6545_v6, %v3108_v40  ;;  %5373 = vrsqrt.f32 %v6843_v29  ;;  %v5366_v6 = vpop.eup %5365  ;;  %vm3127_vm9 = vcmp.eq.f32.partialorder %v6825_v2, 0.0 }
 0x2f8   : > { %v6858_v14 = vpop.f32.mrb[27].mxu0  ;;  %v6860_v26 = vpop.f32.mrb[26].mxu1  ;;  %v3329_v51 = vsel %vm3328_vm4, %v6791_v19, %v3327_v20  ;;  %v3128_v47 = vand.u32 2147483648, %v6825_v2  ;;  %v3320_v38 = vmul.f32 %v5366_v6, %v6799_v32  ;;  %v6878_v54 = vadd.f32 %v4507_v57, %v6714_v23 }
 0x2f9   : > { %v6866_v61 = vpop.f32.mrb[27].mxu1  ;;  %3175 = vst [vmem:[%s6758_s15 + $0x50] sm:$0xf] %v4262_v44  ;;  %v4261_v24 = vpack.c.bf16 %v3134_v10, %v3134_v10  ;;  %v3332_v53 = vsel %vm3330_vm5, %v3331_v45, %v3329_v51  ;;  %v6881_v37 = vadd.f32 %v6714_v23, %v3469_v7  ;;  %vm3118_vm10 = vcmp.eq.f32.partialorder %v6828_v49, inf }
 0x2fa   : > { %v3352_v1 = vmul.f32 %v6569_v22, %v3332_v53  ;;  %vm3120_vm11 = vcmp.eq.f32.partialorder %v6828_v49, 0.0  ;;  %v6890_v19 = vadd.f32 %v4551_v18, %v6714_v23  ;;  %v3322_v3 = vsel %vm3321_vm6, %v6799_v32, %v3320_v38 }
 0x2fb   : > { %v6883_v31 = vpop.f32.mrb[28].mxu0  ;;  %3174 = vst [vmem:[%s6758_s15 + $0x40] sm:$0xf] %v4261_v24  ;;  %v3121_v57 = vand.u32 2147483648, %v6828_v49  ;;  %vm3342_vm12 = vcmp.eq.f32.partialorder %v6835_v11, inf  ;;  %5375 = vrsqrt.f32 %v6878_v54  ;;  %v5368_v13 = vpop.eup %5367  ;;  %v3325_v39 = vsel %vm3323_vm7, %v3324_v35, %v3322_v3 }
 0x2fc   : > { %v6892_v59 = vpop.f32.mrb[29].mxu0  ;;  %v6894_v0 = vpop.f32.mrb[28].mxu1  ;;  %v4270_v15 = vpack.c.bf16 %v3352_v1, %v3352_v1  ;;  %5377 = vrsqrt.f32 %v6881_v37  ;;  %v6908_v7 = vadd.f32 %v6714_v23, %v3686_v33  ;;  %v3351_v18 = vmul.f32 %v6552_v9, %v3325_v39 }
 0x2fd   : > { %v6902_v22 = vpop.f32.mrb[29].mxu1  ;;  %v3124_v41 = vmul.f32 %v5368_v13, %v6825_v2  ;;  %vm3344_vm13 = vcmp.eq.f32.partialorder %v6835_v11, 0.0  ;;  %v3345_v25 = vand.u32 2147483648, %v6835_v11  ;;  %v5370_v48 = vpop.eup %5369  ;;  %vm3335_vm14 = vcmp.eq.f32.partialorder %v6843_v29, inf }
 0x2fe   : > { %3392 = vst [vmem:[%s6758_s15 + $0x54] sm:$0xf] %v4270_v15  ;;  %vm3337_vm15 = vcmp.eq.f32.partialorder %v6843_v29, 0.0  ;;  %5379 = vrsqrt.f32 %v6890_v19  ;;  %v6921_v32 = vadd.f32 %v4510_v27, %v6714_v23  ;;  %v5372_v34 = vpop.eup %5371  ;;  %v4269_v40 = vpack.c.bf16 %v3351_v18, %v3351_v18 }
 0x2ff   : > { %v6914_v46 = vpop.f32.mrb[30].mxu0  ;;  %v3126_v45 = vsel %vm3125_vm8, %v6825_v2, %v3124_v41  ;;  %v3117_v44 = vmul.f32 %v5370_v48, %v6828_v49  ;;  %v3338_v10 = vand.u32 2147483648, %v6843_v29  ;;  %v3341_v35 = vmul.f32 %v5372_v34, %v6835_v11 }
 0x300   : > { %v6923_v9 = vpop.f32.mrb[31].mxu0  ;;  %v6925_v33 = vpop.f32.mrb[30].mxu1  ;;  %v3129_v27 = vsel %vm3127_vm9, %v3128_v47, %v3126_v45  ;;  %vm3517_vm0 = vcmp.eq.f32.partialorder %v6878_v54, inf  ;;  %5381 = vrsqrt.f32 %v6908_v7  ;;  %3391 = vst [vmem:[%s6758_s15 + $0x44] sm:$0xf] %v4269_v40  ;;  %vm3519_vm1 = vcmp.eq.f32.partialorder %v6878_v54, 0.0 }
 0x301   : > { %v6932_v20 = vpop.f32.mrb[31].mxu1  ;;  %v5374_v6 = vpop.eup %5373  ;;  %v3137_v24 = vmul.f32 %v6602_v17, %v3129_v27  ;;  %v3119_v51 = vsel %vm3118_vm10, %v6828_v49, %v3117_v44  ;;  %v3520_v2 = vand.u32 2147483648, %v6878_v54  ;;  %v3343_v53 = vsel %vm3342_vm12, %v6835_v11, %v3341_v35 }
 0x302   : > { %v3122_v47 = vsel %vm3120_vm11, %v3121_v57, %v3119_v51  ;;  %v3334_v38 = vmul.f32 %v5374_v6, %v6843_v29  ;;  %5383 = vrsqrt.f32 %v6921_v32  ;;  %v3346_v3 = vsel %vm3344_vm13, %v3345_v25, %v3343_v53 }
 0x303   : > { %v4264_v17 = vpack.c.bf16 %v3137_v24, %v3137_v24  ;;  %v3136_v1 = vmul.f32 %v6587_v30, %v3122_v47  ;;  %vm3510_vm2 = vcmp.eq.f32.partialorder %v6881_v37, inf  ;;  %v3354_v49 = vmul.f32 %v6611_v52, %v3346_v3 }
 0x304   : > { %v3336_v57 = vsel %vm3335_vm14, %v6843_v29, %v3334_v38  ;;  %vm3512_vm3 = vcmp.eq.f32.partialorder %v6881_v37, 0.0  ;;  %v3513_v13 = vand.u32 2147483648, %v6881_v37  ;;  %v6968_v39 = vadd.f32 %v6714_v23, %v6858_v14 }
 0x305   : > { %v5376_v15 = vpop.eup %5375  ;;  %3177 = vst [vmem:[%s6758_s15 + $0x70] sm:$0xf] %v4264_v17  ;;  %v4263_v30 = vpack.c.bf16 %v3136_v1, %v3136_v1  ;;  %v3339_v11 = vsel %vm3337_vm15, %v3338_v10, %v3336_v57  ;;  %v6972_v52 = vadd.f32 %v6860_v26, %v6714_v23  ;;  %v4272_v41 = vpack.c.bf16 %v3354_v49, %v3354_v49 }
 0x306   : > { %v5378_v18 = vpop.eup %5377  ;;  %v3353_v25 = vmul.f32 %v6592_v36, %v3339_v11  ;;  %v3516_v48 = vmul.f32 %v5376_v15, %v6878_v54  ;;  %vm3734_vm4 = vcmp.eq.f32.partialorder %v6890_v19, inf  ;;  %vm3736_vm5 = vcmp.eq.f32.partialorder %v6890_v19, 0.0 }
 0x307   : > { %3176 = vst [vmem:[%s6758_s15 + $0x60] sm:$0xf] %v4263_v30  ;;  %v3509_v29 = vmul.f32 %v5378_v18, %v6881_v37  ;;  %5385 = vrsqrt.f32 %v6968_v39  ;;  %v6983_v14 = vadd.f32 %v6714_v23, %v6866_v61  ;;  %3394 = vst [vmem:[%s6758_s15 + $0x74] sm:$0xf] %v4272_v41  ;;  %v3737_v40 = vand.u32 2147483648, %v6890_v19 }
 0x308   : > { %v5380_v26 = vpop.eup %5379  ;;  %v4271_v34 = vpack.c.bf16 %v3353_v25, %v3353_v25  ;;  %v3518_v36 = vsel %vm3517_vm0, %v6878_v54, %v3516_v48  ;;  %5387 = vrsqrt.f32 %v6972_v52  ;;  %vm3727_vm6 = vcmp.eq.f32.partialorder %v6908_v7, inf }
 0x309   : > { %v3521_v45 = vsel %vm3519_vm1, %v3520_v2, %v3518_v36  ;;  %v3511_v44 = vsel %vm3510_vm2, %v6881_v37, %v3509_v29  ;;  %v3733_v61 = vmul.f32 %v5380_v26, %v6890_v19  ;;  %vm3729_vm7 = vcmp.eq.f32.partialorder %v6908_v7, 0.0 }
 0x30a   : > { %v5382_v10 = vpop.eup %5381  ;;  %3393 = vst [vmem:[%s6758_s15 + $0x64] sm:$0xf] %v4271_v34  ;;  %v3565_v27 = vmul.f32 %v6628_v21, %v3521_v45  ;;  %v3514_v35 = vsel %vm3512_vm3, %v3513_v13, %v3511_v44  ;;  %v3730_v54 = vand.u32 2147483648, %v6908_v7  ;;  %5389 = vrsqrt.f32 %v6983_v14 }
 0x30b   : > { %v3564_v6 = vmul.f32 %v6597_v42, %v3514_v35  ;;  %v3735_v24 = vsel %vm3734_vm4, %v6890_v19, %v3733_v61  ;;  %v3726_v51 = vmul.f32 %v5382_v10, %v6908_v7  ;;  %vm3531_vm8 = vcmp.eq.f32.partialorder %v6921_v32, inf }
 0x30c   : > { %v5384_v21 = vpop.eup %5383  ;;  %v4274_v2 = vpack.c.bf16 %v3565_v27, %v3565_v27  ;;  %v3738_v37 = vsel %vm3736_vm5, %v3737_v40, %v3735_v24  ;;  %vm3533_vm9 = vcmp.eq.f32.partialorder %v6921_v32, 0.0  ;;  %v3534_v19 = vand.u32 2147483648, %v6921_v32 }
 0x30d   : > { %v4273_v47 = vpack.c.bf16 %v3564_v6, %v3564_v6  ;;  %v3782_v42 = vmul.f32 %v6633_v55, %v3738_v37  ;;  %v3728_v53 = vsel %vm3727_vm6, %v6908_v7, %v3726_v51  ;;  %v3530_v38 = vmul.f32 %v5384_v21, %v6921_v32 }
 0x30e   : > { %3605 = vst [vmem:[%s6758_s15 + $0x18] sm:$0xf] %v4274_v2  ;;  %v3731_v17 = vsel %vm3729_vm7, %v3730_v54, %v3728_v53  ;;  %v7025_v1 = vadd.f32 %v6883_v31, %v6714_v23  ;;  %v7029_v55 = vadd.f32 %v6714_v23, %v6892_v59  ;;  %v7036_v7 = vadd.f32 %v6894_v0, %v6714_v23 }
 0x30f   : > { %3604 = vst [vmem:[%s6758_s15 + $0x8] sm:$0xf] %v4273_v47  ;;  %v4282_v3 = vpack.c.bf16 %v3782_v42, %v3782_v42  ;;  %v3781_v49 = vmul.f32 %v6606_v50, %v3731_v17  ;;  %v3532_v57 = vsel %vm3531_vm8, %v6921_v32, %v3530_v38  ;;  %vm3524_vm10 = vcmp.eq.f32.partialorder %v6968_v39, inf }
 0x310   : > { %v3535_v13 = vsel %vm3533_vm9, %v3534_v19, %v3532_v57  ;;  %5391 = vrsqrt.f32 %v7025_v1  ;;  %vm3526_vm11 = vcmp.eq.f32.partialorder %v6968_v39, 0.0  ;;  %v3527_v0 = vand.u32 2147483648, %v6968_v39 }
 0x311   : > { %v5386_v31 = vpop.eup %5385  ;;  %3822 = vst [vmem:[%s6758_s15 + $0x1c] sm:$0xf] %v4282_v3  ;;  %v4281_v15 = vpack.c.bf16 %v3781_v49, %v3781_v49  ;;  %v3567_v59 = vmul.f32 %v6650_v43, %v3535_v13  ;;  %5393 = vrsqrt.f32 %v7029_v55  ;;  %vm3748_vm12 = vcmp.eq.f32.partialorder %v6972_v52, inf }
 0x312   : > { %v5388_v30 = vpop.eup %5387  ;;  %v3523_v50 = vmul.f32 %v5386_v31, %v6968_v39  ;;  %5395 = vrsqrt.f32 %v7036_v7  ;;  %vm3750_vm13 = vcmp.eq.f32.partialorder %v6972_v52, 0.0  ;;  %v3751_v18 = vand.u32 2147483648, %v6972_v52 }
 0x313   : > { %3821 = vst [vmem:[%s6758_s15 + $0xc] sm:$0xf] %v4281_v15  ;;  %v4276_v32 = vpack.c.bf16 %v3567_v59, %v3567_v59  ;;  %v3747_v11 = vmul.f32 %v5388_v30, %v6972_v52  ;;  %v7055_v41 = vadd.f32 %v6714_v23, %v6902_v22  ;;  %v7061_v26 = vadd.f32 %v6914_v46, %v6714_v23 }
 0x314   : > { %v3525_v43 = vsel %vm3524_vm10, %v6968_v39, %v3523_v50  ;;  %v5390_v25 = vpop.eup %5389  ;;  %v7065_v39 = vadd.f32 %v6714_v23, %v6923_v9  ;;  %vm3741_vm14 = vcmp.eq.f32.partialorder %v6983_v14, inf  ;;  %v3744_v46 = vand.u32 2147483648, %v6983_v14 }
 0x315   : > { %3607 = vst [vmem:[%s6758_s15 + $0x38] sm:$0xf] %v4276_v32  ;;  %v3528_v48 = vsel %vm3526_vm11, %v3527_v0, %v3525_v43  ;;  %v3749_v29 = vsel %vm3748_vm12, %v6972_v52, %v3747_v11  ;;  %v3740_v22 = vmul.f32 %v5390_v25, %v6983_v14  ;;  %5397 = vrsqrt.f32 %v7055_v41 }
 0x316   : > { %v3566_v34 = vmul.f32 %v6637_v58, %v3528_v48  ;;  %v3752_v36 = vsel %vm3750_vm13, %v3751_v18, %v3749_v29  ;;  %vm3743_vm15 = vcmp.eq.f32.partialorder %v6983_v14, 0.0  ;;  %5399 = vrsqrt.f32 %v7061_v26 }
 0x317   : > { %v3784_v40 = vmul.f32 %v6659_v56, %v3752_v36  ;;  %v3742_v45 = vsel %vm3741_vm14, %v6983_v14, %v3740_v22  ;;  %vm3545_vm0 = vcmp.eq.f32.partialorder %v7025_v1, inf  ;;  %5401 = vrsqrt.f32 %v7065_v39 }
 0x318   : > { %v4275_v52 = vpack.c.bf16 %v3566_v34, %v3566_v34  ;;  %v3745_v9 = vsel %vm3743_vm15, %v3744_v46, %v3742_v45  ;;  %vm3547_vm1 = vcmp.eq.f32.partialorder %v7025_v1, 0.0  ;;  %v7085_v14 = vadd.f32 %v6925_v33, %v6714_v23 }
 0x319   : > { %v4284_v58 = vpack.c.bf16 %v3784_v40, %v3784_v40  ;;  %v3783_v61 = vmul.f32 %v6642_v60, %v3745_v9  ;;  %v7089_v27 = vadd.f32 %v6714_v23, %v6932_v20  ;;  %v3548_v35 = vand.u32 2147483648, %v7025_v1 }
 0x31a   : > { %v5392_v44 = vpop.eup %5391  ;;  %3606 = vst [vmem:[%s6758_s15 + $0x28] sm:$0xf] %v4275_v52  ;;  %vm3538_vm2 = vcmp.eq.f32.partialorder %v7029_v55, inf  ;;  %vm3540_vm3 = vcmp.eq.f32.partialorder %v7029_v55, 0.0  ;;  %v3541_v51 = vand.u32 2147483648, %v7029_v55  ;;  %5403 = vrsqrt.f32 %v7085_v14 }
 0x31b   : > { %v5394_v56 = vpop.eup %5393  ;;  %3824 = vst [vmem:[%s6758_s15 + $0x3c] sm:$0xf] %v4284_v58  ;;  %v3544_v10 = vmul.f32 %v5392_v44, %v7025_v1  ;;  %v4283_v60 = vpack.c.bf16 %v3783_v61, %v3783_v61  ;;  %vm3762_vm4 = vcmp.eq.f32.partialorder %v7036_v7, inf  ;;  %v3765_v37 = vand.u32 2147483648, %v7036_v7 }
 0x31c   : > { %v3537_v54 = vmul.f32 %v5394_v56, %v7029_v55  ;;  %v5396_v6 = vpop.eup %5395  ;;  %5405 = vrsqrt.f32 %v7089_v27  ;;  %vm3764_vm5 = vcmp.eq.f32.partialorder %v7036_v7, 0.0  ;;  %vm3755_vm6 = vcmp.eq.f32.partialorder %v7055_v41, inf }
 0x31d   : > { %v3546_v24 = vsel %vm3545_vm0, %v7025_v1, %v3544_v10  ;;  %3823 = vst [vmem:[%s6758_s15 + $0x2c] sm:$0xf] %v4283_v60  ;;  %v3761_v20 = vmul.f32 %v5396_v6, %v7036_v7  ;;  %v3758_v3 = vand.u32 2147483648, %v7055_v41  ;;  %vm3757_vm7 = vcmp.eq.f32.partialorder %v7055_v41, 0.0 }
 0x31e   : > { %v3549_v33 = vsel %vm3547_vm1, %v3548_v35, %v3546_v24  ;;  %v3539_v23 = vsel %vm3538_vm2, %v7029_v55, %v3537_v54  ;;  %vm3559_vm8 = vcmp.eq.f32.partialorder %v7061_v26, inf  ;;  %vm3561_vm9 = vcmp.eq.f32.partialorder %v7061_v26, 0.0 }
 0x31f   : > { %v3569_v21 = vmul.f32 %v6675_v63, %v3549_v33  ;;  %v3542_v2 = vsel %vm3540_vm3, %v3541_v51, %v3539_v23  ;;  %v5398_v47 = vpop.eup %5397  ;;  %v3763_v53 = vsel %vm3762_vm4, %v7036_v7, %v3761_v20  ;;  %vm3552_vm10 = vcmp.eq.f32.partialorder %v7065_v39, inf }
 0x320   : > { %v3568_v42 = vmul.f32 %v6663_v62, %v3542_v2  ;;  %v3766_v17 = vsel %vm3764_vm5, %v3765_v37, %v3763_v53  ;;  %v3754_v19 = vmul.f32 %v5398_v47, %v7055_v41  ;;  %v5400_v1 = vpop.eup %5399  ;;  %v3555_v50 = vand.u32 2147483648, %v7065_v39 }
 0x321   : > { %v4278_v38 = vpack.c.bf16 %v3569_v21, %v3569_v21  ;;  %v3786_v55 = vmul.f32 %v6683_v4, %v3766_v17  ;;  %v3558_v49 = vmul.f32 %v5400_v1, %v7061_v26  ;;  %v5402_v57 = vpop.eup %5401  ;;  %v3562_v4 = vand.u32 2147483648, %v7061_v26 }
 0x322   : > { %v4277_v63 = vpack.c.bf16 %v3568_v42, %v3568_v42  ;;  %v3756_v62 = vsel %vm3755_vm6, %v7055_v41, %v3754_v19  ;;  %v3551_v59 = vmul.f32 %v5402_v57, %v7065_v39  ;;  %vm3554_vm11 = vcmp.eq.f32.partialorder %v7065_v39, 0.0 }
 0x323   : > { %3609 = vst [vmem:[%s6758_s15 + $0x58] sm:$0xf] %v4278_v38  ;;  %v4286_v7 = vpack.c.bf16 %v3786_v55, %v3786_v55  ;;  %v3759_v13 = vsel %vm3757_vm7, %v3758_v3, %v3756_v62  ;;  %v3560_v15 = vsel %vm3559_vm8, %v7061_v26, %v3558_v49  ;;  %vm3776_vm12 = vcmp.eq.f32.partialorder %v7085_v14, inf }
 0x324   : > { %3608 = vst [vmem:[%s6758_s15 + $0x48] sm:$0xf] %v4277_v63  ;;  %v3785_v31 = vmul.f32 %v6669_v28, %v3759_v13  ;;  %v3563_v30 = vsel %vm3561_vm9, %v3562_v4, %v3560_v15  ;;  %v5404_v0 = vpop.eup %5403  ;;  %v3553_v28 = vsel %vm3552_vm10, %v7065_v39, %v3551_v59  ;;  %v3779_v29 = vand.u32 2147483648, %v7085_v14 }
 0x325   : > { %3826 = vst [vmem:[%s6758_s15 + $0x5c] sm:$0xf] %v4286_v7  ;;  %v3571_v11 = vmul.f32 %v6696_v12, %v3563_v30  ;;  %v3556_v43 = vsel %vm3554_vm11, %v3555_v50, %v3553_v28  ;;  %v3775_v18 = vmul.f32 %v5404_v0, %v7085_v14  ;;  %vm3778_vm13 = vcmp.eq.f32.partialorder %v7085_v14, 0.0 }
 0x326   : > { %v4285_v32 = vpack.c.bf16 %v3785_v31, %v3785_v31  ;;  %v5406_v41 = vpop.eup %5405  ;;  %v3570_v48 = vmul.f32 %v6686_v5, %v3556_v43  ;;  %vm3769_vm14 = vcmp.eq.f32.partialorder %v7089_v27, inf  ;;  %v3772_v36 = vand.u32 2147483648, %v7089_v27 }
 0x327   : > { %v4280_v25 = vpack.c.bf16 %v3571_v11, %v3571_v11  ;;  %v3777_v12 = vsel %vm3776_vm12, %v7085_v14, %v3775_v18  ;;  %v3768_v26 = vmul.f32 %v5406_v41, %v7089_v27  ;;  %vm3771_vm15 = vcmp.eq.f32.partialorder %v7089_v27, 0.0 }
 0x328   : > { %3825 = vst [vmem:[%s6758_s15 + $0x4c] sm:$0xf] %v4285_v32  ;;  %v4279_v39 = vpack.c.bf16 %v3570_v48, %v3570_v48  ;;  %v3780_v34 = vsel %vm3778_vm13, %v3779_v29, %v3777_v12 }
 0x329   : > { %3611 = vst [vmem:[%s6758_s15 + $0x78] sm:$0xf] %v4280_v25  ;;  %v3788_v5 = vmul.f32 %v6703_v16, %v3780_v34  ;;  %v3770_v22 = vsel %vm3769_vm14, %v7089_v27, %v3768_v26 }
 0x32a   : > { %3610 = vst [vmem:[%s6758_s15 + $0x68] sm:$0xf] %v4279_v39  ;;  %v3773_v40 = vsel %vm3771_vm15, %v3772_v36, %v3770_v22 }
 0x32b   : > { %v4288_v46 = vpack.c.bf16 %v3788_v5, %v3788_v5  ;;  %v3787_v52 = vmul.f32 %v6691_v8, %v3773_v40 }
 0x32d   : > { %3828 = vst [vmem:[%s6758_s15 + $0x7c] sm:$0xf] %v4288_v46  ;;  %v4287_v45 = vpack.c.bf16 %v3787_v52, %v3787_v52 }
 0x32f   : > { %3827 = vst [vmem:[%s6758_s15 + $0x6c] sm:$0xf] %v4287_v45 }
 0x330 PF: > { %s15_s18 = sadd.s32 1, %s5413_s18  }
 0x331   : > { %p12_p4 = scmp.ge.s32.totalorder %s15_s18, 4  }
 0x333   :  { %14 = sbr.rel (!%p12_p4) target bundleno = 1 (0x1), region = 70 }

// kernel: gdn_net_forward.19
= control target key start
LH: loop header
LB: loop body
LE: loop exit
PB: predicated region body
PF: predicated region fallthrough
CT: control target
= control target key end

     0   :  { %s2455_s12 = smov 0   ;;  %s2882_s0 = inlined_call_operand.vmem [shape: bf16[512,1152], index: 0, kind: input, shape index: {}]   ;;  %s2883_s1 = inlined_call_operand.vmem [shape: bf16[1152,128], index: 1, kind: input, shape index: {}]   ;;  %s2884_s2 = inlined_call_operand.vmem [shape: f32[1,128], index: 2, kind: input, shape index: {}]   ;;  %s2885_s3 = inlined_call_operand.vmem [shape: f32[512,128], index: 3, kind: output, shape index: {}]  }
   0x1 LB: > { %s1766_s13 = sadd.s32 4294967295, %s2433_s12   ;;  %p1770_p0 = scmp.ge.s32.totalorder %s2433_s12, 1  ;;  %s2433_s12 = sphi %s2455_s12, %s13_s12  }
   0x2   : > { %p139_p1 = scmp.lt.s32.totalorder %s2433_s12, 5 }
   0x4   : > { %p140_p2 = pnand %p1770_p0, %p139_p1 }
   0x5   : > { %v2251_v0 = vld [vmem:[%s2883_s1 + $0x40] sm:$0xff] (!%p140_p2)   ;;  %v2255_v4 = vld [vmem:[%s2883_s1 + $0x48] sm:$0xff] (!%p140_p2)   ;;  %v2259_v8 = vld [vmem:[%s2883_s1 + $0x50] sm:$0xff] (!%p140_p2)   ;;  %s1771_s19 = sshll.u32 (!%p140_p2), %s1766_s13, 4 }
   0x6   : > { %143 = sbr.rel (%p140_p2) target bundleno = 394 (0x18a), region = 32  ;;  %v2252_v1 = vld [vmem:[%s2883_s1 + $0xc0] sm:$0xff] (!%p140_p2)   ;;  %1922 = vmatprep.subr.bf16.mxu0 (!%p140_p2), %v2251_v0  ;;  %v2256_v5 = vld [vmem:[%s2883_s1 + $0xc8] sm:$0xff] (!%p140_p2)   ;;  %v2260_v9 = vld [vmem:[%s2883_s1 + $0xd0] sm:$0xff] (!%p140_p2)   ;;  %p165_p3 = scmp.lt.s32.totalorder (!%p140_p2), %s1771_s19, 63 }
   0x7   : > { %v2253_v2 = vld [vmem:[%s2883_s1] sm:$0xff] (!%p140_p2)   ;;  %1986 = vmatprep.subr.bf16.mxu1 (!%p140_p2), %v2252_v1  ;;  %v2257_v6 = vld [vmem:[%s2883_s1 + $0x8] sm:$0xff] (!%p140_p2)   ;;  %v2261_v10 = vld [vmem:[%s2883_s1 + $0x10] sm:$0xff] (!%p140_p2)  }
   0x8   : > { %v2254_v3 = vld [vmem:[%s2883_s1 + $0x80] sm:$0xff] (!%p140_p2)   ;;  %1923 = vmatpush3.bf16.msra.mxu0 (!%p140_p2), %v2253_v2  ;;  %v2258_v7 = vld [vmem:[%s2883_s1 + $0x88] sm:$0xff] (!%p140_p2)   ;;  %v2262_v11 = vld [vmem:[%s2883_s1 + $0x90] sm:$0xff] (!%p140_p2)  }
   0x9   : > { %1987 = vmatpush3.bf16.msra.mxu1 (!%p140_p2), %v2254_v3  ;;  %1924 = vmatprep.subr.bf16.mxu0 (!%p140_p2), %v2255_v4  ;;  %v2263_v12 = vld [vmem:[%s2883_s1 + $0x58] sm:$0xff] (!%p140_p2)   ;;  %v2267_v16 = vld [vmem:[%s2883_s1 + $0x60] sm:$0xff] (!%p140_p2)   ;;  %v2271_v20 = vld [vmem:[%s2883_s1 + $0x68] sm:$0xff] (!%p140_p2)  }
   0xa   : > { %1988 = vmatprep.subr.bf16.mxu1 (!%p140_p2), %v2256_v5  ;;  %v2264_v13 = vld [vmem:[%s2883_s1 + $0xd8] sm:$0xff] (!%p140_p2)   ;;  %v2268_v17 = vld [vmem:[%s2883_s1 + $0xe0] sm:$0xff] (!%p140_p2)   ;;  %v2272_v21 = vld [vmem:[%s2883_s1 + $0xe8] sm:$0xff] (!%p140_p2)  }
   0xb   : > { %v2265_v14 = vld [vmem:[%s2883_s1 + $0x18] sm:$0xff] (!%p140_p2)   ;;  %v2269_v18 = vld [vmem:[%s2883_s1 + $0x20] sm:$0xff] (!%p140_p2)   ;;  %v2273_v22 = vld [vmem:[%s2883_s1 + $0x28] sm:$0xff] (!%p140_p2)  }
   0xc   : > { %1925 = vmatpush3.bf16.msra.mxu0 (!%p140_p2), %v2257_v6  ;;  %v2266_v15 = vld [vmem:[%s2883_s1 + $0x98] sm:$0xff] (!%p140_p2)   ;;  %v2270_v19 = vld [vmem:[%s2883_s1 + $0xa0] sm:$0xff] (!%p140_p2)   ;;  %v2274_v23 = vld [vmem:[%s2883_s1 + $0xa8] sm:$0xff] (!%p140_p2)  }
   0xd   : > { %1989 = vmatpush3.bf16.msra.mxu1 %v2258_v7  ;;  %1926 = vmatprep.subr.bf16.mxu0 %v2259_v8  ;;  %s2887_s19 = smov (!%p165_p3, %s1771_s19), 63  ;;  %v2275_v24 = vld [vmem:[%s2883_s1 + $0x70] sm:$0xff]   ;;  %v2279_v28 = vld [vmem:[%s2883_s1 + $0x78] sm:$0xff]   ;;  %v2289_v36 = vld [vmem:[%s2883_s1 + $0x140] sm:$0xff]  }
   0xe   : > { %1990 = vmatprep.subr.bf16.mxu1 %v2260_v9  ;;  %v2276_v25 = vld [vmem:[%s2883_s1 + $0xf0] sm:$0xff]   ;;  %s2242_s16 = smul.u32 36, %s2887_s19  ;;  %v2280_v29 = vld [vmem:[%s2883_s1 + $0xf8] sm:$0xff]   ;;  %v2290_v37 = vld [vmem:[%s2883_s1 + $0x1c0] sm:$0xff]  }
   0xf   : > { %v2277_v26 = vld [vmem:[%s2883_s1 + $0x30] sm:$0xff]   ;;  %v2281_v30 = vld [vmem:[%s2883_s1 + $0x38] sm:$0xff]   ;;  %v2291_v38 = vld [vmem:[%s2883_s1 + $0x100] sm:$0xff]  }
  0x10   : > { %1927 = vmatpush3.bf16.msra.mxu0 %v2261_v10  ;;  %v2278_v27 = vld [vmem:[%s2883_s1 + $0xb0] sm:$0xff]   ;;  %s2561_s13 = scalar_lea.vmem %s2882_s0, %s2242_s16  ;;  %v2282_v31 = vld [vmem:[%s2883_s1 + $0xb8] sm:$0xff]   ;;  %v2292_v39 = vld [vmem:[%s2883_s1 + $0x180] sm:$0xff]  }
  0x11   : > { %1991 = vmatpush3.bf16.msra.mxu1 %v2262_v11  ;;  %1928 = vmatprep.subr.bf16.mxu0 %v2263_v12  ;;  %v2283_v32 = vld [vmem:[%s2561_s13] ss:$36 sps:$4 sm:$0xff]   ;;  %v2286_v34 = vld [vmem:[%s2561_s13 + $0x8] ss:$36 sps:$4 sm:$0xff]   ;;  %v2295_v41 = vld [vmem:[%s2561_s13 + $0x54] ss:$36 sps:$4 sm:$0xff]  }
  0x12   : > { %1992 = vmatprep.subr.bf16.mxu1 %v2264_v13  ;;  %v2285_v33 = vld [vmem:[%s2561_s13 + $0x4] ss:$36 sps:$4 sm:$0xff]   ;;  %v2288_v35 = vld [vmem:[%s2561_s13 + $0xc] ss:$36 sps:$4 sm:$0xff]   ;;  %v2303_v48 = vld [vmem:[%s2561_s13 + $0x94] ss:$36 sps:$4 sm:$0xff]  }
  0x13   : > { %1241 = vmatprep.mubr.bf16.mxu0 %v2285_v33  ;;  %1338 = vmatprep.mubr.bf16.mxu1 %v2288_v35  ;;  %v2293_v40 = vld [vmem:[%s2561_s13 + $0x4c] ss:$36 sps:$4 sm:$0xff]   ;;  %v2305_v49 = vld [vmem:[%s2561_s13 + $0x9c] ss:$36 sps:$4 sm:$0xff]   ;;  %v2315_v57 = vld [vmem:[%s2561_s13 + $0xe4] ss:$36 sps:$4 sm:$0xff]  }
  0x14   : > { %1929 = vmatpush3.bf16.msra.mxu0 %v2265_v14  ;;  %v2297_v42 = vld [vmem:[%s2561_s13 + $0x48] ss:$36 sps:$4 sm:$0xff]   ;;  %v2298_v43 = vld [vmem:[%s2561_s13 + $0x50] ss:$36 sps:$4 sm:$0xff]   ;;  %v2308_v51 = vld [vmem:[%s2561_s13 + $0x98] ss:$36 sps:$4 sm:$0xff]  }
  0x15   : > { %1993 = vmatpush3.bf16.msra.mxu1 %v2266_v15  ;;  %1930 = vmatprep.subr.bf16.mxu0 %v2267_v16  ;;  %v2299_v44 = vld [vmem:[%s2883_s1 + $0x148] sm:$0xff]   ;;  %v2307_v50 = vld [vmem:[%s2561_s13 + $0x90] ss:$36 sps:$4 sm:$0xff]   ;;  %v2313_v56 = vld [vmem:[%s2561_s13 + $0xdc] ss:$36 sps:$4 sm:$0xff]  }
  0x16   : > { %1994 = vmatprep.subr.bf16.mxu1 %v2268_v17  ;;  %v2300_v45 = vld [vmem:[%s2883_s1 + $0x1c8] sm:$0xff]   ;;  %v2309_v52 = vld [vmem:[%s2883_s1 + $0x150] sm:$0xff]   ;;  %v2317_v58 = vld [vmem:[%s2561_s13 + $0xd8] ss:$36 sps:$4 sm:$0xff]  }
  0x17   : > { %v2301_v46 = vld [vmem:[%s2883_s1 + $0x108] sm:$0xff]   ;;  %v2310_v53 = vld [vmem:[%s2883_s1 + $0x1d0] sm:$0xff]   ;;  %v2318_v59 = vld [vmem:[%s2561_s13 + $0xe0] ss:$36 sps:$4 sm:$0xff]  }
  0x18   : > { %1931 = vmatpush3.bf16.msra.mxu0 %v2269_v18  ;;  %v2302_v47 = vld [vmem:[%s2883_s1 + $0x188] sm:$0xff]   ;;  %v2311_v54 = vld [vmem:[%s2883_s1 + $0x110] sm:$0xff]   ;;  %v2319_v60 = vld [vmem:[%s2883_s1 + $0x158] sm:$0xff]  }
  0x19   : > { %1995 = vmatpush3.bf16.msra.mxu1 %v2270_v19  ;;  %1932 = vmatprep.subr.bf16.mxu0 %v2271_v20  ;;  %v2312_v55 = vld [vmem:[%s2883_s1 + $0x190] sm:$0xff]   ;;  %v2320_v61 = vld [vmem:[%s2883_s1 + $0x1d8] sm:$0xff]   ;;  %v2323_v0 = vld [vmem:[%s2561_s13 + $0x124] ss:$36 sps:$4 sm:$0xff]  }
  0x1a   : > { %1996 = vmatprep.subr.bf16.mxu1 %v2272_v21  ;;  %v2321_v62 = vld [vmem:[%s2883_s1 + $0x118] sm:$0xff]   ;;  %v2325_v1 = vld [vmem:[%s2561_s13 + $0x12c] ss:$36 sps:$4 sm:$0xff]   ;;  %v2327_v2 = vld [vmem:[%s2561_s13 + $0x120] ss:$36 sps:$4 sm:$0xff]  }
  0x1b   : > { %v2322_v63 = vld [vmem:[%s2883_s1 + $0x198] sm:$0xff]   ;;  %v2329_v3 = vld [vmem:[%s2883_s1 + $0x160] sm:$0xff]   ;;  %v2328_v4 = vld [vmem:[%s2561_s13 + $0x128] ss:$36 sps:$4 sm:$0xff]  }
  0x1c   : > { %1933 = vmatpush3.bf16.msra.mxu0 %v2273_v22  ;;  %v2330_v5 = vld [vmem:[%s2883_s1 + $0x1e0] sm:$0xff]   ;;  %v2333_v8 = vld [vmem:[%s2561_s13 + $0x16c] ss:$36 sps:$4 sm:$0xff]   ;;  %v2335_v9 = vld [vmem:[%s2561_s13 + $0x174] ss:$36 sps:$4 sm:$0xff]  }
  0x1d   : > { %1997 = vmatpush3.bf16.msra.mxu1 %v2274_v23  ;;  %1934 = vmatprep.subr.bf16.mxu0 %v2275_v24  ;;  %v2331_v6 = vld [vmem:[%s2883_s1 + $0x120] sm:$0xff]   ;;  %v2339_v10 = vld [vmem:[%s2883_s1 + $0x168] sm:$0xff]   ;;  %v2338_v15 = vld [vmem:[%s2561_s13 + $0x170] ss:$36 sps:$4 sm:$0xff]  }
  0x1e   : > { %1998 = vmatprep.subr.bf16.mxu1 %v2276_v25  ;;  %v2332_v7 = vld [vmem:[%s2883_s1 + $0x1a0] sm:$0xff]   ;;  %v2340_v11 = vld [vmem:[%s2883_s1 + $0x1e8] sm:$0xff]   ;;  %v2343_v16 = vld [vmem:[%s2561_s13 + $0x1b4] ss:$36 sps:$4 sm:$0xff]  }
  0x1f   : > { %v2337_v12 = vld [vmem:[%s2561_s13 + $0x168] ss:$36 sps:$4 sm:$0xff]   ;;  %v2345_v17 = vld [vmem:[%s2561_s13 + $0x1bc] ss:$36 sps:$4 sm:$0xff]   ;;  %v2349_v18 = vld [vmem:[%s2883_s1 + $0x170] sm:$0xff]  }
  0x20   : > { %1935 = vmatpush3.bf16.msra.mxu0 %v2277_v26  ;;  %v2341_v13 = vld [vmem:[%s2883_s1 + $0x128] sm:$0xff]   ;;  %v2350_v19 = vld [vmem:[%s2883_s1 + $0x1f0] sm:$0xff]   ;;  %v2348_v23 = vld [vmem:[%s2561_s13 + $0x1b8] ss:$36 sps:$4 sm:$0xff]  }
  0x21   : > { %1999 = vmatpush3.bf16.msra.mxu1 %v2278_v27  ;;  %1936 = vmatprep.subr.bf16.mxu0 %v2279_v28  ;;  %v2342_v14 = vld [vmem:[%s2883_s1 + $0x1a8] sm:$0xff]   ;;  %v2351_v20 = vld [vmem:[%s2883_s1 + $0x130] sm:$0xff]   ;;  %v2353_v24 = vld [vmem:[%s2561_s13 + $0x1fc] ss:$36 sps:$4 sm:$0xff]  }
  0x22   : > { %2000 = vmatprep.subr.bf16.mxu1 %v2280_v29  ;;  %v2352_v21 = vld [vmem:[%s2883_s1 + $0x1b0] sm:$0xff]   ;;  %v2355_v25 = vld [vmem:[%s2561_s13 + $0x204] ss:$36 sps:$4 sm:$0xff]   ;;  %v2359_v26 = vld [vmem:[%s2883_s1 + $0x178] sm:$0xff]  }
  0x23   : > { %v2347_v22 = vld [vmem:[%s2561_s13 + $0x1b0] ss:$36 sps:$4 sm:$0xff]   ;;  %v2360_v27 = vld [vmem:[%s2883_s1 + $0x1f8] sm:$0xff]  }
  0x24   : > { %1937 = vmatpush3.bf16.msra.mxu0 %v2281_v30  ;;  %v2361_v28 = vld [vmem:[%s2883_s1 + $0x138] sm:$0xff]   ;;  %v2363_v35 = vld [vmem:[%s2561_s13 + $0x10] ss:$36 sps:$4 sm:$0xff]  }
  0x25   : > { %2001 = vmatpush3.bf16.msra.mxu1 %v2282_v31  ;;  %2050 = vmatprep.subr.bf16.mxu0 %v2289_v36  ;;  %v2362_v29 = vld [vmem:[%s2883_s1 + $0x1b8] sm:$0xff]   ;;  %v2358_v31 = vld [vmem:[%s2561_s13 + $0x200] ss:$36 sps:$4 sm:$0xff]  }
  0x26   : > { %2114 = vmatprep.subr.bf16.mxu1 %v2290_v37  ;;  %v2357_v30 = vld [vmem:[%s2561_s13 + $0x1f8] ss:$36 sps:$4 sm:$0xff]  }
  0x27   : > { %1242 = vmatmul.mubr.bf16.vlgmr.msra.gmra.mrb[0].mxu0 %v2283_v32  ;;  %v2369_v32 = vld [vmem:[%s2883_s1 + $0x200] sm:$0xff]   ;;  %v2365_v33 = vld [vmem:[%s2561_s13 + $0x14] ss:$36 sps:$4 sm:$0xff]  }
  0x28   : > { %1339 = vmatmul.mubr.bf16.vlgmr.msra.gmra.mrb[0].mxu1 %v2286_v34  ;;  %2051 = vmatpush3.bf16.msra.mxu0 %v2291_v38  ;;  %v2368_v34 = vld [vmem:[%s2561_s13 + $0x1c] ss:$36 sps:$4 sm:$0xff]   ;;  %v2372_v38 = vld [vmem:[%s2561_s13 + $0x64] ss:$36 sps:$4 sm:$0xff]  }
  0x29   : > { %2115 = vmatpush3.bf16.msra.mxu1 %v2292_v39  ;;  %1249 = vmatprep.mubr.bf16.mxu0 %v2293_v40  ;;  %v2366_v36 = vld [vmem:[%s2561_s13 + $0x18] ss:$36 sps:$4 sm:$0xff]   ;;  %v2376_v39 = vld [vmem:[%s2883_s1 + $0x208] sm:$0xff]   ;;  %v2383_v40 = vld [vmem:[%s2883_s1 + $0x210] sm:$0xff]  }
  0x2a   : > { %1346 = vmatprep.mubr.bf16.mxu1 %v2295_v41  ;;  %2052 = vmatprep.subr.bf16.mxu0 %v2299_v44  ;;  %v2370_v37 = vld [vmem:[%s2561_s13 + $0x5c] ss:$36 sps:$4 sm:$0xff]   ;;  %v2379_v44 = vld [vmem:[%s2561_s13 + $0xac] ss:$36 sps:$4 sm:$0xff]  }
  0x2b   : > { %2116 = vmatprep.subr.bf16.mxu1 %v2300_v45  ;;  %v2374_v41 = vld [vmem:[%s2561_s13 + $0x58] ss:$36 sps:$4 sm:$0xff]  }
  0x2c   : > { %2053 = vmatpush3.bf16.msra.mxu0 %v2301_v46  ;;  %v2390_v45 = vld [vmem:[%s2883_s1 + $0x218] sm:$0xff]   ;;  %v2397_v46 = vld [vmem:[%s2883_s1 + $0x220] sm:$0xff]  }
  0x2d   : > { %2117 = vmatpush3.bf16.msra.mxu1 %v2302_v47  ;;  %2054 = vmatprep.subr.bf16.mxu0 %v2309_v52  ;;  %v2381_v47 = vld [vmem:[%s2561_s13 + $0xa0] ss:$36 sps:$4 sm:$0xff]   ;;  %v2388_v52 = vld [vmem:[%s2561_s13 + $0xe8] ss:$36 sps:$4 sm:$0xff]  }
  0x2e   : > { %2118 = vmatprep.subr.bf16.mxu1 %v2310_v53  ;;  %v2411_v53 = vld [vmem:[%s2883_s1 + $0x230] sm:$0xff]  }
  0x2f   : > { %1250 = vmatmul.mubr.bf16.gmra.mrb[4].mxu0 %v2297_v42  ;;  %v2375_v42 = vld [vmem:[%s2561_s13 + $0x60] ss:$36 sps:$4 sm:$0xff]  }
  0x30   : > { %1347 = vmatmul.mubr.bf16.gmra.mrb[4].mxu1 %v2298_v43  ;;  %1257 = vmatprep.mubr.bf16.mxu0 %v2303_v48  ;;  %v2377_v43 = vld [vmem:[%s2561_s13 + $0xa4] ss:$36 sps:$4 sm:$0xff]  }
  0x31   : > { %1354 = vmatprep.mubr.bf16.mxu1 %v2305_v49  ;;  %2055 = vmatpush3.bf16.msra.mxu0 %v2311_v54  ;;  %v2382_v48 = vld [vmem:[%s2561_s13 + $0xa8] ss:$36 sps:$4 sm:$0xff]   ;;  %v2389_v54 = vld [vmem:[%s2561_s13 + $0xf0] ss:$36 sps:$4 sm:$0xff]  }
  0x32   : > { %2119 = vmatpush3.bf16.msra.mxu1 %v2312_v55  ;;  %2056 = vmatprep.subr.bf16.mxu0 %v2319_v60  ;;  %v2384_v49 = vld [vmem:[%s2561_s13 + $0xec] ss:$36 sps:$4 sm:$0xff]   ;;  %v2391_v55 = vld [vmem:[%s2561_s13 + $0x134] ss:$36 sps:$4 sm:$0xff]   ;;  %v2398_v60 = vld [vmem:[%s2561_s13 + $0x17c] ss:$36 sps:$4 sm:$0xff]  }
  0x33   : > { %2120 = vmatprep.subr.bf16.mxu1 %v2320_v61  ;;  %v2400_v61 = vld [vmem:[%s2561_s13 + $0x184] ss:$36 sps:$4 sm:$0xff]  }
  0x35   : > { %2057 = vmatpush3.bf16.msra.mxu0 %v2321_v62  ;;  %v2402_v62 = vld [vmem:[%s2561_s13 + $0x178] ss:$36 sps:$4 sm:$0xff]  }
  0x36   : > { %2121 = vmatpush3.bf16.msra.mxu1 %v2322_v63  ;;  %2058 = vmatprep.subr.bf16.mxu0 %v2329_v3  ;;  %v2403_v63 = vld [vmem:[%s2561_s13 + $0x180] ss:$36 sps:$4 sm:$0xff]   ;;  %v2410_v3 = vld [vmem:[%s2561_s13 + $0x1c8] ss:$36 sps:$4 sm:$0xff]  }
  0x37   : > { %1258 = vmatmul.mubr.bf16.gmra.mrb[8].mxu0 %v2307_v50  ;;  %2122 = vmatprep.subr.bf16.mxu1 %v2330_v5  ;;  %v2386_v50 = vld [vmem:[%s2561_s13 + $0xf4] ss:$36 sps:$4 sm:$0xff]  }
  0x38   : > { %1355 = vmatmul.mubr.bf16.gmra.mrb[8].mxu1 %v2308_v51  ;;  %1265 = vmatprep.mubr.bf16.mxu0 %v2313_v56  ;;  %v2404_v51 = vld [vmem:[%s2883_s1 + $0x228] sm:$0xff]   ;;  %v2393_v56 = vld [vmem:[%s2561_s13 + $0x13c] ss:$36 sps:$4 sm:$0xff]   ;;  %v2414_v5 = vld [vmem:[%s2561_s13 + $0x214] ss:$36 sps:$4 sm:$0xff]  }
  0x39   : > { %1362 = vmatprep.mubr.bf16.mxu1 %v2315_v57  ;;  %2059 = vmatpush3.bf16.msra.mxu0 %v2331_v6  ;;  %v2418_v57 = vld [vmem:[%s2883_s1 + $0x238] sm:$0xff]   ;;  %v2416_v6 = vld [vmem:[%s2561_s13 + $0x208] ss:$36 sps:$4 sm:$0xff]  }
  0x3a   : > { %2123 = vmatpush3.bf16.msra.mxu1 %v2332_v7  ;;  %2060 = vmatprep.subr.bf16.mxu0 %v2339_v10  ;;  %v2417_v7 = vld [vmem:[%s2561_s13 + $0x210] ss:$36 sps:$4 sm:$0xff]   ;;  %v2421_v10 = vld [vmem:[%s2561_s13 + $0x68] ss:$36 sps:$4 sm:$0xff]  }
  0x3b   : > { %2124 = vmatprep.subr.bf16.mxu1 %v2340_v11  ;;  %v2422_v11 = vld [vmem:[%s2561_s13 + $0x188] ss:$36 sps:$4 sm:$0xff]  }
  0x3d   : > { %2061 = vmatpush3.bf16.msra.mxu0 %v2341_v13  ;;  %v2424_v13 = vld [vmem:[%s2561_s13 + $0x1d0] ss:$36 sps:$4 sm:$0xff]  }
  0x3e   : > { %2125 = vmatpush3.bf16.msra.mxu1 %v2342_v14  ;;  %2062 = vmatprep.subr.bf16.mxu0 %v2349_v18  ;;  %v2425_v14 = vld [vmem:[%s2561_s13 + $0xf8] ss:$36 sps:$4 sm:$0xff]   ;;  %v2764_v18 = vld [vmem:[%s2884_s2] ss:$0 sm:$0xff] }
  0x3f   : > { %1266 = vmatmul.mubr.bf16.gmra.mrb[12].mxu0 %v2317_v58  ;;  %2126 = vmatprep.subr.bf16.mxu1 %v2350_v19  ;;  %v2395_v58 = vld [vmem:[%s2561_s13 + $0x130] ss:$36 sps:$4 sm:$0xff]  }
  0x40   : > { %1363 = vmatmul.mubr.bf16.gmra.mrb[12].mxu1 %v2318_v59  ;;  %1273 = vmatprep.mubr.bf16.mxu0 %v2323_v0  ;;  %v2396_v59 = vld [vmem:[%s2561_s13 + $0x138] ss:$36 sps:$4 sm:$0xff]   ;;  %v2405_v0 = vld [vmem:[%s2561_s13 + $0x1c4] ss:$36 sps:$4 sm:$0xff]  }
  0x41   : > { %1370 = vmatprep.mubr.bf16.mxu1 %v2325_v1  ;;  %2063 = vmatpush3.bf16.msra.mxu0 %v2351_v20  ;;  %v2407_v1 = vld [vmem:[%s2561_s13 + $0x1cc] ss:$36 sps:$4 sm:$0xff]  }
  0x42   : > { %2127 = vmatpush3.bf16.msra.mxu1 %v2352_v21  ;;  %2064 = vmatprep.subr.bf16.mxu0 %v2359_v26 }
  0x43   : > { %2128 = vmatprep.subr.bf16.mxu1 %v2360_v27 }
  0x45   : > { %2065 = vmatpush3.bf16.msra.mxu0 %v2361_v28 }
  0x46   : > { %2129 = vmatpush3.bf16.msra.mxu1 %v2362_v29  ;;  %2194 = vmatprep.subr.bf16.mxu0 %v2369_v32 }
  0x47   : > { %1274 = vmatmul.mubr.bf16.gmra.mrb[16].mxu0 %v2327_v2  ;;  %2226 = vmatprep.subr.bf16.mxu1 %v2369_v32  ;;  %v2409_v2 = vld [vmem:[%s2561_s13 + $0x1c0] ss:$36 sps:$4 sm:$0xff]  }
  0x48   : > { %1371 = vmatmul.mubr.bf16.gmra.mrb[16].mxu1 %v2328_v4  ;;  %1281 = vmatprep.mubr.bf16.mxu0 %v2333_v8  ;;  %v2412_v4 = vld [vmem:[%s2561_s13 + $0x20c] ss:$36 sps:$4 sm:$0xff]   ;;  %v2419_v8 = vld [vmem:[%s2561_s13 + $0x20] ss:$36 sps:$4 sm:$0xff]  }
  0x49   : > { %1378 = vmatprep.mubr.bf16.mxu1 %v2335_v9  ;;  %v2420_v9 = vld [vmem:[%s2561_s13 + $0x140] ss:$36 sps:$4 sm:$0xff]  }
  0x4f   : > { %1282 = vmatmul.mubr.bf16.gmra.mrb[20].mxu0 %v2337_v12  ;;  %v2423_v12 = vld [vmem:[%s2561_s13 + $0xb0] ss:$36 sps:$4 sm:$0xff]  }
  0x50   : > { %1379 = vmatmul.mubr.bf16.gmra.mrb[20].mxu1 %v2338_v15  ;;  %1289 = vmatprep.mubr.bf16.mxu0 %v2343_v16  ;;  %v2426_v15 = vld [vmem:[%s2561_s13 + $0x218] ss:$36 sps:$4 sm:$0xff]   ;;  %s1774_s13 = sshll.u32 %s2887_s19, 3 }
  0x51   : > { %1386 = vmatprep.mubr.bf16.mxu1 %v2345_v17  ;;  %s2852_s20 = scalar_lea.vmem %s2885_s3, %s1774_s13 }
  0x57   : > { %1290 = vmatmul.mubr.bf16.gmra.mrb[24].mxu0 %v2347_v22 }
  0x58   : > { %1387 = vmatmul.mubr.bf16.gmra.mrb[24].mxu1 %v2348_v23  ;;  %1297 = vmatprep.mubr.bf16.mxu0 %v2353_v24 }
  0x59   : > { %1394 = vmatprep.mubr.bf16.mxu1 %v2355_v25 }
  0x5f   : > { %1298 = vmatmul.mubr.bf16.gmra.mrb[28].mxu0 %v2357_v30 }
  0x60   : > { %1395 = vmatmul.mubr.bf16.gmra.mrb[28].mxu1 %v2358_v31  ;;  %1435 = vmatprep.mubr.bf16.mxu0 %v2365_v33 }
  0x61   : > { %1532 = vmatprep.mubr.bf16.mxu1 %v2368_v34 }
  0x67   : > { %1436 = vmatmul.mubr.bf16.vlgmr.msra.gmra.mrb[32].mxu0 %v2363_v35 }
  0x68   : > { %1533 = vmatmul.mubr.bf16.vlgmr.msra.gmra.mrb[32].mxu1 %v2366_v36  ;;  %2195 = vmatpush3.bf16.msra.mxu0 %v2369_v32 }
  0x69   : > { %2234 = vmatpush3.bf16.msra.mxu1 %v2369_v32  ;;  %1443 = vmatprep.mubr.bf16.mxu0 %v2370_v37 }
  0x6a   : > { %1540 = vmatprep.mubr.bf16.mxu1 %v2372_v38  ;;  %2196 = vmatprep.subr.bf16.mxu0 %v2376_v39 }
  0x6b   : > { %2227 = vmatprep.subr.bf16.mxu1 %v2376_v39 }
  0x6c   : > { %2197 = vmatpush3.bf16.msra.mxu0 %v2376_v39 }
  0x6d   : > { %2235 = vmatpush3.bf16.msra.mxu1 %v2376_v39  ;;  %2198 = vmatprep.subr.bf16.mxu0 %v2383_v40 }
  0x6e   : > { %2228 = vmatprep.subr.bf16.mxu1 %v2383_v40 }
  0x6f   : > { %1444 = vmatmul.mubr.bf16.gmra.mrb[36].mxu0 %v2374_v41 }
  0x70   : > { %1541 = vmatmul.mubr.bf16.gmra.mrb[36].mxu1 %v2375_v42  ;;  %1451 = vmatprep.mubr.bf16.mxu0 %v2377_v43 }
  0x71   : > { %1548 = vmatprep.mubr.bf16.mxu1 %v2379_v44  ;;  %2199 = vmatpush3.bf16.msra.mxu0 %v2383_v40 }
  0x72   : > { %2236 = vmatpush3.bf16.msra.mxu1 %v2383_v40  ;;  %2200 = vmatprep.subr.bf16.mxu0 %v2390_v45 }
  0x73   : > { %2229 = vmatprep.subr.bf16.mxu1 %v2390_v45 }
  0x75   : > { %2201 = vmatpush3.bf16.msra.mxu0 %v2390_v45 }
  0x76   : > { %2237 = vmatpush3.bf16.msra.mxu1 %v2390_v45  ;;  %2202 = vmatprep.subr.bf16.mxu0 %v2397_v46 }
  0x77   : > { %1452 = vmatmul.mubr.bf16.gmra.mrb[40].mxu0 %v2381_v47  ;;  %2230 = vmatprep.subr.bf16.mxu1 %v2397_v46 }
  0x78   : > { %1549 = vmatmul.mubr.bf16.gmra.mrb[40].mxu1 %v2382_v48  ;;  %1459 = vmatprep.mubr.bf16.mxu0 %v2384_v49 }
  0x79   : > { %1556 = vmatprep.mubr.bf16.mxu1 %v2386_v50  ;;  %2203 = vmatpush3.bf16.msra.mxu0 %v2397_v46 }
  0x7a   : > { %2238 = vmatpush3.bf16.msra.mxu1 %v2397_v46  ;;  %2204 = vmatprep.subr.bf16.mxu0 %v2404_v51 }
  0x7b   : > { %2231 = vmatprep.subr.bf16.mxu1 %v2404_v51 }
  0x7d   : > { %2205 = vmatpush3.bf16.msra.mxu0 %v2404_v51 }
  0x7e   : > { %2239 = vmatpush3.bf16.msra.mxu1 %v2404_v51  ;;  %2206 = vmatprep.subr.bf16.mxu0 %v2411_v53 }
  0x7f   : > { %1460 = vmatmul.mubr.bf16.gmra.mrb[44].mxu0 %v2388_v52  ;;  %2232 = vmatprep.subr.bf16.mxu1 %v2411_v53 }
  0x80   : > { %1557 = vmatmul.mubr.bf16.gmra.mrb[44].mxu1 %v2389_v54  ;;  %1467 = vmatprep.mubr.bf16.mxu0 %v2391_v55 }
  0x81   : > { %1564 = vmatprep.mubr.bf16.mxu1 %v2393_v56  ;;  %2207 = vmatpush3.bf16.msra.mxu0 %v2411_v53 }
  0x82   : > { %2240 = vmatpush3.bf16.msra.mxu1 %v2411_v53  ;;  %2208 = vmatprep.subr.bf16.mxu0 %v2418_v57 }
  0x83   : > { %2233 = vmatprep.subr.bf16.mxu1 %v2418_v57 }
  0x85   : > { %2209 = vmatpush3.bf16.msra.mxu0 %v2418_v57 }
  0x86   : > { %2241 = vmatpush3.bf16.msra.mxu1 %v2418_v57 }
  0x87   : > { %1468 = vmatmul.mubr.bf16.gmra.mrb[48].mxu0 %v2395_v58 }
  0x88   : > { %1565 = vmatmul.mubr.bf16.gmra.mrb[48].mxu1 %v2396_v59  ;;  %1475 = vmatprep.mubr.bf16.mxu0 %v2398_v60 }
  0x89   : > { %1572 = vmatprep.mubr.bf16.mxu1 %v2400_v61 }
  0x8f   : > { %1476 = vmatmul.mubr.bf16.gmra.mrb[52].mxu0 %v2402_v62 }
  0x90   : > { %1573 = vmatmul.mubr.bf16.gmra.mrb[52].mxu1 %v2403_v63  ;;  %1483 = vmatprep.mubr.bf16.mxu0 %v2405_v0 }
  0x91   : > { %1580 = vmatprep.mubr.bf16.mxu1 %v2407_v1 }
  0x97   : > { %1484 = vmatmul.mubr.bf16.gmra.mrb[56].mxu0 %v2409_v2 }
  0x98   : > { %1581 = vmatmul.mubr.bf16.gmra.mrb[56].mxu1 %v2410_v3  ;;  %1491 = vmatprep.mubr.bf16.mxu0 %v2412_v4 }
  0x99   : > { %1588 = vmatprep.mubr.bf16.mxu1 %v2414_v5 }
  0x9f   : > { %1492 = vmatmul.mubr.bf16.gmra.mrb[60].mxu0 %v2416_v6 }
  0xa0   : > { %1589 = vmatmul.mubr.bf16.gmra.mrb[60].mxu1 %v2417_v7  ;;  %2210 = vmatprep.mubr.bf16.mxu0 %v2419_v8 }
  0xa1   : > { %2218 = vmatprep.mubr.bf16.mxu1 %v2420_v9 }
  0xa7   : > { %2211 = vmatmul.mubr.bf16.vlgmr.msra.gmra.mrb[64].mxu0 %v2421_v10 }
  0xa8   : > { %2219 = vmatmul.mubr.bf16.vlgmr.msra.gmra.mrb[64].mxu1 %v2422_v11  ;;  %2214 = vmatprep.mubr.bf16.mxu0 %v2423_v12 }
  0xa9   : > { %2222 = vmatprep.mubr.bf16.mxu1 %v2424_v13 }
  0xaf   : > { %2215 = vmatmul.mubr.bf16.gmra.mrb[68].mxu0 %v2425_v14 }
  0xb0   : > { %2223 = vmatmul.mubr.bf16.gmra.mrb[68].mxu1 %v2426_v15 }
  0xfa   : > { %v1938_v16 = vpop.f32.mrb[0].mxu0 }
  0xfb   : > { %v2002_v17 = vpop.f32.mrb[0].mxu1  ;;  %v1939_v19 = vpop.f32.mrb[1].mxu0 }
  0xfc   : > { %v1940_v20 = vadd.f32 %v1939_v19, %v1938_v16  ;;  %v2003_v21 = vpop.f32.mrb[1].mxu1  ;;  %v1941_v22 = vpop.f32.mrb[2].mxu0 }
  0xfd   : > { %v2004_v23 = vadd.f32 %v2003_v21, %v2002_v17  ;;  %v2005_v24 = vpop.f32.mrb[2].mxu1  ;;  %v1942_v25 = vpop.f32.mrb[3].mxu0 }
  0xfe   : > { %v1244_v26 = vadd.f32 %v1940_v20, %v2764_v18  ;;  %v1943_v27 = vadd.f32 %v1942_v25, %v1941_v22  ;;  %v2006_v28 = vpop.f32.mrb[3].mxu1 }
  0xff   : > { %v2007_v29 = vadd.f32 %v2006_v28, %v2005_v24 }
 0x100   : > { %v2767_v30 = vadd.f32 %v2004_v23, %v1244_v26  ;;  %v1247_v31 = vadd.f32 %v1943_v27, %v2764_v18 }
 0x102   : > { %v2770_v32 = vadd.f32 %v2007_v29, %v1247_v31  ;;  %v1944_v33 = vpop.f32.mrb[4].mxu0 }
 0x103   : > { %v2008_v34 = vpop.f32.mrb[4].mxu1  ;;  %v1945_v35 = vpop.f32.mrb[5].mxu0 }
 0x104   : > { %v1946_v36 = vadd.f32 %v1945_v35, %v1944_v33  ;;  %v2009_v37 = vpop.f32.mrb[5].mxu1  ;;  %v1947_v38 = vpop.f32.mrb[6].mxu0 }
 0x105   : > { %v2010_v39 = vadd.f32 %v2009_v37, %v2008_v34  ;;  %v2011_v40 = vpop.f32.mrb[6].mxu1  ;;  %v1948_v41 = vpop.f32.mrb[7].mxu0 }
 0x106   : > { %v1252_v42 = vadd.f32 %v1946_v36, %v2764_v18  ;;  %v1949_v43 = vadd.f32 %v1948_v41, %v1947_v38  ;;  %v2012_v44 = vpop.f32.mrb[7].mxu1 }
 0x107   : > { %v2013_v45 = vadd.f32 %v2012_v44, %v2011_v40 }
 0x108   : > { %v2773_v46 = vadd.f32 %v2010_v39, %v1252_v42  ;;  %v1255_v47 = vadd.f32 %v1949_v43, %v2764_v18 }
 0x10a   : > { %v2776_v48 = vadd.f32 %v2013_v45, %v1255_v47  ;;  %v1950_v49 = vpop.f32.mrb[8].mxu0 }
 0x10b   : > { %v2014_v50 = vpop.f32.mrb[8].mxu1  ;;  %v1951_v51 = vpop.f32.mrb[9].mxu0 }
 0x10c   : > { %v1952_v52 = vadd.f32 %v1951_v51, %v1950_v49  ;;  %v2015_v53 = vpop.f32.mrb[9].mxu1  ;;  %v1953_v54 = vpop.f32.mrb[10].mxu0 }
 0x10d   : > { %v2016_v55 = vadd.f32 %v2015_v53, %v2014_v50  ;;  %v2017_v56 = vpop.f32.mrb[10].mxu1  ;;  %v1954_v57 = vpop.f32.mrb[11].mxu0 }
 0x10e   : > { %v1260_v58 = vadd.f32 %v1952_v52, %v2764_v18  ;;  %v1955_v59 = vadd.f32 %v1954_v57, %v1953_v54  ;;  %v2018_v60 = vpop.f32.mrb[11].mxu1 }
 0x10f   : > { %v2019_v61 = vadd.f32 %v2018_v60, %v2017_v56 }
 0x110   : > { %v2779_v62 = vadd.f32 %v2016_v55, %v1260_v58  ;;  %v1263_v63 = vadd.f32 %v1955_v59, %v2764_v18 }
 0x112   : > { %v2782_v0 = vadd.f32 %v2019_v61, %v1263_v63  ;;  %v1956_v1 = vpop.f32.mrb[12].mxu0 }
 0x113   : > { %v2020_v2 = vpop.f32.mrb[12].mxu1  ;;  %v1957_v3 = vpop.f32.mrb[13].mxu0 }
 0x114   : > { %v1958_v4 = vadd.f32 %v1957_v3, %v1956_v1  ;;  %v2021_v5 = vpop.f32.mrb[13].mxu1  ;;  %v1959_v6 = vpop.f32.mrb[14].mxu0 }
 0x115   : > { %v2022_v7 = vadd.f32 %v2021_v5, %v2020_v2  ;;  %v2023_v8 = vpop.f32.mrb[14].mxu1  ;;  %v1960_v9 = vpop.f32.mrb[15].mxu0 }
 0x116   : > { %v1268_v10 = vadd.f32 %v1958_v4, %v2764_v18  ;;  %v1961_v11 = vadd.f32 %v1960_v9, %v1959_v6  ;;  %v2024_v12 = vpop.f32.mrb[15].mxu1 }
 0x117   : > { %v2025_v13 = vadd.f32 %v2024_v12, %v2023_v8 }
 0x118   : > { %v2785_v14 = vadd.f32 %v2022_v7, %v1268_v10  ;;  %v1271_v15 = vadd.f32 %v1961_v11, %v2764_v18 }
 0x11a   : > { %v2788_v16 = vadd.f32 %v2025_v13, %v1271_v15  ;;  %v1962_v17 = vpop.f32.mrb[16].mxu0 }
 0x11b   : > { %v2026_v19 = vpop.f32.mrb[16].mxu1  ;;  %v1963_v20 = vpop.f32.mrb[17].mxu0 }
 0x11c   : > { %v1964_v21 = vadd.f32 %v1963_v20, %v1962_v17  ;;  %v2027_v22 = vpop.f32.mrb[17].mxu1  ;;  %v1965_v23 = vpop.f32.mrb[18].mxu0 }
 0x11d   : > { %v2028_v24 = vadd.f32 %v2027_v22, %v2026_v19  ;;  %v2029_v25 = vpop.f32.mrb[18].mxu1  ;;  %v1966_v26 = vpop.f32.mrb[19].mxu0 }
 0x11e   : > { %v1276_v27 = vadd.f32 %v1964_v21, %v2764_v18  ;;  %v1967_v28 = vadd.f32 %v1966_v26, %v1965_v23  ;;  %v2030_v29 = vpop.f32.mrb[19].mxu1 }
 0x11f   : > { %v2031_v31 = vadd.f32 %v2030_v29, %v2029_v25 }
 0x120   : > { %v2791_v33 = vadd.f32 %v2028_v24, %v1276_v27  ;;  %v1279_v34 = vadd.f32 %v1967_v28, %v2764_v18 }
 0x122   : > { %v2794_v35 = vadd.f32 %v2031_v31, %v1279_v34  ;;  %v1968_v36 = vpop.f32.mrb[20].mxu0 }
 0x123   : > { %v2032_v37 = vpop.f32.mrb[20].mxu1  ;;  %v1969_v38 = vpop.f32.mrb[21].mxu0 }
 0x124   : > { %v1970_v39 = vadd.f32 %v1969_v38, %v1968_v36  ;;  %v2033_v40 = vpop.f32.mrb[21].mxu1  ;;  %v1971_v41 = vpop.f32.mrb[22].mxu0 }
 0x125   : > { %v2034_v42 = vadd.f32 %v2033_v40, %v2032_v37  ;;  %v2035_v43 = vpop.f32.mrb[22].mxu1  ;;  %v1972_v44 = vpop.f32.mrb[23].mxu0 }
 0x126   : > { %v1284_v45 = vadd.f32 %v1970_v39, %v2764_v18  ;;  %v1973_v47 = vadd.f32 %v1972_v44, %v1971_v41  ;;  %v2036_v49 = vpop.f32.mrb[23].mxu1 }
 0x127   : > { %v2037_v50 = vadd.f32 %v2036_v49, %v2035_v43 }
 0x128   : > { %v2797_v51 = vadd.f32 %v2034_v42, %v1284_v45  ;;  %v1287_v52 = vadd.f32 %v1973_v47, %v2764_v18 }
 0x12a   : > { %v2800_v53 = vadd.f32 %v2037_v50, %v1287_v52  ;;  %v1974_v54 = vpop.f32.mrb[24].mxu0 }
 0x12b   : > { %v2038_v55 = vpop.f32.mrb[24].mxu1  ;;  %v1975_v56 = vpop.f32.mrb[25].mxu0 }
 0x12c   : > { %v1976_v57 = vadd.f32 %v1975_v56, %v1974_v54  ;;  %v2039_v58 = vpop.f32.mrb[25].mxu1  ;;  %v1977_v59 = vpop.f32.mrb[26].mxu0 }
 0x12d   : > { %v2040_v60 = vadd.f32 %v2039_v58, %v2038_v55  ;;  %v2041_v61 = vpop.f32.mrb[26].mxu1  ;;  %v1978_v63 = vpop.f32.mrb[27].mxu0 }
 0x12e   : > { %v1292_v1 = vadd.f32 %v1976_v57, %v2764_v18  ;;  %v1979_v2 = vadd.f32 %v1978_v63, %v1977_v59  ;;  %v2042_v3 = vpop.f32.mrb[27].mxu1 }
 0x12f   : > { %v2043_v4 = vadd.f32 %v2042_v3, %v2041_v61 }
 0x130   : > { %v2803_v5 = vadd.f32 %v2040_v60, %v1292_v1  ;;  %v1295_v6 = vadd.f32 %v1979_v2, %v2764_v18 }
 0x132   : > { %v2806_v7 = vadd.f32 %v2043_v4, %v1295_v6  ;;  %v1980_v8 = vpop.f32.mrb[28].mxu0 }
 0x133   : > { %v2044_v9 = vpop.f32.mrb[28].mxu1  ;;  %v1981_v10 = vpop.f32.mrb[29].mxu0 }
 0x134   : > { %v1982_v11 = vadd.f32 %v1981_v10, %v1980_v8  ;;  %v2045_v12 = vpop.f32.mrb[29].mxu1  ;;  %v1983_v13 = vpop.f32.mrb[30].mxu0 }
 0x135   : > { %v2046_v15 = vadd.f32 %v2045_v12, %v2044_v9  ;;  %v2047_v17 = vpop.f32.mrb[30].mxu1  ;;  %v1984_v19 = vpop.f32.mrb[31].mxu0 }
 0x136   : > { %v1300_v20 = vadd.f32 %v1982_v11, %v2764_v18  ;;  %v1985_v21 = vadd.f32 %v1984_v19, %v1983_v13  ;;  %v2048_v22 = vpop.f32.mrb[31].mxu1 }
 0x137   : > { %v2049_v23 = vadd.f32 %v2048_v22, %v2047_v17 }
 0x138   : > { %v2809_v24 = vadd.f32 %v2046_v15, %v1300_v20  ;;  %v1303_v25 = vadd.f32 %v1985_v21, %v2764_v18 }
 0x13a   : > { %v2812_v26 = vadd.f32 %v2049_v23, %v1303_v25  ;;  %v2066_v27 = vpop.f32.mrb[32].mxu0 }
 0x13b   : > { %v2130_v28 = vpop.f32.mrb[32].mxu1  ;;  %v2067_v29 = vpop.f32.mrb[33].mxu0 }
 0x13c   : > { %v2068_v31 = vadd.f32 %v2067_v29, %v2066_v27  ;;  %v2131_v34 = vpop.f32.mrb[33].mxu1  ;;  %v2069_v36 = vpop.f32.mrb[34].mxu0 }
 0x13d   : > { %v2132_v37 = vadd.f32 %v2131_v34, %v2130_v28  ;;  %v2133_v38 = vpop.f32.mrb[34].mxu1  ;;  %v2070_v39 = vpop.f32.mrb[35].mxu0 }
 0x13e   : > { %v1438_v40 = vadd.f32 %v2068_v31, %v2767_v30  ;;  %v2071_v41 = vadd.f32 %v2070_v39, %v2069_v36  ;;  %v2134_v42 = vpop.f32.mrb[35].mxu1 }
 0x13f   : > { %v2135_v43 = vadd.f32 %v2134_v42, %v2133_v38 }
 0x140   : > { %v1441_v44 = vadd.f32 %v2071_v41, %v2770_v32  ;;  %v2816_v45 = vadd.f32 %v2132_v37, %v1438_v40 }
 0x142   : > { %v2072_v18 = vpop.f32.mrb[36].mxu0  ;;  %v2818_v47 = vadd.f32 %v2135_v43, %v1441_v44 }
 0x143   : > { %v2136_v49 = vpop.f32.mrb[36].mxu1  ;;  %v2073_v50 = vpop.f32.mrb[37].mxu0 }
 0x144   : > { %v2074_v52 = vadd.f32 %v2073_v50, %v2072_v18  ;;  %v2137_v54 = vpop.f32.mrb[37].mxu1  ;;  %v2075_v55 = vpop.f32.mrb[38].mxu0 }
 0x145   : > { %v2138_v56 = vadd.f32 %v2137_v54, %v2136_v49  ;;  %v2139_v57 = vpop.f32.mrb[38].mxu1  ;;  %v2076_v58 = vpop.f32.mrb[39].mxu0 }
 0x146   : > { %v1446_v30 = vadd.f32 %v2074_v52, %v2773_v46  ;;  %v2077_v59 = vadd.f32 %v2076_v58, %v2075_v55  ;;  %v2140_v60 = vpop.f32.mrb[39].mxu1 }
 0x147   : > { %v2141_v61 = vadd.f32 %v2140_v60, %v2139_v57 }
 0x148   : > { %v1449_v32 = vadd.f32 %v2077_v59, %v2776_v48  ;;  %v2822_v63 = vadd.f32 %v2138_v56, %v1446_v30 }
 0x14a   : > { %v2078_v1 = vpop.f32.mrb[40].mxu0  ;;  %v2824_v2 = vadd.f32 %v2141_v61, %v1449_v32 }
 0x14b   : > { %v2142_v3 = vpop.f32.mrb[40].mxu1  ;;  %v2079_v4 = vpop.f32.mrb[41].mxu0 }
 0x14c   : > { %v2080_v6 = vadd.f32 %v2079_v4, %v2078_v1  ;;  %v2143_v8 = vpop.f32.mrb[41].mxu1  ;;  %v2081_v9 = vpop.f32.mrb[42].mxu0 }
 0x14d   : > { %v2144_v10 = vadd.f32 %v2143_v8, %v2142_v3  ;;  %v2145_v11 = vpop.f32.mrb[42].mxu1  ;;  %v2082_v12 = vpop.f32.mrb[43].mxu0 }
 0x14e   : > { %v1454_v46 = vadd.f32 %v2080_v6, %v2779_v62  ;;  %v2083_v13 = vadd.f32 %v2082_v12, %v2081_v9  ;;  %v2146_v15 = vpop.f32.mrb[43].mxu1 }
 0x14f   : > { %v2147_v17 = vadd.f32 %v2146_v15, %v2145_v11 }
 0x150   : > { %v1457_v48 = vadd.f32 %v2083_v13, %v2782_v0  ;;  %v2828_v19 = vadd.f32 %v2144_v10, %v1454_v46 }
 0x152   : > { %v2084_v20 = vpop.f32.mrb[44].mxu0  ;;  %v2830_v21 = vadd.f32 %v2147_v17, %v1457_v48 }
 0x153   : > { %v2148_v22 = vpop.f32.mrb[44].mxu1  ;;  %v2085_v23 = vpop.f32.mrb[45].mxu0 }
 0x154   : > { %v2086_v25 = vadd.f32 %v2085_v23, %v2084_v20  ;;  %v2149_v27 = vpop.f32.mrb[45].mxu1  ;;  %v2087_v28 = vpop.f32.mrb[46].mxu0 }
 0x155   : > { %v2150_v29 = vadd.f32 %v2149_v27, %v2148_v22  ;;  %v2151_v31 = vpop.f32.mrb[46].mxu1  ;;  %v2088_v34 = vpop.f32.mrb[47].mxu0 }
 0x156   : > { %v1462_v62 = vadd.f32 %v2086_v25, %v2785_v14  ;;  %v2089_v36 = vadd.f32 %v2088_v34, %v2087_v28  ;;  %v2152_v37 = vpop.f32.mrb[47].mxu1 }
 0x157   : > { %v2153_v38 = vadd.f32 %v2152_v37, %v2151_v31 }
 0x158   : > { %v1465_v0 = vadd.f32 %v2089_v36, %v2788_v16  ;;  %v2834_v39 = vadd.f32 %v2150_v29, %v1462_v62 }
 0x15a   : > { %v2090_v40 = vpop.f32.mrb[48].mxu0  ;;  %v2836_v41 = vadd.f32 %v2153_v38, %v1465_v0 }
 0x15b   : > { %v2154_v42 = vpop.f32.mrb[48].mxu1  ;;  %v2091_v43 = vpop.f32.mrb[49].mxu0 }
 0x15c   : > { %v2092_v44 = vadd.f32 %v2091_v43, %v2090_v40  ;;  %v2155_v18 = vpop.f32.mrb[49].mxu1  ;;  %v2093_v49 = vpop.f32.mrb[50].mxu0 }
 0x15d   : > { %v2156_v50 = vadd.f32 %v2155_v18, %v2154_v42  ;;  %v2157_v52 = vpop.f32.mrb[50].mxu1  ;;  %v2094_v54 = vpop.f32.mrb[51].mxu0 }
 0x15e   : > { %v1470_v14 = vadd.f32 %v2092_v44, %v2791_v33  ;;  %v2095_v55 = vadd.f32 %v2094_v54, %v2093_v49  ;;  %v2158_v56 = vpop.f32.mrb[51].mxu1 }
 0x15f   : > { %v2159_v57 = vadd.f32 %v2158_v56, %v2157_v52 }
 0x160   : > { %v1473_v16 = vadd.f32 %v2095_v55, %v2794_v35  ;;  %v1567_v58 = vadd.f32 %v2156_v50, %v1470_v14 }
 0x162   : > { %v2096_v30 = vpop.f32.mrb[52].mxu0  ;;  %v2840_v59 = vadd.f32 %v2159_v57, %v1473_v16 }
 0x163   : > { %v2160_v60 = vpop.f32.mrb[52].mxu1  ;;  %v2097_v61 = vpop.f32.mrb[53].mxu0 }
 0x164   : > { %v2098_v32 = vadd.f32 %v2097_v61, %v2096_v30  ;;  %v2161_v1 = vpop.f32.mrb[53].mxu1  ;;  %v2099_v3 = vpop.f32.mrb[54].mxu0 }
 0x165   : > { %v2162_v4 = vadd.f32 %v2161_v1, %v2160_v60  ;;  %v2163_v6 = vpop.f32.mrb[54].mxu1  ;;  %v2100_v8 = vpop.f32.mrb[55].mxu0 }
 0x166   : > { %v1478_v9 = vadd.f32 %v2098_v32, %v2797_v51  ;;  %v2101_v33 = vadd.f32 %v2100_v8, %v2099_v3  ;;  %v2164_v10 = vpop.f32.mrb[55].mxu1 }
 0x167   : > { %v2165_v11 = vadd.f32 %v2164_v10, %v2163_v6 }
 0x168   : > { %v1481_v12 = vadd.f32 %v2101_v33, %v2800_v53  ;;  %v1575_v35 = vadd.f32 %v2162_v4, %v1478_v9 }
 0x16a   : > { %v2102_v46 = vpop.f32.mrb[56].mxu0  ;;  %v1578_v13 = vadd.f32 %v2165_v11, %v1481_v12 }
 0x16b   : > { %v2166_v15 = vpop.f32.mrb[56].mxu1  ;;  %v2103_v17 = vpop.f32.mrb[57].mxu0 }
 0x16c   : > { %v2104_v48 = vadd.f32 %v2103_v17, %v2102_v46  ;;  %v2167_v20 = vpop.f32.mrb[57].mxu1  ;;  %v2105_v22 = vpop.f32.mrb[58].mxu0 }
 0x16d   : > { %v2168_v23 = vadd.f32 %v2167_v20, %v2166_v15  ;;  %v2169_v25 = vpop.f32.mrb[58].mxu1  ;;  %v2106_v27 = vpop.f32.mrb[59].mxu0 }
 0x16e   : > { %v1486_v28 = vadd.f32 %v2104_v48, %v2803_v5  ;;  %v2107_v29 = vadd.f32 %v2106_v27, %v2105_v22  ;;  %v2170_v51 = vpop.f32.mrb[59].mxu1 }
 0x16f   : > { %v2171_v31 = vadd.f32 %v2170_v51, %v2169_v25 }
 0x170   : > { %v1489_v34 = vadd.f32 %v2107_v29, %v2806_v7  ;;  %v1583_v53 = vadd.f32 %v2168_v23, %v1486_v28 }
 0x172   : > { %v2108_v62 = vpop.f32.mrb[60].mxu0  ;;  %v1586_v36 = vadd.f32 %v2171_v31, %v1489_v34 }
 0x173   : > { %v2172_v37 = vpop.f32.mrb[60].mxu1  ;;  %v2109_v38 = vpop.f32.mrb[61].mxu0 }
 0x174   : > { %v2110_v0 = vadd.f32 %v2109_v38, %v2108_v62  ;;  %v2173_v40 = vpop.f32.mrb[61].mxu1  ;;  %v2111_v42 = vpop.f32.mrb[62].mxu0 }
 0x175   : > { %v2174_v43 = vadd.f32 %v2173_v40, %v2172_v37  ;;  %v2175_v44 = vpop.f32.mrb[62].mxu1  ;;  %v2112_v18 = vpop.f32.mrb[63].mxu0 }
 0x176   : > { %v1494_v49 = vadd.f32 %v2110_v0, %v2809_v24  ;;  %v2113_v5 = vadd.f32 %v2112_v18, %v2111_v42  ;;  %v2176_v50 = vpop.f32.mrb[63].mxu1 }
 0x177   : > { %v2177_v52 = vadd.f32 %v2176_v50, %v2175_v44 }
 0x178   : > { %v1497_v7 = vadd.f32 %v2113_v5, %v2812_v26  ;;  %v1591_v54 = vadd.f32 %v2174_v43, %v1494_v49 }
 0x17a   : > { %v2212_v14 = vpop.f32.mrb[64].mxu0  ;;  %v1594_v55 = vadd.f32 %v2177_v52, %v1497_v7 }
 0x17b   : > { %v1640_v56 = vadd.f32 %v2212_v14, %v2822_v63  ;;  %v2220_v24 = vpop.f32.mrb[64].mxu1  ;;  %v1631_v57 = vpop.f32.mrb[65].mxu0 }
 0x17c   : > { %v1672_v16 = vadd.f32 %v2220_v24, %v1575_v35  ;;  %v1632_v26 = vadd.f32 %v1631_v57, %v2816_v45  ;;  %v1663_v30 = vpop.f32.mrb[65].mxu1  ;;  %v2213_v60 = vpop.f32.mrb[66].mxu0 }
 0x17d   : > { %1696 = vst [vmem:[%s2852_s20 + $0x10] sm:$0xff] %v1640_v56  ;;  %v1664_v61 = vadd.f32 %v1663_v30, %v1567_v58  ;;  %v1643_v32 = vadd.f32 %v2213_v60, %v2824_v2  ;;  %v2221_v1 = vpop.f32.mrb[66].mxu1  ;;  %v1634_v3 = vpop.f32.mrb[67].mxu0 }
 0x17e   : > { %1704 = vst [vmem:[%s2852_s20 + $0x50] sm:$0xff] %v1672_v16  ;;  %1694 = vst [vmem:[%s2852_s20] sm:$0xff] %v1632_v26  ;;  %v1675_v63 = vadd.f32 %v2221_v1, %v1578_v13  ;;  %v1635_v4 = vadd.f32 %v1634_v3, %v2818_v47  ;;  %v1666_v6 = vpop.f32.mrb[67].mxu1 }
 0x17f   : > { %1702 = vst [vmem:[%s2852_s20 + $0x40] sm:$0xff] %v1664_v61  ;;  %1697 = vst [vmem:[%s2852_s20 + $0x18] sm:$0xff] %v1643_v32  ;;  %v1667_v45 = vadd.f32 %v1666_v6, %v2840_v59 }
 0x180   : > { %1705 = vst [vmem:[%s2852_s20 + $0x58] sm:$0xff] %v1675_v63  ;;  %1695 = vst [vmem:[%s2852_s20 + $0x8] sm:$0xff] %v1635_v4 }
 0x181   : > { %1703 = vst [vmem:[%s2852_s20 + $0x48] sm:$0xff] %v1667_v45 }
 0x182   : > { %v2216_v58 = vpop.f32.mrb[68].mxu0 }
 0x183   : > { %v1656_v2 = vadd.f32 %v2216_v58, %v2834_v39  ;;  %v2224_v8 = vpop.f32.mrb[68].mxu1  ;;  %v1647_v9 = vpop.f32.mrb[69].mxu0 }
 0x184   : > { %v1688_v33 = vadd.f32 %v2224_v8, %v1591_v54  ;;  %v1648_v47 = vadd.f32 %v1647_v9, %v2828_v19  ;;  %v1679_v10 = vpop.f32.mrb[69].mxu1  ;;  %v2217_v11 = vpop.f32.mrb[70].mxu0 }
 0x185   : > { %1700 = vst [vmem:[%s2852_s20 + $0x30] sm:$0xff] %v1656_v2  ;;  %v1680_v59 = vadd.f32 %v1679_v10, %v1583_v53  ;;  %v1659_v12 = vadd.f32 %v2217_v11, %v2836_v41  ;;  %v2225_v35 = vpop.f32.mrb[70].mxu1  ;;  %v1650_v46 = vpop.f32.mrb[71].mxu0 }
 0x186   : > { %1708 = vst [vmem:[%s2852_s20 + $0x70] sm:$0xff] %v1688_v33  ;;  %1698 = vst [vmem:[%s2852_s20 + $0x20] sm:$0xff] %v1648_v47  ;;  %v1691_v39 = vadd.f32 %v2225_v35, %v1594_v55  ;;  %v1651_v13 = vadd.f32 %v1650_v46, %v2830_v21  ;;  %v1682_v15 = vpop.f32.mrb[71].mxu1 }
 0x187   : > { %1706 = vst [vmem:[%s2852_s20 + $0x60] sm:$0xff] %v1680_v59  ;;  %1701 = vst [vmem:[%s2852_s20 + $0x38] sm:$0xff] %v1659_v12  ;;  %v1683_v19 = vadd.f32 %v1682_v15, %v1586_v36 }
 0x188   : > { %1709 = vst [vmem:[%s2852_s20 + $0x78] sm:$0xff] %v1691_v39  ;;  %1699 = vst [vmem:[%s2852_s20 + $0x28] sm:$0xff] %v1651_v13 }
 0x189   : > { %1707 = vst [vmem:[%s2852_s20 + $0x68] sm:$0xff] %v1683_v19 }
 0x18a PF: > { %s13_s12 = sadd.s32 1, %s2433_s12  }
 0x18b   : > { %p10_p4 = scmp.ge.s32.totalorder %s13_s12, 6  }
 0x18d   :  { %12 = sbr.rel (!%p10_p4) target bundleno = 1 (0x1), region = 62 }

</bundles_post_ra>
